<compile_context>
chip_gen: v5e
topology: v5e:2x2
jax: 0.10.0
libtpu: 0.0.40
codegen_flags: <defaults>
</compile_context>

<pallas_src>
import functools

import jax
import jax.numpy as jnp
from jax.experimental import pallas as pl
from jax.experimental.pallas import tpu as pltpu


_VMEM_LIMIT = 32 * 1024 * 1024


# ----------------------------------------------------------------------------
# In-kernel helpers
# ----------------------------------------------------------------------------
def _junk_col_mask(H, W):
    """(H*(W+2), 1) bool mask: True on real columns, False on the 2 junk
    columns every flattened padded-width row carries."""
    wp = W + 2
    col = jax.lax.broadcasted_iota(jnp.int32, (H * wp, 1), 0) % wp
    return col < W


def _maxpool2_into(src_ref, dst_ref, H, W):
    """2x2 / stride-2 max-pool of a flat padded-width activation.

    src_ref: VMEM scratch (H*(W+2), C) f32, junk columns zero.
    dst_ref: output block (1, (H//2)*((W//2)+2), C); junk columns written 0.
    """
    wp = W + 2
    w2 = W // 2
    wp2 = w2 + 2
    dst_ref[...] = jnp.zeros(dst_ref.shape, dst_ref.dtype)
    for h2 in range(H // 2):
        r0 = 2 * h2 * wp
        r1 = r0 + wp
        a = src_ref[pl.ds(r0, w2, stride=2), :]        # even cols, row 2*h2
        b = src_ref[pl.ds(r0 + 1, w2, stride=2), :]    # odd  cols, row 2*h2
        c = src_ref[pl.ds(r1, w2, stride=2), :]        # even cols, row 2*h2+1
        d = src_ref[pl.ds(r1 + 1, w2, stride=2), :]    # odd  cols, row 2*h2+1
        m = jnp.maximum(jnp.maximum(a, b), jnp.maximum(c, d))
        dst_ref[0, pl.ds(h2 * wp2, w2), :] = m.astype(dst_ref.dtype)


# ----------------------------------------------------------------------------
# Pallas kernels
# ----------------------------------------------------------------------------
def _conv3x3_kernel(*refs, H, W, in_affine, out_relu, emit_pool, emit_stats):
    """3x3 / stride-1 / pad-1 conv on a flat padded-width input.

    Optional fusions: per-channel affine + ReLU on the input (the previous
    conv's training-mode BatchNorm), ReLU on the output, 2x2 max-pool second
    output, per-image BN partial sums (sum / sum-of-squares).
    """
    wp = W + 2
    L = H * wp
    it = iter(refs)
    x_ref = next(it)                                    # (1, L, Cin) bf16
    w_ref = next(it)                                    # (3, 3, Cin, Cout) bf16
    b_ref = next(it)                                    # (1, Cout) f32
    s_ref = next(it) if in_affine else None             # (1, Cin) f32
    t_ref = next(it) if in_affine else None             # (1, Cin) f32
    y_ref = next(it)                                    # (1, L, Cout) bf16
    pool_ref = next(it) if emit_pool else None
    sum_ref = next(it) if emit_stats else None          # (1, 1, Cout) f32
    ssq_ref = next(it) if emit_stats else None          # (1, 1, Cout) f32
    xpad = next(it)                                     # ((H+2)*wp + 8, Cin) f32
    pact = next(it) if emit_pool else None              # (L, Cout) f32

    valid = _junk_col_mask(H, W)

    # Build the zero-padded, flattened conv input in VMEM.  Flattening the
    # spatial dims with row stride W+2 makes every 3x3 tap a contiguous slice.
    xpad[...] = jnp.zeros(xpad.shape, xpad.dtype)
    xin = x_ref[0].astype(jnp.float32)
    if in_affine:
        # Fused BatchNorm (batch-stats affine) + ReLU of the producing conv.
        xin = jnp.maximum(xin * s_ref[...] + t_ref[...], 0.0)
        xin = jnp.where(valid, xin, 0.0)                # keep padding zero
    xpad[pl.ds(wp + 1, L), :] = xin

    # 3x3 conv = 9 shifted (L, Cin) x (Cin, Cout) bf16 MXU matmuls, f32 acc.
    cout = y_ref.shape[-1]
    acc = jnp.zeros((L, cout), jnp.float32)
    for kh in range(3):
        for kw in range(3):
            off = kh * wp + kw
            lhs = xpad[pl.ds(off, L), :].astype(jnp.bfloat16)
            acc = acc + jnp.dot(lhs, w_ref[kh, kw],
                                preferred_element_type=jnp.float32)
    acc = acc + b_ref[...]
    acc = jnp.where(valid, acc, 0.0)                    # zero junk columns

    if emit_stats:
        # Per-image partial sums for the training-mode BatchNorm that the
        # next kernel folds into its input stage (no re-read of this output).
        sum_ref[...] = jnp.sum(acc, axis=0, keepdims=True)[None]
        ssq_ref[...] = jnp.sum(acc * acc, axis=0, keepdims=True)[None]

    if out_relu:
        acc = jnp.maximum(acc, 0.0)

    y_ref[...] = acc[None].astype(y_ref.dtype)

    if emit_pool:
        pact[...] = acc
        _maxpool2_into(pact, pool_ref, H, W)


def _bn_relu_pool_kernel(*refs, H, W, emit_pool):
    """Per-layer finalize: y * scale + shift -> ReLU (-> 2x2 max-pool)."""
    it = iter(refs)
    y_ref = next(it)                                    # (1, L, C) bf16
    s_ref = next(it)                                    # (1, C) f32
    t_ref = next(it)                                    # (1, C) f32
    act_ref = next(it)                                  # (1, L, C) bf16
    pool_ref = next(it) if emit_pool else None
    pact = next(it) if emit_pool else None              # (L, C) f32 scratch

    valid = _junk_col_mask(H, W)
    a = y_ref[0].astype(jnp.float32) * s_ref[...] + t_ref[...]
    a = jnp.maximum(a, 0.0)
    a = jnp.where(valid, a, 0.0)                        # keep junk columns zero
    act_ref[...] = a[None].astype(act_ref.dtype)
    if emit_pool:
        pact[...] = a
        _maxpool2_into(pact, pool_ref, H, W)


# ----------------------------------------------------------------------------
# Wrappers (thin JAX glue around pallas_call)
# ----------------------------------------------------------------------------
def conv3x3_flat(x_flat, wgt, bias, H, W, *, in_affine=None, out_relu=False,
                 emit_pool=False, emit_stats=False):
    N, L, Cin = x_flat.shape
    wp = W + 2
    assert L == H * wp, (L, H, W)
    Cout = wgt.shape[-1]
    if emit_pool:
        assert H % 2 == 0 and W % 2 == 0

    inputs = [x_flat,
              wgt.astype(jnp.bfloat16),
              bias.reshape(1, Cout).astype(jnp.float32)]
    in_specs = [
        pl.BlockSpec((1, L, Cin), lambda n: (n, 0, 0)),
        pl.BlockSpec((3, 3, Cin, Cout), lambda n: (0, 0, 0, 0)),
        pl.BlockSpec((1, Cout), lambda n: (0, 0)),
    ]
    if in_affine is not None:
        scale, shift = in_affine
        inputs += [scale.reshape(1, Cin).astype(jnp.float32),
                   shift.reshape(1, Cin).astype(jnp.float32)]
        in_specs += [pl.BlockSpec((1, Cin), lambda n: (0, 0)),
                     pl.BlockSpec((1, Cin), lambda n: (0, 0))]

    names = ["y"]
    out_shapes = [jax.ShapeDtypeStruct((N, L, Cout), jnp.bfloat16)]
    out_specs = [pl.BlockSpec((1, L, Cout), lambda n: (n, 0, 0))]
    if emit_pool:
        L2 = (H // 2) * (W // 2 + 2)
        names.append("pool")
        out_shapes.append(jax.ShapeDtypeStruct((N, L2, Cout), jnp.bfloat16))
        out_specs.append(pl.BlockSpec((1, L2, Cout), lambda n: (n, 0, 0)))
    if emit_stats:
        for nm in ("psum", "pssq"):
            names.append(nm)
            out_shapes.append(jax.ShapeDtypeStruct((N, 1, Cout), jnp.float32))
            out_specs.append(pl.BlockSpec((1, 1, Cout), lambda n: (n, 0, 0)))

    scratch = [pltpu.VMEM(((H + 2) * wp + 8, Cin), jnp.float32)]
    if emit_pool:
        scratch.append(pltpu.VMEM((L, Cout), jnp.float32))

    kernel = functools.partial(
        _conv3x3_kernel, H=H, W=W, in_affine=in_affine is not None,
        out_relu=out_relu, emit_pool=emit_pool, emit_stats=emit_stats)

    outs = pl.pallas_call(
        kernel,
        grid=(N,),
        in_specs=in_specs,
        out_specs=tuple(out_specs),
        out_shape=tuple(out_shapes),
        scratch_shapes=scratch,
        compiler_params=pltpu.CompilerParams(
            dimension_semantics=("parallel",),
            vmem_limit_bytes=_VMEM_LIMIT),
    )(*inputs)
    if not isinstance(outs, (tuple, list)):
        outs = (outs,)
    return dict(zip(names, outs))


def bn_relu_pool(y_flat, scale, shift, H, W, *, emit_pool):
    N, L, C = y_flat.shape
    names = ["act"]
    out_shapes = [jax.ShapeDtypeStruct((N, L, C), jnp.bfloat16)]
    out_specs = [pl.BlockSpec((1, L, C), lambda n: (n, 0, 0))]
    scratch = []
    if emit_pool:
        L2 = (H // 2) * (W // 2 + 2)
        names.append("pool")
        out_shapes.append(jax.ShapeDtypeStruct((N, L2, C), jnp.bfloat16))
        out_specs.append(pl.BlockSpec((1, L2, C), lambda n: (n, 0, 0)))
        scratch.append(pltpu.VMEM((L, C), jnp.float32))

    kernel = functools.partial(_bn_relu_pool_kernel, H=H, W=W,
                               emit_pool=emit_pool)
    outs = pl.pallas_call(
        kernel,
        grid=(N,),
        in_specs=[pl.BlockSpec((1, L, C), lambda n: (n, 0, 0)),
                  pl.BlockSpec((1, C), lambda n: (0, 0)),
                  pl.BlockSpec((1, C), lambda n: (0, 0))],
        out_specs=tuple(out_specs),
        out_shape=tuple(out_shapes),
        scratch_shapes=scratch,
        compiler_params=pltpu.CompilerParams(
            dimension_semantics=("parallel",),
            vmem_limit_bytes=_VMEM_LIMIT),
    )(y_flat,
      scale.reshape(1, C).astype(jnp.float32),
      shift.reshape(1, C).astype(jnp.float32))
    if not isinstance(outs, (tuple, list)):
        outs = (outs,)
    return dict(zip(names, outs))


def bn_scale_shift(psum, pssq, gamma, beta, count, eps=1e-5):
    """Training-mode BatchNorm affine from fused per-image partial sums."""
    total = jnp.sum(psum, axis=(0, 1))
    total_sq = jnp.sum(pssq, axis=(0, 1))
    mean = total / count
    # E[x^2]-E[x]^2 in f32 (clamped); fine at these magnitudes / counts.
    var = jnp.maximum(total_sq / count - mean * mean, 0.0)
    scale = gamma * jax.lax.rsqrt(var + eps)
    shift = beta - mean * scale
    return scale, shift


# ----------------------------------------------------------------------------
# Layout glue (once at the start / once per returned tensor at the end)
# ----------------------------------------------------------------------------
def nchw_to_flat(x_nchw):
    N, C, H, W = x_nchw.shape
    x = jnp.transpose(x_nchw, (0, 2, 3, 1))
    x = jnp.pad(x, ((0, 0), (0, 0), (0, 2), (0, 0)))
    return x.reshape(N, H * (W + 2), C).astype(jnp.bfloat16)


def flat_to_nchw(y_flat, H, W):
    N, _, C = y_flat.shape
    y = y_flat.reshape(N, H, W + 2, C)[:, :, :W, :]
    return jnp.transpose(y, (0, 3, 1, 2)).astype(jnp.float32)


# ----------------------------------------------------------------------------
# Parameter init (mirrors the PyTorch __init__: kaiming conv weights,
# default conv bias, BN gamma=1 / beta=0)
# ----------------------------------------------------------------------------
def init_conv_params(key, cin, cout):
    kw_, kb = jax.random.split(key)
    fan_in = 9 * cin
    std = (2.0 / fan_in) ** 0.5                      # kaiming_normal_
    w = jax.random.normal(kw_, (3, 3, cin, cout), jnp.float32) * std
    bound = 1.0 / fan_in ** 0.5                      # default Conv2d bias init
    b = jax.random.uniform(kb, (cout,), jnp.float32, -bound, bound)
    return {"w": w, "b": b}


def init_encoder_params(key, img_channel, channels):
    params = {}
    key, k0 = jax.random.split(key)
    params["layer_0"] = init_conv_params(k0, img_channel, channels[0])
    for i in range(len(channels) - 1):
        cin, cout = channels[i], channels[i + 1]
        key, k1, k2 = jax.random.split(key, 3)
        params[f"layer_{i + 1}"] = {
            "conv1": init_conv_params(k1, cin, cout),
            "conv2": init_conv_params(k2, cout, cout),
            "bn1": {"gamma": jnp.ones((cout,), jnp.float32),
                    "beta": jnp.zeros((cout,), jnp.float32)},
            "bn2": {"gamma": jnp.ones((cout,), jnp.float32),
                    "beta": jnp.zeros((cout,), jnp.float32)},
        }
    return params


# ----------------------------------------------------------------------------
# Encoder forward (matches Encoder.forward: returns (x, middle_output dict))
# ----------------------------------------------------------------------------
def encoder_forward(params, x_nchw, channels):
    n_layers = len(channels)
    N = x_nchw.shape[0]
    H, W = x_nchw.shape[2], x_nchw.shape[3]

    x_flat = nchw_to_flat(x_nchw)

    middle_flat = []

    # layer_0: Conv2d(3x3, pad 1) + ReLU  (+ fused 2x2 pool for layer_1)
    p0 = params["layer_0"]
    o0 = conv3x3_flat(x_flat, p0["w"], p0["b"], H, W,
                      out_relu=True, emit_pool=(n_layers > 1),
                      emit_stats=False)
    middle_flat.append(("layer_0", o0["y"], H, W))
    pool = o0.get("pool")

    # layer_i: MaxPool2d(2) -> [conv3x3 -> BN -> ReLU] x 2
    h, w = H, W
    for i in range(1, n_layers):
        p = params[f"layer_{i}"]
        h, w = h // 2, w // 2
        count = N * h * w

        # conv1 on the pooled activation; emits BN1 partial sums.
        o1 = conv3x3_flat(pool, p["conv1"]["w"], p["conv1"]["b"], h, w,
                          emit_stats=True)
        sc1, sh1 = bn_scale_shift(o1["psum"], o1["pssq"],
                                  p["bn1"]["gamma"], p["bn1"]["beta"], count)

        # conv2 with BN1-affine + ReLU fused into its input stage.
        o2 = conv3x3_flat(o1["y"], p["conv2"]["w"], p["conv2"]["b"], h, w,
                          in_affine=(sc1, sh1), emit_stats=True)
        sc2, sh2 = bn_scale_shift(o2["psum"], o2["pssq"],
                                  p["bn2"]["gamma"], p["bn2"]["beta"], count)

        # Finalize: BN2 affine + ReLU (+ fused pool for the next layer).
        fo = bn_relu_pool(o2["y"], sc2, sh2, h, w,
                          emit_pool=(i < n_layers - 1))
        middle_flat.append((f"layer_{i}", fo["act"], h, w))
        pool = fo.get("pool")

    # flat padded-width bf16 -> NCHW f32, once per returned tensor, at the end.
    middle = {name: flat_to_nchw(t, hh, ww) for name, t, hh, ww in middle_flat}
    x_out = middle[middle_flat[-1][0]]
    return x_out, middle


# ----------------------------------------------------------------------------
if __name__ == "__main__":
    img_channel = 3
    channels = [8, 16, 32]
    N, H, W = 2, 16, 16

    key = jax.random.PRNGKey(0)
    kx, kp = jax.random.split(key)
    x = jax.random.normal(kx, (N, img_channel, H, W), jnp.float32)
    params = init_encoder_params(kp, img_channel, channels)

    fwd = jax.jit(functools.partial(encoder_forward, channels=channels))
    out, middle = fwd(params, x)
    out = jax.block_until_ready(out)
    jax.tree_util.tree_map(jax.block_until_ready, middle)

    assert out.shape == (N, channels[-1], H // 4, W // 4), out.shape
    assert middle["layer_0"].shape == (N, channels[0], H, W)
    assert middle["layer_1"].shape == (N, channels[1], H // 2, W // 2)
    assert middle["layer_2"].shape == (N, channels[2], H // 4, W // 4)
    assert bool(jnp.all(jnp.isfinite(out)))
    print("KERNEL_OK")
</pallas_src>

<mosaic_0001>
module attributes {stable_mosaic.version = 11 : i64} {
  func.func @_bn_relu_pool_kernel(%arg0: i32, %arg1: memref<1x80x16xbf16, #tpu.memory_space<vmem>>, %arg2: memref<1x16xf32, #tpu.memory_space<vmem>>, %arg3: memref<1x16xf32, #tpu.memory_space<vmem>>, %arg4: memref<1x80x16xbf16, #tpu.memory_space<vmem>>, %arg5: memref<1x24x16xbf16, #tpu.memory_space<vmem>>, %arg6: memref<80x16xf32, #tpu.memory_space<vmem>>) attributes {dimension_semantics = [#tpu.dimension_semantics<parallel>], iteration_bounds = array<i64: 2>, scalar_prefetch = 0 : i64, scratch_operands = 1 : i64, tpu.core_type = #tpu.core_type<tc>, window_params = [{transform_indices = @transform_0, window_bounds = array<i64: 1, 80, 16>}, {pipeline_mode = #tpu.pipeline_mode<synchronous>, transform_indices = @transform_1, window_bounds = array<i64: 1, 16>}, {pipeline_mode = #tpu.pipeline_mode<synchronous>, transform_indices = @transform_2, window_bounds = array<i64: 1, 16>}, {transform_indices = @transform_3, window_bounds = array<i64: 1, 80, 16>}, {transform_indices = @transform_4, window_bounds = array<i64: 1, 24, 16>}]} {
    %0 = tpu.iota {dimensions = array<i32: 0>} : vector<80x1xi32>
    %c10_i32 = arith.constant 10 : i32
    %c0_i32 = arith.constant 0 : i32
    %1 = arith.cmpi eq, %c10_i32, %c0_i32 : i32
    %c1_i32 = arith.constant 1 : i32
    %2 = arith.select %1, %c1_i32, %c10_i32 : i32
    %3 = vector.broadcast %2 : i32 to vector<80x1xi32>
    %4 = arith.remsi %0, %3 : vector<80x1xi32>
    %c0_i32_0 = arith.constant 0 : i32
    %5 = vector.broadcast %c0_i32_0 : i32 to vector<80x1xi32>
    %6 = arith.cmpi ne, %4, %5 : vector<80x1xi32>
    %c0_i32_1 = arith.constant 0 : i32
    %7 = vector.broadcast %c0_i32_1 : i32 to vector<80x1xi32>
    %8 = arith.cmpi slt, %4, %7 : vector<80x1xi32>
    %c0_i32_2 = arith.constant 0 : i32
    %9 = arith.cmpi slt, %2, %c0_i32_2 : i32
    %10 = vector.broadcast %9 : i1 to vector<80x1xi1>
    %11 = vector.broadcast %10 : vector<80x1xi1> to vector<80x1xi1>
    %12 = arith.xori %8, %11 : vector<80x1xi1>
    %13 = arith.andi %12, %6 : vector<80x1xi1>
    %14 = vector.broadcast %2 : i32 to vector<80x1xi32>
    %15 = arith.addi %4, %14 : vector<80x1xi32>
    %16 = arith.select %13, %15, %4 : vector<80x1xi1>, vector<80x1xi32>
    %c8_i32 = arith.constant 8 : i32
    %17 = vector.broadcast %c8_i32 : i32 to vector<80x1xi32>
    %18 = arith.cmpi slt, %16, %17 : vector<80x1xi32>
    %c0 = arith.constant 0 : index
    %c0_3 = arith.constant 0 : index
    %c0_4 = arith.constant 0 : index
    %19 = vector.load %arg1[%c0, %c0_3, %c0_4] : memref<1x80x16xbf16, #tpu.memory_space<vmem>>, vector<1x80x16xbf16>
    %20 = vector.shape_cast %19 : vector<1x80x16xbf16> to vector<80x16xbf16>
    %21 = arith.extf %20 : vector<80x16xbf16> to vector<80x16xf32>
    %c0_5 = arith.constant 0 : index
    %c0_6 = arith.constant 0 : index
    %22 = vector.load %arg2[%c0_5, %c0_6] : memref<1x16xf32, #tpu.memory_space<vmem>>, vector<1x16xf32>
    %23 = vector.broadcast %22 : vector<1x16xf32> to vector<80x16xf32>
    %24 = arith.mulf %21, %23 : vector<80x16xf32>
    %c0_7 = arith.constant 0 : index
    %c0_8 = arith.constant 0 : index
    %25 = vector.load %arg3[%c0_7, %c0_8] : memref<1x16xf32, #tpu.memory_space<vmem>>, vector<1x16xf32>
    %26 = vector.broadcast %25 : vector<1x16xf32> to vector<80x16xf32>
    %27 = arith.addf %24, %26 : vector<80x16xf32>
    %cst = arith.constant 0.000000e+00 : f32
    %28 = vector.broadcast %cst : f32 to vector<80x16xf32>
    %29 = arith.maximumf %27, %28 : vector<80x16xf32>
    %cst_9 = arith.constant 0.000000e+00 : f32
    %30 = vector.shape_cast %18 : vector<80x1xi1> to vector<80x1xi1>
    %31 = vector.broadcast %30 : vector<80x1xi1> to vector<80x16xi1>
    %32 = vector.broadcast %cst_9 : f32 to vector<80x16xf32>
    %33 = arith.select %31, %29, %32 : vector<80x16xi1>, vector<80x16xf32>
    %34 = vector.shape_cast %33 : vector<80x16xf32> to vector<1x80x16xf32>
    %35 = arith.truncf %34 : vector<1x80x16xf32> to vector<1x80x16xbf16>
    %c0_10 = arith.constant 0 : index
    %c0_11 = arith.constant 0 : index
    %c0_12 = arith.constant 0 : index
    %36 = vector.load %arg4[%c0_10, %c0_11, %c0_12] : memref<1x80x16xbf16, #tpu.memory_space<vmem>>, vector<1x80x16xbf16>
    tpu.vector_store %arg4[%c0_10, %c0_11, %c0_12], %35 {strides = array<i32>} : memref<1x80x16xbf16, #tpu.memory_space<vmem>>, vector<1x80x16xbf16>,
    %c0_13 = arith.constant 0 : index
    %c0_14 = arith.constant 0 : index
    %37 = vector.load %arg6[%c0_13, %c0_14] : memref<80x16xf32, #tpu.memory_space<vmem>>, vector<80x16xf32>
    tpu.vector_store %arg6[%c0_13, %c0_14], %33 {strides = array<i32>} : memref<80x16xf32, #tpu.memory_space<vmem>>, vector<80x16xf32>,
    %cst_15 = arith.constant 0.000000e+00 : bf16
    %38 = vector.broadcast %cst_15 : bf16 to vector<1x24x16xbf16>
    %c0_16 = arith.constant 0 : index
    %c0_17 = arith.constant 0 : index
    %c0_18 = arith.constant 0 : index
    %39 = vector.load %arg5[%c0_16, %c0_17, %c0_18] : memref<1x24x16xbf16, #tpu.memory_space<vmem>>, vector<1x24x16xbf16>
    tpu.vector_store %arg5[%c0_16, %c0_17, %c0_18], %38 {strides = array<i32>} : memref<1x24x16xbf16, #tpu.memory_space<vmem>>, vector<1x24x16xbf16>,
    %c0_19 = arith.constant 0 : index
    %c0_20 = arith.constant 0 : index
    %40 = tpu.strided_load %arg6[%c0_19, %c0_20] {strides = array<i32: 2, 1>} : memref<80x16xf32, #tpu.memory_space<vmem>>, vector<4x16xf32>
    %c1 = arith.constant 1 : index
    %c0_21 = arith.constant 0 : index
    %41 = tpu.strided_load %arg6[%c1, %c0_21] {strides = array<i32: 2, 1>} : memref<80x16xf32, #tpu.memory_space<vmem>>, vector<4x16xf32>
    %c10 = arith.constant 10 : index
    %c0_22 = arith.constant 0 : index
    %42 = tpu.strided_load %arg6[%c10, %c0_22] {strides = array<i32: 2, 1>} : memref<80x16xf32, #tpu.memory_space<vmem>>, vector<4x16xf32>
    %c11 = arith.constant 11 : index
    %c0_23 = arith.constant 0 : index
    %43 = tpu.strided_load %arg6[%c11, %c0_23] {strides = array<i32: 2, 1>} : memref<80x16xf32, #tpu.memory_space<vmem>>, vector<4x16xf32>
    %44 = arith.maximumf %40, %41 : vector<4x16xf32>
    %45 = arith.maximumf %42, %43 : vector<4x16xf32>
    %46 = arith.maximumf %44, %45 : vector<4x16xf32>
    %47 = arith.truncf %46 : vector<4x16xf32> to vector<4x16xbf16>
    %c0_24 = arith.constant 0 : index
    %c0_25 = arith.constant 0 : index
    %c0_26 = arith.constant 0 : index
    %48 = vector.load %arg5[%c0_24, %c0_25, %c0_26] : memref<1x24x16xbf16, #tpu.memory_space<vmem>>, vector<1x4x16xbf16>
    %49 = vector.shape_cast %48 : vector<1x4x16xbf16> to vector<4x16xbf16>
    %50 = vector.shape_cast %47 : vector<4x16xbf16> to vector<1x4x16xbf16>
    tpu.vector_store %arg5[%c0_24, %c0_25, %c0_26], %50 {strides = array<i32>} : memref<1x24x16xbf16, #tpu.memory_space<vmem>>, vector<1x4x16xbf16>,
    %c20 = arith.constant 20 : index
    %c0_27 = arith.constant 0 : index
    %51 = tpu.strided_load %arg6[%c20, %c0_27] {strides = array<i32: 2, 1>} : memref<80x16xf32, #tpu.memory_space<vmem>>, vector<4x16xf32>
    %c21 = arith.constant 21 : index
    %c0_28 = arith.constant 0 : index
    %52 = tpu.strided_load %arg6[%c21, %c0_28] {strides = array<i32: 2, 1>} : memref<80x16xf32, #tpu.memory_space<vmem>>, vector<4x16xf32>
    %c30 = arith.constant 30 : index
    %c0_29 = arith.constant 0 : index
    %53 = tpu.strided_load %arg6[%c30, %c0_29] {strides = array<i32: 2, 1>} : memref<80x16xf32, #tpu.memory_space<vmem>>, vector<4x16xf32>
    %c31 = arith.constant 31 : index
    %c0_30 = arith.constant 0 : index
    %54 = tpu.strided_load %arg6[%c31, %c0_30] {strides = array<i32: 2, 1>} : memref<80x16xf32, #tpu.memory_space<vmem>>, vector<4x16xf32>
    %55 = arith.maximumf %51, %52 : vector<4x16xf32>
    %56 = arith.maximumf %53, %54 : vector<4x16xf32>
    %57 = arith.maximumf %55, %56 : vector<4x16xf32>
    %58 = arith.truncf %57 : vector<4x16xf32> to vector<4x16xbf16>
    %c0_31 = arith.constant 0 : index
    %c6 = arith.constant 6 : index
    %c0_32 = arith.constant 0 : index
    %59 = vector.load %arg5[%c0_31, %c6, %c0_32] : memref<1x24x16xbf16, #tpu.memory_space<vmem>>, vector<1x4x16xbf16>
    %60 = vector.shape_cast %59 : vector<1x4x16xbf16> to vector<4x16xbf16>
    %61 = vector.shape_cast %58 : vector<4x16xbf16> to vector<1x4x16xbf16>
    tpu.vector_store %arg5[%c0_31, %c6, %c0_32], %61 {strides = array<i32>} : memref<1x24x16xbf16, #tpu.memory_space<vmem>>, vector<1x4x16xbf16>,
    %c40 = arith.constant 40 : index
    %c0_33 = arith.constant 0 : index
    %62 = tpu.strided_load %arg6[%c40, %c0_33] {strides = array<i32: 2, 1>} : memref<80x16xf32, #tpu.memory_space<vmem>>, vector<4x16xf32>
    %c41 = arith.constant 41 : index
    %c0_34 = arith.constant 0 : index
    %63 = tpu.strided_load %arg6[%c41, %c0_34] {strides = array<i32: 2, 1>} : memref<80x16xf32, #tpu.memory_space<vmem>>, vector<4x16xf32>
    %c50 = arith.constant 50 : index
    %c0_35 = arith.constant 0 : index
    %64 = tpu.strided_load %arg6[%c50, %c0_35] {strides = array<i32: 2, 1>} : memref<80x16xf32, #tpu.memory_space<vmem>>, vector<4x16xf32>
    %c51 = arith.constant 51 : index
    %c0_36 = arith.constant 0 : index
    %65 = tpu.strided_load %arg6[%c51, %c0_36] {strides = array<i32: 2, 1>} : memref<80x16xf32, #tpu.memory_space<vmem>>, vector<4x16xf32>
    %66 = arith.maximumf %62, %63 : vector<4x16xf32>
    %67 = arith.maximumf %64, %65 : vector<4x16xf32>
    %68 = arith.maximumf %66, %67 : vector<4x16xf32>
    %69 = arith.truncf %68 : vector<4x16xf32> to vector<4x16xbf16>
    %c0_37 = arith.constant 0 : index
    %c12 = arith.constant 12 : index
    %c0_38 = arith.constant 0 : index
    %70 = vector.load %arg5[%c0_37, %c12, %c0_38] : memref<1x24x16xbf16, #tpu.memory_space<vmem>>, vector<1x4x16xbf16>
    %71 = vector.shape_cast %70 : vector<1x4x16xbf16> to vector<4x16xbf16>
    %72 = vector.shape_cast %69 : vector<4x16xbf16> to vector<1x4x16xbf16>
    tpu.vector_store %arg5[%c0_37, %c12, %c0_38], %72 {strides = array<i32>} : memref<1x24x16xbf16, #tpu.memory_space<vmem>>, vector<1x4x16xbf16>,
    %c60 = arith.constant 60 : index
    %c0_39 = arith.constant 0 : index
    %73 = tpu.strided_load %arg6[%c60, %c0_39] {strides = array<i32: 2, 1>} : memref<80x16xf32, #tpu.memory_space<vmem>>, vector<4x16xf32>
    %c61 = arith.constant 61 : index
    %c0_40 = arith.constant 0 : index
    %74 = tpu.strided_load %arg6[%c61, %c0_40] {strides = array<i32: 2, 1>} : memref<80x16xf32, #tpu.memory_space<vmem>>, vector<4x16xf32>
    %c70 = arith.constant 70 : index
    %c0_41 = arith.constant 0 : index
    %75 = tpu.strided_load %arg6[%c70, %c0_41] {strides = array<i32: 2, 1>} : memref<80x16xf32, #tpu.memory_space<vmem>>, vector<4x16xf32>
    %c71 = arith.constant 71 : index
    %c0_42 = arith.constant 0 : index
    %76 = tpu.strided_load %arg6[%c71, %c0_42] {strides = array<i32: 2, 1>} : memref<80x16xf32, #tpu.memory_space<vmem>>, vector<4x16xf32>
    %77 = arith.maximumf %73, %74 : vector<4x16xf32>
    %78 = arith.maximumf %75, %76 : vector<4x16xf32>
    %79 = arith.maximumf %77, %78 : vector<4x16xf32>
    %80 = arith.truncf %79 : vector<4x16xf32> to vector<4x16xbf16>
    %c0_43 = arith.constant 0 : index
    %c18 = arith.constant 18 : index
    %c0_44 = arith.constant 0 : index
    %81 = vector.load %arg5[%c0_43, %c18, %c0_44] : memref<1x24x16xbf16, #tpu.memory_space<vmem>>, vector<1x4x16xbf16>
    %82 = vector.shape_cast %81 : vector<1x4x16xbf16> to vector<4x16xbf16>
    %83 = vector.shape_cast %80 : vector<4x16xbf16> to vector<1x4x16xbf16>
    tpu.vector_store %arg5[%c0_43, %c18, %c0_44], %83 {strides = array<i32>} : memref<1x24x16xbf16, #tpu.memory_space<vmem>>, vector<1x4x16xbf16>,
    return
  }
  func.func @transform_0(%arg0: i32) -> (i32, i32, i32) {
    %c0_i32 = arith.constant 0 : i32
    %c0_i32_0 = arith.constant 0 : i32
    %c0_i32_1 = arith.constant 0 : i32
    return %arg0, %c0_i32, %c0_i32_0 : i32, i32, i32
  }
  func.func @transform_1(%arg0: i32) -> (i32, i32) {
    %c0_i32 = arith.constant 0 : i32
    %c0_i32_0 = arith.constant 0 : i32
    %c0_i32_1 = arith.constant 0 : i32
    return %c0_i32, %c0_i32_0 : i32, i32
  }
  func.func @transform_2(%arg0: i32) -> (i32, i32) {
    %c0_i32 = arith.constant 0 : i32
    %c0_i32_0 = arith.constant 0 : i32
    %c0_i32_1 = arith.constant 0 : i32
    return %c0_i32, %c0_i32_0 : i32, i32
  }
  func.func @transform_3(%arg0: i32) -> (i32, i32, i32) {
    %c0_i32 = arith.constant 0 : i32
    %c0_i32_0 = arith.constant 0 : i32
    %c0_i32_1 = arith.constant 0 : i32
    return %arg0, %c0_i32, %c0_i32_0 : i32, i32, i32
  }
  func.func @transform_4(%arg0: i32) -> (i32, i32, i32) {
    %c0_i32 = arith.constant 0 : i32
    %c0_i32_0 = arith.constant 0 : i32
    %c0_i32_1 = arith.constant 0 : i32
    return %arg0, %c0_i32, %c0_i32_0 : i32, i32, i32
  }
}

module attributes {stable_mosaic.version = 11 : i64} {
  func.func @_conv3x3_kernel(%arg0: i32, %arg1: memref<1x288x3xbf16, #tpu.memory_space<vmem>>, %arg2: memref<3x3x3x8xbf16, #tpu.memory_space<vmem>>, %arg3: memref<1x8xf32, #tpu.memory_space<vmem>>, %arg4: memref<1x288x8xbf16, #tpu.memory_space<vmem>>, %arg5: memref<1x80x8xbf16, #tpu.memory_space<vmem>>, %arg6: memref<332x3xf32, #tpu.memory_space<vmem>>, %arg7: memref<288x8xf32, #tpu.memory_space<vmem>>) attributes {dimension_semantics = [#tpu.dimension_semantics<parallel>], iteration_bounds = array<i64: 2>, scalar_prefetch = 0 : i64, scratch_operands = 2 : i64, tpu.core_type = #tpu.core_type<tc>, window_params = [{transform_indices = @transform_0, window_bounds = array<i64: 1, 288, 3>}, {pipeline_mode = #tpu.pipeline_mode<synchronous>, transform_indices = @transform_1, window_bounds = array<i64: 3, 3, 3, 8>}, {pipeline_mode = #tpu.pipeline_mode<synchronous>, transform_indices = @transform_2, window_bounds = array<i64: 1, 8>}, {transform_indices = @transform_3, window_bounds = array<i64: 1, 288, 8>}, {transform_indices = @transform_4, window_bounds = array<i64: 1, 80, 8>}]} {
    %0 = tpu.iota {dimensions = array<i32: 0>} : vector<288x1xi32>
    %c18_i32 = arith.constant 18 : i32
    %c0_i32 = arith.constant 0 : i32
    %1 = arith.cmpi eq, %c18_i32, %c0_i32 : i32
    %c1_i32 = arith.constant 1 : i32
    %2 = arith.select %1, %c1_i32, %c18_i32 : i32
    %3 = vector.broadcast %2 : i32 to vector<288x1xi32>
    %4 = arith.remsi %0, %3 : vector<288x1xi32>
    %c0_i32_0 = arith.constant 0 : i32
    %5 = vector.broadcast %c0_i32_0 : i32 to vector<288x1xi32>
    %6 = arith.cmpi ne, %4, %5 : vector<288x1xi32>
    %c0_i32_1 = arith.constant 0 : i32
    %7 = vector.broadcast %c0_i32_1 : i32 to vector<288x1xi32>
    %8 = arith.cmpi slt, %4, %7 : vector<288x1xi32>
    %c0_i32_2 = arith.constant 0 : i32
    %9 = arith.cmpi slt, %2, %c0_i32_2 : i32
    %10 = vector.broadcast %9 : i1 to vector<288x1xi1>
    %11 = vector.broadcast %10 : vector<288x1xi1> to vector<288x1xi1>
    %12 = arith.xori %8, %11 : vector<288x1xi1>
    %13 = arith.andi %12, %6 : vector<288x1xi1>
    %14 = vector.broadcast %2 : i32 to vector<288x1xi32>
    %15 = arith.addi %4, %14 : vector<288x1xi32>
    %16 = arith.select %13, %15, %4 : vector<288x1xi1>, vector<288x1xi32>
    %c16_i32 = arith.constant 16 : i32
    %17 = vector.broadcast %c16_i32 : i32 to vector<288x1xi32>
    %18 = arith.cmpi slt, %16, %17 : vector<288x1xi32>
    %cst = arith.constant 0.000000e+00 : f32
    %19 = vector.broadcast %cst : f32 to vector<332x3xf32>
    %c0 = arith.constant 0 : index
    %c0_3 = arith.constant 0 : index
    %20 = vector.load %arg6[%c0, %c0_3] : memref<332x3xf32, #tpu.memory_space<vmem>>, vector<332x3xf32>
    tpu.vector_store %arg6[%c0, %c0_3], %19 {strides = array<i32>} : memref<332x3xf32, #tpu.memory_space<vmem>>, vector<332x3xf32>,
    %c0_4 = arith.constant 0 : index
    %c0_5 = arith.constant 0 : index
    %c0_6 = arith.constant 0 : index
    %21 = vector.load %arg1[%c0_4, %c0_5, %c0_6] : memref<1x288x3xbf16, #tpu.memory_space<vmem>>, vector<1x288x3xbf16>
    %22 = vector.shape_cast %21 : vector<1x288x3xbf16> to vector<288x3xbf16>
    %23 = arith.extf %22 : vector<288x3xbf16> to vector<288x3xf32>
    %c19 = arith.constant 19 : index
    %c0_7 = arith.constant 0 : index
    %24 = vector.load %arg6[%c19, %c0_7] : memref<332x3xf32, #tpu.memory_space<vmem>>, vector<288x3xf32>
    tpu.vector_store %arg6[%c19, %c0_7], %23 {strides = array<i32>} : memref<332x3xf32, #tpu.memory_space<vmem>>, vector<288x3xf32>,
    %cst_8 = arith.constant 0.000000e+00 : f32
    %25 = vector.broadcast %cst_8 : f32 to vector<288x8xf32>
    %c0_9 = arith.constant 0 : index
    %c0_10 = arith.constant 0 : index
    %26 = vector.load %arg6[%c0_9, %c0_10] : memref<332x3xf32, #tpu.memory_space<vmem>>, vector<288x3xf32>
    %27 = arith.truncf %26 : vector<288x3xf32> to vector<288x3xbf16>
    %c0_11 = arith.constant 0 : index
    %c0_12 = arith.constant 0 : index
    %c0_13 = arith.constant 0 : index
    %c0_14 = arith.constant 0 : index
    %28 = vector.load %arg2[%c0_11, %c0_12, %c0_13, %c0_14] : memref<3x3x3x8xbf16, #tpu.memory_space<vmem>>, vector<1x1x3x8xbf16>
    %29 = vector.shape_cast %28 : vector<1x1x3x8xbf16> to vector<3x8xbf16>
    %cst_15 = arith.constant dense<0.000000e+00> : vector<288x8xf32>
    %30 = tpu.matmul %27, %29, %cst_15 {dimension_numbers = #tpu.dot_dimension_numbers<[1], [0], [0], [1], [0, 0, 1, 1], [], []>} : vector<288x3xbf16>, vector<3x8xbf16>, vector<288x8xf32> -> vector<288x8xf32>
    %31 = arith.addf %25, %30 : vector<288x8xf32>
    %c1 = arith.constant 1 : index
    %c0_16 = arith.constant 0 : index
    %32 = vector.load %arg6[%c1, %c0_16] : memref<332x3xf32, #tpu.memory_space<vmem>>, vector<288x3xf32>
    %33 = arith.truncf %32 : vector<288x3xf32> to vector<288x3xbf16>
    %c0_17 = arith.constant 0 : index
    %c1_18 = arith.constant 1 : index
    %c0_19 = arith.constant 0 : index
    %c0_20 = arith.constant 0 : index
    %34 = vector.load %arg2[%c0_17, %c1_18, %c0_19, %c0_20] : memref<3x3x3x8xbf16, #tpu.memory_space<vmem>>, vector<1x1x3x8xbf16>
    %35 = vector.shape_cast %34 : vector<1x1x3x8xbf16> to vector<3x8xbf16>
    %cst_21 = arith.constant dense<0.000000e+00> : vector<288x8xf32>
    %36 = tpu.matmul %33, %35, %cst_21 {dimension_numbers = #tpu.dot_dimension_numbers<[1], [0], [0], [1], [0, 0, 1, 1], [], []>} : vector<288x3xbf16>, vector<3x8xbf16>, vector<288x8xf32> -> vector<288x8xf32>
    %37 = arith.addf %31, %36 : vector<288x8xf32>
    %c2 = arith.constant 2 : index
    %c0_22 = arith.constant 0 : index
    %38 = vector.load %arg6[%c2, %c0_22] : memref<332x3xf32, #tpu.memory_space<vmem>>, vector<288x3xf32>
    %39 = arith.truncf %38 : vector<288x3xf32> to vector<288x3xbf16>
    %c0_23 = arith.constant 0 : index
    %c2_24 = arith.constant 2 : index
    %c0_25 = arith.constant 0 : index
    %c0_26 = arith.constant 0 : index
    %40 = vector.load %arg2[%c0_23, %c2_24, %c0_25, %c0_26] : memref<3x3x3x8xbf16, #tpu.memory_space<vmem>>, vector<1x1x3x8xbf16>
    %41 = vector.shape_cast %40 : vector<1x1x3x8xbf16> to vector<3x8xbf16>
    %cst_27 = arith.constant dense<0.000000e+00> : vector<288x8xf32>
    %42 = tpu.matmul %39, %41, %cst_27 {dimension_numbers = #tpu.dot_dimension_numbers<[1], [0], [0], [1], [0, 0, 1, 1], [], []>} : vector<288x3xbf16>, vector<3x8xbf16>, vector<288x8xf32> -> vector<288x8xf32>
    %43 = arith.addf %37, %42 : vector<288x8xf32>
    %c18 = arith.constant 18 : index
    %c0_28 = arith.constant 0 : index
    %44 = vector.load %arg6[%c18, %c0_28] : memref<332x3xf32, #tpu.memory_space<vmem>>, vector<288x3xf32>
    %45 = arith.truncf %44 : vector<288x3xf32> to vector<288x3xbf16>
    %c1_29 = arith.constant 1 : index
    %c0_30 = arith.constant 0 : index
    %c0_31 = arith.constant 0 : index
    %c0_32 = arith.constant 0 : index
    %46 = vector.load %arg2[%c1_29, %c0_30, %c0_31, %c0_32] : memref<3x3x3x8xbf16, #tpu.memory_space<vmem>>, vector<1x1x3x8xbf16>
    %47 = vector.shape_cast %46 : vector<1x1x3x8xbf16> to vector<3x8xbf16>
    %cst_33 = arith.constant dense<0.000000e+00> : vector<288x8xf32>
    %48 = tpu.matmul %45, %47, %cst_33 {dimension_numbers = #tpu.dot_dimension_numbers<[1], [0], [0], [1], [0, 0, 1, 1], [], []>} : vector<288x3xbf16>, vector<3x8xbf16>, vector<288x8xf32> -> vector<288x8xf32>
    %49 = arith.addf %43, %48 : vector<288x8xf32>
    %c19_34 = arith.constant 19 : index
    %c0_35 = arith.constant 0 : index
    %50 = vector.load %arg6[%c19_34, %c0_35] : memref<332x3xf32, #tpu.memory_space<vmem>>, vector<288x3xf32>
    %51 = arith.truncf %50 : vector<288x3xf32> to vector<288x3xbf16>
    %c1_36 = arith.constant 1 : index
    %c1_37 = arith.constant 1 : index
    %c0_38 = arith.constant 0 : index
    %c0_39 = arith.constant 0 : index
    %52 = vector.load %arg2[%c1_36, %c1_37, %c0_38, %c0_39] : memref<3x3x3x8xbf16, #tpu.memory_space<vmem>>, vector<1x1x3x8xbf16>
    %53 = vector.shape_cast %52 : vector<1x1x3x8xbf16> to vector<3x8xbf16>
    %cst_40 = arith.constant dense<0.000000e+00> : vector<288x8xf32>
    %54 = tpu.matmul %51, %53, %cst_40 {dimension_numbers = #tpu.dot_dimension_numbers<[1], [0], [0], [1], [0, 0, 1, 1], [], []>} : vector<288x3xbf16>, vector<3x8xbf16>, vector<288x8xf32> -> vector<288x8xf32>
    %55 = arith.addf %49, %54 : vector<288x8xf32>
    %c20 = arith.constant 20 : index
    %c0_41 = arith.constant 0 : index
    %56 = vector.load %arg6[%c20, %c0_41] : memref<332x3xf32, #tpu.memory_space<vmem>>, vector<288x3xf32>
    %57 = arith.truncf %56 : vector<288x3xf32> to vector<288x3xbf16>
    %c1_42 = arith.constant 1 : index
    %c2_43 = arith.constant 2 : index
    %c0_44 = arith.constant 0 : index
    %c0_45 = arith.constant 0 : index
    %58 = vector.load %arg2[%c1_42, %c2_43, %c0_44, %c0_45] : memref<3x3x3x8xbf16, #tpu.memory_space<vmem>>, vector<1x1x3x8xbf16>
    %59 = vector.shape_cast %58 : vector<1x1x3x8xbf16> to vector<3x8xbf16>
    %cst_46 = arith.constant dense<0.000000e+00> : vector<288x8xf32>
    %60 = tpu.matmul %57, %59, %cst_46 {dimension_numbers = #tpu.dot_dimension_numbers<[1], [0], [0], [1], [0, 0, 1, 1], [], []>} : vector<288x3xbf16>, vector<3x8xbf16>, vector<288x8xf32> -> vector<288x8xf32>
    %61 = arith.addf %55, %60 : vector<288x8xf32>
    %c36 = arith.constant 36 : index
    %c0_47 = arith.constant 0 : index
    %62 = vector.load %arg6[%c36, %c0_47] : memref<332x3xf32, #tpu.memory_space<vmem>>, vector<288x3xf32>
    %63 = arith.truncf %62 : vector<288x3xf32> to vector<288x3xbf16>
    %c2_48 = arith.constant 2 : index
    %c0_49 = arith.constant 0 : index
    %c0_50 = arith.constant 0 : index
    %c0_51 = arith.constant 0 : index
    %64 = vector.load %arg2[%c2_48, %c0_49, %c0_50, %c0_51] : memref<3x3x3x8xbf16, #tpu.memory_space<vmem>>, vector<1x1x3x8xbf16>
    %65 = vector.shape_cast %64 : vector<1x1x3x8xbf16> to vector<3x8xbf16>
    %cst_52 = arith.constant dense<0.000000e+00> : vector<288x8xf32>
    %66 = tpu.matmul %63, %65, %cst_52 {dimension_numbers = #tpu.dot_dimension_numbers<[1], [0], [0], [1], [0, 0, 1, 1], [], []>} : vector<288x3xbf16>, vector<3x8xbf16>, vector<288x8xf32> -> vector<288x8xf32>
    %67 = arith.addf %61, %66 : vector<288x8xf32>
    %c37 = arith.constant 37 : index
    %c0_53 = arith.constant 0 : index
    %68 = vector.load %arg6[%c37, %c0_53] : memref<332x3xf32, #tpu.memory_space<vmem>>, vector<288x3xf32>
    %69 = arith.truncf %68 : vector<288x3xf32> to vector<288x3xbf16>
    %c2_54 = arith.constant 2 : index
    %c1_55 = arith.constant 1 : index
    %c0_56 = arith.constant 0 : index
    %c0_57 = arith.constant 0 : index
    %70 = vector.load %arg2[%c2_54, %c1_55, %c0_56, %c0_57] : memref<3x3x3x8xbf16, #tpu.memory_space<vmem>>, vector<1x1x3x8xbf16>
    %71 = vector.shape_cast %70 : vector<1x1x3x8xbf16> to vector<3x8xbf16>
    %cst_58 = arith.constant dense<0.000000e+00> : vector<288x8xf32>
    %72 = tpu.matmul %69, %71, %cst_58 {dimension_numbers = #tpu.dot_dimension_numbers<[1], [0], [0], [1], [0, 0, 1, 1], [], []>} : vector<288x3xbf16>, vector<3x8xbf16>, vector<288x8xf32> -> vector<288x8xf32>
    %73 = arith.addf %67, %72 : vector<288x8xf32>
    %c38 = arith.constant 38 : index
    %c0_59 = arith.constant 0 : index
    %74 = vector.load %arg6[%c38, %c0_59] : memref<332x3xf32, #tpu.memory_space<vmem>>, vector<288x3xf32>
    %75 = arith.truncf %74 : vector<288x3xf32> to vector<288x3xbf16>
    %c2_60 = arith.constant 2 : index
    %c2_61 = arith.constant 2 : index
    %c0_62 = arith.constant 0 : index
    %c0_63 = arith.constant 0 : index
    %76 = vector.load %arg2[%c2_60, %c2_61, %c0_62, %c0_63] : memref<3x3x3x8xbf16, #tpu.memory_space<vmem>>, vector<1x1x3x8xbf16>
    %77 = vector.shape_cast %76 : vector<1x1x3x8xbf16> to vector<3x8xbf16>
    %cst_64 = arith.constant dense<0.000000e+00> : vector<288x8xf32>
    %78 = tpu.matmul %75, %77, %cst_64 {dimension_numbers = #tpu.dot_dimension_numbers<[1], [0], [0], [1], [0, 0, 1, 1], [], []>} : vector<288x3xbf16>, vector<3x8xbf16>, vector<288x8xf32> -> vector<288x8xf32>
    %79 = arith.addf %73, %78 : vector<288x8xf32>
    %c0_65 = arith.constant 0 : index
    %c0_66 = arith.constant 0 : index
    %80 = vector.load %arg3[%c0_65, %c0_66] : memref<1x8xf32, #tpu.memory_space<vmem>>, vector<1x8xf32>
    %81 = vector.broadcast %80 : vector<1x8xf32> to vector<288x8xf32>
    %82 = arith.addf %79, %81 : vector<288x8xf32>
    %cst_67 = arith.constant 0.000000e+00 : f32
    %83 = vector.shape_cast %18 : vector<288x1xi1> to vector<288x1xi1>
    %84 = vector.broadcast %83 : vector<288x1xi1> to vector<288x8xi1>
    %85 = vector.broadcast %cst_67 : f32 to vector<288x8xf32>
    %86 = arith.select %84, %82, %85 : vector<288x8xi1>, vector<288x8xf32>
    %cst_68 = arith.constant 0.000000e+00 : f32
    %87 = vector.broadcast %cst_68 : f32 to vector<288x8xf32>
    %88 = arith.maximumf %86, %87 : vector<288x8xf32>
    %89 = vector.shape_cast %88 : vector<288x8xf32> to vector<1x288x8xf32>
    %90 = arith.truncf %89 : vector<1x288x8xf32> to vector<1x288x8xbf16>
    %c0_69 = arith.constant 0 : index
    %c0_70 = arith.constant 0 : index
    %c0_71 = arith.constant 0 : index
    %91 = vector.load %arg4[%c0_69, %c0_70, %c0_71] : memref<1x288x8xbf16, #tpu.memory_space<vmem>>, vector<1x288x8xbf16>
    tpu.vector_store %arg4[%c0_69, %c0_70, %c0_71], %90 {strides = array<i32>} : memref<1x288x8xbf16, #tpu.memory_space<vmem>>, vector<1x288x8xbf16>,
    %c0_72 = arith.constant 0 : index
    %c0_73 = arith.constant 0 : index
    %92 = vector.load %arg7[%c0_72, %c0_73] : memref<288x8xf32, #tpu.memory_space<vmem>>, vector<288x8xf32>
    tpu.vector_store %arg7[%c0_72, %c0_73], %88 {strides = array<i32>} : memref<288x8xf32, #tpu.memory_space<vmem>>, vector<288x8xf32>,
    %cst_74 = arith.constant 0.000000e+00 : bf16
    %93 = vector.broadcast %cst_74 : bf16 to vector<1x80x8xbf16>
    %c0_75 = arith.constant 0 : index
    %c0_76 = arith.constant 0 : index
    %c0_77 = arith.constant 0 : index
    %94 = vector.load %arg5[%c0_75, %c0_76, %c0_77] : memref<1x80x8xbf16, #tpu.memory_space<vmem>>, vector<1x80x8xbf16>
    tpu.vector_store %arg5[%c0_75, %c0_76, %c0_77], %93 {strides = array<i32>} : memref<1x80x8xbf16, #tpu.memory_space<vmem>>, vector<1x80x8xbf16>,
    %c0_78 = arith.constant 0 : index
    %c0_79 = arith.constant 0 : index
    %95 = tpu.strided_load %arg7[%c0_78, %c0_79] {strides = array<i32: 2, 1>} : memref<288x8xf32, #tpu.memory_space<vmem>>, vector<8x8xf32>
    %c1_80 = arith.constant 1 : index
    %c0_81 = arith.constant 0 : index
    %96 = tpu.strided_load %arg7[%c1_80, %c0_81] {strides = array<i32: 2, 1>} : memref<288x8xf32, #tpu.memory_space<vmem>>, vector<8x8xf32>
    %c18_82 = arith.constant 18 : index
    %c0_83 = arith.constant 0 : index
    %97 = tpu.strided_load %arg7[%c18_82, %c0_83] {strides = array<i32: 2, 1>} : memref<288x8xf32, #tpu.memory_space<vmem>>, vector<8x8xf32>
    %c19_84 = arith.constant 19 : index
    %c0_85 = arith.constant 0 : index
    %98 = tpu.strided_load %arg7[%c19_84, %c0_85] {strides = array<i32: 2, 1>} : memref<288x8xf32, #tpu.memory_space<vmem>>, vector<8x8xf32>
    %99 = arith.maximumf %95, %96 : vector<8x8xf32>
    %100 = arith.maximumf %97, %98 : vector<8x8xf32>
    %101 = arith.maximumf %99, %100 : vector<8x8xf32>
    %102 = arith.truncf %101 : vector<8x8xf32> to vector<8x8xbf16>
    %c0_86 = arith.constant 0 : index
    %c0_87 = arith.constant 0 : index
    %c0_88 = arith.constant 0 : index
    %103 = vector.load %arg5[%c0_86, %c0_87, %c0_88] : memref<1x80x8xbf16, #tpu.memory_space<vmem>>, vector<1x8x8xbf16>
    %104 = vector.shape_cast %103 : vector<1x8x8xbf16> to vector<8x8xbf16>
    %105 = vector.shape_cast %102 : vector<8x8xbf16> to vector<1x8x8xbf16>
    tpu.vector_store %arg5[%c0_86, %c0_87, %c0_88], %105 {strides = array<i32>} : memref<1x80x8xbf16, #tpu.memory_space<vmem>>, vector<1x8x8xbf16>,
    %c36_89 = arith.constant 36 : index
    %c0_90 = arith.constant 0 : index
    %106 = tpu.strided_load %arg7[%c36_89, %c0_90] {strides = array<i32: 2, 1>} : memref<288x8xf32, #tpu.memory_space<vmem>>, vector<8x8xf32>
    %c37_91 = arith.constant 37 : index
    %c0_92 = arith.constant 0 : index
    %107 = tpu.strided_load %arg7[%c37_91, %c0_92] {strides = array<i32: 2, 1>} : memref<288x8xf32, #tpu.memory_space<vmem>>, vector<8x8xf32>
    %c54 = arith.constant 54 : index
    %c0_93 = arith.constant 0 : index
    %108 = tpu.strided_load %arg7[%c54, %c0_93] {strides = array<i32: 2, 1>} : memref<288x8xf32, #tpu.memory_space<vmem>>, vector<8x8xf32>
    %c55 = arith.constant 55 : index
    %c0_94 = arith.constant 0 : index
    %109 = tpu.strided_load %arg7[%c55, %c0_94] {strides = array<i32: 2, 1>} : memref<288x8xf32, #tpu.memory_space<vmem>>, vector<8x8xf32>
    %110 = arith.maximumf %106, %107 : vector<8x8xf32>
    %111 = arith.maximumf %108, %109 : vector<8x8xf32>
    %112 = arith.maximumf %110, %111 : vector<8x8xf32>
    %113 = arith.truncf %112 : vector<8x8xf32> to vector<8x8xbf16>
    %c0_95 = arith.constant 0 : index
    %c10 = arith.constant 10 : index
    %c0_96 = arith.constant 0 : index
    %114 = vector.load %arg5[%c0_95, %c10, %c0_96] : memref<1x80x8xbf16, #tpu.memory_space<vmem>>, vector<1x8x8xbf16>
    %115 = vector.shape_cast %114 : vector<1x8x8xbf16> to vector<8x8xbf16>
    %116 = vector.shape_cast %113 : vector<8x8xbf16> to vector<1x8x8xbf16>
    tpu.vector_store %arg5[%c0_95, %c10, %c0_96], %116 {strides = array<i32>} : memref<1x80x8xbf16, #tpu.memory_space<vmem>>, vector<1x8x8xbf16>,
    %c72 = arith.constant 72 : index
    %c0_97 = arith.constant 0 : index
    %117 = tpu.strided_load %arg7[%c72, %c0_97] {strides = array<i32: 2, 1>} : memref<288x8xf32, #tpu.memory_space<vmem>>, vector<8x8xf32>
    %c73 = arith.constant 73 : index
    %c0_98 = arith.constant 0 : index
    %118 = tpu.strided_load %arg7[%c73, %c0_98] {strides = array<i32: 2, 1>} : memref<288x8xf32, #tpu.memory_space<vmem>>, vector<8x8xf32>
    %c90 = arith.constant 90 : index
    %c0_99 = arith.constant 0 : index
    %119 = tpu.strided_load %arg7[%c90, %c0_99] {strides = array<i32: 2, 1>} : memref<288x8xf32, #tpu.memory_space<vmem>>, vector<8x8xf32>
    %c91 = arith.constant 91 : index
    %c0_100 = arith.constant 0 : index
    %120 = tpu.strided_load %arg7[%c91, %c0_100] {strides = array<i32: 2, 1>} : memref<288x8xf32, #tpu.memory_space<vmem>>, vector<8x8xf32>
    %121 = arith.maximumf %117, %118 : vector<8x8xf32>
    %122 = arith.maximumf %119, %120 : vector<8x8xf32>
    %123 = arith.maximumf %121, %122 : vector<8x8xf32>
    %124 = arith.truncf %123 : vector<8x8xf32> to vector<8x8xbf16>
    %c0_101 = arith.constant 0 : index
    %c20_102 = arith.constant 20 : index
    %c0_103 = arith.constant 0 : index
    %125 = vector.load %arg5[%c0_101, %c20_102, %c0_103] : memref<1x80x8xbf16, #tpu.memory_space<vmem>>, vector<1x8x8xbf16>
    %126 = vector.shape_cast %125 : vector<1x8x8xbf16> to vector<8x8xbf16>
    %127 = vector.shape_cast %124 : vector<8x8xbf16> to vector<1x8x8xbf16>
    tpu.vector_store %arg5[%c0_101, %c20_102, %c0_103], %127 {strides = array<i32>} : memref<1x80x8xbf16, #tpu.memory_space<vmem>>, vector<1x8x8xbf16>,
    %c108 = arith.constant 108 : index
    %c0_104 = arith.constant 0 : index
    %128 = tpu.strided_load %arg7[%c108, %c0_104] {strides = array<i32: 2, 1>} : memref<288x8xf32, #tpu.memory_space<vmem>>, vector<8x8xf32>
    %c109 = arith.constant 109 : index
    %c0_105 = arith.constant 0 : index
    %129 = tpu.strided_load %arg7[%c109, %c0_105] {strides = array<i32: 2, 1>} : memref<288x8xf32, #tpu.memory_space<vmem>>, vector<8x8xf32>
    %c126 = arith.constant 126 : index
    %c0_106 = arith.constant 0 : index
    %130 = tpu.strided_load %arg7[%c126, %c0_106] {strides = array<i32: 2, 1>} : memref<288x8xf32, #tpu.memory_space<vmem>>, vector<8x8xf32>
    %c127 = arith.constant 127 : index
    %c0_107 = arith.constant 0 : index
    %131 = tpu.strided_load %arg7[%c127, %c0_107] {strides = array<i32: 2, 1>} : memref<288x8xf32, #tpu.memory_space<vmem>>, vector<8x8xf32>
    %132 = arith.maximumf %128, %129 : vector<8x8xf32>
    %133 = arith.maximumf %130, %131 : vector<8x8xf32>
    %134 = arith.maximumf %132, %133 : vector<8x8xf32>
    %135 = arith.truncf %134 : vector<8x8xf32> to vector<8x8xbf16>
    %c0_108 = arith.constant 0 : index
    %c30 = arith.constant 30 : index
    %c0_109 = arith.constant 0 : index
    %136 = vector.load %arg5[%c0_108, %c30, %c0_109] : memref<1x80x8xbf16, #tpu.memory_space<vmem>>, vector<1x8x8xbf16>
    %137 = vector.shape_cast %136 : vector<1x8x8xbf16> to vector<8x8xbf16>
    %138 = vector.shape_cast %135 : vector<8x8xbf16> to vector<1x8x8xbf16>
    tpu.vector_store %arg5[%c0_108, %c30, %c0_109], %138 {strides = array<i32>} : memref<1x80x8xbf16, #tpu.memory_space<vmem>>, vector<1x8x8xbf16>,
    %c144 = arith.constant 144 : index
    %c0_110 = arith.constant 0 : index
    %139 = tpu.strided_load %arg7[%c144, %c0_110] {strides = array<i32: 2, 1>} : memref<288x8xf32, #tpu.memory_space<vmem>>, vector<8x8xf32>
    %c145 = arith.constant 145 : index
    %c0_111 = arith.constant 0 : index
    %140 = tpu.strided_load %arg7[%c145, %c0_111] {strides = array<i32: 2, 1>} : memref<288x8xf32, #tpu.memory_space<vmem>>, vector<8x8xf32>
    %c162 = arith.constant 162 : index
    %c0_112 = arith.constant 0 : index
    %141 = tpu.strided_load %arg7[%c162, %c0_112] {strides = array<i32: 2, 1>} : memref<288x8xf32, #tpu.memory_space<vmem>>, vector<8x8xf32>
    %c163 = arith.constant 163 : index
    %c0_113 = arith.constant 0 : index
    %142 = tpu.strided_load %arg7[%c163, %c0_113] {strides = array<i32: 2, 1>} : memref<288x8xf32, #tpu.memory_space<vmem>>, vector<8x8xf32>
    %143 = arith.maximumf %139, %140 : vector<8x8xf32>
    %144 = arith.maximumf %141, %142 : vector<8x8xf32>
    %145 = arith.maximumf %143, %144 : vector<8x8xf32>
    %146 = arith.truncf %145 : vector<8x8xf32> to vector<8x8xbf16>
    %c0_114 = arith.constant 0 : index
    %c40 = arith.constant 40 : index
    %c0_115 = arith.constant 0 : index
    %147 = vector.load %arg5[%c0_114, %c40, %c0_115] : memref<1x80x8xbf16, #tpu.memory_space<vmem>>, vector<1x8x8xbf16>
    %148 = vector.shape_cast %147 : vector<1x8x8xbf16> to vector<8x8xbf16>
    %149 = vector.shape_cast %146 : vector<8x8xbf16> to vector<1x8x8xbf16>
    tpu.vector_store %arg5[%c0_114, %c40, %c0_115], %149 {strides = array<i32>} : memref<1x80x8xbf16, #tpu.memory_space<vmem>>, vector<1x8x8xbf16>,
    %c180 = arith.constant 180 : index
    %c0_116 = arith.constant 0 : index
    %150 = tpu.strided_load %arg7[%c180, %c0_116] {strides = array<i32: 2, 1>} : memref<288x8xf32, #tpu.memory_space<vmem>>, vector<8x8xf32>
    %c181 = arith.constant 181 : index
    %c0_117 = arith.constant 0 : index
    %151 = tpu.strided_load %arg7[%c181, %c0_117] {strides = array<i32: 2, 1>} : memref<288x8xf32, #tpu.memory_space<vmem>>, vector<8x8xf32>
    %c198 = arith.constant 198 : index
    %c0_118 = arith.constant 0 : index
    %152 = tpu.strided_load %arg7[%c198, %c0_118] {strides = array<i32: 2, 1>} : memref<288x8xf32, #tpu.memory_space<vmem>>, vector<8x8xf32>
    %c199 = arith.constant 199 : index
    %c0_119 = arith.constant 0 : index
    %153 = tpu.strided_load %arg7[%c199, %c0_119] {strides = array<i32: 2, 1>} : memref<288x8xf32, #tpu.memory_space<vmem>>, vector<8x8xf32>
    %154 = arith.maximumf %150, %151 : vector<8x8xf32>
    %155 = arith.maximumf %152, %153 : vector<8x8xf32>
    %156 = arith.maximumf %154, %155 : vector<8x8xf32>
    %157 = arith.truncf %156 : vector<8x8xf32> to vector<8x8xbf16>
    %c0_120 = arith.constant 0 : index
    %c50 = arith.constant 50 : index
    %c0_121 = arith.constant 0 : index
    %158 = vector.load %arg5[%c0_120, %c50, %c0_121] : memref<1x80x8xbf16, #tpu.memory_space<vmem>>, vector<1x8x8xbf16>
    %159 = vector.shape_cast %158 : vector<1x8x8xbf16> to vector<8x8xbf16>
    %160 = vector.shape_cast %157 : vector<8x8xbf16> to vector<1x8x8xbf16>
    tpu.vector_store %arg5[%c0_120, %c50, %c0_121], %160 {strides = array<i32>} : memref<1x80x8xbf16, #tpu.memory_space<vmem>>, vector<1x8x8xbf16>,
    %c216 = arith.constant 216 : index
    %c0_122 = arith.constant 0 : index
    %161 = tpu.strided_load %arg7[%c216, %c0_122] {strides = array<i32: 2, 1>} : memref<288x8xf32, #tpu.memory_space<vmem>>, vector<8x8xf32>
    %c217 = arith.constant 217 : index
    %c0_123 = arith.constant 0 : index
    %162 = tpu.strided_load %arg7[%c217, %c0_123] {strides = array<i32: 2, 1>} : memref<288x8xf32, #tpu.memory_space<vmem>>, vector<8x8xf32>
    %c234 = arith.constant 234 : index
    %c0_124 = arith.constant 0 : index
    %163 = tpu.strided_load %arg7[%c234, %c0_124] {strides = array<i32: 2, 1>} : memref<288x8xf32, #tpu.memory_space<vmem>>, vector<8x8xf32>
    %c235 = arith.constant 235 : index
    %c0_125 = arith.constant 0 : index
    %164 = tpu.strided_load %arg7[%c235, %c0_125] {strides = array<i32: 2, 1>} : memref<288x8xf32, #tpu.memory_space<vmem>>, vector<8x8xf32>
    %165 = arith.maximumf %161, %162 : vector<8x8xf32>
    %166 = arith.maximumf %163, %164 : vector<8x8xf32>
    %167 = arith.maximumf %165, %166 : vector<8x8xf32>
    %168 = arith.truncf %167 : vector<8x8xf32> to vector<8x8xbf16>
    %c0_126 = arith.constant 0 : index
    %c60 = arith.constant 60 : index
    %c0_127 = arith.constant 0 : index
    %169 = vector.load %arg5[%c0_126, %c60, %c0_127] : memref<1x80x8xbf16, #tpu.memory_space<vmem>>, vector<1x8x8xbf16>
    %170 = vector.shape_cast %169 : vector<1x8x8xbf16> to vector<8x8xbf16>
    %171 = vector.shape_cast %168 : vector<8x8xbf16> to vector<1x8x8xbf16>
    tpu.vector_store %arg5[%c0_126, %c60, %c0_127], %171 {strides = array<i32>} : memref<1x80x8xbf16, #tpu.memory_space<vmem>>, vector<1x8x8xbf16>,
    %c252 = arith.constant 252 : index
    %c0_128 = arith.constant 0 : index
    %172 = tpu.strided_load %arg7[%c252, %c0_128] {strides = array<i32: 2, 1>} : memref<288x8xf32, #tpu.memory_space<vmem>>, vector<8x8xf32>
    %c253 = arith.constant 253 : index
    %c0_129 = arith.constant 0 : index
    %173 = tpu.strided_load %arg7[%c253, %c0_129] {strides = array<i32: 2, 1>} : memref<288x8xf32, #tpu.memory_space<vmem>>, vector<8x8xf32>
    %c270 = arith.constant 270 : index
    %c0_130 = arith.constant 0 : index
    %174 = tpu.strided_load %arg7[%c270, %c0_130] {strides = array<i32: 2, 1>} : memref<288x8xf32, #tpu.memory_space<vmem>>, vector<8x8xf32>
    %c271 = arith.constant 271 : index
    %c0_131 = arith.constant 0 : index
    %175 = tpu.strided_load %arg7[%c271, %c0_131] {strides = array<i32: 2, 1>} : memref<288x8xf32, #tpu.memory_space<vmem>>, vector<8x8xf32>
    %176 = arith.maximumf %172, %173 : vector<8x8xf32>
    %177 = arith.maximumf %174, %175 : vector<8x8xf32>
    %178 = arith.maximumf %176, %177 : vector<8x8xf32>
    %179 = arith.truncf %178 : vector<8x8xf32> to vector<8x8xbf16>
    %c0_132 = arith.constant 0 : index
    %c70 = arith.constant 70 : index
    %c0_133 = arith.constant 0 : index
    %180 = vector.load %arg5[%c0_132, %c70, %c0_133] : memref<1x80x8xbf16, #tpu.memory_space<vmem>>, vector<1x8x8xbf16>
    %181 = vector.shape_cast %180 : vector<1x8x8xbf16> to vector<8x8xbf16>
    %182 = vector.shape_cast %179 : vector<8x8xbf16> to vector<1x8x8xbf16>
    tpu.vector_store %arg5[%c0_132, %c70, %c0_133], %182 {strides = array<i32>} : memref<1x80x8xbf16, #tpu.memory_space<vmem>>, vector<1x8x8xbf16>,
    return
  }
  func.func @transform_0(%arg0: i32) -> (i32, i32, i32) {
    %c0_i32 = arith.constant 0 : i32
    %c0_i32_0 = arith.constant 0 : i32
    %c0_i32_1 = arith.constant 0 : i32
    return %arg0, %c0_i32, %c0_i32_0 : i32, i32, i32
  }
  func.func @transform_1(%arg0: i32) -> (i32, i32, i32, i32) {
    %c0_i32 = arith.constant 0 : i32
    %c0_i32_0 = arith.constant 0 : i32
    %c0_i32_1 = arith.constant 0 : i32
    %c0_i32_2 = arith.constant 0 : i32
    %c0_i32_3 = arith.constant 0 : i32
    return %c0_i32, %c0_i32_0, %c0_i32_1, %c0_i32_2 : i32, i32, i32, i32
  }
  func.func @transform_2(%arg0: i32) -> (i32, i32) {
    %c0_i32 = arith.constant 0 : i32
    %c0_i32_0 = arith.constant 0 : i32
    %c0_i32_1 = arith.constant 0 : i32
    return %c0_i32, %c0_i32_0 : i32, i32
  }
  func.func @transform_3(%arg0: i32) -> (i32, i32, i32) {
    %c0_i32 = arith.constant 0 : i32
    %c0_i32_0 = arith.constant 0 : i32
    %c0_i32_1 = arith.constant 0 : i32
    return %arg0, %c0_i32, %c0_i32_0 : i32, i32, i32
  }
  func.func @transform_4(%arg0: i32) -> (i32, i32, i32) {
    %c0_i32 = arith.constant 0 : i32
    %c0_i32_0 = arith.constant 0 : i32
    %c0_i32_1 = arith.constant 0 : i32
    return %arg0, %c0_i32, %c0_i32_0 : i32, i32, i32
  }
}

module attributes {stable_mosaic.version = 11 : i64} {
  func.func @_conv3x3_kernel(%arg0: i32, %arg1: memref<1x80x8xbf16, #tpu.memory_space<vmem>>, %arg2: memref<3x3x8x16xbf16, #tpu.memory_space<vmem>>, %arg3: memref<1x16xf32, #tpu.memory_space<vmem>>, %arg4: memref<1x80x16xbf16, #tpu.memory_space<vmem>>, %arg5: memref<1x1x16xf32, #tpu.memory_space<vmem>>, %arg6: memref<1x1x16xf32, #tpu.memory_space<vmem>>, %arg7: memref<108x8xf32, #tpu.memory_space<vmem>>) attributes {dimension_semantics = [#tpu.dimension_semantics<parallel>], iteration_bounds = array<i64: 2>, scalar_prefetch = 0 : i64, scratch_operands = 1 : i64, tpu.core_type = #tpu.core_type<tc>, window_params = [{transform_indices = @transform_0, window_bounds = array<i64: 1, 80, 8>}, {pipeline_mode = #tpu.pipeline_mode<synchronous>, transform_indices = @transform_1, window_bounds = array<i64: 3, 3, 8, 16>}, {pipeline_mode = #tpu.pipeline_mode<synchronous>, transform_indices = @transform_2, window_bounds = array<i64: 1, 16>}, {transform_indices = @transform_3, window_bounds = array<i64: 1, 80, 16>}, {transform_indices = @transform_4, window_bounds = array<i64: 1, 1, 16>}, {transform_indices = @transform_5, window_bounds = array<i64: 1, 1, 16>}]} {
    %0 = tpu.iota {dimensions = array<i32: 0>} : vector<80x1xi32>
    %c10_i32 = arith.constant 10 : i32
    %c0_i32 = arith.constant 0 : i32
    %1 = arith.cmpi eq, %c10_i32, %c0_i32 : i32
    %c1_i32 = arith.constant 1 : i32
    %2 = arith.select %1, %c1_i32, %c10_i32 : i32
    %3 = vector.broadcast %2 : i32 to vector<80x1xi32>
    %4 = arith.remsi %0, %3 : vector<80x1xi32>
    %c0_i32_0 = arith.constant 0 : i32
    %5 = vector.broadcast %c0_i32_0 : i32 to vector<80x1xi32>
    %6 = arith.cmpi ne, %4, %5 : vector<80x1xi32>
    %c0_i32_1 = arith.constant 0 : i32
    %7 = vector.broadcast %c0_i32_1 : i32 to vector<80x1xi32>
    %8 = arith.cmpi slt, %4, %7 : vector<80x1xi32>
    %c0_i32_2 = arith.constant 0 : i32
    %9 = arith.cmpi slt, %2, %c0_i32_2 : i32
    %10 = vector.broadcast %9 : i1 to vector<80x1xi1>
    %11 = vector.broadcast %10 : vector<80x1xi1> to vector<80x1xi1>
    %12 = arith.xori %8, %11 : vector<80x1xi1>
    %13 = arith.andi %12, %6 : vector<80x1xi1>
    %14 = vector.broadcast %2 : i32 to vector<80x1xi32>
    %15 = arith.addi %4, %14 : vector<80x1xi32>
    %16 = arith.select %13, %15, %4 : vector<80x1xi1>, vector<80x1xi32>
    %c8_i32 = arith.constant 8 : i32
    %17 = vector.broadcast %c8_i32 : i32 to vector<80x1xi32>
    %18 = arith.cmpi slt, %16, %17 : vector<80x1xi32>
    %cst = arith.constant 0.000000e+00 : f32
    %19 = vector.broadcast %cst : f32 to vector<108x8xf32>
    %c0 = arith.constant 0 : index
    %c0_3 = arith.constant 0 : index
    %20 = vector.load %arg7[%c0, %c0_3] : memref<108x8xf32, #tpu.memory_space<vmem>>, vector<108x8xf32>
    tpu.vector_store %arg7[%c0, %c0_3], %19 {strides = array<i32>} : memref<108x8xf32, #tpu.memory_space<vmem>>, vector<108x8xf32>,
    %c0_4 = arith.constant 0 : index
    %c0_5 = arith.constant 0 : index
    %c0_6 = arith.constant 0 : index
    %21 = vector.load %arg1[%c0_4, %c0_5, %c0_6] : memref<1x80x8xbf16, #tpu.memory_space<vmem>>, vector<1x80x8xbf16>
    %22 = vector.shape_cast %21 : vector<1x80x8xbf16> to vector<80x8xbf16>
    %23 = arith.extf %22 : vector<80x8xbf16> to vector<80x8xf32>
    %c11 = arith.constant 11 : index
    %c0_7 = arith.constant 0 : index
    %24 = vector.load %arg7[%c11, %c0_7] : memref<108x8xf32, #tpu.memory_space<vmem>>, vector<80x8xf32>
    tpu.vector_store %arg7[%c11, %c0_7], %23 {strides = array<i32>} : memref<108x8xf32, #tpu.memory_space<vmem>>, vector<80x8xf32>,
    %cst_8 = arith.constant 0.000000e+00 : f32
    %25 = vector.broadcast %cst_8 : f32 to vector<80x16xf32>
    %c0_9 = arith.constant 0 : index
    %c0_10 = arith.constant 0 : index
    %26 = vector.load %arg7[%c0_9, %c0_10] : memref<108x8xf32, #tpu.memory_space<vmem>>, vector<80x8xf32>
    %27 = arith.truncf %26 : vector<80x8xf32> to vector<80x8xbf16>
    %c0_11 = arith.constant 0 : index
    %c0_12 = arith.constant 0 : index
    %c0_13 = arith.constant 0 : index
    %c0_14 = arith.constant 0 : index
    %28 = vector.load %arg2[%c0_11, %c0_12, %c0_13, %c0_14] : memref<3x3x8x16xbf16, #tpu.memory_space<vmem>>, vector<1x1x8x16xbf16>
    %29 = vector.shape_cast %28 : vector<1x1x8x16xbf16> to vector<8x16xbf16>
    %cst_15 = arith.constant dense<0.000000e+00> : vector<80x16xf32>
    %30 = tpu.matmul %27, %29, %cst_15 {dimension_numbers = #tpu.dot_dimension_numbers<[1], [0], [0], [1], [0, 0, 1, 1], [], []>} : vector<80x8xbf16>, vector<8x16xbf16>, vector<80x16xf32> -> vector<80x16xf32>
    %31 = arith.addf %25, %30 : vector<80x16xf32>
    %c1 = arith.constant 1 : index
    %c0_16 = arith.constant 0 : index
    %32 = vector.load %arg7[%c1, %c0_16] : memref<108x8xf32, #tpu.memory_space<vmem>>, vector<80x8xf32>
    %33 = arith.truncf %32 : vector<80x8xf32> to vector<80x8xbf16>
    %c0_17 = arith.constant 0 : index
    %c1_18 = arith.constant 1 : index
    %c0_19 = arith.constant 0 : index
    %c0_20 = arith.constant 0 : index
    %34 = vector.load %arg2[%c0_17, %c1_18, %c0_19, %c0_20] : memref<3x3x8x16xbf16, #tpu.memory_space<vmem>>, vector<1x1x8x16xbf16>
    %35 = vector.shape_cast %34 : vector<1x1x8x16xbf16> to vector<8x16xbf16>
    %cst_21 = arith.constant dense<0.000000e+00> : vector<80x16xf32>
    %36 = tpu.matmul %33, %35, %cst_21 {dimension_numbers = #tpu.dot_dimension_numbers<[1], [0], [0], [1], [0, 0, 1, 1], [], []>} : vector<80x8xbf16>, vector<8x16xbf16>, vector<80x16xf32> -> vector<80x16xf32>
    %37 = arith.addf %31, %36 : vector<80x16xf32>
    %c2 = arith.constant 2 : index
    %c0_22 = arith.constant 0 : index
    %38 = vector.load %arg7[%c2, %c0_22] : memref<108x8xf32, #tpu.memory_space<vmem>>, vector<80x8xf32>
    %39 = arith.truncf %38 : vector<80x8xf32> to vector<80x8xbf16>
    %c0_23 = arith.constant 0 : index
    %c2_24 = arith.constant 2 : index
    %c0_25 = arith.constant 0 : index
    %c0_26 = arith.constant 0 : index
    %40 = vector.load %arg2[%c0_23, %c2_24, %c0_25, %c0_26] : memref<3x3x8x16xbf16, #tpu.memory_space<vmem>>, vector<1x1x8x16xbf16>
    %41 = vector.shape_cast %40 : vector<1x1x8x16xbf16> to vector<8x16xbf16>
    %cst_27 = arith.constant dense<0.000000e+00> : vector<80x16xf32>
    %42 = tpu.matmul %39, %41, %cst_27 {dimension_numbers = #tpu.dot_dimension_numbers<[1], [0], [0], [1], [0, 0, 1, 1], [], []>} : vector<80x8xbf16>, vector<8x16xbf16>, vector<80x16xf32> -> vector<80x16xf32>
    %43 = arith.addf %37, %42 : vector<80x16xf32>
    %c10 = arith.constant 10 : index
    %c0_28 = arith.constant 0 : index
    %44 = vector.load %arg7[%c10, %c0_28] : memref<108x8xf32, #tpu.memory_space<vmem>>, vector<80x8xf32>
    %45 = arith.truncf %44 : vector<80x8xf32> to vector<80x8xbf16>
    %c1_29 = arith.constant 1 : index
    %c0_30 = arith.constant 0 : index
    %c0_31 = arith.constant 0 : index
    %c0_32 = arith.constant 0 : index
    %46 = vector.load %arg2[%c1_29, %c0_30, %c0_31, %c0_32] : memref<3x3x8x16xbf16, #tpu.memory_space<vmem>>, vector<1x1x8x16xbf16>
    %47 = vector.shape_cast %46 : vector<1x1x8x16xbf16> to vector<8x16xbf16>
    %cst_33 = arith.constant dense<0.000000e+00> : vector<80x16xf32>
    %48 = tpu.matmul %45, %47, %cst_33 {dimension_numbers = #tpu.dot_dimension_numbers<[1], [0], [0], [1], [0, 0, 1, 1], [], []>} : vector<80x8xbf16>, vector<8x16xbf16>, vector<80x16xf32> -> vector<80x16xf32>
    %49 = arith.addf %43, %48 : vector<80x16xf32>
    %c11_34 = arith.constant 11 : index
    %c0_35 = arith.constant 0 : index
    %50 = vector.load %arg7[%c11_34, %c0_35] : memref<108x8xf32, #tpu.memory_space<vmem>>, vector<80x8xf32>
    %51 = arith.truncf %50 : vector<80x8xf32> to vector<80x8xbf16>
    %c1_36 = arith.constant 1 : index
    %c1_37 = arith.constant 1 : index
    %c0_38 = arith.constant 0 : index
    %c0_39 = arith.constant 0 : index
    %52 = vector.load %arg2[%c1_36, %c1_37, %c0_38, %c0_39] : memref<3x3x8x16xbf16, #tpu.memory_space<vmem>>, vector<1x1x8x16xbf16>
    %53 = vector.shape_cast %52 : vector<1x1x8x16xbf16> to vector<8x16xbf16>
    %cst_40 = arith.constant dense<0.000000e+00> : vector<80x16xf32>
    %54 = tpu.matmul %51, %53, %cst_40 {dimension_numbers = #tpu.dot_dimension_numbers<[1], [0], [0], [1], [0, 0, 1, 1], [], []>} : vector<80x8xbf16>, vector<8x16xbf16>, vector<80x16xf32> -> vector<80x16xf32>
    %55 = arith.addf %49, %54 : vector<80x16xf32>
    %c12 = arith.constant 12 : index
    %c0_41 = arith.constant 0 : index
    %56 = vector.load %arg7[%c12, %c0_41] : memref<108x8xf32, #tpu.memory_space<vmem>>, vector<80x8xf32>
    %57 = arith.truncf %56 : vector<80x8xf32> to vector<80x8xbf16>
    %c1_42 = arith.constant 1 : index
    %c2_43 = arith.constant 2 : index
    %c0_44 = arith.constant 0 : index
    %c0_45 = arith.constant 0 : index
    %58 = vector.load %arg2[%c1_42, %c2_43, %c0_44, %c0_45] : memref<3x3x8x16xbf16, #tpu.memory_space<vmem>>, vector<1x1x8x16xbf16>
    %59 = vector.shape_cast %58 : vector<1x1x8x16xbf16> to vector<8x16xbf16>
    %cst_46 = arith.constant dense<0.000000e+00> : vector<80x16xf32>
    %60 = tpu.matmul %57, %59, %cst_46 {dimension_numbers = #tpu.dot_dimension_numbers<[1], [0], [0], [1], [0, 0, 1, 1], [], []>} : vector<80x8xbf16>, vector<8x16xbf16>, vector<80x16xf32> -> vector<80x16xf32>
    %61 = arith.addf %55, %60 : vector<80x16xf32>
    %c20 = arith.constant 20 : index
    %c0_47 = arith.constant 0 : index
    %62 = vector.load %arg7[%c20, %c0_47] : memref<108x8xf32, #tpu.memory_space<vmem>>, vector<80x8xf32>
    %63 = arith.truncf %62 : vector<80x8xf32> to vector<80x8xbf16>
    %c2_48 = arith.constant 2 : index
    %c0_49 = arith.constant 0 : index
    %c0_50 = arith.constant 0 : index
    %c0_51 = arith.constant 0 : index
    %64 = vector.load %arg2[%c2_48, %c0_49, %c0_50, %c0_51] : memref<3x3x8x16xbf16, #tpu.memory_space<vmem>>, vector<1x1x8x16xbf16>
    %65 = vector.shape_cast %64 : vector<1x1x8x16xbf16> to vector<8x16xbf16>
    %cst_52 = arith.constant dense<0.000000e+00> : vector<80x16xf32>
    %66 = tpu.matmul %63, %65, %cst_52 {dimension_numbers = #tpu.dot_dimension_numbers<[1], [0], [0], [1], [0, 0, 1, 1], [], []>} : vector<80x8xbf16>, vector<8x16xbf16>, vector<80x16xf32> -> vector<80x16xf32>
    %67 = arith.addf %61, %66 : vector<80x16xf32>
    %c21 = arith.constant 21 : index
    %c0_53 = arith.constant 0 : index
    %68 = vector.load %arg7[%c21, %c0_53] : memref<108x8xf32, #tpu.memory_space<vmem>>, vector<80x8xf32>
    %69 = arith.truncf %68 : vector<80x8xf32> to vector<80x8xbf16>
    %c2_54 = arith.constant 2 : index
    %c1_55 = arith.constant 1 : index
    %c0_56 = arith.constant 0 : index
    %c0_57 = arith.constant 0 : index
    %70 = vector.load %arg2[%c2_54, %c1_55, %c0_56, %c0_57] : memref<3x3x8x16xbf16, #tpu.memory_space<vmem>>, vector<1x1x8x16xbf16>
    %71 = vector.shape_cast %70 : vector<1x1x8x16xbf16> to vector<8x16xbf16>
    %cst_58 = arith.constant dense<0.000000e+00> : vector<80x16xf32>
    %72 = tpu.matmul %69, %71, %cst_58 {dimension_numbers = #tpu.dot_dimension_numbers<[1], [0], [0], [1], [0, 0, 1, 1], [], []>} : vector<80x8xbf16>, vector<8x16xbf16>, vector<80x16xf32> -> vector<80x16xf32>
    %73 = arith.addf %67, %72 : vector<80x16xf32>
    %c22 = arith.constant 22 : index
    %c0_59 = arith.constant 0 : index
    %74 = vector.load %arg7[%c22, %c0_59] : memref<108x8xf32, #tpu.memory_space<vmem>>, vector<80x8xf32>
    %75 = arith.truncf %74 : vector<80x8xf32> to vector<80x8xbf16>
    %c2_60 = arith.constant 2 : index
    %c2_61 = arith.constant 2 : index
    %c0_62 = arith.constant 0 : index
    %c0_63 = arith.constant 0 : index
    %76 = vector.load %arg2[%c2_60, %c2_61, %c0_62, %c0_63] : memref<3x3x8x16xbf16, #tpu.memory_space<vmem>>, vector<1x1x8x16xbf16>
    %77 = vector.shape_cast %76 : vector<1x1x8x16xbf16> to vector<8x16xbf16>
    %cst_64 = arith.constant dense<0.000000e+00> : vector<80x16xf32>
    %78 = tpu.matmul %75, %77, %cst_64 {dimension_numbers = #tpu.dot_dimension_numbers<[1], [0], [0], [1], [0, 0, 1, 1], [], []>} : vector<80x8xbf16>, vector<8x16xbf16>, vector<80x16xf32> -> vector<80x16xf32>
    %79 = arith.addf %73, %78 : vector<80x16xf32>
    %c0_65 = arith.constant 0 : index
    %c0_66 = arith.constant 0 : index
    %80 = vector.load %arg3[%c0_65, %c0_66] : memref<1x16xf32, #tpu.memory_space<vmem>>, vector<1x16xf32>
    %81 = vector.broadcast %80 : vector<1x16xf32> to vector<80x16xf32>
    %82 = arith.addf %79, %81 : vector<80x16xf32>
    %cst_67 = arith.constant 0.000000e+00 : f32
    %83 = vector.shape_cast %18 : vector<80x1xi1> to vector<80x1xi1>
    %84 = vector.broadcast %83 : vector<80x1xi1> to vector<80x16xi1>
    %85 = vector.broadcast %cst_67 : f32 to vector<80x16xf32>
    %86 = arith.select %84, %82, %85 : vector<80x16xi1>, vector<80x16xf32>
    %cst_68 = arith.constant dense<0.000000e+00> : vector<16xf32>
    %87 = vector.multi_reduction <add>, %86, %cst_68 [0] : vector<80x16xf32> to vector<16xf32>
    %88 = vector.shape_cast %87 : vector<16xf32> to vector<1x16xf32>
    %89 = vector.shape_cast %88 : vector<1x16xf32> to vector<1x1x16xf32>
    %c0_69 = arith.constant 0 : index
    %c0_70 = arith.constant 0 : index
    %c0_71 = arith.constant 0 : index
    %90 = vector.load %arg5[%c0_69, %c0_70, %c0_71] : memref<1x1x16xf32, #tpu.memory_space<vmem>>, vector<1x1x16xf32>
    tpu.vector_store %arg5[%c0_69, %c0_70, %c0_71], %89 {strides = array<i32>} : memref<1x1x16xf32, #tpu.memory_space<vmem>>, vector<1x1x16xf32>,
    %91 = arith.mulf %86, %86 : vector<80x16xf32>
    %cst_72 = arith.constant dense<0.000000e+00> : vector<16xf32>
    %92 = vector.multi_reduction <add>, %91, %cst_72 [0] : vector<80x16xf32> to vector<16xf32>
    %93 = vector.shape_cast %92 : vector<16xf32> to vector<1x16xf32>
    %94 = vector.shape_cast %93 : vector<1x16xf32> to vector<1x1x16xf32>
    %c0_73 = arith.constant 0 : index
    %c0_74 = arith.constant 0 : index
    %c0_75 = arith.constant 0 : index
    %95 = vector.load %arg6[%c0_73, %c0_74, %c0_75] : memref<1x1x16xf32, #tpu.memory_space<vmem>>, vector<1x1x16xf32>
    tpu.vector_store %arg6[%c0_73, %c0_74, %c0_75], %94 {strides = array<i32>} : memref<1x1x16xf32, #tpu.memory_space<vmem>>, vector<1x1x16xf32>,
    %96 = vector.shape_cast %86 : vector<80x16xf32> to vector<1x80x16xf32>
    %97 = arith.truncf %96 : vector<1x80x16xf32> to vector<1x80x16xbf16>
    %c0_76 = arith.constant 0 : index
    %c0_77 = arith.constant 0 : index
    %c0_78 = arith.constant 0 : index
    %98 = vector.load %arg4[%c0_76, %c0_77, %c0_78] : memref<1x80x16xbf16, #tpu.memory_space<vmem>>, vector<1x80x16xbf16>
    tpu.vector_store %arg4[%c0_76, %c0_77, %c0_78], %97 {strides = array<i32>} : memref<1x80x16xbf16, #tpu.memory_space<vmem>>, vector<1x80x16xbf16>,
    return
  }
  func.func @transform_0(%arg0: i32) -> (i32, i32, i32) {
    %c0_i32 = arith.constant 0 : i32
    %c0_i32_0 = arith.constant 0 : i32
    %c0_i32_1 = arith.constant 0 : i32
    return %arg0, %c0_i32, %c0_i32_0 : i32, i32, i32
  }
  func.func @transform_1(%arg0: i32) -> (i32, i32, i32, i32) {
    %c0_i32 = arith.constant 0 : i32
    %c0_i32_0 = arith.constant 0 : i32
    %c0_i32_1 = arith.constant 0 : i32
    %c0_i32_2 = arith.constant 0 : i32
    %c0_i32_3 = arith.constant 0 : i32
    return %c0_i32, %c0_i32_0, %c0_i32_1, %c0_i32_2 : i32, i32, i32, i32
  }
  func.func @transform_2(%arg0: i32) -> (i32, i32) {
    %c0_i32 = arith.constant 0 : i32
    %c0_i32_0 = arith.constant 0 : i32
    %c0_i32_1 = arith.constant 0 : i32
    return %c0_i32, %c0_i32_0 : i32, i32
  }
  func.func @transform_3(%arg0: i32) -> (i32, i32, i32) {
    %c0_i32 = arith.constant 0 : i32
    %c0_i32_0 = arith.constant 0 : i32
    %c0_i32_1 = arith.constant 0 : i32
    return %arg0, %c0_i32, %c0_i32_0 : i32, i32, i32
  }
  func.func @transform_4(%arg0: i32) -> (i32, i32, i32) {
    %c0_i32 = arith.constant 0 : i32
    %c0_i32_0 = arith.constant 0 : i32
    %c0_i32_1 = arith.constant 0 : i32
    return %arg0, %c0_i32, %c0_i32_0 : i32, i32, i32
  }
  func.func @transform_5(%arg0: i32) -> (i32, i32, i32) {
    %c0_i32 = arith.constant 0 : i32
    %c0_i32_0 = arith.constant 0 : i32
    %c0_i32_1 = arith.constant 0 : i32
    return %arg0, %c0_i32, %c0_i32_0 : i32, i32, i32
  }
}

module attributes {stable_mosaic.version = 11 : i64} {
  func.func @_conv3x3_kernel(%arg0: i32, %arg1: memref<1x80x16xbf16, #tpu.memory_space<vmem>>, %arg2: memref<3x3x16x16xbf16, #tpu.memory_space<vmem>>, %arg3: memref<1x16xf32, #tpu.memory_space<vmem>>, %arg4: memref<1x16xf32, #tpu.memory_space<vmem>>, %arg5: memref<1x16xf32, #tpu.memory_space<vmem>>, %arg6: memref<1x80x16xbf16, #tpu.memory_space<vmem>>, %arg7: memref<1x1x16xf32, #tpu.memory_space<vmem>>, %arg8: memref<1x1x16xf32, #tpu.memory_space<vmem>>, %arg9: memref<108x16xf32, #tpu.memory_space<vmem>>) attributes {dimension_semantics = [#tpu.dimension_semantics<parallel>], iteration_bounds = array<i64: 2>, scalar_prefetch = 0 : i64, scratch_operands = 1 : i64, tpu.core_type = #tpu.core_type<tc>, window_params = [{transform_indices = @transform_0, window_bounds = array<i64: 1, 80, 16>}, {pipeline_mode = #tpu.pipeline_mode<synchronous>, transform_indices = @transform_1, window_bounds = array<i64: 3, 3, 16, 16>}, {pipeline_mode = #tpu.pipeline_mode<synchronous>, transform_indices = @transform_2, window_bounds = array<i64: 1, 16>}, {pipeline_mode = #tpu.pipeline_mode<synchronous>, transform_indices = @transform_3, window_bounds = array<i64: 1, 16>}, {pipeline_mode = #tpu.pipeline_mode<synchronous>, transform_indices = @transform_4, window_bounds = array<i64: 1, 16>}, {transform_indices = @transform_5, window_bounds = array<i64: 1, 80, 16>}, {transform_indices = @transform_6, window_bounds = array<i64: 1, 1, 16>}, {transform_indices = @transform_7, window_bounds = array<i64: 1, 1, 16>}]} {
    %0 = tpu.iota {dimensions = array<i32: 0>} : vector<80x1xi32>
    %c10_i32 = arith.constant 10 : i32
    %c0_i32 = arith.constant 0 : i32
    %1 = arith.cmpi eq, %c10_i32, %c0_i32 : i32
    %c1_i32 = arith.constant 1 : i32
    %2 = arith.select %1, %c1_i32, %c10_i32 : i32
    %3 = vector.broadcast %2 : i32 to vector<80x1xi32>
    %4 = arith.remsi %0, %3 : vector<80x1xi32>
    %c0_i32_0 = arith.constant 0 : i32
    %5 = vector.broadcast %c0_i32_0 : i32 to vector<80x1xi32>
    %6 = arith.cmpi ne, %4, %5 : vector<80x1xi32>
    %c0_i32_1 = arith.constant 0 : i32
    %7 = vector.broadcast %c0_i32_1 : i32 to vector<80x1xi32>
    %8 = arith.cmpi slt, %4, %7 : vector<80x1xi32>
    %c0_i32_2 = arith.constant 0 : i32
    %9 = arith.cmpi slt, %2, %c0_i32_2 : i32
    %10 = vector.broadcast %9 : i1 to vector<80x1xi1>
    %11 = vector.broadcast %10 : vector<80x1xi1> to vector<80x1xi1>
    %12 = arith.xori %8, %11 : vector<80x1xi1>
    %13 = arith.andi %12, %6 : vector<80x1xi1>
    %14 = vector.broadcast %2 : i32 to vector<80x1xi32>
    %15 = arith.addi %4, %14 : vector<80x1xi32>
    %16 = arith.select %13, %15, %4 : vector<80x1xi1>, vector<80x1xi32>
    %c8_i32 = arith.constant 8 : i32
    %17 = vector.broadcast %c8_i32 : i32 to vector<80x1xi32>
    %18 = arith.cmpi slt, %16, %17 : vector<80x1xi32>
    %cst = arith.constant 0.000000e+00 : f32
    %19 = vector.broadcast %cst : f32 to vector<108x16xf32>
    %c0 = arith.constant 0 : index
    %c0_3 = arith.constant 0 : index
    %20 = vector.load %arg9[%c0, %c0_3] : memref<108x16xf32, #tpu.memory_space<vmem>>, vector<108x16xf32>
    tpu.vector_store %arg9[%c0, %c0_3], %19 {strides = array<i32>} : memref<108x16xf32, #tpu.memory_space<vmem>>, vector<108x16xf32>,
    %c0_4 = arith.constant 0 : index
    %c0_5 = arith.constant 0 : index
    %c0_6 = arith.constant 0 : index
    %21 = vector.load %arg1[%c0_4, %c0_5, %c0_6] : memref<1x80x16xbf16, #tpu.memory_space<vmem>>, vector<1x80x16xbf16>
    %22 = vector.shape_cast %21 : vector<1x80x16xbf16> to vector<80x16xbf16>
    %23 = arith.extf %22 : vector<80x16xbf16> to vector<80x16xf32>
    %c0_7 = arith.constant 0 : index
    %c0_8 = arith.constant 0 : index
    %24 = vector.load %arg4[%c0_7, %c0_8] : memref<1x16xf32, #tpu.memory_space<vmem>>, vector<1x16xf32>
    %25 = vector.broadcast %24 : vector<1x16xf32> to vector<80x16xf32>
    %26 = arith.mulf %23, %25 : vector<80x16xf32>
    %c0_9 = arith.constant 0 : index
    %c0_10 = arith.constant 0 : index
    %27 = vector.load %arg5[%c0_9, %c0_10] : memref<1x16xf32, #tpu.memory_space<vmem>>, vector<1x16xf32>
    %28 = vector.broadcast %27 : vector<1x16xf32> to vector<80x16xf32>
    %29 = arith.addf %26, %28 : vector<80x16xf32>
    %cst_11 = arith.constant 0.000000e+00 : f32
    %30 = vector.broadcast %cst_11 : f32 to vector<80x16xf32>
    %31 = arith.maximumf %29, %30 : vector<80x16xf32>
    %cst_12 = arith.constant 0.000000e+00 : f32
    %32 = vector.shape_cast %18 : vector<80x1xi1> to vector<80x1xi1>
    %33 = vector.broadcast %32 : vector<80x1xi1> to vector<80x16xi1>
    %34 = vector.broadcast %cst_12 : f32 to vector<80x16xf32>
    %35 = arith.select %33, %31, %34 : vector<80x16xi1>, vector<80x16xf32>
    %c11 = arith.constant 11 : index
    %c0_13 = arith.constant 0 : index
    %36 = vector.load %arg9[%c11, %c0_13] : memref<108x16xf32, #tpu.memory_space<vmem>>, vector<80x16xf32>
    tpu.vector_store %arg9[%c11, %c0_13], %35 {strides = array<i32>} : memref<108x16xf32, #tpu.memory_space<vmem>>, vector<80x16xf32>,
    %cst_14 = arith.constant 0.000000e+00 : f32
    %37 = vector.broadcast %cst_14 : f32 to vector<80x16xf32>
    %c0_15 = arith.constant 0 : index
    %c0_16 = arith.constant 0 : index
    %38 = vector.load %arg9[%c0_15, %c0_16] : memref<108x16xf32, #tpu.memory_space<vmem>>, vector<80x16xf32>
    %39 = arith.truncf %38 : vector<80x16xf32> to vector<80x16xbf16>
    %c0_17 = arith.constant 0 : index
    %c0_18 = arith.constant 0 : index
    %c0_19 = arith.constant 0 : index
    %c0_20 = arith.constant 0 : index
    %40 = vector.load %arg2[%c0_17, %c0_18, %c0_19, %c0_20] : memref<3x3x16x16xbf16, #tpu.memory_space<vmem>>, vector<1x1x16x16xbf16>
    %41 = vector.shape_cast %40 : vector<1x1x16x16xbf16> to vector<16x16xbf16>
    %cst_21 = arith.constant dense<0.000000e+00> : vector<80x16xf32>
    %42 = tpu.matmul %39, %41, %cst_21 {dimension_numbers = #tpu.dot_dimension_numbers<[1], [0], [0], [1], [0, 0, 1, 1], [], []>} : vector<80x16xbf16>, vector<16x16xbf16>, vector<80x16xf32> -> vector<80x16xf32>
    %43 = arith.addf %37, %42 : vector<80x16xf32>
    %c1 = arith.constant 1 : index
    %c0_22 = arith.constant 0 : index
    %44 = vector.load %arg9[%c1, %c0_22] : memref<108x16xf32, #tpu.memory_space<vmem>>, vector<80x16xf32>
    %45 = arith.truncf %44 : vector<80x16xf32> to vector<80x16xbf16>
    %c0_23 = arith.constant 0 : index
    %c1_24 = arith.constant 1 : index
    %c0_25 = arith.constant 0 : index
    %c0_26 = arith.constant 0 : index
    %46 = vector.load %arg2[%c0_23, %c1_24, %c0_25, %c0_26] : memref<3x3x16x16xbf16, #tpu.memory_space<vmem>>, vector<1x1x16x16xbf16>
    %47 = vector.shape_cast %46 : vector<1x1x16x16xbf16> to vector<16x16xbf16>
    %cst_27 = arith.constant dense<0.000000e+00> : vector<80x16xf32>
    %48 = tpu.matmul %45, %47, %cst_27 {dimension_numbers = #tpu.dot_dimension_numbers<[1], [0], [0], [1], [0, 0, 1, 1], [], []>} : vector<80x16xbf16>, vector<16x16xbf16>, vector<80x16xf32> -> vector<80x16xf32>
    %49 = arith.addf %43, %48 : vector<80x16xf32>
    %c2 = arith.constant 2 : index
    %c0_28 = arith.constant 0 : index
    %50 = vector.load %arg9[%c2, %c0_28] : memref<108x16xf32, #tpu.memory_space<vmem>>, vector<80x16xf32>
    %51 = arith.truncf %50 : vector<80x16xf32> to vector<80x16xbf16>
    %c0_29 = arith.constant 0 : index
    %c2_30 = arith.constant 2 : index
    %c0_31 = arith.constant 0 : index
    %c0_32 = arith.constant 0 : index
    %52 = vector.load %arg2[%c0_29, %c2_30, %c0_31, %c0_32] : memref<3x3x16x16xbf16, #tpu.memory_space<vmem>>, vector<1x1x16x16xbf16>
    %53 = vector.shape_cast %52 : vector<1x1x16x16xbf16> to vector<16x16xbf16>
    %cst_33 = arith.constant dense<0.000000e+00> : vector<80x16xf32>
    %54 = tpu.matmul %51, %53, %cst_33 {dimension_numbers = #tpu.dot_dimension_numbers<[1], [0], [0], [1], [0, 0, 1, 1], [], []>} : vector<80x16xbf16>, vector<16x16xbf16>, vector<80x16xf32> -> vector<80x16xf32>
    %55 = arith.addf %49, %54 : vector<80x16xf32>
    %c10 = arith.constant 10 : index
    %c0_34 = arith.constant 0 : index
    %56 = vector.load %arg9[%c10, %c0_34] : memref<108x16xf32, #tpu.memory_space<vmem>>, vector<80x16xf32>
    %57 = arith.truncf %56 : vector<80x16xf32> to vector<80x16xbf16>
    %c1_35 = arith.constant 1 : index
    %c0_36 = arith.constant 0 : index
    %c0_37 = arith.constant 0 : index
    %c0_38 = arith.constant 0 : index
    %58 = vector.load %arg2[%c1_35, %c0_36, %c0_37, %c0_38] : memref<3x3x16x16xbf16, #tpu.memory_space<vmem>>, vector<1x1x16x16xbf16>
    %59 = vector.shape_cast %58 : vector<1x1x16x16xbf16> to vector<16x16xbf16>
    %cst_39 = arith.constant dense<0.000000e+00> : vector<80x16xf32>
    %60 = tpu.matmul %57, %59, %cst_39 {dimension_numbers = #tpu.dot_dimension_numbers<[1], [0], [0], [1], [0, 0, 1, 1], [], []>} : vector<80x16xbf16>, vector<16x16xbf16>, vector<80x16xf32> -> vector<80x16xf32>
    %61 = arith.addf %55, %60 : vector<80x16xf32>
    %c11_40 = arith.constant 11 : index
    %c0_41 = arith.constant 0 : index
    %62 = vector.load %arg9[%c11_40, %c0_41] : memref<108x16xf32, #tpu.memory_space<vmem>>, vector<80x16xf32>
    %63 = arith.truncf %62 : vector<80x16xf32> to vector<80x16xbf16>
    %c1_42 = arith.constant 1 : index
    %c1_43 = arith.constant 1 : index
    %c0_44 = arith.constant 0 : index
    %c0_45 = arith.constant 0 : index
    %64 = vector.load %arg2[%c1_42, %c1_43, %c0_44, %c0_45] : memref<3x3x16x16xbf16, #tpu.memory_space<vmem>>, vector<1x1x16x16xbf16>
    %65 = vector.shape_cast %64 : vector<1x1x16x16xbf16> to vector<16x16xbf16>
    %cst_46 = arith.constant dense<0.000000e+00> : vector<80x16xf32>
    %66 = tpu.matmul %63, %65, %cst_46 {dimension_numbers = #tpu.dot_dimension_numbers<[1], [0], [0], [1], [0, 0, 1, 1], [], []>} : vector<80x16xbf16>, vector<16x16xbf16>, vector<80x16xf32> -> vector<80x16xf32>
    %67 = arith.addf %61, %66 : vector<80x16xf32>
    %c12 = arith.constant 12 : index
    %c0_47 = arith.constant 0 : index
    %68 = vector.load %arg9[%c12, %c0_47] : memref<108x16xf32, #tpu.memory_space<vmem>>, vector<80x16xf32>
    %69 = arith.truncf %68 : vector<80x16xf32> to vector<80x16xbf16>
    %c1_48 = arith.constant 1 : index
    %c2_49 = arith.constant 2 : index
    %c0_50 = arith.constant 0 : index
    %c0_51 = arith.constant 0 : index
    %70 = vector.load %arg2[%c1_48, %c2_49, %c0_50, %c0_51] : memref<3x3x16x16xbf16, #tpu.memory_space<vmem>>, vector<1x1x16x16xbf16>
    %71 = vector.shape_cast %70 : vector<1x1x16x16xbf16> to vector<16x16xbf16>
    %cst_52 = arith.constant dense<0.000000e+00> : vector<80x16xf32>
    %72 = tpu.matmul %69, %71, %cst_52 {dimension_numbers = #tpu.dot_dimension_numbers<[1], [0], [0], [1], [0, 0, 1, 1], [], []>} : vector<80x16xbf16>, vector<16x16xbf16>, vector<80x16xf32> -> vector<80x16xf32>
    %73 = arith.addf %67, %72 : vector<80x16xf32>
    %c20 = arith.constant 20 : index
    %c0_53 = arith.constant 0 : index
    %74 = vector.load %arg9[%c20, %c0_53] : memref<108x16xf32, #tpu.memory_space<vmem>>, vector<80x16xf32>
    %75 = arith.truncf %74 : vector<80x16xf32> to vector<80x16xbf16>
    %c2_54 = arith.constant 2 : index
    %c0_55 = arith.constant 0 : index
    %c0_56 = arith.constant 0 : index
    %c0_57 = arith.constant 0 : index
    %76 = vector.load %arg2[%c2_54, %c0_55, %c0_56, %c0_57] : memref<3x3x16x16xbf16, #tpu.memory_space<vmem>>, vector<1x1x16x16xbf16>
    %77 = vector.shape_cast %76 : vector<1x1x16x16xbf16> to vector<16x16xbf16>
    %cst_58 = arith.constant dense<0.000000e+00> : vector<80x16xf32>
    %78 = tpu.matmul %75, %77, %cst_58 {dimension_numbers = #tpu.dot_dimension_numbers<[1], [0], [0], [1], [0, 0, 1, 1], [], []>} : vector<80x16xbf16>, vector<16x16xbf16>, vector<80x16xf32> -> vector<80x16xf32>
    %79 = arith.addf %73, %78 : vector<80x16xf32>
    %c21 = arith.constant 21 : index
    %c0_59 = arith.constant 0 : index
    %80 = vector.load %arg9[%c21, %c0_59] : memref<108x16xf32, #tpu.memory_space<vmem>>, vector<80x16xf32>
    %81 = arith.truncf %80 : vector<80x16xf32> to vector<80x16xbf16>
    %c2_60 = arith.constant 2 : index
    %c1_61 = arith.constant 1 : index
    %c0_62 = arith.constant 0 : index
    %c0_63 = arith.constant 0 : index
    %82 = vector.load %arg2[%c2_60, %c1_61, %c0_62, %c0_63] : memref<3x3x16x16xbf16, #tpu.memory_space<vmem>>, vector<1x1x16x16xbf16>
    %83 = vector.shape_cast %82 : vector<1x1x16x16xbf16> to vector<16x16xbf16>
    %cst_64 = arith.constant dense<0.000000e+00> : vector<80x16xf32>
    %84 = tpu.matmul %81, %83, %cst_64 {dimension_numbers = #tpu.dot_dimension_numbers<[1], [0], [0], [1], [0, 0, 1, 1], [], []>} : vector<80x16xbf16>, vector<16x16xbf16>, vector<80x16xf32> -> vector<80x16xf32>
    %85 = arith.addf %79, %84 : vector<80x16xf32>
    %c22 = arith.constant 22 : index
    %c0_65 = arith.constant 0 : index
    %86 = vector.load %arg9[%c22, %c0_65] : memref<108x16xf32, #tpu.memory_space<vmem>>, vector<80x16xf32>
    %87 = arith.truncf %86 : vector<80x16xf32> to vector<80x16xbf16>
    %c2_66 = arith.constant 2 : index
    %c2_67 = arith.constant 2 : index
    %c0_68 = arith.constant 0 : index
    %c0_69 = arith.constant 0 : index
    %88 = vector.load %arg2[%c2_66, %c2_67, %c0_68, %c0_69] : memref<3x3x16x16xbf16, #tpu.memory_space<vmem>>, vector<1x1x16x16xbf16>
    %89 = vector.shape_cast %88 : vector<1x1x16x16xbf16> to vector<16x16xbf16>
    %cst_70 = arith.constant dense<0.000000e+00> : vector<80x16xf32>
    %90 = tpu.matmul %87, %89, %cst_70 {dimension_numbers = #tpu.dot_dimension_numbers<[1], [0], [0], [1], [0, 0, 1, 1], [], []>} : vector<80x16xbf16>, vector<16x16xbf16>, vector<80x16xf32> -> vector<80x16xf32>
    %91 = arith.addf %85, %90 : vector<80x16xf32>
    %c0_71 = arith.constant 0 : index
    %c0_72 = arith.constant 0 : index
    %92 = vector.load %arg3[%c0_71, %c0_72] : memref<1x16xf32, #tpu.memory_space<vmem>>, vector<1x16xf32>
    %93 = vector.broadcast %92 : vector<1x16xf32> to vector<80x16xf32>
    %94 = arith.addf %91, %93 : vector<80x16xf32>
    %cst_73 = arith.constant 0.000000e+00 : f32
    %95 = vector.shape_cast %18 : vector<80x1xi1> to vector<80x1xi1>
    %96 = vector.broadcast %95 : vector<80x1xi1> to vector<80x16xi1>
    %97 = vector.broadcast %cst_73 : f32 to vector<80x16xf32>
    %98 = arith.select %96, %94, %97 : vector<80x16xi1>, vector<80x16xf32>
    %cst_74 = arith.constant dense<0.000000e+00> : vector<16xf32>
    %99 = vector.multi_reduction <add>, %98, %cst_74 [0] : vector<80x16xf32> to vector<16xf32>
    %100 = vector.shape_cast %99 : vector<16xf32> to vector<1x16xf32>
    %101 = vector.shape_cast %100 : vector<1x16xf32> to vector<1x1x16xf32>
    %c0_75 = arith.constant 0 : index
    %c0_76 = arith.constant 0 : index
    %c0_77 = arith.constant 0 : index
    %102 = vector.load %arg7[%c0_75, %c0_76, %c0_77] : memref<1x1x16xf32, #tpu.memory_space<vmem>>, vector<1x1x16xf32>
    tpu.vector_store %arg7[%c0_75, %c0_76, %c0_77], %101 {strides = array<i32>} : memref<1x1x16xf32, #tpu.memory_space<vmem>>, vector<1x1x16xf32>,
    %103 = arith.mulf %98, %98 : vector<80x16xf32>
    %cst_78 = arith.constant dense<0.000000e+00> : vector<16xf32>
    %104 = vector.multi_reduction <add>, %103, %cst_78 [0] : vector<80x16xf32> to vector<16xf32>
    %105 = vector.shape_cast %104 : vector<16xf32> to vector<1x16xf32>
    %106 = vector.shape_cast %105 : vector<1x16xf32> to vector<1x1x16xf32>
    %c0_79 = arith.constant 0 : index
    %c0_80 = arith.constant 0 : index
    %c0_81 = arith.constant 0 : index
    %107 = vector.load %arg8[%c0_79, %c0_80, %c0_81] : memref<1x1x16xf32, #tpu.memory_space<vmem>>, vector<1x1x16xf32>
    tpu.vector_store %arg8[%c0_79, %c0_80, %c0_81], %106 {strides = array<i32>} : memref<1x1x16xf32, #tpu.memory_space<vmem>>, vector<1x1x16xf32>,
    %108 = vector.shape_cast %98 : vector<80x16xf32> to vector<1x80x16xf32>
    %109 = arith.truncf %108 : vector<1x80x16xf32> to vector<1x80x16xbf16>
    %c0_82 = arith.constant 0 : index
    %c0_83 = arith.constant 0 : index
    %c0_84 = arith.constant 0 : index
    %110 = vector.load %arg6[%c0_82, %c0_83, %c0_84] : memref<1x80x16xbf16, #tpu.memory_space<vmem>>, vector<1x80x16xbf16>
    tpu.vector_store %arg6[%c0_82, %c0_83, %c0_84], %109 {strides = array<i32>} : memref<1x80x16xbf16, #tpu.memory_space<vmem>>, vector<1x80x16xbf16>,
    return
  }
  func.func @transform_0(%arg0: i32) -> (i32, i32, i32) {
    %c0_i32 = arith.constant 0 : i32
    %c0_i32_0 = arith.constant 0 : i32
    %c0_i32_1 = arith.constant 0 : i32
    return %arg0, %c0_i32, %c0_i32_0 : i32, i32, i32
  }
  func.func @transform_1(%arg0: i32) -> (i32, i32, i32, i32) {
    %c0_i32 = arith.constant 0 : i32
    %c0_i32_0 = arith.constant 0 : i32
    %c0_i32_1 = arith.constant 0 : i32
    %c0_i32_2 = arith.constant 0 : i32
    %c0_i32_3 = arith.constant 0 : i32
    return %c0_i32, %c0_i32_0, %c0_i32_1, %c0_i32_2 : i32, i32, i32, i32
  }
  func.func @transform_2(%arg0: i32) -> (i32, i32) {
    %c0_i32 = arith.constant 0 : i32
    %c0_i32_0 = arith.constant 0 : i32
    %c0_i32_1 = arith.constant 0 : i32
    return %c0_i32, %c0_i32_0 : i32, i32
  }
  func.func @transform_3(%arg0: i32) -> (i32, i32) {
    %c0_i32 = arith.constant 0 : i32
    %c0_i32_0 = arith.constant 0 : i32
    %c0_i32_1 = arith.constant 0 : i32
    return %c0_i32, %c0_i32_0 : i32, i32
  }
  func.func @transform_4(%arg0: i32) -> (i32, i32) {
    %c0_i32 = arith.constant 0 : i32
    %c0_i32_0 = arith.constant 0 : i32
    %c0_i32_1 = arith.constant 0 : i32
    return %c0_i32, %c0_i32_0 : i32, i32
  }
  func.func @transform_5(%arg0: i32) -> (i32, i32, i32) {
    %c0_i32 = arith.constant 0 : i32
    %c0_i32_0 = arith.constant 0 : i32
    %c0_i32_1 = arith.constant 0 : i32
    return %arg0, %c0_i32, %c0_i32_0 : i32, i32, i32
  }
  func.func @transform_6(%arg0: i32) -> (i32, i32, i32) {
    %c0_i32 = arith.constant 0 : i32
    %c0_i32_0 = arith.constant 0 : i32
    %c0_i32_1 = arith.constant 0 : i32
    return %arg0, %c0_i32, %c0_i32_0 : i32, i32, i32
  }
  func.func @transform_7(%arg0: i32) -> (i32, i32, i32) {
    %c0_i32 = arith.constant 0 : i32
    %c0_i32_0 = arith.constant 0 : i32
    %c0_i32_1 = arith.constant 0 : i32
    return %arg0, %c0_i32, %c0_i32_0 : i32, i32, i32
  }
}

module attributes {stable_mosaic.version = 11 : i64} {
  func.func @_conv3x3_kernel(%arg0: i32, %arg1: memref<1x24x16xbf16, #tpu.memory_space<vmem>>, %arg2: memref<3x3x16x32xbf16, #tpu.memory_space<vmem>>, %arg3: memref<1x32xf32, #tpu.memory_space<vmem>>, %arg4: memref<1x24x32xbf16, #tpu.memory_space<vmem>>, %arg5: memref<1x1x32xf32, #tpu.memory_space<vmem>>, %arg6: memref<1x1x32xf32, #tpu.memory_space<vmem>>, %arg7: memref<44x16xf32, #tpu.memory_space<vmem>>) attributes {dimension_semantics = [#tpu.dimension_semantics<parallel>], iteration_bounds = array<i64: 2>, scalar_prefetch = 0 : i64, scratch_operands = 1 : i64, tpu.core_type = #tpu.core_type<tc>, window_params = [{transform_indices = @transform_0, window_bounds = array<i64: 1, 24, 16>}, {pipeline_mode = #tpu.pipeline_mode<synchronous>, transform_indices = @transform_1, window_bounds = array<i64: 3, 3, 16, 32>}, {pipeline_mode = #tpu.pipeline_mode<synchronous>, transform_indices = @transform_2, window_bounds = array<i64: 1, 32>}, {transform_indices = @transform_3, window_bounds = array<i64: 1, 24, 32>}, {transform_indices = @transform_4, window_bounds = array<i64: 1, 1, 32>}, {transform_indices = @transform_5, window_bounds = array<i64: 1, 1, 32>}]} {
    %0 = tpu.iota {dimensions = array<i32: 0>} : vector<24x1xi32>
    %c6_i32 = arith.constant 6 : i32
    %c0_i32 = arith.constant 0 : i32
    %1 = arith.cmpi eq, %c6_i32, %c0_i32 : i32
    %c1_i32 = arith.constant 1 : i32
    %2 = arith.select %1, %c1_i32, %c6_i32 : i32
    %3 = vector.broadcast %2 : i32 to vector<24x1xi32>
    %4 = arith.remsi %0, %3 : vector<24x1xi32>
    %c0_i32_0 = arith.constant 0 : i32
    %5 = vector.broadcast %c0_i32_0 : i32 to vector<24x1xi32>
    %6 = arith.cmpi ne, %4, %5 : vector<24x1xi32>
    %c0_i32_1 = arith.constant 0 : i32
    %7 = vector.broadcast %c0_i32_1 : i32 to vector<24x1xi32>
    %8 = arith.cmpi slt, %4, %7 : vector<24x1xi32>
    %c0_i32_2 = arith.constant 0 : i32
    %9 = arith.cmpi slt, %2, %c0_i32_2 : i32
    %10 = vector.broadcast %9 : i1 to vector<24x1xi1>
    %11 = vector.broadcast %10 : vector<24x1xi1> to vector<24x1xi1>
    %12 = arith.xori %8, %11 : vector<24x1xi1>
    %13 = arith.andi %12, %6 : vector<24x1xi1>
    %14 = vector.broadcast %2 : i32 to vector<24x1xi32>
    %15 = arith.addi %4, %14 : vector<24x1xi32>
    %16 = arith.select %13, %15, %4 : vector<24x1xi1>, vector<24x1xi32>
    %c4_i32 = arith.constant 4 : i32
    %17 = vector.broadcast %c4_i32 : i32 to vector<24x1xi32>
    %18 = arith.cmpi slt, %16, %17 : vector<24x1xi32>
    %cst = arith.constant 0.000000e+00 : f32
    %19 = vector.broadcast %cst : f32 to vector<44x16xf32>
    %c0 = arith.constant 0 : index
    %c0_3 = arith.constant 0 : index
    %20 = vector.load %arg7[%c0, %c0_3] : memref<44x16xf32, #tpu.memory_space<vmem>>, vector<44x16xf32>
    tpu.vector_store %arg7[%c0, %c0_3], %19 {strides = array<i32>} : memref<44x16xf32, #tpu.memory_space<vmem>>, vector<44x16xf32>,
    %c0_4 = arith.constant 0 : index
    %c0_5 = arith.constant 0 : index
    %c0_6 = arith.constant 0 : index
    %21 = vector.load %arg1[%c0_4, %c0_5, %c0_6] : memref<1x24x16xbf16, #tpu.memory_space<vmem>>, vector<1x24x16xbf16>
    %22 = vector.shape_cast %21 : vector<1x24x16xbf16> to vector<24x16xbf16>
    %23 = arith.extf %22 : vector<24x16xbf16> to vector<24x16xf32>
    %c7 = arith.constant 7 : index
    %c0_7 = arith.constant 0 : index
    %24 = vector.load %arg7[%c7, %c0_7] : memref<44x16xf32, #tpu.memory_space<vmem>>, vector<24x16xf32>
    tpu.vector_store %arg7[%c7, %c0_7], %23 {strides = array<i32>} : memref<44x16xf32, #tpu.memory_space<vmem>>, vector<24x16xf32>,
    %cst_8 = arith.constant 0.000000e+00 : f32
    %25 = vector.broadcast %cst_8 : f32 to vector<24x32xf32>
    %c0_9 = arith.constant 0 : index
    %c0_10 = arith.constant 0 : index
    %26 = vector.load %arg7[%c0_9, %c0_10] : memref<44x16xf32, #tpu.memory_space<vmem>>, vector<24x16xf32>
    %27 = arith.truncf %26 : vector<24x16xf32> to vector<24x16xbf16>
    %c0_11 = arith.constant 0 : index
    %c0_12 = arith.constant 0 : index
    %c0_13 = arith.constant 0 : index
    %c0_14 = arith.constant 0 : index
    %28 = vector.load %arg2[%c0_11, %c0_12, %c0_13, %c0_14] : memref<3x3x16x32xbf16, #tpu.memory_space<vmem>>, vector<1x1x16x32xbf16>
    %29 = vector.shape_cast %28 : vector<1x1x16x32xbf16> to vector<16x32xbf16>
    %cst_15 = arith.constant dense<0.000000e+00> : vector<24x32xf32>
    %30 = tpu.matmul %27, %29, %cst_15 {dimension_numbers = #tpu.dot_dimension_numbers<[1], [0], [0], [1], [0, 0, 1, 1], [], []>} : vector<24x16xbf16>, vector<16x32xbf16>, vector<24x32xf32> -> vector<24x32xf32>
    %31 = arith.addf %25, %30 : vector<24x32xf32>
    %c1 = arith.constant 1 : index
    %c0_16 = arith.constant 0 : index
    %32 = vector.load %arg7[%c1, %c0_16] : memref<44x16xf32, #tpu.memory_space<vmem>>, vector<24x16xf32>
    %33 = arith.truncf %32 : vector<24x16xf32> to vector<24x16xbf16>
    %c0_17 = arith.constant 0 : index
    %c1_18 = arith.constant 1 : index
    %c0_19 = arith.constant 0 : index
    %c0_20 = arith.constant 0 : index
    %34 = vector.load %arg2[%c0_17, %c1_18, %c0_19, %c0_20] : memref<3x3x16x32xbf16, #tpu.memory_space<vmem>>, vector<1x1x16x32xbf16>
    %35 = vector.shape_cast %34 : vector<1x1x16x32xbf16> to vector<16x32xbf16>
    %cst_21 = arith.constant dense<0.000000e+00> : vector<24x32xf32>
    %36 = tpu.matmul %33, %35, %cst_21 {dimension_numbers = #tpu.dot_dimension_numbers<[1], [0], [0], [1], [0, 0, 1, 1], [], []>} : vector<24x16xbf16>, vector<16x32xbf16>, vector<24x32xf32> -> vector<24x32xf32>
    %37 = arith.addf %31, %36 : vector<24x32xf32>
    %c2 = arith.constant 2 : index
    %c0_22 = arith.constant 0 : index
    %38 = vector.load %arg7[%c2, %c0_22] : memref<44x16xf32, #tpu.memory_space<vmem>>, vector<24x16xf32>
    %39 = arith.truncf %38 : vector<24x16xf32> to vector<24x16xbf16>
    %c0_23 = arith.constant 0 : index
    %c2_24 = arith.constant 2 : index
    %c0_25 = arith.constant 0 : index
    %c0_26 = arith.constant 0 : index
    %40 = vector.load %arg2[%c0_23, %c2_24, %c0_25, %c0_26] : memref<3x3x16x32xbf16, #tpu.memory_space<vmem>>, vector<1x1x16x32xbf16>
    %41 = vector.shape_cast %40 : vector<1x1x16x32xbf16> to vector<16x32xbf16>
    %cst_27 = arith.constant dense<0.000000e+00> : vector<24x32xf32>
    %42 = tpu.matmul %39, %41, %cst_27 {dimension_numbers = #tpu.dot_dimension_numbers<[1], [0], [0], [1], [0, 0, 1, 1], [], []>} : vector<24x16xbf16>, vector<16x32xbf16>, vector<24x32xf32> -> vector<24x32xf32>
    %43 = arith.addf %37, %42 : vector<24x32xf32>
    %c6 = arith.constant 6 : index
    %c0_28 = arith.constant 0 : index
    %44 = vector.load %arg7[%c6, %c0_28] : memref<44x16xf32, #tpu.memory_space<vmem>>, vector<24x16xf32>
    %45 = arith.truncf %44 : vector<24x16xf32> to vector<24x16xbf16>
    %c1_29 = arith.constant 1 : index
    %c0_30 = arith.constant 0 : index
    %c0_31 = arith.constant 0 : index
    %c0_32 = arith.constant 0 : index
    %46 = vector.load %arg2[%c1_29, %c0_30, %c0_31, %c0_32] : memref<3x3x16x32xbf16, #tpu.memory_space<vmem>>, vector<1x1x16x32xbf16>
    %47 = vector.shape_cast %46 : vector<1x1x16x32xbf16> to vector<16x32xbf16>
    %cst_33 = arith.constant dense<0.000000e+00> : vector<24x32xf32>
    %48 = tpu.matmul %45, %47, %cst_33 {dimension_numbers = #tpu.dot_dimension_numbers<[1], [0], [0], [1], [0, 0, 1, 1], [], []>} : vector<24x16xbf16>, vector<16x32xbf16>, vector<24x32xf32> -> vector<24x32xf32>
    %49 = arith.addf %43, %48 : vector<24x32xf32>
    %c7_34 = arith.constant 7 : index
    %c0_35 = arith.constant 0 : index
    %50 = vector.load %arg7[%c7_34, %c0_35] : memref<44x16xf32, #tpu.memory_space<vmem>>, vector<24x16xf32>
    %51 = arith.truncf %50 : vector<24x16xf32> to vector<24x16xbf16>
    %c1_36 = arith.constant 1 : index
    %c1_37 = arith.constant 1 : index
    %c0_38 = arith.constant 0 : index
    %c0_39 = arith.constant 0 : index
    %52 = vector.load %arg2[%c1_36, %c1_37, %c0_38, %c0_39] : memref<3x3x16x32xbf16, #tpu.memory_space<vmem>>, vector<1x1x16x32xbf16>
    %53 = vector.shape_cast %52 : vector<1x1x16x32xbf16> to vector<16x32xbf16>
    %cst_40 = arith.constant dense<0.000000e+00> : vector<24x32xf32>
    %54 = tpu.matmul %51, %53, %cst_40 {dimension_numbers = #tpu.dot_dimension_numbers<[1], [0], [0], [1], [0, 0, 1, 1], [], []>} : vector<24x16xbf16>, vector<16x32xbf16>, vector<24x32xf32> -> vector<24x32xf32>
    %55 = arith.addf %49, %54 : vector<24x32xf32>
    %c8 = arith.constant 8 : index
    %c0_41 = arith.constant 0 : index
    %56 = vector.load %arg7[%c8, %c0_41] : memref<44x16xf32, #tpu.memory_space<vmem>>, vector<24x16xf32>
    %57 = arith.truncf %56 : vector<24x16xf32> to vector<24x16xbf16>
    %c1_42 = arith.constant 1 : index
    %c2_43 = arith.constant 2 : index
    %c0_44 = arith.constant 0 : index
    %c0_45 = arith.constant 0 : index
    %58 = vector.load %arg2[%c1_42, %c2_43, %c0_44, %c0_45] : memref<3x3x16x32xbf16, #tpu.memory_space<vmem>>, vector<1x1x16x32xbf16>
    %59 = vector.shape_cast %58 : vector<1x1x16x32xbf16> to vector<16x32xbf16>
    %cst_46 = arith.constant dense<0.000000e+00> : vector<24x32xf32>
    %60 = tpu.matmul %57, %59, %cst_46 {dimension_numbers = #tpu.dot_dimension_numbers<[1], [0], [0], [1], [0, 0, 1, 1], [], []>} : vector<24x16xbf16>, vector<16x32xbf16>, vector<24x32xf32> -> vector<24x32xf32>
    %61 = arith.addf %55, %60 : vector<24x32xf32>
    %c12 = arith.constant 12 : index
    %c0_47 = arith.constant 0 : index
    %62 = vector.load %arg7[%c12, %c0_47] : memref<44x16xf32, #tpu.memory_space<vmem>>, vector<24x16xf32>
    %63 = arith.truncf %62 : vector<24x16xf32> to vector<24x16xbf16>
    %c2_48 = arith.constant 2 : index
    %c0_49 = arith.constant 0 : index
    %c0_50 = arith.constant 0 : index
    %c0_51 = arith.constant 0 : index
    %64 = vector.load %arg2[%c2_48, %c0_49, %c0_50, %c0_51] : memref<3x3x16x32xbf16, #tpu.memory_space<vmem>>, vector<1x1x16x32xbf16>
    %65 = vector.shape_cast %64 : vector<1x1x16x32xbf16> to vector<16x32xbf16>
    %cst_52 = arith.constant dense<0.000000e+00> : vector<24x32xf32>
    %66 = tpu.matmul %63, %65, %cst_52 {dimension_numbers = #tpu.dot_dimension_numbers<[1], [0], [0], [1], [0, 0, 1, 1], [], []>} : vector<24x16xbf16>, vector<16x32xbf16>, vector<24x32xf32> -> vector<24x32xf32>
    %67 = arith.addf %61, %66 : vector<24x32xf32>
    %c13 = arith.constant 13 : index
    %c0_53 = arith.constant 0 : index
    %68 = vector.load %arg7[%c13, %c0_53] : memref<44x16xf32, #tpu.memory_space<vmem>>, vector<24x16xf32>
    %69 = arith.truncf %68 : vector<24x16xf32> to vector<24x16xbf16>
    %c2_54 = arith.constant 2 : index
    %c1_55 = arith.constant 1 : index
    %c0_56 = arith.constant 0 : index
    %c0_57 = arith.constant 0 : index
    %70 = vector.load %arg2[%c2_54, %c1_55, %c0_56, %c0_57] : memref<3x3x16x32xbf16, #tpu.memory_space<vmem>>, vector<1x1x16x32xbf16>
    %71 = vector.shape_cast %70 : vector<1x1x16x32xbf16> to vector<16x32xbf16>
    %cst_58 = arith.constant dense<0.000000e+00> : vector<24x32xf32>
    %72 = tpu.matmul %69, %71, %cst_58 {dimension_numbers = #tpu.dot_dimension_numbers<[1], [0], [0], [1], [0, 0, 1, 1], [], []>} : vector<24x16xbf16>, vector<16x32xbf16>, vector<24x32xf32> -> vector<24x32xf32>
    %73 = arith.addf %67, %72 : vector<24x32xf32>
    %c14 = arith.constant 14 : index
    %c0_59 = arith.constant 0 : index
    %74 = vector.load %arg7[%c14, %c0_59] : memref<44x16xf32, #tpu.memory_space<vmem>>, vector<24x16xf32>
    %75 = arith.truncf %74 : vector<24x16xf32> to vector<24x16xbf16>
    %c2_60 = arith.constant 2 : index
    %c2_61 = arith.constant 2 : index
    %c0_62 = arith.constant 0 : index
    %c0_63 = arith.constant 0 : index
    %76 = vector.load %arg2[%c2_60, %c2_61, %c0_62, %c0_63] : memref<3x3x16x32xbf16, #tpu.memory_space<vmem>>, vector<1x1x16x32xbf16>
    %77 = vector.shape_cast %76 : vector<1x1x16x32xbf16> to vector<16x32xbf16>
    %cst_64 = arith.constant dense<0.000000e+00> : vector<24x32xf32>
    %78 = tpu.matmul %75, %77, %cst_64 {dimension_numbers = #tpu.dot_dimension_numbers<[1], [0], [0], [1], [0, 0, 1, 1], [], []>} : vector<24x16xbf16>, vector<16x32xbf16>, vector<24x32xf32> -> vector<24x32xf32>
    %79 = arith.addf %73, %78 : vector<24x32xf32>
    %c0_65 = arith.constant 0 : index
    %c0_66 = arith.constant 0 : index
    %80 = vector.load %arg3[%c0_65, %c0_66] : memref<1x32xf32, #tpu.memory_space<vmem>>, vector<1x32xf32>
    %81 = vector.broadcast %80 : vector<1x32xf32> to vector<24x32xf32>
    %82 = arith.addf %79, %81 : vector<24x32xf32>
    %cst_67 = arith.constant 0.000000e+00 : f32
    %83 = vector.shape_cast %18 : vector<24x1xi1> to vector<24x1xi1>
    %84 = vector.broadcast %83 : vector<24x1xi1> to vector<24x32xi1>
    %85 = vector.broadcast %cst_67 : f32 to vector<24x32xf32>
    %86 = arith.select %84, %82, %85 : vector<24x32xi1>, vector<24x32xf32>
    %cst_68 = arith.constant dense<0.000000e+00> : vector<32xf32>
    %87 = vector.multi_reduction <add>, %86, %cst_68 [0] : vector<24x32xf32> to vector<32xf32>
    %88 = vector.shape_cast %87 : vector<32xf32> to vector<1x32xf32>
    %89 = vector.shape_cast %88 : vector<1x32xf32> to vector<1x1x32xf32>
    %c0_69 = arith.constant 0 : index
    %c0_70 = arith.constant 0 : index
    %c0_71 = arith.constant 0 : index
    %90 = vector.load %arg5[%c0_69, %c0_70, %c0_71] : memref<1x1x32xf32, #tpu.memory_space<vmem>>, vector<1x1x32xf32>
    tpu.vector_store %arg5[%c0_69, %c0_70, %c0_71], %89 {strides = array<i32>} : memref<1x1x32xf32, #tpu.memory_space<vmem>>, vector<1x1x32xf32>,
    %91 = arith.mulf %86, %86 : vector<24x32xf32>
    %cst_72 = arith.constant dense<0.000000e+00> : vector<32xf32>
    %92 = vector.multi_reduction <add>, %91, %cst_72 [0] : vector<24x32xf32> to vector<32xf32>
    %93 = vector.shape_cast %92 : vector<32xf32> to vector<1x32xf32>
    %94 = vector.shape_cast %93 : vector<1x32xf32> to vector<1x1x32xf32>
    %c0_73 = arith.constant 0 : index
    %c0_74 = arith.constant 0 : index
    %c0_75 = arith.constant 0 : index
    %95 = vector.load %arg6[%c0_73, %c0_74, %c0_75] : memref<1x1x32xf32, #tpu.memory_space<vmem>>, vector<1x1x32xf32>
    tpu.vector_store %arg6[%c0_73, %c0_74, %c0_75], %94 {strides = array<i32>} : memref<1x1x32xf32, #tpu.memory_space<vmem>>, vector<1x1x32xf32>,
    %96 = vector.shape_cast %86 : vector<24x32xf32> to vector<1x24x32xf32>
    %97 = arith.truncf %96 : vector<1x24x32xf32> to vector<1x24x32xbf16>
    %c0_76 = arith.constant 0 : index
    %c0_77 = arith.constant 0 : index
    %c0_78 = arith.constant 0 : index
    %98 = vector.load %arg4[%c0_76, %c0_77, %c0_78] : memref<1x24x32xbf16, #tpu.memory_space<vmem>>, vector<1x24x32xbf16>
    tpu.vector_store %arg4[%c0_76, %c0_77, %c0_78], %97 {strides = array<i32>} : memref<1x24x32xbf16, #tpu.memory_space<vmem>>, vector<1x24x32xbf16>,
    return
  }
  func.func @transform_0(%arg0: i32) -> (i32, i32, i32) {
    %c0_i32 = arith.constant 0 : i32
    %c0_i32_0 = arith.constant 0 : i32
    %c0_i32_1 = arith.constant 0 : i32
    return %arg0, %c0_i32, %c0_i32_0 : i32, i32, i32
  }
  func.func @transform_1(%arg0: i32) -> (i32, i32, i32, i32) {
    %c0_i32 = arith.constant 0 : i32
    %c0_i32_0 = arith.constant 0 : i32
    %c0_i32_1 = arith.constant 0 : i32
    %c0_i32_2 = arith.constant 0 : i32
    %c0_i32_3 = arith.constant 0 : i32
    return %c0_i32, %c0_i32_0, %c0_i32_1, %c0_i32_2 : i32, i32, i32, i32
  }
  func.func @transform_2(%arg0: i32) -> (i32, i32) {
    %c0_i32 = arith.constant 0 : i32
    %c0_i32_0 = arith.constant 0 : i32
    %c0_i32_1 = arith.constant 0 : i32
    return %c0_i32, %c0_i32_0 : i32, i32
  }
  func.func @transform_3(%arg0: i32) -> (i32, i32, i32) {
    %c0_i32 = arith.constant 0 : i32
    %c0_i32_0 = arith.constant 0 : i32
    %c0_i32_1 = arith.constant 0 : i32
    return %arg0, %c0_i32, %c0_i32_0 : i32, i32, i32
  }
  func.func @transform_4(%arg0: i32) -> (i32, i32, i32) {
    %c0_i32 = arith.constant 0 : i32
    %c0_i32_0 = arith.constant 0 : i32
    %c0_i32_1 = arith.constant 0 : i32
    return %arg0, %c0_i32, %c0_i32_0 : i32, i32, i32
  }
  func.func @transform_5(%arg0: i32) -> (i32, i32, i32) {
    %c0_i32 = arith.constant 0 : i32
    %c0_i32_0 = arith.constant 0 : i32
    %c0_i32_1 = arith.constant 0 : i32
    return %arg0, %c0_i32, %c0_i32_0 : i32, i32, i32
  }
}

module attributes {stable_mosaic.version = 11 : i64} {
  func.func @_bn_relu_pool_kernel(%arg0: i32, %arg1: memref<1x24x32xbf16, #tpu.memory_space<vmem>>, %arg2: memref<1x32xf32, #tpu.memory_space<vmem>>, %arg3: memref<1x32xf32, #tpu.memory_space<vmem>>, %arg4: memref<1x24x32xbf16, #tpu.memory_space<vmem>>) attributes {dimension_semantics = [#tpu.dimension_semantics<parallel>], iteration_bounds = array<i64: 2>, scalar_prefetch = 0 : i64, scratch_operands = 0 : i64, tpu.core_type = #tpu.core_type<tc>, window_params = [{transform_indices = @transform_0, window_bounds = array<i64: 1, 24, 32>}, {pipeline_mode = #tpu.pipeline_mode<synchronous>, transform_indices = @transform_1, window_bounds = array<i64: 1, 32>}, {pipeline_mode = #tpu.pipeline_mode<synchronous>, transform_indices = @transform_2, window_bounds = array<i64: 1, 32>}, {transform_indices = @transform_3, window_bounds = array<i64: 1, 24, 32>}]} {
    %0 = tpu.iota {dimensions = array<i32: 0>} : vector<24x1xi32>
    %c6_i32 = arith.constant 6 : i32
    %c0_i32 = arith.constant 0 : i32
    %1 = arith.cmpi eq, %c6_i32, %c0_i32 : i32
    %c1_i32 = arith.constant 1 : i32
    %2 = arith.select %1, %c1_i32, %c6_i32 : i32
    %3 = vector.broadcast %2 : i32 to vector<24x1xi32>
    %4 = arith.remsi %0, %3 : vector<24x1xi32>
    %c0_i32_0 = arith.constant 0 : i32
    %5 = vector.broadcast %c0_i32_0 : i32 to vector<24x1xi32>
    %6 = arith.cmpi ne, %4, %5 : vector<24x1xi32>
    %c0_i32_1 = arith.constant 0 : i32
    %7 = vector.broadcast %c0_i32_1 : i32 to vector<24x1xi32>
    %8 = arith.cmpi slt, %4, %7 : vector<24x1xi32>
    %c0_i32_2 = arith.constant 0 : i32
    %9 = arith.cmpi slt, %2, %c0_i32_2 : i32
    %10 = vector.broadcast %9 : i1 to vector<24x1xi1>
    %11 = vector.broadcast %10 : vector<24x1xi1> to vector<24x1xi1>
    %12 = arith.xori %8, %11 : vector<24x1xi1>
    %13 = arith.andi %12, %6 : vector<24x1xi1>
    %14 = vector.broadcast %2 : i32 to vector<24x1xi32>
    %15 = arith.addi %4, %14 : vector<24x1xi32>
    %16 = arith.select %13, %15, %4 : vector<24x1xi1>, vector<24x1xi32>
    %c4_i32 = arith.constant 4 : i32
    %17 = vector.broadcast %c4_i32 : i32 to vector<24x1xi32>
    %18 = arith.cmpi slt, %16, %17 : vector<24x1xi32>
    %c0 = arith.constant 0 : index
    %c0_3 = arith.constant 0 : index
    %c0_4 = arith.constant 0 : index
    %19 = vector.load %arg1[%c0, %c0_3, %c0_4] : memref<1x24x32xbf16, #tpu.memory_space<vmem>>, vector<1x24x32xbf16>
    %20 = vector.shape_cast %19 : vector<1x24x32xbf16> to vector<24x32xbf16>
    %21 = arith.extf %20 : vector<24x32xbf16> to vector<24x32xf32>
    %c0_5 = arith.constant 0 : index
    %c0_6 = arith.constant 0 : index
    %22 = vector.load %arg2[%c0_5, %c0_6] : memref<1x32xf32, #tpu.memory_space<vmem>>, vector<1x32xf32>
    %23 = vector.broadcast %22 : vector<1x32xf32> to vector<24x32xf32>
    %24 = arith.mulf %21, %23 : vector<24x32xf32>
    %c0_7 = arith.constant 0 : index
    %c0_8 = arith.constant 0 : index
    %25 = vector.load %arg3[%c0_7, %c0_8] : memref<1x32xf32, #tpu.memory_space<vmem>>, vector<1x32xf32>
    %26 = vector.broadcast %25 : vector<1x32xf32> to vector<24x32xf32>
    %27 = arith.addf %24, %26 : vector<24x32xf32>
    %cst = arith.constant 0.000000e+00 : f32
    %28 = vector.broadcast %cst : f32 to vector<24x32xf32>
    %29 = arith.maximumf %27, %28 : vector<24x32xf32>
    %cst_9 = arith.constant 0.000000e+00 : f32
    %30 = vector.shape_cast %18 : vector<24x1xi1> to vector<24x1xi1>
    %31 = vector.broadcast %30 : vector<24x1xi1> to vector<24x32xi1>
    %32 = vector.broadcast %cst_9 : f32 to vector<24x32xf32>
    %33 = arith.select %31, %29, %32 : vector<24x32xi1>, vector<24x32xf32>
    %34 = vector.shape_cast %33 : vector<24x32xf32> to vector<1x24x32xf32>
    %35 = arith.truncf %34 : vector<1x24x32xf32> to vector<1x24x32xbf16>
    %c0_10 = arith.constant 0 : index
    %c0_11 = arith.constant 0 : index
    %c0_12 = arith.constant 0 : index
    %36 = vector.load %arg4[%c0_10, %c0_11, %c0_12] : memref<1x24x32xbf16, #tpu.memory_space<vmem>>, vector<1x24x32xbf16>
    tpu.vector_store %arg4[%c0_10, %c0_11, %c0_12], %35 {strides = array<i32>} : memref<1x24x32xbf16, #tpu.memory_space<vmem>>, vector<1x24x32xbf16>,
    return
  }
  func.func @transform_0(%arg0: i32) -> (i32, i32, i32) {
    %c0_i32 = arith.constant 0 : i32
    %c0_i32_0 = arith.constant 0 : i32
    %c0_i32_1 = arith.constant 0 : i32
    return %arg0, %c0_i32, %c0_i32_0 : i32, i32, i32
  }
  func.func @transform_1(%arg0: i32) -> (i32, i32) {
    %c0_i32 = arith.constant 0 : i32
    %c0_i32_0 = arith.constant 0 : i32
    %c0_i32_1 = arith.constant 0 : i32
    return %c0_i32, %c0_i32_0 : i32, i32
  }
  func.func @transform_2(%arg0: i32) -> (i32, i32) {
    %c0_i32 = arith.constant 0 : i32
    %c0_i32_0 = arith.constant 0 : i32
    %c0_i32_1 = arith.constant 0 : i32
    return %c0_i32, %c0_i32_0 : i32, i32
  }
  func.func @transform_3(%arg0: i32) -> (i32, i32, i32) {
    %c0_i32 = arith.constant 0 : i32
    %c0_i32_0 = arith.constant 0 : i32
    %c0_i32_1 = arith.constant 0 : i32
    return %arg0, %c0_i32, %c0_i32_0 : i32, i32, i32
  }
}

module attributes {stable_mosaic.version = 11 : i64} {
  func.func @_conv3x3_kernel(%arg0: i32, %arg1: memref<1x24x32xbf16, #tpu.memory_space<vmem>>, %arg2: memref<3x3x32x32xbf16, #tpu.memory_space<vmem>>, %arg3: memref<1x32xf32, #tpu.memory_space<vmem>>, %arg4: memref<1x32xf32, #tpu.memory_space<vmem>>, %arg5: memref<1x32xf32, #tpu.memory_space<vmem>>, %arg6: memref<1x24x32xbf16, #tpu.memory_space<vmem>>, %arg7: memref<1x1x32xf32, #tpu.memory_space<vmem>>, %arg8: memref<1x1x32xf32, #tpu.memory_space<vmem>>, %arg9: memref<44x32xf32, #tpu.memory_space<vmem>>) attributes {dimension_semantics = [#tpu.dimension_semantics<parallel>], iteration_bounds = array<i64: 2>, scalar_prefetch = 0 : i64, scratch_operands = 1 : i64, tpu.core_type = #tpu.core_type<tc>, window_params = [{transform_indices = @transform_0, window_bounds = array<i64: 1, 24, 32>}, {pipeline_mode = #tpu.pipeline_mode<synchronous>, transform_indices = @transform_1, window_bounds = array<i64: 3, 3, 32, 32>}, {pipeline_mode = #tpu.pipeline_mode<synchronous>, transform_indices = @transform_2, window_bounds = array<i64: 1, 32>}, {pipeline_mode = #tpu.pipeline_mode<synchronous>, transform_indices = @transform_3, window_bounds = array<i64: 1, 32>}, {pipeline_mode = #tpu.pipeline_mode<synchronous>, transform_indices = @transform_4, window_bounds = array<i64: 1, 32>}, {transform_indices = @transform_5, window_bounds = array<i64: 1, 24, 32>}, {transform_indices = @transform_6, window_bounds = array<i64: 1, 1, 32>}, {transform_indices = @transform_7, window_bounds = array<i64: 1, 1, 32>}]} {
    %0 = tpu.iota {dimensions = array<i32: 0>} : vector<24x1xi32>
    %c6_i32 = arith.constant 6 : i32
    %c0_i32 = arith.constant 0 : i32
    %1 = arith.cmpi eq, %c6_i32, %c0_i32 : i32
    %c1_i32 = arith.constant 1 : i32
    %2 = arith.select %1, %c1_i32, %c6_i32 : i32
    %3 = vector.broadcast %2 : i32 to vector<24x1xi32>
    %4 = arith.remsi %0, %3 : vector<24x1xi32>
    %c0_i32_0 = arith.constant 0 : i32
    %5 = vector.broadcast %c0_i32_0 : i32 to vector<24x1xi32>
    %6 = arith.cmpi ne, %4, %5 : vector<24x1xi32>
    %c0_i32_1 = arith.constant 0 : i32
    %7 = vector.broadcast %c0_i32_1 : i32 to vector<24x1xi32>
    %8 = arith.cmpi slt, %4, %7 : vector<24x1xi32>
    %c0_i32_2 = arith.constant 0 : i32
    %9 = arith.cmpi slt, %2, %c0_i32_2 : i32
    %10 = vector.broadcast %9 : i1 to vector<24x1xi1>
    %11 = vector.broadcast %10 : vector<24x1xi1> to vector<24x1xi1>
    %12 = arith.xori %8, %11 : vector<24x1xi1>
    %13 = arith.andi %12, %6 : vector<24x1xi1>
    %14 = vector.broadcast %2 : i32 to vector<24x1xi32>
    %15 = arith.addi %4, %14 : vector<24x1xi32>
    %16 = arith.select %13, %15, %4 : vector<24x1xi1>, vector<24x1xi32>
    %c4_i32 = arith.constant 4 : i32
    %17 = vector.broadcast %c4_i32 : i32 to vector<24x1xi32>
    %18 = arith.cmpi slt, %16, %17 : vector<24x1xi32>
    %cst = arith.constant 0.000000e+00 : f32
    %19 = vector.broadcast %cst : f32 to vector<44x32xf32>
    %c0 = arith.constant 0 : index
    %c0_3 = arith.constant 0 : index
    %20 = vector.load %arg9[%c0, %c0_3] : memref<44x32xf32, #tpu.memory_space<vmem>>, vector<44x32xf32>
    tpu.vector_store %arg9[%c0, %c0_3], %19 {strides = array<i32>} : memref<44x32xf32, #tpu.memory_space<vmem>>, vector<44x32xf32>,
    %c0_4 = arith.constant 0 : index
    %c0_5 = arith.constant 0 : index
    %c0_6 = arith.constant 0 : index
    %21 = vector.load %arg1[%c0_4, %c0_5, %c0_6] : memref<1x24x32xbf16, #tpu.memory_space<vmem>>, vector<1x24x32xbf16>
    %22 = vector.shape_cast %21 : vector<1x24x32xbf16> to vector<24x32xbf16>
    %23 = arith.extf %22 : vector<24x32xbf16> to vector<24x32xf32>
    %c0_7 = arith.constant 0 : index
    %c0_8 = arith.constant 0 : index
    %24 = vector.load %arg4[%c0_7, %c0_8] : memref<1x32xf32, #tpu.memory_space<vmem>>, vector<1x32xf32>
    %25 = vector.broadcast %24 : vector<1x32xf32> to vector<24x32xf32>
    %26 = arith.mulf %23, %25 : vector<24x32xf32>
    %c0_9 = arith.constant 0 : index
    %c0_10 = arith.constant 0 : index
    %27 = vector.load %arg5[%c0_9, %c0_10] : memref<1x32xf32, #tpu.memory_space<vmem>>, vector<1x32xf32>
    %28 = vector.broadcast %27 : vector<1x32xf32> to vector<24x32xf32>
    %29 = arith.addf %26, %28 : vector<24x32xf32>
    %cst_11 = arith.constant 0.000000e+00 : f32
    %30 = vector.broadcast %cst_11 : f32 to vector<24x32xf32>
    %31 = arith.maximumf %29, %30 : vector<24x32xf32>
    %cst_12 = arith.constant 0.000000e+00 : f32
    %32 = vector.shape_cast %18 : vector<24x1xi1> to vector<24x1xi1>
    %33 = vector.broadcast %32 : vector<24x1xi1> to vector<24x32xi1>
    %34 = vector.broadcast %cst_12 : f32 to vector<24x32xf32>
    %35 = arith.select %33, %31, %34 : vector<24x32xi1>, vector<24x32xf32>
    %c7 = arith.constant 7 : index
    %c0_13 = arith.constant 0 : index
    %36 = vector.load %arg9[%c7, %c0_13] : memref<44x32xf32, #tpu.memory_space<vmem>>, vector<24x32xf32>
    tpu.vector_store %arg9[%c7, %c0_13], %35 {strides = array<i32>} : memref<44x32xf32, #tpu.memory_space<vmem>>, vector<24x32xf32>,
    %cst_14 = arith.constant 0.000000e+00 : f32
    %37 = vector.broadcast %cst_14 : f32 to vector<24x32xf32>
    %c0_15 = arith.constant 0 : index
    %c0_16 = arith.constant 0 : index
    %38 = vector.load %arg9[%c0_15, %c0_16] : memref<44x32xf32, #tpu.memory_space<vmem>>, vector<24x32xf32>
    %39 = arith.truncf %38 : vector<24x32xf32> to vector<24x32xbf16>
    %c0_17 = arith.constant 0 : index
    %c0_18 = arith.constant 0 : index
    %c0_19 = arith.constant 0 : index
    %c0_20 = arith.constant 0 : index
    %40 = vector.load %arg2[%c0_17, %c0_18, %c0_19, %c0_20] : memref<3x3x32x32xbf16, #tpu.memory_space<vmem>>, vector<1x1x32x32xbf16>
    %41 = vector.shape_cast %40 : vector<1x1x32x32xbf16> to vector<32x32xbf16>
    %cst_21 = arith.constant dense<0.000000e+00> : vector<24x32xf32>
    %42 = tpu.matmul %39, %41, %cst_21 {dimension_numbers = #tpu.dot_dimension_numbers<[1], [0], [0], [1], [0, 0, 1, 1], [], []>} : vector<24x32xbf16>, vector<32x32xbf16>, vector<24x32xf32> -> vector<24x32xf32>
    %43 = arith.addf %37, %42 : vector<24x32xf32>
    %c1 = arith.constant 1 : index
    %c0_22 = arith.constant 0 : index
    %44 = vector.load %arg9[%c1, %c0_22] : memref<44x32xf32, #tpu.memory_space<vmem>>, vector<24x32xf32>
    %45 = arith.truncf %44 : vector<24x32xf32> to vector<24x32xbf16>
    %c0_23 = arith.constant 0 : index
    %c1_24 = arith.constant 1 : index
    %c0_25 = arith.constant 0 : index
    %c0_26 = arith.constant 0 : index
    %46 = vector.load %arg2[%c0_23, %c1_24, %c0_25, %c0_26] : memref<3x3x32x32xbf16, #tpu.memory_space<vmem>>, vector<1x1x32x32xbf16>
    %47 = vector.shape_cast %46 : vector<1x1x32x32xbf16> to vector<32x32xbf16>
    %cst_27 = arith.constant dense<0.000000e+00> : vector<24x32xf32>
    %48 = tpu.matmul %45, %47, %cst_27 {dimension_numbers = #tpu.dot_dimension_numbers<[1], [0], [0], [1], [0, 0, 1, 1], [], []>} : vector<24x32xbf16>, vector<32x32xbf16>, vector<24x32xf32> -> vector<24x32xf32>
    %49 = arith.addf %43, %48 : vector<24x32xf32>
    %c2 = arith.constant 2 : index
    %c0_28 = arith.constant 0 : index
    %50 = vector.load %arg9[%c2, %c0_28] : memref<44x32xf32, #tpu.memory_space<vmem>>, vector<24x32xf32>
    %51 = arith.truncf %50 : vector<24x32xf32> to vector<24x32xbf16>
    %c0_29 = arith.constant 0 : index
    %c2_30 = arith.constant 2 : index
    %c0_31 = arith.constant 0 : index
    %c0_32 = arith.constant 0 : index
    %52 = vector.load %arg2[%c0_29, %c2_30, %c0_31, %c0_32] : memref<3x3x32x32xbf16, #tpu.memory_space<vmem>>, vector<1x1x32x32xbf16>
    %53 = vector.shape_cast %52 : vector<1x1x32x32xbf16> to vector<32x32xbf16>
    %cst_33 = arith.constant dense<0.000000e+00> : vector<24x32xf32>
    %54 = tpu.matmul %51, %53, %cst_33 {dimension_numbers = #tpu.dot_dimension_numbers<[1], [0], [0], [1], [0, 0, 1, 1], [], []>} : vector<24x32xbf16>, vector<32x32xbf16>, vector<24x32xf32> -> vector<24x32xf32>
    %55 = arith.addf %49, %54 : vector<24x32xf32>
    %c6 = arith.constant 6 : index
    %c0_34 = arith.constant 0 : index
    %56 = vector.load %arg9[%c6, %c0_34] : memref<44x32xf32, #tpu.memory_space<vmem>>, vector<24x32xf32>
    %57 = arith.truncf %56 : vector<24x32xf32> to vector<24x32xbf16>
    %c1_35 = arith.constant 1 : index
    %c0_36 = arith.constant 0 : index
    %c0_37 = arith.constant 0 : index
    %c0_38 = arith.constant 0 : index
    %58 = vector.load %arg2[%c1_35, %c0_36, %c0_37, %c0_38] : memref<3x3x32x32xbf16, #tpu.memory_space<vmem>>, vector<1x1x32x32xbf16>
    %59 = vector.shape_cast %58 : vector<1x1x32x32xbf16> to vector<32x32xbf16>
    %cst_39 = arith.constant dense<0.000000e+00> : vector<24x32xf32>
    %60 = tpu.matmul %57, %59, %cst_39 {dimension_numbers = #tpu.dot_dimension_numbers<[1], [0], [0], [1], [0, 0, 1, 1], [], []>} : vector<24x32xbf16>, vector<32x32xbf16>, vector<24x32xf32> -> vector<24x32xf32>
    %61 = arith.addf %55, %60 : vector<24x32xf32>
    %c7_40 = arith.constant 7 : index
    %c0_41 = arith.constant 0 : index
    %62 = vector.load %arg9[%c7_40, %c0_41] : memref<44x32xf32, #tpu.memory_space<vmem>>, vector<24x32xf32>
    %63 = arith.truncf %62 : vector<24x32xf32> to vector<24x32xbf16>
    %c1_42 = arith.constant 1 : index
    %c1_43 = arith.constant 1 : index
    %c0_44 = arith.constant 0 : index
    %c0_45 = arith.constant 0 : index
    %64 = vector.load %arg2[%c1_42, %c1_43, %c0_44, %c0_45] : memref<3x3x32x32xbf16, #tpu.memory_space<vmem>>, vector<1x1x32x32xbf16>
    %65 = vector.shape_cast %64 : vector<1x1x32x32xbf16> to vector<32x32xbf16>
    %cst_46 = arith.constant dense<0.000000e+00> : vector<24x32xf32>
    %66 = tpu.matmul %63, %65, %cst_46 {dimension_numbers = #tpu.dot_dimension_numbers<[1], [0], [0], [1], [0, 0, 1, 1], [], []>} : vector<24x32xbf16>, vector<32x32xbf16>, vector<24x32xf32> -> vector<24x32xf32>
    %67 = arith.addf %61, %66 : vector<24x32xf32>
    %c8 = arith.constant 8 : index
    %c0_47 = arith.constant 0 : index
    %68 = vector.load %arg9[%c8, %c0_47] : memref<44x32xf32, #tpu.memory_space<vmem>>, vector<24x32xf32>
    %69 = arith.truncf %68 : vector<24x32xf32> to vector<24x32xbf16>
    %c1_48 = arith.constant 1 : index
    %c2_49 = arith.constant 2 : index
    %c0_50 = arith.constant 0 : index
    %c0_51 = arith.constant 0 : index
    %70 = vector.load %arg2[%c1_48, %c2_49, %c0_50, %c0_51] : memref<3x3x32x32xbf16, #tpu.memory_space<vmem>>, vector<1x1x32x32xbf16>
    %71 = vector.shape_cast %70 : vector<1x1x32x32xbf16> to vector<32x32xbf16>
    %cst_52 = arith.constant dense<0.000000e+00> : vector<24x32xf32>
    %72 = tpu.matmul %69, %71, %cst_52 {dimension_numbers = #tpu.dot_dimension_numbers<[1], [0], [0], [1], [0, 0, 1, 1], [], []>} : vector<24x32xbf16>, vector<32x32xbf16>, vector<24x32xf32> -> vector<24x32xf32>
    %73 = arith.addf %67, %72 : vector<24x32xf32>
    %c12 = arith.constant 12 : index
    %c0_53 = arith.constant 0 : index
    %74 = vector.load %arg9[%c12, %c0_53] : memref<44x32xf32, #tpu.memory_space<vmem>>, vector<24x32xf32>
    %75 = arith.truncf %74 : vector<24x32xf32> to vector<24x32xbf16>
    %c2_54 = arith.constant 2 : index
    %c0_55 = arith.constant 0 : index
    %c0_56 = arith.constant 0 : index
    %c0_57 = arith.constant 0 : index
    %76 = vector.load %arg2[%c2_54, %c0_55, %c0_56, %c0_57] : memref<3x3x32x32xbf16, #tpu.memory_space<vmem>>, vector<1x1x32x32xbf16>
    %77 = vector.shape_cast %76 : vector<1x1x32x32xbf16> to vector<32x32xbf16>
    %cst_58 = arith.constant dense<0.000000e+00> : vector<24x32xf32>
    %78 = tpu.matmul %75, %77, %cst_58 {dimension_numbers = #tpu.dot_dimension_numbers<[1], [0], [0], [1], [0, 0, 1, 1], [], []>} : vector<24x32xbf16>, vector<32x32xbf16>, vector<24x32xf32> -> vector<24x32xf32>
    %79 = arith.addf %73, %78 : vector<24x32xf32>
    %c13 = arith.constant 13 : index
    %c0_59 = arith.constant 0 : index
    %80 = vector.load %arg9[%c13, %c0_59] : memref<44x32xf32, #tpu.memory_space<vmem>>, vector<24x32xf32>
    %81 = arith.truncf %80 : vector<24x32xf32> to vector<24x32xbf16>
    %c2_60 = arith.constant 2 : index
    %c1_61 = arith.constant 1 : index
    %c0_62 = arith.constant 0 : index
    %c0_63 = arith.constant 0 : index
    %82 = vector.load %arg2[%c2_60, %c1_61, %c0_62, %c0_63] : memref<3x3x32x32xbf16, #tpu.memory_space<vmem>>, vector<1x1x32x32xbf16>
    %83 = vector.shape_cast %82 : vector<1x1x32x32xbf16> to vector<32x32xbf16>
    %cst_64 = arith.constant dense<0.000000e+00> : vector<24x32xf32>
    %84 = tpu.matmul %81, %83, %cst_64 {dimension_numbers = #tpu.dot_dimension_numbers<[1], [0], [0], [1], [0, 0, 1, 1], [], []>} : vector<24x32xbf16>, vector<32x32xbf16>, vector<24x32xf32> -> vector<24x32xf32>
    %85 = arith.addf %79, %84 : vector<24x32xf32>
    %c14 = arith.constant 14 : index
    %c0_65 = arith.constant 0 : index
    %86 = vector.load %arg9[%c14, %c0_65] : memref<44x32xf32, #tpu.memory_space<vmem>>, vector<24x32xf32>
    %87 = arith.truncf %86 : vector<24x32xf32> to vector<24x32xbf16>
    %c2_66 = arith.constant 2 : index
    %c2_67 = arith.constant 2 : index
    %c0_68 = arith.constant 0 : index
    %c0_69 = arith.constant 0 : index
    %88 = vector.load %arg2[%c2_66, %c2_67, %c0_68, %c0_69] : memref<3x3x32x32xbf16, #tpu.memory_space<vmem>>, vector<1x1x32x32xbf16>
    %89 = vector.shape_cast %88 : vector<1x1x32x32xbf16> to vector<32x32xbf16>
    %cst_70 = arith.constant dense<0.000000e+00> : vector<24x32xf32>
    %90 = tpu.matmul %87, %89, %cst_70 {dimension_numbers = #tpu.dot_dimension_numbers<[1], [0], [0], [1], [0, 0, 1, 1], [], []>} : vector<24x32xbf16>, vector<32x32xbf16>, vector<24x32xf32> -> vector<24x32xf32>
    %91 = arith.addf %85, %90 : vector<24x32xf32>
    %c0_71 = arith.constant 0 : index
    %c0_72 = arith.constant 0 : index
    %92 = vector.load %arg3[%c0_71, %c0_72] : memref<1x32xf32, #tpu.memory_space<vmem>>, vector<1x32xf32>
    %93 = vector.broadcast %92 : vector<1x32xf32> to vector<24x32xf32>
    %94 = arith.addf %91, %93 : vector<24x32xf32>
    %cst_73 = arith.constant 0.000000e+00 : f32
    %95 = vector.shape_cast %18 : vector<24x1xi1> to vector<24x1xi1>
    %96 = vector.broadcast %95 : vector<24x1xi1> to vector<24x32xi1>
    %97 = vector.broadcast %cst_73 : f32 to vector<24x32xf32>
    %98 = arith.select %96, %94, %97 : vector<24x32xi1>, vector<24x32xf32>
    %cst_74 = arith.constant dense<0.000000e+00> : vector<32xf32>
    %99 = vector.multi_reduction <add>, %98, %cst_74 [0] : vector<24x32xf32> to vector<32xf32>
    %100 = vector.shape_cast %99 : vector<32xf32> to vector<1x32xf32>
    %101 = vector.shape_cast %100 : vector<1x32xf32> to vector<1x1x32xf32>
    %c0_75 = arith.constant 0 : index
    %c0_76 = arith.constant 0 : index
    %c0_77 = arith.constant 0 : index
    %102 = vector.load %arg7[%c0_75, %c0_76, %c0_77] : memref<1x1x32xf32, #tpu.memory_space<vmem>>, vector<1x1x32xf32>
    tpu.vector_store %arg7[%c0_75, %c0_76, %c0_77], %101 {strides = array<i32>} : memref<1x1x32xf32, #tpu.memory_space<vmem>>, vector<1x1x32xf32>,
    %103 = arith.mulf %98, %98 : vector<24x32xf32>
    %cst_78 = arith.constant dense<0.000000e+00> : vector<32xf32>
    %104 = vector.multi_reduction <add>, %103, %cst_78 [0] : vector<24x32xf32> to vector<32xf32>
    %105 = vector.shape_cast %104 : vector<32xf32> to vector<1x32xf32>
    %106 = vector.shape_cast %105 : vector<1x32xf32> to vector<1x1x32xf32>
    %c0_79 = arith.constant 0 : index
    %c0_80 = arith.constant 0 : index
    %c0_81 = arith.constant 0 : index
    %107 = vector.load %arg8[%c0_79, %c0_80, %c0_81] : memref<1x1x32xf32, #tpu.memory_space<vmem>>, vector<1x1x32xf32>
    tpu.vector_store %arg8[%c0_79, %c0_80, %c0_81], %106 {strides = array<i32>} : memref<1x1x32xf32, #tpu.memory_space<vmem>>, vector<1x1x32xf32>,
    %108 = vector.shape_cast %98 : vector<24x32xf32> to vector<1x24x32xf32>
    %109 = arith.truncf %108 : vector<1x24x32xf32> to vector<1x24x32xbf16>
    %c0_82 = arith.constant 0 : index
    %c0_83 = arith.constant 0 : index
    %c0_84 = arith.constant 0 : index
    %110 = vector.load %arg6[%c0_82, %c0_83, %c0_84] : memref<1x24x32xbf16, #tpu.memory_space<vmem>>, vector<1x24x32xbf16>
    tpu.vector_store %arg6[%c0_82, %c0_83, %c0_84], %109 {strides = array<i32>} : memref<1x24x32xbf16, #tpu.memory_space<vmem>>, vector<1x24x32xbf16>,
    return
  }
  func.func @transform_0(%arg0: i32) -> (i32, i32, i32) {
    %c0_i32 = arith.constant 0 : i32
    %c0_i32_0 = arith.constant 0 : i32
    %c0_i32_1 = arith.constant 0 : i32
    return %arg0, %c0_i32, %c0_i32_0 : i32, i32, i32
  }
  func.func @transform_1(%arg0: i32) -> (i32, i32, i32, i32) {
    %c0_i32 = arith.constant 0 : i32
    %c0_i32_0 = arith.constant 0 : i32
    %c0_i32_1 = arith.constant 0 : i32
    %c0_i32_2 = arith.constant 0 : i32
    %c0_i32_3 = arith.constant 0 : i32
    return %c0_i32, %c0_i32_0, %c0_i32_1, %c0_i32_2 : i32, i32, i32, i32
  }
  func.func @transform_2(%arg0: i32) -> (i32, i32) {
    %c0_i32 = arith.constant 0 : i32
    %c0_i32_0 = arith.constant 0 : i32
    %c0_i32_1 = arith.constant 0 : i32
    return %c0_i32, %c0_i32_0 : i32, i32
  }
  func.func @transform_3(%arg0: i32) -> (i32, i32) {
    %c0_i32 = arith.constant 0 : i32
    %c0_i32_0 = arith.constant 0 : i32
    %c0_i32_1 = arith.constant 0 : i32
    return %c0_i32, %c0_i32_0 : i32, i32
  }
  func.func @transform_4(%arg0: i32) -> (i32, i32) {
    %c0_i32 = arith.constant 0 : i32
    %c0_i32_0 = arith.constant 0 : i32
    %c0_i32_1 = arith.constant 0 : i32
    return %c0_i32, %c0_i32_0 : i32, i32
  }
  func.func @transform_5(%arg0: i32) -> (i32, i32, i32) {
    %c0_i32 = arith.constant 0 : i32
    %c0_i32_0 = arith.constant 0 : i32
    %c0_i32_1 = arith.constant 0 : i32
    return %arg0, %c0_i32, %c0_i32_0 : i32, i32, i32
  }
  func.func @transform_6(%arg0: i32) -> (i32, i32, i32) {
    %c0_i32 = arith.constant 0 : i32
    %c0_i32_0 = arith.constant 0 : i32
    %c0_i32_1 = arith.constant 0 : i32
    return %arg0, %c0_i32, %c0_i32_0 : i32, i32, i32
  }
  func.func @transform_7(%arg0: i32) -> (i32, i32, i32) {
    %c0_i32 = arith.constant 0 : i32
    %c0_i32_0 = arith.constant 0 : i32
    %c0_i32_1 = arith.constant 0 : i32
    return %arg0, %c0_i32, %c0_i32_0 : i32, i32, i32
  }
}

</mosaic_0001>

<bundles_post_ra>
// kernel: encoder_forward.10
= control target key start
LH: loop header
LB: loop body
LE: loop exit
PB: predicated region body
PF: predicated region fallthrough
CT: control target
= control target key end

     0   :  { %s933_s15 = smov 0   ;;  %s1209_s0 = inlined_call_operand.vmem [shape: bf16[2,80,16], index: 0, kind: input, shape index: {}]   ;;  %s1210_s1 = inlined_call_operand.vmem [shape: f32[1,16], index: 1, kind: input, shape index: {}]   ;;  %s1211_s2 = inlined_call_operand.vmem [shape: f32[1,16], index: 2, kind: input, shape index: {}]   ;;  %s1212_s3 = inlined_call_operand.vmem [shape: bf16[2,80,16], index: 3, kind: output, shape index: {0}]   ;;  %s1213_s4 = inlined_call_operand.vmem [shape: bf16[2,24,16], index: 4, kind: output, shape index: {1}]  }
   0x1 LB: > { %s852_s16 = sadd.s32 4294967295, %s905_s15   ;;  %p856_p0 = scmp.ge.s32.totalorder %s905_s15, 1  ;;  %s905_s15 = sphi %s933_s15, %s15_s15  }
   0x2   : > { %p165_p1 = scmp.lt.s32.totalorder %s905_s15, 3 }
   0x4   : > { %p166_p2 = pnand %p856_p0, %p165_p1 }
   0x5   : > { %p196_p3 = scmp.lt.s32.totalorder (!%p166_p2), %s852_s16, 1 }
   0x6   : > { %169 = sbr.rel (%p166_p2) target bundleno = 129 (0x81), region = 32 }
   0xb   : > { %v212_v0 = vlaneseq  ;;  %s1215_s16 = smov (!%p196_p3, %s852_s16), 1  ;;  %v964_v9 = vld [vmem:[%s1210_s1] ss:$0 sm:$0xff]  ;;  %v907_v28 = vmov 0   ;;  %vm682_vm5 = vcmask 130048  }
   0xc   : > { %s886_s17 = smul.u32 40, %s1215_s16  ;;  %v980_v21 = vld [vmem:[%s1211_s2] ss:$0 sm:$0xff] }
   0xd   : > { %v943_v1 = vshrl.u32 %v212_v0, 7  ;;  %s887_s25 = smul.u32 12, %s1215_s16 }
   0xe   : > { %s959_s20 = scalar_lea.vmem %s1209_s0, %s886_s17  ;;  %s1138_s5 = scalar_lea.vmem %s1212_s3, %s886_s17 }
   0xf   : > { %v226_v2 = vand.u32 65535, %v943_v1  ;;  %v227_v3 = vshrl.u32 %v943_v1, 16  ;;  %v949_v4 = vadd.s32 8, %v943_v1  ;;  %v952_v5 = vadd.s32 16, %v943_v1  ;;  %v863_v12 = vld [vmem:[%s959_s20] sm:$0xff]   ;;  %v992_v50 = vld [vmem:[%s959_s20 + $0x8] sm:$0xff]   ;;  %s1131_s28 = scalar_lea.vmem %s1213_s4, %s887_s25 }
  0x10   : > { %v967_v10 = vadd.s32 24, %v943_v1  ;;  %v973_v15 = vadd.s32 32, %v943_v1  ;;  %v864_v20 = vunpack.c.l.bf16 %v863_v12  ;;  %v865_v27 = vunpack.c.h.bf16 %v863_v12 }
  0x11   : > { %v229_v6 = vmul.u32 52429, %v226_v2  ;;  %v230_v7 = vmul.u32 52428, %v226_v2  ;;  %v231_v8 = vmul.u32 52429, %v227_v3  ;;  %v232_v11 = vmul.u32 52428, %v227_v3 }
  0x12   : > { %v255_v13 = vand.u32 65535, %v949_v4  ;;  %v256_v14 = vshrl.u32 %v949_v4, 16  ;;  %v284_v18 = vand.u32 65535, %v952_v5  ;;  %v285_v19 = vshrl.u32 %v952_v5, 16 }
  0x13   : > { %v233_v16 = vshll.u32 %v230_v7, 16  ;;  %v235_v17 = vshll.u32 %v231_v8, 16  ;;  %v234_v25 = vshrl.u32 %v230_v7, 16  ;;  %v597_v30 = vmul.f32 %v964_v9, %v864_v20 }
  0x14   : > { %v258_v22 = vmul.u32 52429, %v255_v13  ;;  %v259_v23 = vmul.u32 52428, %v255_v13  ;;  %v260_v24 = vmul.u32 52429, %v256_v14  ;;  %v261_v31 = vmul.u32 52428, %v256_v14 }
  0x15   : > { %vm237_vm0 = vc.u32 %v229_v6, %v233_v16  ;;  %v239_v26 = vadd.s32 %v233_v16, %v229_v6  ;;  %v236_v33 = vshrl.u32 %v231_v8, 16  ;;  %v986_v37 = vadd.f32 %v980_v21, %v597_v30 }
  0x16   : > { %v238_v29 = vsel %vm237_vm0, 1, %v907_v28  ;;  %v262_v32 = vshll.u32 %v259_v23, 16  ;;  %v264_v35 = vshll.u32 %v260_v24, 16  ;;  %v263_v40 = vshrl.u32 %v259_v23, 16 }
  0x17   : > { %v240_v34 = vadd.s32 %v238_v29, %v232_v11  ;;  %vm241_vm1 = vc.u32 %v239_v26, %v235_v17  ;;  %v598_v42 = vmul.f32 %v964_v9, %v865_v27  ;;  %v287_v44 = vmul.u32 52429, %v284_v18 }
  0x18   : > { %v242_v36 = vsel %vm241_vm1, 1, %v907_v28  ;;  %vm266_vm2 = vc.u32 %v258_v22, %v262_v32  ;;  %v268_v38 = vadd.s32 %v262_v32, %v258_v22  ;;  %v288_v45 = vmul.u32 52428, %v284_v18 }
  0x19   : > { %v244_v39 = vadd.s32 %v242_v36, %v240_v34  ;;  %v267_v41 = vsel %vm266_vm2, 1, %v907_v28  ;;  %v265_v47 = vshrl.u32 %v260_v24, 16  ;;  %v289_v49 = vmul.u32 52429, %v285_v19 }
  0x1a   : > { %v269_v43 = vadd.s32 %v267_v41, %v261_v31  ;;  %vm270_vm3 = vc.u32 %v268_v38, %v264_v35  ;;  %v621_v51 = vmax.f32 %v986_v37, 0.0  ;;  %v290_v53 = vmul.u32 52428, %v285_v19 }
  0x1b   : > { %v245_v46 = vadd.s32 %v244_v39, %v234_v25  ;;  %v271_v48 = vsel %vm270_vm3, 1, %v907_v28  ;;  %v291_v54 = vshll.u32 %v288_v45, 16  ;;  %v996_v56 = vadd.f32 %v980_v21, %v598_v42 }
  0x1c   : > { %v273_v52 = vadd.s32 %v271_v48, %v269_v43  ;;  %v292_v57 = vshrl.u32 %v288_v45, 16  ;;  %v293_v58 = vshll.u32 %v289_v49, 16  ;;  %v868_v61 = vunpack.c.l.bf16 %v992_v50 }
  0x1d   : > { %v246_v55 = vadd.s32 %v245_v46, %v236_v33  ;;  %vm295_vm4 = vc.u32 %v287_v44, %v291_v54  ;;  %v297_v60 = vadd.s32 %v291_v54, %v287_v44  ;;  %v313_v0 = vand.u32 65535, %v967_v10 }
  0x1e   : > { %v274_v59 = vadd.s32 %v273_v52, %v263_v40  ;;  %v296_v63 = vsel %vm295_vm4, 1, %v907_v28  ;;  %v314_v2 = vshrl.u32 %v967_v10, 16  ;;  %v599_v7 = vmul.f32 %v964_v9, %v868_v61 }
  0x1f   : > { %v247_v62 = vshrl.u32 %v246_v55, 3  ;;  %v298_v6 = vadd.s32 %v296_v63, %v290_v53  ;;  %vm299_vm6 = vc.u32 %v297_v60, %v293_v58  ;;  %v294_v11 = vshrl.u32 %v289_v49, 16 }
  0x20   : > { %v275_v3 = vadd.s32 %v274_v59, %v265_v47  ;;  %v300_v12 = vsel %vm299_vm6, 1, %v907_v28  ;;  %v317_v13 = vmul.u32 52428, %v313_v0  ;;  %v316_v17 = vmul.u32 52429, %v313_v0  ;;  %v1031_v59 = vld [vmem:[%s959_s20 + $0x10] sm:$0xff]  }
  0x21   : > { %v248_v8 = vmul.u32 10, %v247_v62  ;;  %v302_v16 = vadd.s32 %v300_v12, %v298_v6  ;;  %v318_v18 = vmul.u32 52429, %v314_v2  ;;  %v622_v20 = vmax.f32 %v996_v56, 0.0 }
  0x22   : > { %v276_v14 = vshrl.u32 %v275_v3, 3  ;;  %v1007_v22 = vadd.f32 %v980_v21, %v599_v7  ;;  %v320_v23 = vshll.u32 %v317_v13, 16  ;;  %v319_v26 = vmul.u32 52428, %v314_v2 }
  0x23   : > { %v249_v19 = vsub.s32 %v943_v1, %v248_v8  ;;  %v303_v25 = vadd.s32 %v302_v16, %v292_v57  ;;  %v321_v27 = vshrl.u32 %v317_v13, 16  ;;  %v322_v30 = vshll.u32 %v318_v18, 16 }
  0x24   : > { %v277_v24 = vmul.u32 10, %v276_v14  ;;  %vm324_vm10 = vc.u32 %v316_v17, %v320_v23  ;;  %v326_v33 = vadd.s32 %v320_v23, %v316_v17  ;;  %v869_v36 = vunpack.c.h.bf16 %v992_v50 }
  0x25   : > { %vm513_vm7 = vcmp.ne.s32.totalorder %v249_v19, 0  ;;  %vm523_vm8 = vcmp.lt.s32.totalorder %v249_v19, 0  ;;  %v543_v29 = vadd.s32 10, %v249_v19  ;;  %v304_v32 = vadd.s32 %v303_v25, %v294_v11 }
  0x26   : > { %vm533_vm9 = vmand %vm523_vm8, %vm513_vm7  ;;  %v278_v31 = vsub.s32 %v949_v4, %v277_v24  ;;  %v325_v35 = vsel %vm324_vm10, 1, %v907_v28  ;;  %v342_v37 = vand.u32 65535, %v973_v15  ;;  %vm328_vm15 = vc.u32 %v326_v33, %v322_v30 }
  0x27   : > { %v553_v34 = vsel %vm533_vm9, %v543_v29, %v249_v19  ;;  %v305_v40 = vshrl.u32 %v304_v32, 3  ;;  %v327_v41 = vadd.s32 %v325_v35, %v319_v26  ;;  %v323_v42 = vshrl.u32 %v318_v18, 16 }
  0x28   : > { %vm563_vm11 = vcmp.lt.s32.totalorder %v553_v34, 8  ;;  %vm514_vm12 = vcmp.ne.s32.totalorder %v278_v31, 0  ;;  %vm524_vm13 = vcmp.lt.s32.totalorder %v278_v31, 0  ;;  %v544_v38 = vadd.s32 10, %v278_v31 }
  0x29   : > { %v1013_v39 = vsel %vm563_vm11, %v621_v51, 0.0  ;;  %vm534_vm14 = vmand %vm524_vm13, %vm514_vm12  ;;  %v329_v43 = vsel %vm328_vm15, 1, %v907_v28  ;;  %v600_v44 = vmul.f32 %v964_v9, %v869_v36  ;;  %v306_v45 = vmul.u32 10, %v305_v40 }
  0x2a   : > { %683 = vst.msk [vmem:[#allocation2] sm:$0xff] %vm682_vm5, %v1013_v39  ;;  %v554_v4 = vsel %vm534_vm14, %v544_v38, %v278_v31  ;;  %v331_v46 = vadd.s32 %v329_v43, %v327_v41  ;;  %v343_v47 = vshrl.u32 %v973_v15, 16  ;;  %v345_v49 = vmul.u32 52429, %v342_v37 }
  0x2b   : > { %vm564_vm0 = vcmp.lt.s32.totalorder %v554_v4, 8  ;;  %v346_v50 = vmul.u32 52428, %v342_v37  ;;  %v307_v51 = vsub.s32 %v952_v5, %v306_v45  ;;  %v1026_v54 = vadd.s32 40, %v943_v1 }
  0x2c   : > { %v1020_v48 = vsel %vm564_vm0, %v622_v20, 0.0  ;;  %v332_v52 = vadd.s32 %v331_v46, %v321_v27  ;;  %v347_v53 = vmul.u32 52429, %v343_v47  ;;  %v623_v55 = vmax.f32 %v1007_v22, 0.0 }
  0x2d   : > { %684 = vst.msk [vmem:[#allocation2 + $0x8] sm:$0xff] %vm682_vm5, %v1020_v48  ;;  %v614_v56 = vadd.f32 %v980_v21, %v600_v44  ;;  %v348_v57 = vmul.u32 52428, %v343_v47  ;;  %v349_v58 = vshll.u32 %v346_v50, 16  ;;  %vm515_vm1 = vcmp.ne.s32.totalorder %v307_v51, 0  ;;  %v1061_v47 = vld [vmem:[%s959_s20 + $0x18] sm:$0xff]  }
  0x2e   : > { %vm525_vm2 = vcmp.lt.s32.totalorder %v307_v51, 0  ;;  %v545_v60 = vadd.s32 10, %v307_v51  ;;  %v333_v61 = vadd.s32 %v332_v52, %v323_v42  ;;  %v350_v62 = vshrl.u32 %v346_v50, 16 }
  0x2f   : > { %vm535_vm3 = vmand %vm525_vm2, %vm515_vm1  ;;  %v351_v5 = vshll.u32 %v347_v53, 16  ;;  %vm353_vm4 = vc.u32 %v345_v49, %v349_v58  ;;  %v355_v63 = vadd.s32 %v349_v58, %v345_v49  ;;  %v872_v6 = vunpack.c.l.bf16 %v1031_v59 }
  0x30   : > { %v555_v0 = vsel %vm535_vm3, %v545_v60, %v307_v51  ;;  %v334_v2 = vshrl.u32 %v333_v61, 3  ;;  %v354_v3 = vsel %vm353_vm4, 1, %v907_v28  ;;  %v371_v8 = vand.u32 65535, %v1026_v54 }
  0x31   : > { %vm565_vm6 = vcmp.lt.s32.totalorder %v555_v0, 8  ;;  %v356_v7 = vadd.s32 %v354_v3, %v348_v57  ;;  %vm357_vm7 = vc.u32 %v355_v63, %v351_v5  ;;  %v601_v14 = vmul.f32 %v964_v9, %v872_v6 }
  0x32   : > { %v1036_v11 = vsel %vm565_vm6, %v623_v55, 0.0  ;;  %v335_v12 = vmul.u32 10, %v334_v2  ;;  %v358_v13 = vsel %vm357_vm7, 1, %v907_v28  ;;  %v352_v16 = vshrl.u32 %v347_v53, 16 }
  0x33   : > { %685 = vst.msk [vmem:[#allocation2 + $0x10] sm:$0xff] %vm682_vm5, %v1036_v11  ;;  %v360_v17 = vadd.s32 %v358_v13, %v356_v7  ;;  %v372_v18 = vshrl.u32 %v1026_v54, 16  ;;  %v661_v19 = vpack.c.bf16 %v1013_v39, %v1013_v39  ;;  %v624_v22 = vmax.f32 %v614_v56, 0.0 }
  0x34   : > { %v336_v20 = vsub.s32 %v967_v10, %v335_v12  ;;  %v375_v23 = vmul.u32 52428, %v371_v8  ;;  %v374_v25 = vmul.u32 52429, %v371_v8  ;;  %v1047_v27 = vadd.s32 48, %v943_v1 }
  0x35   : > { %v361_v24 = vadd.s32 %v360_v17, %v350_v62  ;;  %v376_v26 = vmul.u32 52429, %v372_v18  ;;  %v615_v30 = vadd.f32 %v980_v21, %v601_v14  ;;  %v377_v32 = vmul.u32 52428, %v372_v18 }
  0x36   : > { %vm516_vm8 = vcmp.ne.s32.totalorder %v336_v20, 0  ;;  %vm526_vm9 = vcmp.lt.s32.totalorder %v336_v20, 0  ;;  %v546_v29 = vadd.s32 10, %v336_v20  ;;  %v378_v33 = vshll.u32 %v375_v23, 16 }
  0x37   : > { %vm536_vm10 = vmand %vm526_vm9, %vm516_vm8  ;;  %v362_v31 = vadd.s32 %v361_v24, %v352_v16  ;;  %v380_v34 = vshll.u32 %v376_v26, 16  ;;  %v662_v10 = vpack.c.bf16 %v1020_v48, %v1020_v48  ;;  %v873_v36 = vunpack.c.h.bf16 %v1031_v59 }
  0x38   : > { %v556_v35 = vsel %vm536_vm10, %v546_v29, %v336_v20  ;;  %v400_v37 = vand.u32 65535, %v1047_v27  ;;  %vm382_vm12 = vc.u32 %v374_v25, %v378_v33  ;;  %v384_v40 = vadd.s32 %v378_v33, %v374_v25 }
  0x39   : > { %vm566_vm11 = vcmp.lt.s32.totalorder %v556_v35, 8  ;;  %v363_v38 = vshrl.u32 %v362_v31, 3  ;;  %v625_v4 = vmax.f32 %v615_v30, 0.0  ;;  %v383_v42 = vsel %vm382_vm12, 1, %v907_v28 }
  0x3a   : > { %v1054_v41 = vsel %vm566_vm11, %v624_v22, 0.0  ;;  %v401_v43 = vshrl.u32 %v1047_v27, 16  ;;  %v379_v45 = vshrl.u32 %v375_v23, 16  ;;  %v385_v46 = vadd.s32 %v383_v42, %v377_v32 }
  0x3b   : > { %686 = vst.msk [vmem:[#allocation2 + $0x18] sm:$0xff] %vm682_vm5, %v1054_v41  ;;  %v364_v44 = vmul.u32 10, %v363_v38  ;;  %vm386_vm13 = vc.u32 %v384_v40, %v380_v34  ;;  %v602_v50 = vmul.f32 %v964_v9, %v873_v36  ;;  %v403_v51 = vmul.u32 52429, %v400_v37 }
  0x3c   : > { %v387_v49 = vsel %vm386_vm13, 1, %v907_v28  ;;  %v404_v52 = vmul.u32 52428, %v400_v37  ;;  %v381_v55 = vshrl.u32 %v376_v26, 16  ;;  %v405_v57 = vmul.u32 52429, %v401_v43 }
  0x3d   : > { %v365_v53 = vsub.s32 %v973_v15, %v364_v44  ;;  %v389_v56 = vadd.s32 %v387_v49, %v385_v46  ;;  %v406_v58 = vmul.u32 52428, %v401_v43  ;;  %v876_v60 = vunpack.c.l.bf16 %v1061_v47 }
  0x3e   : > { %v407_v59 = vshll.u32 %v404_v52, 16  ;;  %v1068_v61 = vadd.s32 56, %v943_v1  ;;  %v616_v63 = vadd.f32 %v980_v21, %v602_v50  ;;  %v409_v0 = vshll.u32 %v405_v57, 16 }
  0x3f   : > { %vm517_vm14 = vcmp.ne.s32.totalorder %v365_v53, 0  ;;  %vm527_vm15 = vcmp.lt.s32.totalorder %v365_v53, 0  ;;  %v547_v62 = vadd.s32 10, %v365_v53  ;;  %v390_v5 = vadd.s32 %v389_v56, %v379_v45 }
  0x40   : > { %vm537_vm0 = vmand %vm527_vm15, %vm517_vm14  ;;  %vm411_vm1 = vc.u32 %v403_v51, %v407_v59  ;;  %v413_v15 = vadd.s32 %v407_v59, %v403_v51  ;;  %v408_v6 = vshrl.u32 %v404_v52, 16  ;;  %v429_v12 = vand.u32 65535, %v1068_v61 }
  0x41   : > { %v557_v2 = vsel %vm537_vm0, %v547_v62, %v365_v53  ;;  %v391_v3 = vadd.s32 %v390_v5, %v381_v55  ;;  %v412_v7 = vsel %vm411_vm1, 1, %v907_v28  ;;  %v603_v17 = vmul.f32 %v964_v9, %v876_v60 }
  0x42   : > { %vm567_vm2 = vcmp.lt.s32.totalorder %v557_v2, 8  ;;  %v414_v8 = vadd.s32 %v412_v7, %v406_v58  ;;  %vm415_vm3 = vc.u32 %v413_v15, %v409_v0  ;;  %v663_v18 = vpack.c.bf16 %v1036_v11, %v1036_v11 }
  0x43   : > { %v1073_v13 = vsel %vm567_vm2, %v625_v4, 0.0  ;;  %v392_v14 = vshrl.u32 %v391_v3, 3  ;;  %v416_v16 = vsel %vm415_vm3, 1, %v907_v28  ;;  %v410_v20 = vshrl.u32 %v405_v57, 16 }
  0x44   : > { %687 = vst.msk [vmem:[#allocation2 + $0x20] sm:$0xff] %vm682_vm5, %v1073_v13  ;;  %v418_v22 = vadd.s32 %v416_v16, %v414_v8  ;;  %v430_v23 = vshrl.u32 %v1068_v61, 16  ;;  %v664_v24 = vpack.c.bf16 %v1054_v41, %v1054_v41  ;;  %v432_v26 = vmul.u32 52429, %v429_v12 }
  0x45   : > { %v393_v25 = vmul.u32 10, %v392_v14  ;;  %v433_v29 = vmul.u32 52428, %v429_v12  ;;  %v626_v30 = vmax.f32 %v616_v63, 0.0  ;;  %v1085_v33 = vadd.s32 64, %v943_v1  ;;  %v1103_v63 = vld [vmem:[%s959_s20 + $0x20] sm:$0xff]  }
  0x46   : > { %v419_v31 = vadd.s32 %v418_v22, %v408_v6  ;;  %v434_v32 = vmul.u32 52429, %v430_v23  ;;  %v617_v35 = vadd.f32 %v980_v21, %v603_v17  ;;  %v435_v36 = vmul.u32 52428, %v430_v23 }
  0x47   : > { %v394_v34 = vsub.s32 %v1026_v54, %v393_v25  ;;  %v436_v37 = vshll.u32 %v433_v29, 16  ;;  %v665_v38 = vpack.c.bf16 %v1073_v13, %v1073_v13  ;;  %v458_v42 = vand.u32 65535, %v1085_v33 }
  0x48   : > { %v420_v40 = vadd.s32 %v419_v31, %v410_v20  ;;  %v438_v4 = vshll.u32 %v434_v32, 16  ;;  %v877_v46 = vunpack.c.h.bf16 %v1061_v47  ;;  %v437_v50 = vshrl.u32 %v433_v29, 16 }
  0x49   : > { %vm518_vm4 = vcmp.ne.s32.totalorder %v394_v34, 0  ;;  %vm528_vm6 = vcmp.lt.s32.totalorder %v394_v34, 0  ;;  %v548_v43 = vadd.s32 10, %v394_v34  ;;  %vm440_vm7 = vc.u32 %v432_v26, %v436_v37 }
  0x4a   : > { %vm538_vm8 = vmand %vm528_vm6, %vm518_vm4  ;;  %v421_v44 = vshrl.u32 %v420_v40, 3  ;;  %v441_v45 = vsel %vm440_vm7, 1, %v907_v28  ;;  %v442_v54 = vadd.s32 %v436_v37, %v432_v26  ;;  %v459_v52 = vshrl.u32 %v1085_v33, 16 }
  0x4b   : > { %v558_v49 = vsel %vm538_vm8, %v548_v43, %v394_v34  ;;  %v443_v51 = vadd.s32 %v441_v45, %v435_v36  ;;  %v461_v55 = vmul.u32 52429, %v458_v42  ;;  %v462_v58 = vmul.u32 52428, %v458_v42  ;;  %v696_v45 = vld [vmem:[#allocation2] ss:$2 sm:$0xf] }
  0x4c   : > { %vm568_vm9 = vcmp.lt.s32.totalorder %v558_v49, 8  ;;  %v422_v53 = vmul.u32 10, %v421_v44  ;;  %vm444_vm10 = vc.u32 %v442_v54, %v438_v4  ;;  %v463_v59 = vmul.u32 52429, %v459_v52  ;;  %v698_v54 = vld [vmem:[#allocation2 + $0x1] ss:$2 sm:$0xf] }
  0x4d   : > { %v1095_v56 = vsel %vm568_vm9, %v626_v30, 0.0  ;;  %v445_v57 = vsel %vm444_vm10, 1, %v907_v28  ;;  %v439_v60 = vshrl.u32 %v434_v32, 16  ;;  %v604_v5 = vmul.f32 %v964_v9, %v877_v46  ;;  %v700_v46 = vld [vmem:[#allocation2 + $0xa] ss:$2 sm:$0xf] }
  0x4e   : > { %688 = vst.msk [vmem:[#allocation2 + $0x28] sm:$0xff] %vm682_vm5, %v1095_v56  ;;  %v423_v47 = vsub.s32 %v1047_v27, %v422_v53  ;;  %v447_v62 = vadd.s32 %v445_v57, %v443_v51  ;;  %v627_v0 = vmax.f32 %v617_v35, 0.0  ;;  %v464_v15 = vmul.u32 52428, %v459_v52  ;;  %v702_v53 = vld [vmem:[#allocation2 + $0xb] ss:$2 sm:$0xf] }
  0x4f   : > { %v465_v2 = vshll.u32 %v462_v58, 16  ;;  %v467_v3 = vshll.u32 %v463_v59, 16  ;;  %v880_v27 = vunpack.c.l.bf16 %v1103_v63  ;;  %v1107_v12 = vadd.s32 72, %v943_v1 }
  0x50   : > { %vm519_vm11 = vcmp.ne.s32.totalorder %v423_v47, 0  ;;  %vm529_vm12 = vcmp.lt.s32.totalorder %v423_v47, 0  ;;  %v549_v6 = vadd.s32 10, %v423_v47  ;;  %v448_v7 = vadd.s32 %v447_v62, %v437_v50 }
  0x51   : > { %vm539_vm13 = vmand %vm529_vm12, %vm519_vm11  ;;  %vm469_vm14 = vc.u32 %v461_v55, %v465_v2  ;;  %v471_v8 = vadd.s32 %v465_v2, %v461_v55  ;;  %v1110_v17 = vadd.f32 %v980_v21, %v604_v5  ;;  %v466_v22 = vshrl.u32 %v462_v58, 16  ;;  %v710_v58 = vld [vmem:[#allocation2 + $0x14] ss:$2 sm:$0xf] }
  0x52   : > { %v559_v14 = vsel %vm539_vm13, %v549_v6, %v423_v47  ;;  %v449_v16 = vadd.s32 %v448_v7, %v439_v60  ;;  %v470_v20 = vsel %vm469_vm14, 1, %v907_v28  ;;  %v487_v1 = vand.u32 65535, %v1107_v12  ;;  %v716_v7 = vld [vmem:[#allocation2 + $0x1f] ss:$2 sm:$0xf] }
  0x53   : > { %vm569_vm15 = vcmp.lt.s32.totalorder %v559_v14, 8  ;;  %v472_v23 = vadd.s32 %v470_v20, %v464_v15  ;;  %vm473_vm0 = vc.u32 %v471_v8, %v467_v3  ;;  %v468_v30 = vshrl.u32 %v463_v59, 16  ;;  %v712_v59 = vld [vmem:[#allocation2 + $0x15] ss:$2 sm:$0xf] }
  0x54   : > { %v1114_v25 = vsel %vm569_vm15, %v627_v0, 0.0  ;;  %v450_v26 = vshrl.u32 %v449_v16, 3  ;;  %v474_v29 = vsel %vm473_vm0, 1, %v907_v28  ;;  %v605_v32 = vmul.f32 %v964_v9, %v880_v27 }
  0x55   : > { %689 = vst.msk [vmem:[#allocation2 + $0x30] sm:$0xff] %vm682_vm5, %v1114_v25  ;;  %v476_v31 = vadd.s32 %v474_v29, %v472_v23  ;;  %v488_v34 = vshrl.u32 %v1107_v12, 16  ;;  %v628_v36 = vmax.f32 %v1110_v17, 0.0  ;;  %v490_v37 = vmul.u32 52429, %v487_v1 }
  0x56   : > { %v451_v35 = vmul.u32 10, %v450_v26  ;;  %v491_v40 = vmul.u32 52428, %v487_v1  ;;  %v666_v4 = vpack.c.bf16 %v1095_v56, %v1095_v56  ;;  %v881_v44 = vunpack.c.h.bf16 %v1103_v63  ;;  %v731_v20 = vld [vmem:[#allocation2 + $0x28] ss:$2 sm:$0xf] }
  0x57   : > { %v477_v42 = vadd.s32 %v476_v31, %v466_v22  ;;  %v1125_v43 = vmul.u32 52429, %v488_v34  ;;  %v667_v49 = vpack.c.bf16 %v1114_v25, %v1114_v25  ;;  %v493_v51 = vmul.u32 52428, %v488_v34  ;;  %v733_v25 = vld [vmem:[#allocation2 + $0x29] ss:$2 sm:$0xf] }
  0x58   : > { %v452_v50 = vsub.s32 %v1068_v61, %v451_v35  ;;  %v494_v52 = vshll.u32 %v491_v40, 16  ;;  %v619_v56 = vadd.f32 %v980_v21, %v605_v32  ;;  %vm671_vm1 = vcmask 125952   ;;  %v714_v61 = vld [vmem:[#allocation2 + $0x1e] ss:$2 sm:$0xf] }
  0x59   : > { %v478_v55 = vadd.s32 %v477_v42, %v468_v30  ;;  %v496_v57 = vshll.u32 %v1125_v43, 16  ;;  %693 = vst.msk [vmem:[%s1131_s28] sm:$0xf] %vm671_vm1, %v907_v28  ;;  %v495_v62 = vshrl.u32 %v491_v40, 16  ;;  %v703_v3 = vmax.f32 %v696_v45, %v698_v54 }
  0x5a   : > { %vm520_vm2 = vcmp.ne.s32.totalorder %v452_v50, 0  ;;  %vm530_vm3 = vcmp.lt.s32.totalorder %v452_v50, 0  ;;  %v550_v47 = vadd.s32 10, %v452_v50  ;;  %vm498_vm4 = vc.u32 %v490_v37, %v494_v52  ;;  %672 = vst.msk [vmem:[%s1138_s5] sm:$0xf] %vm671_vm1, %v661_v19 }
  0x5b   : > { %vm540_vm6 = vmand %vm530_vm3, %vm520_vm2  ;;  %v479_v60 = vshrl.u32 %v478_v55, 3  ;;  %v499_v5 = vsel %vm498_vm4, 1, %v907_v28  ;;  %v500_v0 = vadd.s32 %v494_v52, %v490_v37  ;;  %673 = vst.msk [vmem:[%s1138_s5 + $0x4] sm:$0xf] %vm671_vm1, %v662_v10  ;;  %v704_v6 = vmax.f32 %v700_v46, %v702_v53 }
  0x5c   : > { %v560_v15 = vsel %vm540_vm6, %v550_v47, %v452_v50  ;;  %v501_v2 = vadd.s32 %v499_v5, %v493_v51  ;;  %v497_v27 = vshrl.u32 %v1125_v43, 16  ;;  %674 = vst.msk [vmem:[%s1138_s5 + $0x8] sm:$0xf] %vm671_vm1, %v663_v18  ;;  %v717_v10 = vmax.f32 %v710_v58, %v712_v59 }
  0x5d   : > { %vm570_vm7 = vcmp.lt.s32.totalorder %v560_v15, 8  ;;  %v480_v8 = vmul.u32 10, %v479_v60  ;;  %vm502_vm8 = vc.u32 %v500_v0, %v496_v57  ;;  %675 = vst.msk [vmem:[%s1138_s5 + $0xc] sm:$0xf] %vm671_vm1, %v664_v24  ;;  %v705_v19 = vmax.f32 %v703_v3, %v704_v6 }
  0x5e   : > { %v658_v39 = vsel %vm570_vm7, %v628_v36, 0.0  ;;  %v503_v48 = vsel %vm502_vm8, 1, %v907_v28  ;;  %v718_v18 = vmax.f32 %v714_v61, %v716_v7  ;;  %v629_v17 = vmax.f32 %v619_v56, 0.0  ;;  %676 = vst.msk [vmem:[%s1138_s5 + $0x10] sm:$0xf] %vm671_vm1, %v665_v38 }
  0x5f   : > { %v668_v14 = vpack.c.bf16 %v658_v39, %v658_v39  ;;  %690 = vst.msk [vmem:[#allocation2 + $0x38] sm:$0xff] %vm682_vm5, %v658_v39  ;;  %v481_v16 = vsub.s32 %v1085_v33, %v480_v8  ;;  %v505_v11 = vadd.s32 %v503_v48, %v501_v2  ;;  %v606_v13 = vmul.f32 %v964_v9, %v881_v44 }
  0x60   : > { %677 = vst.msk [vmem:[%s1138_s5 + $0x14] sm:$0xf] %vm671_vm1, %v666_v4  ;;  %v719_v33 = vmax.f32 %v717_v10, %v718_v18  ;;  %v706_v38 = vpack.c.bf16 %v705_v19, %v705_v19  ;;  %vm707_vm13 = vcmask 123904   ;;  %vm726_vm14 = vcmask 125955  }
  0x61   : > { %vm521_vm9 = vcmp.ne.s32.totalorder %v481_v16, 0  ;;  %vm531_vm10 = vcmp.lt.s32.totalorder %v481_v16, 0  ;;  %v551_v41 = vadd.s32 10, %v481_v16  ;;  %v506_v24 = vadd.s32 %v505_v11, %v495_v62  ;;  %678 = vst.msk [vmem:[%s1138_s5 + $0x18] sm:$0xf] %vm671_vm1, %v667_v49 }
  0x62   : > { %vm541_vm11 = vmand %vm531_vm10, %vm521_vm9  ;;  %679 = vst.msk [vmem:[%s1138_s5 + $0x1c] sm:$0xf] %vm671_vm1, %v668_v14  ;;  %v720_v26 = vpack.c.bf16 %v719_v33, %v719_v33  ;;  %vm728_vm15 = vcmask 122880   ;;  %v738_v31 = vmax.f32 %v731_v20, %v733_v25  ;;  %v620_v34 = vadd.f32 %v980_v21, %v606_v13 }
  0x63   : > { %v561_v22 = vsel %vm541_vm11, %v551_v41, %v481_v16  ;;  %v507_v23 = vadd.s32 %v506_v24, %v497_v27  ;;  %694 = vst.msk [vmem:[%s1131_s28 + $0x4] sm:$0xf] %vm671_vm1, %v907_v28  ;;  %vm745_vm6 = vcmask 125954   ;;  %vm762_vm7 = vcmask 124929  }
  0x64   : > { %vm571_vm12 = vcmp.lt.s32.totalorder %v561_v22, 8  ;;  %695 = vst.msk [vmem:[%s1131_s28 + $0x8] sm:$0xf] %vm671_vm1, %v907_v28  ;;  %v722_v63 = vrot.slane %v720_v26, 5  ;;  %v630_v42 = vmax.f32 %v620_v34, 0.0 }
  0x65   : > { %v659_v29 = vsel %vm571_vm12, %v629_v17, 0.0  ;;  %v508_v1 = vshrl.u32 %v507_v23, 3  ;;  %708 = vst.msk [vmem:[%s1131_s28] sm:$0x3] %vm707_vm13, %v706_v38 }
  0x66   : > { %v669_v9 = vpack.c.bf16 %v659_v29, %v659_v29  ;;  %691 = vst.msk [vmem:[#allocation2 + $0x40] sm:$0xff] %vm682_vm5, %v659_v29  ;;  %v735_v30 = vld [vmem:[#allocation2 + $0x32] ss:$2 sm:$0xf]  ;;  %v723_v36 = vrot.slane %v722_v63, 4 }
  0x67   : > { %v509_v32 = vmul.u32 10, %v508_v1  ;;  %v737_v35 = vld [vmem:[#allocation2 + $0x33] ss:$2 sm:$0xf]  ;;  %727 = vst.msk [vmem:[%s1131_s28] sm:$0x8] %vm726_vm14, %v722_v63 }
  0x68   : > { %680 = vst.msk [vmem:[%s1138_s5 + $0x20] sm:$0xf] %vm671_vm1, %v669_v9  ;;  %v739_v37 = vmax.f32 %v735_v30, %v737_v35 }
  0x69   : > { %v510_v28 = vsub.s32 %v1107_v12, %v509_v32  ;;  %729 = vst.msk [vmem:[%s1131_s28 + $0x4] sm:$0x1] %vm728_vm15, %v723_v36 }
  0x6a   : > { %v740_v40 = vmax.f32 %v738_v31, %v739_v37 }
  0x6b   : > { %vm522_vm0 = vcmp.ne.s32.totalorder %v510_v28, 0  ;;  %vm532_vm2 = vcmp.lt.s32.totalorder %v510_v28, 0  ;;  %v552_v4 = vadd.s32 10, %v510_v28 }
  0x6c   : > { %vm542_vm3 = vmand %vm532_vm2, %vm522_vm0  ;;  %v741_v43 = vpack.c.bf16 %v740_v40, %v740_v40 }
  0x6d   : > { %v562_v21 = vsel %vm542_vm3, %v552_v4, %v510_v28  ;;  %v748_v12 = vld [vmem:[#allocation2 + $0x3c] ss:$2 sm:$0xf]  ;;  %v750_v46 = vld [vmem:[#allocation2 + $0x3d] ss:$2 sm:$0xf] }
  0x6e   : > { %vm572_vm4 = vcmp.lt.s32.totalorder %v562_v21, 8  ;;  %v743_v44 = vrot.slane %v741_v43, 6  ;;  %v755_v49 = vmax.f32 %v748_v12, %v750_v46 }
  0x6f   : > { %v660_v45 = vsel %vm572_vm4, %v630_v42, 0.0 }
  0x70   : > { %v670_v54 = vpack.c.bf16 %v660_v45, %v660_v45  ;;  %692 = vst.msk [vmem:[#allocation2 + $0x48] sm:$0xff] %vm682_vm5, %v660_v45 }
  0x71   : > { %746 = vst.msk [vmem:[%s1131_s28 + $0x4] sm:$0xc] %vm745_vm6, %v743_v44 }
  0x72   : > { %681 = vst.msk [vmem:[%s1138_s5 + $0x24] sm:$0xf] %vm671_vm1, %v670_v54 }
  0x77   : > { %v752_v50 = vld [vmem:[#allocation2 + $0x46] ss:$2 sm:$0xf]  ;;  %v754_v51 = vld [vmem:[#allocation2 + $0x47] ss:$2 sm:$0xf] }
  0x78   : > { %v756_v52 = vmax.f32 %v752_v50, %v754_v51 }
  0x7a   : > { %v757_v53 = vmax.f32 %v755_v49, %v756_v52 }
  0x7c   : > { %v758_v55 = vpack.c.bf16 %v757_v53, %v757_v53 }
  0x7e   : > { %v760_v56 = vrot.slane %v758_v55, 7 }
  0x80   : > { %763 = vst.msk [vmem:[%s1131_s28 + $0x8] sm:$0x6] %vm762_vm7, %v760_v56 }
  0x81 PF: > { %s15_s15 = sadd.s32 1, %s905_s15  }
  0x82   : > { %p12_p4 = scmp.ge.s32.totalorder %s15_s15, 4  }
  0x84   :  { %14 = sbr.rel (!%p12_p4) target bundleno = 1 (0x1), region = 89 }

// kernel: encoder_forward.8
= control target key start
LH: loop header
LB: loop body
LE: loop exit
PB: predicated region body
PF: predicated region fallthrough
CT: control target
= control target key end

     0   :  { %s1716_s18 = smov 0   ;;  %s2274_s0 = inlined_call_operand.vmem [shape: bf16[2,80,8], index: 0, kind: input, shape index: {}]   ;;  %s2275_s1 = inlined_call_operand.vmem [shape: bf16[3,3,8,16], index: 1, kind: input, shape index: {}]   ;;  %s2276_s2 = inlined_call_operand.vmem [shape: f32[1,16], index: 2, kind: input, shape index: {}]   ;;  %s2277_s3 = inlined_call_operand.vmem [shape: bf16[2,80,16], index: 3, kind: output, shape index: {0}]   ;;  %s2278_s4 = inlined_call_operand.vmem [shape: f32[2,1,16], index: 4, kind: output, shape index: {1}]   ;;  %s2279_s5 = inlined_call_operand.vmem [shape: f32[2,1,16], index: 5, kind: output, shape index: {2}]  }
   0x1 LB: > { %s1575_s19 = sadd.s32 4294967295, %s1682_s18   ;;  %p1579_p0 = scmp.ge.s32.totalorder %s1682_s18, 1  ;;  %s1682_s18 = sphi %s1716_s18, %s16_s18  }
   0x2   : > { %p192_p1 = scmp.lt.s32.totalorder %s1682_s18, 3 }
   0x4   : > { %p193_p2 = pnand %p1579_p0, %p192_p1 }
   0x5   : > { %p226_p3 = scmp.lt.s32.totalorder (!%p193_p2), %s1575_s19, 1 }
   0x6   : > { %196 = sbr.rel (%p193_p2) target bundleno = 382 (0x17e), region = 32 }
   0xb   : > { %v1582_v0 = vld [vmem:[%s2275_s1 + $0x4] sm:$0xf]  ;;  %vm698_vm0 = vcmask 1043456   ;;  %vm604_vm1 = vcmask 64512   ;;  %v1684_v2 = vmov 0.0   ;;  %s2309_s19 = smov (!%p226_p3, %s1575_s19), 1 }
   0xc   : > { %v700_v1 = vsel %vm698_vm0, %v1582_v0, 0  ;;  %606 = vst.msk [vmem:[#allocation2 + $0x8] sm:$0xff] %vm604_vm1, %v1684_v2  ;;  %v1593_v3 = vld [vmem:[%s2275_s1 + $0x8] sm:$0xf]  ;;  %v665_v5 = vld [vmem:[%s2275_s1] sm:$0xf] }
   0xd   : > { %1661 = vmatpush.bf16.msra.mxu1 %v700_v1  ;;  %1662 = vmatpush.bf16.msra.mxu2 %v700_v1  ;;  %607 = vst.msk [vmem:[#allocation2 + $0x10] sm:$0xff] %vm604_vm1, %v1684_v2  ;;  %v821_v4 = vsel %vm698_vm0, %v1593_v3, 0  ;;  %v752_v6 = vsel %vm698_vm0, %v665_v5, 0  ;;  %s1664_s26 = smul.u32 40, %s2309_s19  ;;  %v1599_v14 = vld [vmem:[%s2275_s1 + $0xc] sm:$0xf] }
   0xe   : > { %608 = vst.msk [vmem:[#allocation2 + $0x18] sm:$0xff] %vm604_vm1, %v1684_v2  ;;  %1663 = vmatpush.bf16.msra.mxu3 %v700_v1  ;;  %709 = vmatpush.bf16.msra.mxu0 %v700_v1  ;;  %v900_v16 = vsel %vm698_vm0, %v1599_v14, 0  ;;  %v1605_v21 = vld [vmem:[%s2275_s1 + $0x10] sm:$0xf]  ;;  %v1617_v38 = vld [vmem:[%s2275_s1 + $0x18] sm:$0xf] }
   0xf   : > { %609 = vst.msk [vmem:[#allocation2 + $0x20] sm:$0xff] %vm604_vm1, %v1684_v2  ;;  %s230_s29 = scalar_lea.vmem %s2274_s0, %s1664_s26  ;;  %v979_v24 = vsel %vm698_vm0, %v1605_v21, 0  ;;  %v1623_v39 = vld [vmem:[%s2275_s1 + $0x1c] sm:$0xf]  ;;  %v1137_v41 = vsel %vm698_vm0, %v1617_v38, 0  ;;  %s2036_s23 = scalar_lea.vmem %s2277_s3, %s1664_s26 }
  0x10   : > { %605 = vst.msk [vmem:[#allocation2] sm:$0xff] %vm604_vm1, %v1684_v2  ;;  %v1638_v7 = vld [vmem:[%s230_s29] sm:$0xff]   ;;  %v1657_v8 = vld [vmem:[%s230_s29 + $0x8] sm:$0xff]   ;;  %v1658_v12 = vld [vmem:[%s230_s29 + $0x10] sm:$0xff]   ;;  %v1216_v42 = vsel %vm698_vm0, %v1623_v39, 0  ;;  %s238_s26 = scalar_lea.vmem %s2278_s4, %s2309_s19 }
  0x11   : > { %830 = vmatpush.bf16.msrb.mxu2 %v821_v4  ;;  %761 = vmatpush.bf16.msrb.mxu1 %v752_v6  ;;  %610 = vst.msk [vmem:[#allocation2 + $0x28] sm:$0xff] %vm604_vm1, %v1684_v2  ;;  %v1639_v9 = vunpack.c.l.bf16 %v1638_v7  ;;  %v1640_v10 = vunpack.c.h.bf16 %v1638_v7  ;;  %v1643_v11 = vunpack.c.l.bf16 %v1657_v8  ;;  %v1659_v13 = vld [vmem:[%s230_s29 + $0x18] sm:$0xff]   ;;  %v1644_v15 = vunpack.c.h.bf16 %v1657_v8  ;;  %v1762_v18 = vld [vmem:[%s230_s29 + $0x20] sm:$0xff]   ;;  %v1611_v43 = vld [vmem:[%s2275_s1 + $0x14] sm:$0xf]  ;;  %s241_s29 = scalar_lea.vmem %s2279_s5, %s2309_s19 }
  0x12   : > { %611 = vst.msk [vmem:[#allocation2 + $0x30] sm:$0xff] %vm604_vm1, %v1684_v2  ;;  %v1647_v17 = vunpack.c.l.bf16 %v1658_v12  ;;  %909 = vmatpush.bf16.msrb.mxu3 %v900_v16  ;;  %v1651_v20 = vunpack.c.l.bf16 %v1659_v13  ;;  %v1652_v22 = vunpack.c.h.bf16 %v1659_v13  ;;  %v1655_v26 = vunpack.c.l.bf16 %v1762_v18  ;;  %988 = vmatpush.bf16.msrb.mxu0 %v979_v24  ;;  %v1629_v48 = vld [vmem:[%s2275_s1 + $0x20] sm:$0xf] }
  0x13   : > { %612 = vst.msk [vmem:[#allocation2 + $0x38] sm:$0xff] %vm604_vm1, %v1684_v2  ;;  %v1648_v29 = vunpack.c.h.bf16 %v1658_v12  ;;  %v1058_v46 = vsel %vm698_vm0, %v1611_v43, 0  ;;  %v1295_v49 = vsel %vm698_vm0, %v1629_v48, 0  ;;  %v1656_v13 = vunpack.c.h.bf16 %v1762_v18 }
  0x14   : > { %640 = vst.msk [vmem:[#allocation2 + $0xb] sm:$0xff] %vm604_vm1, %v1639_v9 }
  0x15   : > { %641 = vst.msk [vmem:[#allocation2 + $0x13] sm:$0xff] %vm604_vm1, %v1640_v10 }
  0x16   : > { %642 = vst.msk [vmem:[#allocation2 + $0x1b] sm:$0xff] %vm604_vm1, %v1643_v11 }
  0x17   : > { %613 = vst.msk [vmem:[#allocation2 + $0x40] sm:$0xff] %vm604_vm1, %v1684_v2  ;;  %v666_v19 = vld [vmem:[#allocation2 + $0x1] sm:$0xff] }
  0x18   : > { %614 = vst.msk [vmem:[#allocation2 + $0x48] sm:$0xff] %vm604_vm1, %v1684_v2  ;;  %v650_v44 = vld [vmem:[#allocation2] sm:$0xff] }
  0x19   : > { %615 = vst.msk [vmem:[#allocation2 + $0x50] sm:$0xff] %vm604_vm1, %v1684_v2  ;;  %v788_v63 = vld [vmem:[#allocation2 + $0x2] sm:$0xff] }
  0x1a   : > { %616 = vst.msk [vmem:[#allocation2 + $0x58] sm:$0xff] %vm604_vm1, %v1684_v2 }
  0x1b   : > { %617 = vst.msk [vmem:[#allocation2 + $0x60] sm:$0xff] %vm604_vm1, %v1684_v2  ;;  %v667_v23 = vld [vmem:[#allocation2 + $0x9] sm:$0xff] }
  0x1c   : > { %v668_v25 = vld [vmem:[#allocation2 + $0x11] sm:$0xff]  ;;  %643 = vst.msk [vmem:[#allocation2 + $0x23] sm:$0xff] %vm604_vm1, %v1644_v15  ;;  %v676_v27 = vpack.c.bf16 %v667_v23, %v666_v19  ;;  %v651_v45 = vld [vmem:[#allocation2 + $0x8] sm:$0xff] }
  0x1d   : > { %v669_v28 = vld [vmem:[#allocation2 + $0x19] sm:$0xff]  ;;  %644 = vst.msk [vmem:[#allocation2 + $0x2b] sm:$0xff] %vm604_vm1, %v1647_v17  ;;  %v946_v35 = vld [vmem:[#allocation2 + $0xb] sm:$0xff]  ;;  %v660_v50 = vpack.c.bf16 %v651_v45, %v650_v44 }
  0x1e   : > { %v677_v30 = vpack.c.bf16 %v669_v28, %v668_v25  ;;  %646 = vst.msk [vmem:[#allocation2 + $0x3b] sm:$0xff] %vm604_vm1, %v1651_v20  ;;  %1583 = vmatmul.msk.bf16.vlgmr.msra.gmra.mxu0 %vm604_vm1, %v676_v27  ;;  %v947_v36 = vld [vmem:[#allocation2 + $0x13] sm:$0xff]  ;;  %v867_v54 = vld [vmem:[#allocation2 + $0xa] sm:$0xff]  ;;  %v948_v57 = vld [vmem:[#allocation2 + $0x1b] sm:$0xff] }
  0x1f   : > { %647 = vst.msk [vmem:[#allocation2 + $0x43] sm:$0xff] %vm604_vm1, %v1652_v22  ;;  %v956_v47 = vpack.c.bf16 %v947_v36, %v946_v35  ;;  %1304 = vmatpush.bf16.msra.mxu0 %v1295_v49  ;;  %v868_v55 = vld [vmem:[#allocation2 + $0x12] sm:$0xff]  ;;  %v798_v0 = vpack.c.bf16 %v867_v54, %v788_v63  ;;  %v869_v1 = vld [vmem:[#allocation2 + $0x1a] sm:$0xff] }
  0x20   : > { %1584 = vmatmul.msk.bf16.vlgmr.msra.gmra.mxu1 %vm604_vm1, %v677_v30  ;;  %648 = vst.msk [vmem:[#allocation2 + $0x4b] sm:$0xff] %vm604_vm1, %v1655_v26  ;;  %v877_v56 = vpack.c.bf16 %v868_v55, %v867_v54  ;;  %v652_v59 = vld [vmem:[#allocation2 + $0x10] sm:$0xff]  ;;  %v653_v60 = vld [vmem:[#allocation2 + $0x18] sm:$0xff]  ;;  %v799_v10 = vpack.c.bf16 %v869_v1, %v868_v55 }
  0x21   : > { %645 = vst.msk [vmem:[#allocation2 + $0x33] sm:$0xff] %vm604_vm1, %v1648_v29  ;;  %1067 = vmatpush.bf16.msra.mxu1 %v1058_v46  ;;  %v661_v62 = vpack.c.bf16 %v653_v60, %v652_v59  ;;  %v1262_v35 = vld [vmem:[#allocation2 + $0x16] sm:$0xff] }
  0x22   : > { %649 = vst.msk [vmem:[#allocation2 + $0x53] sm:$0xff] %vm604_vm1, %v1656_v13  ;;  %v1026_v38 = vld [vmem:[#allocation2 + $0x14] sm:$0xff] }
  0x23   : > { %v670_v31 = vld [vmem:[#allocation2 + $0x21] sm:$0xff] }
  0x24   : > { %v671_v32 = vld [vmem:[#allocation2 + $0x29] sm:$0xff]  ;;  %v654_v6 = vld [vmem:[#allocation2 + $0x20] sm:$0xff] }
  0x25   : > { %v678_v33 = vpack.c.bf16 %v671_v32, %v670_v31  ;;  %v949_v58 = vld [vmem:[#allocation2 + $0x23] sm:$0xff]  ;;  %v950_v4 = vld [vmem:[#allocation2 + $0x2b] sm:$0xff]  ;;  %v952_v15 = vld [vmem:[#allocation2 + $0x3b] sm:$0xff] }
  0x26   : > { %v674_v34 = vld [vmem:[#allocation2 + $0x41] sm:$0xff]  ;;  %v957_v61 = vpack.c.bf16 %v949_v58, %v948_v57  ;;  %v871_v11 = vld [vmem:[#allocation2 + $0x2a] sm:$0xff] }
  0x27   : > { %1585 = vmatmul.msk.bf16.vlgmr.msra.gmra.mxu2 %vm604_vm1, %v678_v33  ;;  %v675_v37 = vld [vmem:[#allocation2 + $0x49] sm:$0xff]  ;;  %v658_v27 = vld [vmem:[#allocation2 + $0x40] sm:$0xff] }
  0x28   : > { %v680_v40 = vpack.c.bf16 %v675_v37, %v674_v34  ;;  %1146 = vmatpush.bf16.msra.mxu2 %v1137_v41  ;;  %v672_v51 = vld [vmem:[#allocation2 + $0x31] sm:$0xff]  ;;  %v673_v52 = vld [vmem:[#allocation2 + $0x39] sm:$0xff]  ;;  %v870_v2 = vld [vmem:[#allocation2 + $0x22] sm:$0xff] }
  0x29   : > { %v679_v53 = vpack.c.bf16 %v673_v52, %v672_v51  ;;  %v878_v3 = vpack.c.bf16 %v870_v2, %v869_v1  ;;  %v951_v5 = vld [vmem:[#allocation2 + $0x33] sm:$0xff]  ;;  %v655_v7 = vld [vmem:[#allocation2 + $0x28] sm:$0xff]  ;;  %v800_v22 = vpack.c.bf16 %v871_v11, %v870_v2  ;;  %v1263_v36 = vld [vmem:[#allocation2 + $0x1e] sm:$0xff] }
  0x2a   : > { %1587 = vmatmul.msk.bf16.vlgmr.msra.gmra.mxu3 %vm604_vm1, %v680_v40  ;;  %v958_v8 = vpack.c.bf16 %v951_v5, %v950_v4  ;;  %v662_v9 = vpack.c.bf16 %v655_v7, %v654_v6  ;;  %v872_v12 = vld [vmem:[#allocation2 + $0x32] sm:$0xff]  ;;  %v953_v16 = vld [vmem:[#allocation2 + $0x43] sm:$0xff]  ;;  %v873_v23 = vld [vmem:[#allocation2 + $0x3a] sm:$0xff]  ;;  %v1272_v39 = vpack.c.bf16 %v1263_v36, %v1262_v35 }
  0x2b   : > { %1225 = vmatpush.bf16.msra.mxu3 %v1216_v42  ;;  %v879_v14 = vpack.c.bf16 %v872_v12, %v871_v11  ;;  %v656_v17 = vld [vmem:[#allocation2 + $0x30] sm:$0xff]  ;;  %v657_v19 = vld [vmem:[#allocation2 + $0x38] sm:$0xff]  ;;  %v959_v20 = vpack.c.bf16 %v953_v16, %v952_v15  ;;  %v874_v18 = vld [vmem:[#allocation2 + $0x42] sm:$0xff]  ;;  %v801_v31 = vpack.c.bf16 %v873_v23, %v872_v12 }
  0x2c   : > { %v663_v21 = vpack.c.bf16 %v657_v19, %v656_v17  ;;  %v880_v24 = vpack.c.bf16 %v874_v18, %v873_v23  ;;  %v954_v25 = vld [vmem:[#allocation2 + $0x4b] sm:$0xff]  ;;  %v955_v26 = vld [vmem:[#allocation2 + $0x53] sm:$0xff]  ;;  %v1184_v43 = vld [vmem:[#allocation2 + $0x1d] sm:$0xff] }
  0x2d   : > { %v659_v28 = vld [vmem:[#allocation2 + $0x48] sm:$0xff]  ;;  %v960_v29 = vpack.c.bf16 %v955_v26, %v954_v25  ;;  %v876_v33 = vld [vmem:[#allocation2 + $0x52] sm:$0xff]  ;;  %v1188_v1 = vld [vmem:[#allocation2 + $0x3d] sm:$0xff] }
  0x2e   : > { %1606 = vmatmul.msk.bf16.vlgmr.msrb.gmra.mxu0 %vm604_vm1, %v956_v47  ;;  %v664_v30 = vpack.c.bf16 %v659_v28, %v658_v27  ;;  %v875_v32 = vld [vmem:[#allocation2 + $0x4a] sm:$0xff]  ;;  %v1183_v42 = vld [vmem:[#allocation2 + $0x15] sm:$0xff]  ;;  %v1271_v26 = vld [vmem:[#allocation2 + $0x5e] sm:$0xff] }
  0x2f   : > { %v881_v34 = vpack.c.bf16 %v876_v33, %v875_v32  ;;  %v1025_v37 = vld [vmem:[#allocation2 + $0xc] sm:$0xff]  ;;  %v802_v41 = vpack.c.bf16 %v875_v32, %v874_v18  ;;  %v1193_v44 = vpack.c.bf16 %v1184_v43, %v1183_v42  ;;  %v1027_v47 = vld [vmem:[#allocation2 + $0x1c] sm:$0xff]  ;;  %v1028_v48 = vld [vmem:[#allocation2 + $0x24] sm:$0xff] }
  0x30   : > { %1588 = vmatmul.msk.bf16.vlgmr.msrb.gmra.mxu1 %vm604_vm1, %v660_v50  ;;  %v1035_v40 = vpack.c.bf16 %v1026_v38, %v1025_v37  ;;  %v1264_v45 = vld [vmem:[#allocation2 + $0x26] sm:$0xff]  ;;  %v1265_v46 = vld [vmem:[#allocation2 + $0x2e] sm:$0xff]  ;;  %v1036_v50 = vpack.c.bf16 %v1028_v48, %v1027_v47  ;;  %v1114_v51 = vpack.c.bf16 %v1027_v47, %v1026_v38  ;;  %v1266_v55 = vld [vmem:[#allocation2 + $0x36] sm:$0xff] }
  0x31   : > { %v1273_v49 = vpack.c.bf16 %v1265_v46, %v1264_v45  ;;  %v1185_v52 = vld [vmem:[#allocation2 + $0x25] sm:$0xff]  ;;  %v1030_v58 = vld [vmem:[#allocation2 + $0x34] sm:$0xff]  ;;  %v1031_v7 = vld [vmem:[#allocation2 + $0x3c] sm:$0xff] }
  0x32   : > { %v1029_v57 = vld [vmem:[#allocation2 + $0x2c] sm:$0xff]  ;;  %v1116_v17 = vpack.c.bf16 %v1031_v7, %v1030_v58  ;;  %v1270_v25 = vld [vmem:[#allocation2 + $0x56] sm:$0xff] }
  0x33   : > { %v1115_v63 = vpack.c.bf16 %v1029_v57, %v1028_v48  ;;  %v1268_v5 = vld [vmem:[#allocation2 + $0x46] sm:$0xff]  ;;  %v1269_v6 = vld [vmem:[#allocation2 + $0x4e] sm:$0xff] }
  0x34   : > { %v1189_v19 = vld [vmem:[#allocation2 + $0x45] sm:$0xff]  ;;  %v1034_v28 = vld [vmem:[#allocation2 + $0x54] sm:$0xff] }
  0x35   : > { %v1033_v27 = vld [vmem:[#allocation2 + $0x4c] sm:$0xff]  ;;  %v1191_v38 = vld [vmem:[#allocation2 + $0x55] sm:$0xff] }
  0x37   : > { %1586 = vmatmul.msk.bf16.gmra.mxu2 %vm604_vm1, %v679_v53  ;;  %v1186_v53 = vld [vmem:[#allocation2 + $0x2d] sm:$0xff] }
  0x38   : > { %v1194_v54 = vpack.c.bf16 %v1186_v53, %v1185_v52  ;;  %v1113_v52 = vld [vmem:[#allocation2 + $0x5c] sm:$0xff] }
  0x3a   : > { %1600 = vmatmul.msk.bf16.vlgmr.msrb.gmra.mxu3 %vm604_vm1, %v877_v56  ;;  %v1267_v56 = vld [vmem:[#allocation2 + $0x3e] sm:$0xff] }
  0x3b   : > { %v1274_v59 = vpack.c.bf16 %v1267_v56, %v1266_v55  ;;  %v1118_v56 = vpack.c.bf16 %v1113_v52, %v1034_v28 }
  0x3e   : > { %1607 = vmatmul.msk.bf16.gmra.mxu0 %vm604_vm1, %v957_v61  ;;  %v1037_v61 = vpack.c.bf16 %v1030_v58, %v1029_v57 }
  0x40   : > { %1589 = vmatmul.msk.bf16.gmra.mxu1 %vm604_vm1, %v661_v62 }
  0x47   : > { %1594 = vmatmul.msk.bf16.vlgmr.msrb.gmra.mxu2 %vm604_vm1, %v798_v0  ;;  %v1187_v0 = vld [vmem:[#allocation2 + $0x35] sm:$0xff] }
  0x48   : > { %v1195_v4 = vpack.c.bf16 %v1188_v1, %v1187_v0 }
  0x4a   : > { %1601 = vmatmul.msk.bf16.gmra.mxu3 %vm604_vm1, %v878_v3 }
  0x4e   : > { %1608 = vmatmul.msk.bf16.gmra.mxu0 %vm604_vm1, %v958_v8  ;;  %v1032_v8 = vld [vmem:[#allocation2 + $0x44] sm:$0xff] }
  0x4f   : > { %v1038_v12 = vpack.c.bf16 %v1032_v8, %v1031_v7  ;;  %v1117_v37 = vpack.c.bf16 %v1033_v27, %v1032_v8 }
  0x50   : > { %1590 = vmatmul.msk.bf16.gmra.mxu1 %vm604_vm1, %v662_v9 }
  0x57   : > { %1595 = vmatmul.msk.bf16.gmra.mxu2 %vm604_vm1, %v799_v10  ;;  %v1275_v10 = vpack.c.bf16 %v1269_v6, %v1268_v5 }
  0x5a   : > { %1602 = vmatmul.msk.bf16.gmra.mxu3 %vm604_vm1, %v879_v14 }
  0x5e   : > { %1609 = vmatmul.msk.bf16.gmra.mxu0 %vm604_vm1, %v959_v20  ;;  %v1190_v20 = vld [vmem:[#allocation2 + $0x4d] sm:$0xff] }
  0x60   : > { %1591 = vmatmul.msk.bf16.gmra.mxu1 %vm604_vm1, %v663_v21 }
  0x67   : > { %1596 = vmatmul.msk.bf16.gmra.mxu2 %vm604_vm1, %v800_v22 }
  0x6a   : > { %1603 = vmatmul.msk.bf16.gmra.mxu3 %vm604_vm1, %v880_v24  ;;  %v1196_v24 = vpack.c.bf16 %v1190_v20, %v1189_v19 }
  0x6e   : > { %1610 = vmatmul.msk.bf16.gmra.mxu0 %vm604_vm1, %v960_v29 }
  0x70   : > { %1592 = vmatmul.msk.bf16.gmra.mxu1 %vm604_vm1, %v664_v30  ;;  %v1276_v30 = vpack.c.bf16 %v1271_v26, %v1270_v25 }
  0x77   : > { %1597 = vmatmul.msk.bf16.gmra.mxu2 %vm604_vm1, %v801_v31  ;;  %v1039_v31 = vpack.c.bf16 %v1034_v28, %v1033_v27 }
  0x7a   : > { %1604 = vmatmul.msk.bf16.gmra.mxu3 %vm604_vm1, %v881_v34 }
  0x7e   : > { %1630 = vmatmul.msk.bf16.vlgmr.msra.gmra.mxu0 %vm604_vm1, %v1272_v39  ;;  %v1192_v39 = vld [vmem:[#allocation2 + $0x5d] sm:$0xff] }
  0x7f   : > { %v1197_v43 = vpack.c.bf16 %v1192_v39, %v1191_v38 }
  0x80   : > { %1612 = vmatmul.msk.bf16.vlgmr.msra.gmra.mxu1 %vm604_vm1, %v1035_v40 }
  0x87   : > { %1598 = vmatmul.msk.bf16.gmra.mxu2 %vm604_vm1, %v802_v41 }
  0x8a   : > { %1624 = vmatmul.msk.bf16.vlgmr.msra.gmra.mxu3 %vm604_vm1, %v1193_v44 }
  0x8e   : > { %1631 = vmatmul.msk.bf16.gmra.mxu0 %vm604_vm1, %v1273_v49 }
  0x90   : > { %1613 = vmatmul.msk.bf16.gmra.mxu1 %vm604_vm1, %v1036_v50 }
  0x97   : > { %1618 = vmatmul.msk.bf16.vlgmr.msra.gmra.mxu2 %vm604_vm1, %v1114_v51 }
  0x9a   : > { %1625 = vmatmul.msk.bf16.gmra.mxu3 %vm604_vm1, %v1194_v54 }
  0x9b   : > { %v711_v60 = vpop.f32.mrf.mxu0 }
  0x9d   : > { %v716_v62 = vpop.f32.mrf.mxu1 }
  0x9e   : > { %1632 = vmatmul.msk.bf16.gmra.mxu0 %vm604_vm1, %v1274_v59 }
  0xa0   : > { %1614 = vmatmul.msk.bf16.gmra.mxu1 %vm604_vm1, %v1037_v61 }
  0xa3   : > { %v713_v2 = vpop.f32.mrf.mxu0 }
  0xa5   : > { %v718_v3 = vpop.f32.mrf.mxu1 }
  0xa7   : > { %1619 = vmatmul.msk.bf16.gmra.mxu2 %vm604_vm1, %v1115_v63 }
  0xaa   : > { %v721_v9 = vpop.f32.mrf.mxu2  ;;  %1626 = vmatmul.msk.bf16.gmra.mxu3 %vm604_vm1, %v1195_v4 }
  0xab   : > { %v990_v11 = vpop.f32.mrf.mxu0 }
  0xad   : > { %v1831_v13 = vpop.f32.mrf.mxu3  ;;  %v763_v14 = vpop.f32.mrf.mxu1 }
  0xae   : > { %v764_v15 = vadd.f32 %v763_v14, %v711_v60  ;;  %1633 = vmatmul.msk.bf16.gmra.mxu0 %vm604_vm1, %v1275_v10 }
  0xb0   : > { %1615 = vmatmul.msk.bf16.gmra.mxu1 %vm604_vm1, %v1038_v12  ;;  %v243_v12 = vlaneseq }
  0xb2   : > { %v723_v16 = vpop.f32.mrf.mxu2 }
  0xb3   : > { %v992_v21 = vpop.f32.mrf.mxu0 }
  0xb5   : > { %v1835_v22 = vpop.f32.mrf.mxu3  ;;  %v765_v23 = vpop.f32.mrf.mxu1 }
  0xb6   : > { %v766_v18 = vadd.f32 %v765_v23, %v713_v2 }
  0xb7   : > { %1620 = vmatmul.msk.bf16.gmra.mxu2 %vm604_vm1, %v1116_v17 }
  0xba   : > { %v726_v29 = vpop.f32.mrf.mxu2  ;;  %1627 = vmatmul.msk.bf16.gmra.mxu3 %vm604_vm1, %v1196_v24 }
  0xbb   : > { %v995_v32 = vpop.f32.mrf.mxu0 }
  0xbd   : > { %v768_v33 = vpop.f32.mrf.mxu1  ;;  %v911_v34 = vpop.f32.mrf.mxu3 }
  0xbe   : > { %v769_v35 = vadd.f32 %v768_v33, %v716_v62  ;;  %1634 = vmatmul.msk.bf16.gmra.mxu0 %vm604_vm1, %v1276_v30  ;;  %v1685_v33 = vmov 0  }
  0xc0   : > { %1616 = vmatmul.msk.bf16.gmra.mxu1 %vm604_vm1, %v1039_v31 }
  0xc2   : > { %v728_v36 = vpop.f32.mrf.mxu2 }
  0xc3   : > { %v997_v44 = vpop.f32.mrf.mxu0 }
  0xc5   : > { %v770_v40 = vpop.f32.mrf.mxu1  ;;  %v913_v41 = vpop.f32.mrf.mxu3 }
  0xc6   : > { %v771_v42 = vadd.f32 %v770_v40, %v718_v3 }
  0xc7   : > { %1621 = vmatmul.msk.bf16.gmra.mxu2 %vm604_vm1, %v1117_v37 }
  0xca   : > { %v832_v45 = vpop.f32.mrf.mxu2  ;;  %1628 = vmatmul.msk.bf16.gmra.mxu3 %vm604_vm1, %v1197_v43 }
  0xcb   : > { %v857_v46 = vadd.f32 %v832_v45, %v764_v15  ;;  %v1000_v53 = vpop.f32.mrf.mxu0  ;;  %v1854_v15 = vshrl.u32 %v243_v12, 7 }
  0xcd   : > { %v936_v47 = vadd.f32 %v911_v34, %v857_v46  ;;  %v773_v48 = vpop.f32.mrf.mxu1  ;;  %v916_v49 = vpop.f32.mrf.mxu3  ;;  %v257_v17 = vand.u32 65535, %v1854_v15 }
  0xce   : > { %v774_v50 = vadd.f32 %v773_v48, %v721_v9 }
  0xcf   : > { %v1843_v51 = vadd.f32 %v990_v11, %v936_v47  ;;  %v261_v23 = vmul.u32 52428, %v257_v17  ;;  %v260_v26 = vmul.u32 52429, %v257_v17 }
  0xd1   : > { %v264_v28 = vshll.u32 %v261_v23, 16 }
  0xd2   : > { %v834_v54 = vpop.f32.mrf.mxu2 }
  0xd3   : > { %v858_v55 = vadd.f32 %v834_v54, %v766_v18  ;;  %v1002_v63 = vpop.f32.mrf.mxu0  ;;  %vm268_vm2 = vc.u32 %v260_v26, %v264_v28 }
  0xd4   : > { %v269_v34 = vsel %vm268_vm2, 1, %v1685_v33 }
  0xd5   : > { %v937_v57 = vadd.f32 %v913_v41, %v858_v55  ;;  %v775_v58 = vpop.f32.mrf.mxu1  ;;  %v918_v59 = vpop.f32.mrf.mxu3  ;;  %v265_v41 = vshrl.u32 %v261_v23, 16 }
  0xd6   : > { %v776_v60 = vadd.f32 %v775_v58, %v723_v16 }
  0xd7   : > { %1622 = vmatmul.msk.bf16.gmra.mxu2 %vm604_vm1, %v1118_v56  ;;  %v1846_v61 = vadd.f32 %v992_v21, %v937_v57  ;;  %v258_v21 = vshrl.u32 %v1854_v15, 16 }
  0xd9   : > { %v262_v27 = vmul.u32 52429, %v258_v21  ;;  %v263_v31 = vmul.u32 52428, %v258_v21 }
  0xda   : > { %v837_v62 = vpop.f32.mrf.mxu2 }
  0xdb   : > { %v859_v0 = vadd.f32 %v837_v62, %v769_v35  ;;  %v1850_v8 = vpop.f32.mrf.mxu0  ;;  %v270_v35 = vadd.s32 %v264_v28, %v260_v26  ;;  %v271_v38 = vadd.s32 %v269_v34, %v263_v31  ;;  %v267_v54 = vshrl.u32 %v262_v27, 16 }
  0xdc   : > { %v1898_v31 = vadd.s32 24, %v1854_v15 }
  0xdd   : > { %v938_v1 = vadd.f32 %v916_v49, %v859_v0  ;;  %v778_v2 = vpop.f32.mrf.mxu1  ;;  %v921_v3 = vpop.f32.mrf.mxu3 }
  0xde   : > { %v779_v4 = vadd.f32 %v778_v2, %v726_v29 }
  0xdf   : > { %v1848_v5 = vadd.f32 %v995_v32, %v938_v1  ;;  %v266_v32 = vshll.u32 %v262_v27, 16 }
  0xe1   : > { %vm272_vm3 = vc.u32 %v270_v35, %v266_v32 }
  0xe2   : > { %v839_v6 = vpop.f32.mrf.mxu2 }
  0xe3   : > { %v860_v7 = vadd.f32 %v839_v6, %v771_v42  ;;  %v1863_v30 = vpop.f32.mrf.mxu0  ;;  %v273_v42 = vsel %vm272_vm3, 1, %v1685_v33  ;;  %vm1459_vm3 = vcmask 125952  }
  0xe5   : > { %v939_v9 = vadd.f32 %v918_v59, %v860_v7  ;;  %v780_v10 = vpop.f32.mrf.mxu1  ;;  %v923_v11 = vpop.f32.mrf.mxu3 }
  0xe6   : > { %v1852_v14 = vadd.f32 %v780_v10, %v728_v36  ;;  %v1867_v36 = vadd.s32 8, %v1854_v15 }
  0xe7   : > { %v1856_v16 = vadd.f32 %v997_v44, %v939_v9  ;;  %v275_v44 = vadd.s32 %v273_v42, %v271_v38  ;;  %v344_v38 = vand.u32 65535, %v1898_v31 }
  0xe8   : > { %v287_v43 = vshrl.u32 %v1867_v36, 16 }
  0xe9   : > { %v276_v55 = vadd.s32 %v275_v44, %v265_v41  ;;  %v345_v41 = vshrl.u32 %v1898_v31, 16 }
  0xea   : > { %v842_v19 = vpop.f32.mrf.mxu2  ;;  %v292_v0 = vmul.u32 52428, %v287_v43 }
  0xeb   : > { %v861_v20 = vadd.f32 %v842_v19, %v774_v50  ;;  %v1874_v50 = vmul.u32 52429, %v287_v43  ;;  %v1881_v57 = vpop.f32.mrf.mxu0 }
  0xed   : > { %v940_v18 = vadd.f32 %v921_v3, %v861_v20  ;;  %v783_v24 = vpop.f32.mrf.mxu1  ;;  %v926_v25 = vpop.f32.mrf.mxu3  ;;  %v295_v58 = vshll.u32 %v1874_v50, 16  ;;  %v277_v3 = vadd.s32 %v276_v55, %v267_v54  ;;  %v296_v42 = vshrl.u32 %v1874_v50, 16 }
  0xee   : > { %v1861_v29 = vadd.f32 %v783_v24, %v1831_v13  ;;  %v286_v13 = vand.u32 65535, %v1867_v36 }
  0xef   : > { %v1869_v37 = vadd.f32 %v1000_v53, %v940_v18  ;;  %v278_v21 = vshrl.u32 %v277_v3, 3 }
  0xf0   : > { %v290_v45 = vmul.u32 52428, %v286_v13  ;;  %v289_v49 = vmul.u32 52429, %v286_v13 }
  0xf1   : > { %v279_v35 = vmul.u32 10, %v278_v21 }
  0xf2   : > { %v844_v39 = vpop.f32.mrf.mxu2  ;;  %v293_v53 = vshll.u32 %v290_v45, 16  ;;  %v294_v27 = vshrl.u32 %v290_v45, 16 }
  0xf3   : > { %v862_v40 = vadd.f32 %v844_v39, %v776_v60  ;;  %v1885_v60 = vadd.s32 16, %v1854_v15  ;;  %v1894_v26 = vpop.f32.mrf.mxu0 }
  0xf4   : > { %vm297_vm4 = vc.u32 %v289_v49, %v293_v53  ;;  %v299_v59 = vadd.s32 %v293_v53, %v289_v49  ;;  %v1911_v53 = vsub.s32 %v1854_v15, %v279_v35 }
  0xf5   : > { %v941_v46 = vadd.f32 %v923_v11, %v862_v40  ;;  %v785_v47 = vpop.f32.mrf.mxu1  ;;  %v928_v48 = vpop.f32.mrf.mxu3  ;;  %v315_v1 = vand.u32 65535, %v1885_v60  ;;  %v298_v2 = vsel %vm297_vm4, 1, %v1685_v33 }
  0xf6   : > { %v1877_v52 = vadd.f32 %v785_v47, %v1835_v22  ;;  %vm301_vm5 = vc.u32 %v299_v59, %v295_v58  ;;  %v300_v10 = vadd.s32 %v298_v2, %v292_v0  ;;  %v349_v47 = vmul.u32 52429, %v345_v41 }
  0xf7   : > { %v1879_v56 = vadd.f32 %v1002_v63, %v941_v46  ;;  %v316_v63 = vshrl.u32 %v1885_v60, 16  ;;  %v319_v6 = vmul.u32 52428, %v315_v1  ;;  %v318_v11 = vmul.u32 52429, %v315_v1 }
  0xf8   : > { %v302_v12 = vsel %vm301_vm5, 1, %v1685_v33  ;;  %v347_v46 = vmul.u32 52429, %v344_v38  ;;  %v353_v55 = vshll.u32 %v349_v47, 16  ;;  %v1914_v58 = vadd.s32 32, %v1854_v15 }
  0xf9   : > { %v320_v17 = vmul.u32 52429, %v316_v63  ;;  %v322_v19 = vshll.u32 %v319_v6, 16  ;;  %v323_v44 = vshrl.u32 %v319_v6, 16  ;;  %vm544_vm9 = vcmp.ne.s32.totalorder %v1911_v53, 0 }
  0xfa   : > { %v847_v62 = vpop.f32.mrf.mxu2  ;;  %vm554_vm11 = vcmp.lt.s32.totalorder %v1911_v53, 0  ;;  %vm1385_vm5 = vcmask 130048  }
  0xfb   : > { %v863_v22 = vadd.f32 %v847_v62, %v779_v4  ;;  %v321_v4 = vmul.u32 52428, %v316_v63  ;;  %v324_v23 = vshll.u32 %v320_v17, 16  ;;  %vm326_vm6 = vc.u32 %v318_v11, %v322_v19  ;;  %v1917_v2 = vpop.f32.mrf.mxu0  ;;  %vm1940_vm12 = vmand %vm554_vm11, %vm544_vm9 }
  0xfc   : > { %v328_v18 = vadd.s32 %v322_v19, %v318_v11  ;;  %v327_v28 = vsel %vm326_vm6, 1, %v1685_v33  ;;  %v325_v62 = vshrl.u32 %v320_v17, 16  ;;  %v373_v63 = vand.u32 65535, %v1914_v58 }
  0xfd   : > { %v942_v7 = vadd.f32 %v926_v25, %v863_v22  ;;  %v931_v9 = vpop.f32.mrf.mxu3  ;;  %v304_v25 = vadd.s32 %v302_v12, %v300_v10  ;;  %v1901_v34 = vpop.f32.mrf.mxu1 }
  0xfe   : > { %vm330_vm7 = vc.u32 %v328_v18, %v324_v23  ;;  %v377_v23 = vmul.u32 52428, %v373_v63 }
  0xff   : > { %v1892_v20 = vadd.f32 %v1850_v8, %v942_v7  ;;  %v329_v8 = vadd.s32 %v327_v28, %v321_v4  ;;  %v331_v40 = vsel %vm330_vm7, 1, %v1685_v33  ;;  %v305_v43 = vadd.s32 %v304_v25, %v294_v27 }
 0x100   : > { %v376_v4 = vmul.u32 52429, %v373_v63  ;;  %v354_v25 = vshrl.u32 %v349_v47, 16 }
 0x101   : > { %v333_v45 = vadd.s32 %v331_v40, %v329_v8  ;;  %v306_v50 = vadd.s32 %v305_v43, %v296_v42  ;;  %v380_v8 = vshll.u32 %v377_v23, 16 }
 0x102   : > { %v849_v24 = vpop.f32.mrf.mxu2 }
 0x103   : > { %v864_v32 = vadd.f32 %v849_v24, %v1852_v14  ;;  %v348_v14 = vmul.u32 52428, %v344_v38  ;;  %v334_v0 = vadd.s32 %v333_v45, %v323_v44  ;;  %v307_v12 = vshrl.u32 %v306_v50, 3 }
 0x104   : > { %v1931_v24 = vadd.s32 40, %v1854_v15  ;;  %vm384_vm13 = vc.u32 %v376_v4, %v380_v8  ;;  %v381_v50 = vshrl.u32 %v377_v23, 16 }
 0x105   : > { %v943_v39 = vadd.f32 %v928_v48, %v864_v32  ;;  %v933_v13 = vpop.f32.mrf.mxu3  ;;  %v350_v48 = vmul.u32 52428, %v345_v41  ;;  %v351_v54 = vshll.u32 %v348_v14, 16  ;;  %v1922_v7 = vpop.f32.mrf.mxu1  ;;  %v335_v17 = vadd.s32 %v334_v0, %v325_v62 }
 0x106   : > { %v402_v43 = vand.u32 65535, %v1931_v24  ;;  %v385_v44 = vsel %vm384_vm13, 1, %v1685_v33  ;;  %v403_v45 = vshrl.u32 %v1931_v24, 16 }
 0x107   : > { %v1908_v49 = vadd.f32 %v1863_v30, %v943_v39  ;;  %vm355_vm8 = vc.u32 %v347_v46, %v351_v54  ;;  %v357_v22 = vadd.s32 %v351_v54, %v347_v46  ;;  %v352_v30 = vshrl.u32 %v348_v14, 16 }
 0x108   : > { %v356_v3 = vsel %vm355_vm8, 1, %v1685_v33  ;;  %v308_v39 = vmul.u32 10, %v307_v12  ;;  %v336_v40 = vshrl.u32 %v335_v17, 3 }
 0x109   : > { %v358_v11 = vadd.s32 %v356_v3, %v350_v48  ;;  %vm359_vm10 = vc.u32 %v357_v22, %v353_v55  ;;  %v1953_v55 = vpop.f32.mrf.mxu0  ;;  %v1961_v22 = vmul.u32 52429, %v403_v45  ;;  %v1964_v3 = vadd.s32 48, %v1854_v15 }
 0x10a   : > { %v852_v59 = vpop.f32.mrf.mxu2  ;;  %v360_v19 = vsel %vm359_vm10, 1, %v1685_v33 }
 0x10b   : > { %v865_v1 = vadd.f32 %v852_v59, %v1861_v29  ;;  %v374_v29 = vshrl.u32 %v1914_v58, 16  ;;  %v362_v21 = vadd.s32 %v360_v19, %v358_v11  ;;  %v337_v59 = vmul.u32 10, %v336_v40 }
 0x10d   : > { %v944_v6 = vadd.f32 %v931_v9, %v865_v1  ;;  %v1924_v10 = vpop.f32.mrf.mxu3  ;;  %v378_v18 = vmul.u32 52429, %v374_v29  ;;  %v574_v9 = vadd.s32 10, %v1911_v53  ;;  %v363_v28 = vadd.s32 %v362_v21, %v352_v30  ;;  %v1958_v62 = vpop.f32.mrf.mxu1 }
 0x10e   : > { %v379_v32 = vmul.u32 52428, %v374_v29  ;;  %v406_v1 = vmul.u32 52428, %v402_v43  ;;  %v405_v30 = vmul.u32 52429, %v402_v43  ;;  %v1978_v17 = vsub.s32 %v1885_v60, %v337_v59 }
 0x10f   : > { %v1934_v27 = vadd.f32 %v1881_v57, %v944_v6  ;;  %v382_v41 = vshll.u32 %v378_v18, 16  ;;  %v386_v57 = vadd.s32 %v380_v8, %v376_v4  ;;  %v584_v14 = vsel %vm1940_vm12, %v574_v9, %v1911_v53 }
 0x110   : > { %v364_v48 = vadd.s32 %v363_v28, %v354_v25  ;;  %v387_v54 = vadd.s32 %v385_v44, %v379_v32  ;;  %v383_v0 = vshrl.u32 %v378_v18, 16  ;;  %vm1971_vm15 = vcmp.lt.s32.totalorder %v584_v14, 8  ;;  %v1987_v25 = vld [vmem:[%s2276_s2] ss:$0 sm:$0xff] }
 0x111   : > { %vm388_vm14 = vc.u32 %v386_v57, %v382_v41  ;;  %v409_v29 = vshll.u32 %v406_v1, 16  ;;  %v408_v4 = vmul.u32 52428, %v403_v45  ;;  %v431_v18 = vand.u32 65535, %v1964_v3 }
 0x112   : > { %v854_v35 = vpop.f32.mrf.mxu2  ;;  %v365_v11 = vshrl.u32 %v364_v48, 3  ;;  %v1095_v8 = vadd.f32 %v1922_v7, %v1846_v61  ;;  %vm546_vm6 = vcmp.ne.s32.totalorder %v1978_v17, 0  ;;  %vm556_vm7 = vcmp.lt.s32.totalorder %v1978_v17, 0  ;;  %v2007_v61 = vpop.f32.mrf.mxu0 }
 0x113   : > { %v866_v42 = vadd.f32 %v854_v35, %v1877_v52  ;;  %v1956_v52 = vsub.s32 %v1867_v36, %v308_v39  ;;  %v1094_v36 = vadd.f32 %v1901_v34, %v1843_v51  ;;  %v411_v51 = vshll.u32 %v1961_v22, 16  ;;  %vm2021_vm9 = vmand %vm556_vm7, %vm546_vm6 }
 0x114   : > { %vm413_vm2 = vc.u32 %v405_v30, %v409_v29  ;;  %v415_v23 = vadd.s32 %v409_v29, %v405_v30  ;;  %v366_v28 = vmul.u32 10, %v365_v11  ;;  %v432_v35 = vshrl.u32 %v1964_v3, 16 }
 0x115   : > { %v945_v46 = vadd.f32 %v933_v13, %v866_v42  ;;  %v1951_v47 = vpop.f32.mrf.mxu3  ;;  %v389_v13 = vsel %vm388_vm14, 1, %v1685_v33  ;;  %vm545_vm0 = vcmp.ne.s32.totalorder %v1956_v52, 0  ;;  %vm555_vm1 = vcmp.lt.s32.totalorder %v1956_v52, 0  ;;  %v1076_v44 = vpop.f32.mrf.mxu1 }
 0x116   : > { %v391_v53 = vadd.s32 %v389_v13, %v387_v54  ;;  %v575_v21 = vadd.s32 10, %v1956_v52  ;;  %vm1991_vm4 = vmand %vm555_vm1, %vm545_vm0  ;;  %v414_v32 = vsel %vm413_vm2, 1, %v1685_v33  ;;  %v410_v39 = vshrl.u32 %v406_v1, 16 }
 0x117   : > { %v1967_v63 = vadd.f32 %v1894_v26, %v945_v46  ;;  %v416_v40 = vadd.s32 %v414_v32, %v408_v4  ;;  %vm417_vm8 = vc.u32 %v415_v23, %v411_v51  ;;  %v2010_v57 = vmul.u32 52428, %v431_v18 }
 0x118   : > { %v392_v19 = vadd.s32 %v391_v53, %v381_v50  ;;  %v585_v41 = vsel %vm1991_vm4, %v575_v21, %v1956_v52  ;;  %v418_v42 = vsel %vm417_vm8, 1, %v1685_v33  ;;  %v2015_v45 = vsub.s32 %v1898_v31, %v366_v28 }
 0x119   : > { %v420_v46 = vadd.s32 %v418_v42, %v416_v40  ;;  %v412_v54 = vshrl.u32 %v1961_v22, 16  ;;  %v434_v52 = vmul.u32 52429, %v431_v18  ;;  %v2026_v59 = vmul.u32 52429, %v432_v35 }
 0x11a   : > { %v1148_v12 = vpop.f32.mrf.mxu2  ;;  %v393_v34 = vadd.s32 %v392_v19, %v383_v0  ;;  %v2029_v50 = vadd.s32 56, %v1854_v15  ;;  %v438_v1 = vshll.u32 %v2010_v57, 16  ;;  %v1096_v22 = vadd.f32 %v1958_v62, %v1848_v5  ;;  %v2077_v28 = vpop.f32.mrf.mxu0 }
 0x11b   : > { %v1173_v26 = vadd.f32 %v1148_v12, %v1094_v36  ;;  %v421_v13 = vadd.s32 %v420_v46, %v410_v39  ;;  %vm2043_vm10 = vcmp.lt.s32.totalorder %v585_v41, 8  ;;  %v2048_v11 = vadd.f32 %v1076_v44, %v1856_v16 }
 0x11c   : > { %v394_v7 = vshrl.u32 %v393_v34, 3  ;;  %v437_v12 = vmul.u32 52428, %v432_v35  ;;  %vm547_vm11 = vcmp.ne.s32.totalorder %v2015_v45, 0  ;;  %v440_v62 = vshll.u32 %v2026_v59, 16 }
 0x11d   : > { %v1252_v9 = vadd.f32 %v1924_v10, %v1173_v26  ;;  %v1998_v10 = vpop.f32.mrf.mxu3  ;;  %v422_v5 = vadd.s32 %v421_v13, %v412_v54  ;;  %v460_v19 = vand.u32 65535, %v2029_v50  ;;  %vm557_vm12 = vcmp.lt.s32.totalorder %v2015_v45, 0 }
 0x11e   : > { %v395_v36 = vmul.u32 10, %v394_v7  ;;  %v2062_v16 = vadd.s32 10, %v2015_v45  ;;  %vm442_vm13 = vc.u32 %v434_v52, %v438_v1  ;;  %v444_v51 = vadd.s32 %v438_v1, %v434_v52  ;;  %vm2094_vm0 = vmand %vm557_vm12, %vm547_vm11 }
 0x11f   : > { %v1331_v38 = vadd.f32 %v1917_v2, %v1252_v9  ;;  %v576_v2 = vadd.s32 10, %v1978_v17  ;;  %v443_v4 = vsel %vm442_vm13, 1, %v1685_v33  ;;  %v423_v32 = vshrl.u32 %v422_v5, 3 }
 0x120   : > { %v2071_v21 = vsub.s32 %v1914_v58, %v395_v36  ;;  %v445_v9 = vadd.s32 %v443_v4, %v437_v12  ;;  %v2080_v58 = vmul.u32 52428, %v460_v19  ;;  %v463_v48 = vmul.u32 52429, %v460_v19 }
 0x121   : > { %v1345_v43 = vadd.f32 %v1987_v25, %v1331_v38  ;;  %v586_v29 = vsel %vm2021_vm9, %v576_v2, %v1978_v17  ;;  %v1079_v38 = vpop.f32.mrf.mxu1  ;;  %v424_v52 = vmul.u32 10, %v423_v32 }
 0x122   : > { %v1150_v14 = vpop.f32.mrf.mxu2  ;;  %vm2064_vm14 = vcmp.lt.s32.totalorder %v586_v29, 8  ;;  %vm548_vm1 = vcmp.ne.s32.totalorder %v2071_v21, 0  ;;  %vm558_vm2 = vcmp.lt.s32.totalorder %v2071_v21, 0  ;;  %v2113_v36 = vadd.s32 10, %v2071_v21 }
 0x123   : > { %v1375_v31 = vsel %vm1971_vm15, %v1345_v43, 0.0  ;;  %v1174_v0 = vadd.f32 %v1150_v14, %v1095_v8  ;;  %v439_v8 = vshrl.u32 %v2010_v57, 16  ;;  %vm446_vm15 = vc.u32 %v444_v51, %v440_v62  ;;  %vm2132_vm7 = vmand %vm558_vm2, %vm548_vm1 }
 0x124   : > { %v1449_v53 = vpack.c.bf16 %v1375_v31, %v1375_v31  ;;  %v1386_v34 = vsel %vm1385_vm5, %v1375_v31, 0.0  ;;  %v1413_v23 = vmul.f32 %v1375_v31, %v1375_v31  ;;  %v447_v40 = vsel %vm446_vm15, 1, %v1685_v33 }
 0x125   : > { %v1253_v6 = vadd.f32 %v1951_v47, %v1174_v0  ;;  %v2068_v17 = vpop.f32.mrf.mxu3  ;;  %v449_v44 = vadd.s32 %v447_v40, %v445_v9  ;;  %v441_v31 = vshrl.u32 %v2026_v59, 16  ;;  %v2116_v12 = vsub.s32 %v1931_v24, %v424_v52  ;;  %v1316_v24 = vpop.f32.mrf.mxu0 }
 0x126   : > { %1460 = vst.msk [vmem:[%s2036_s23] sm:$0xf] %vm1459_vm3, %v1449_v53  ;;  %v1423_v57 = vsel %vm1385_vm5, %v1413_v23, 0.0  ;;  %v587_v53 = vsel %vm2094_vm0, %v2062_v16, %v2015_v45  ;;  %v2120_v62 = vadd.s32 64, %v1854_v15  ;;  %v1098_v32 = vadd.f32 %v1079_v38, %v1869_v37 }
 0x127   : > { %v1332_v26 = vadd.f32 %v1953_v55, %v1253_v6  ;;  %v461_v55 = vshrl.u32 %v2029_v50, 16  ;;  %v450_v0 = vadd.s32 %v449_v44, %v439_v8  ;;  %vm2142_vm8 = vcmp.lt.s32.totalorder %v587_v53, 8 }
 0x128   : > { %v588_v37 = vsel %vm2132_vm7, %v2113_v36, %v2071_v21  ;;  %vm549_vm9 = vcmp.ne.s32.totalorder %v2116_v12, 0  ;;  %v2163_v14 = vadd.s32 72, %v1854_v15 }
 0x129   : > { %v1346_v18 = vadd.f32 %v1987_v25, %v1332_v26  ;;  %v2085_v41 = vmul.u32 52429, %v461_v55  ;;  %v466_v1 = vmul.u32 52428, %v461_v55  ;;  %v451_v5 = vadd.s32 %v450_v0, %v441_v31 }
 0x12a   : > { %v1153_v60 = vpop.f32.mrf.mxu2  ;;  %vm598_vm13 = vcmp.lt.s32.totalorder %v588_v37, 8 }
 0x12b   : > { %v1376_v35 = vsel %vm2043_vm10, %v1346_v18, 0.0  ;;  %v1175_v39 = vadd.f32 %v1153_v60, %v1096_v22  ;;  %v467_v22 = vshll.u32 %v2080_v58, 16  ;;  %v469_v30 = vshll.u32 %v2085_v41, 16  ;;  %v1081_v18 = vpop.f32.mrf.mxu1 }
 0x12c   : > { %v1387_v7 = vsel %vm1385_vm5, %v1376_v35, 0.0  ;;  %v1414_v42 = vmul.f32 %v1376_v35, %v1376_v35  ;;  %v1450_v43 = vpack.c.bf16 %v1376_v35, %v1376_v35  ;;  %v489_v60 = vand.u32 65535, %v2120_v62 }
 0x12d   : > { %v1388_v2 = vadd.f32 %v1387_v7, %v1386_v34  ;;  %v1254_v46 = vadd.f32 %v1998_v10, %v1175_v39  ;;  %vm471_vm4 = vc.u32 %v463_v48, %v467_v22  ;;  %v1237_v29 = vpop.f32.mrf.mxu3  ;;  %v468_v34 = vshrl.u32 %v2080_v58, 16  ;;  %v1318_v36 = vpop.f32.mrf.mxu0 }
 0x12e   : > { %v1424_v54 = vsel %vm1385_vm5, %v1414_v42, 0.0  ;;  %1461 = vst.msk [vmem:[%s2036_s23 + $0x4] sm:$0xf] %vm1459_vm3, %v1450_v43  ;;  %v472_v45 = vsel %vm471_vm4, 1, %v1685_v33  ;;  %v452_v58 = vshrl.u32 %v451_v5, 3  ;;  %v490_v7 = vshrl.u32 %v2120_v62, 16 }
 0x12f   : > { %v1425_v13 = vadd.f32 %v1424_v54, %v1423_v57  ;;  %v1333_v10 = vadd.f32 %v2007_v61, %v1254_v46  ;;  %v473_v61 = vadd.s32 %v467_v22, %v463_v48  ;;  %v474_v16 = vadd.s32 %v472_v45, %v466_v1 }
 0x130   : > { %v1099_v42 = vadd.f32 %v1081_v18, %v1879_v56  ;;  %v470_v38 = vshrl.u32 %v2085_v41, 16  ;;  %v493_v57 = vmul.u32 52428, %v489_v60  ;;  %vm559_vm10 = vcmp.lt.s32.totalorder %v2116_v12, 0 }
 0x131   : > { %v1347_v59 = vadd.f32 %v1987_v25, %v1333_v10  ;;  %vm475_vm6 = vc.u32 %v473_v61, %v469_v30  ;;  %v2160_v56 = vadd.s32 10, %v2116_v12  ;;  %v453_v46 = vmul.u32 10, %v452_v58  ;;  %vm2172_vm11 = vmand %vm559_vm10, %vm549_vm9 }
 0x132   : > { %v1155_v6 = vpop.f32.mrf.mxu2  ;;  %v476_v47 = vsel %vm475_vm6, 1, %v1685_v33  ;;  %v492_v48 = vmul.u32 52429, %v489_v60  ;;  %v496_v54 = vshll.u32 %v493_v57, 16  ;;  %v495_v53 = vmul.u32 52428, %v490_v7 }
 0x133   : > { %v1377_v19 = vsel %vm2064_vm14, %v1347_v59, 0.0  ;;  %v1176_v26 = vadd.f32 %v1155_v6, %v2048_v11  ;;  %v2181_v61 = vsub.s32 %v1964_v3, %v453_v46  ;;  %v518_v6 = vand.u32 65535, %v2163_v14 }
 0x134   : > { %v1389_v4 = vsel %vm1385_vm5, %v1377_v19, 0.0  ;;  %v1415_v51 = vmul.f32 %v1377_v19, %v1377_v19  ;;  %v1451_v55 = vpack.c.bf16 %v1377_v19, %v1377_v19  ;;  %vm500_vm12 = vc.u32 %v492_v48, %v496_v54 }
 0x135   : > { %v1390_v23 = vadd.f32 %v1389_v4, %v1388_v2  ;;  %v1255_v9 = vadd.f32 %v2068_v17, %v1176_v26  ;;  %v478_v17 = vadd.s32 %v476_v47, %v474_v16  ;;  %v2156_v2 = vmul.u32 52429, %v490_v7  ;;  %v1084_v26 = vpop.f32.mrf.mxu1  ;;  %v1321_v46 = vpop.f32.mrf.mxu0 }
 0x136   : > { %v1426_v8 = vsel %vm1385_vm5, %v1415_v51, 0.0  ;;  %1462 = vst.msk [vmem:[%s2036_s23 + $0x8] sm:$0xf] %vm1459_vm3, %v1451_v55  ;;  %v502_v19 = vadd.s32 %v496_v54, %v492_v48  ;;  %v589_v16 = vsel %vm2172_vm11, %v2160_v56, %v2116_v12  ;;  %v501_v51 = vsel %vm500_vm12, 1, %v1685_v33 }
 0x137   : > { %v1427_v35 = vadd.f32 %v1426_v8, %v1425_v13  ;;  %v1334_v40 = vadd.f32 %v2077_v28, %v1255_v9  ;;  %v479_v43 = vadd.s32 %v478_v17, %v468_v34  ;;  %v1239_v13 = vpop.f32.mrf.mxu3  ;;  %v498_v30 = vshll.u32 %v2156_v2, 16 }
 0x138   : > { %v497_v55 = vshrl.u32 %v493_v57, 16  ;;  %v503_v34 = vadd.s32 %v501_v51, %v495_v53  ;;  %vm550_vm15 = vcmp.ne.s32.totalorder %v2181_v61, 0  ;;  %v522_v9 = vmul.u32 52428, %v518_v6 }
 0x139   : > { %v1348_v44 = vadd.f32 %v1987_v25, %v1334_v40  ;;  %v480_v10 = vadd.s32 %v479_v43, %v470_v38  ;;  %vm504_vm14 = vc.u32 %v502_v19, %v498_v30  ;;  %v521_v17 = vmul.u32 52429, %v518_v6 }
 0x13a   : > { %v1158_v28 = vpop.f32.mrf.mxu2  ;;  %v505_v18 = vsel %vm504_vm14, 1, %v1685_v33  ;;  %vm560_vm0 = vcmp.lt.s32.totalorder %v2181_v61, 0  ;;  %v1100_v56 = vadd.f32 %v1084_v26, %v1892_v20  ;;  %vm599_vm1 = vcmp.lt.s32.totalorder %v589_v16, 8 }
 0x13b   : > { %v1378_v21 = vsel %vm2142_vm8, %v1348_v44, 0.0  ;;  %v1177_v41 = vadd.f32 %v1158_v28, %v1098_v32  ;;  %v481_v4 = vshrl.u32 %v480_v10, 3  ;;  %v507_v12 = vadd.s32 %v505_v18, %v503_v34  ;;  %vm2208_vm4 = vmand %vm560_vm0, %vm550_vm15 }
 0x13c   : > { %v1391_v52 = vsel %vm1385_vm5, %v1378_v21, 0.0  ;;  %v1416_v31 = vmul.f32 %v1378_v21, %v1378_v21  ;;  %v1452_v0 = vpack.c.bf16 %v1378_v21, %v1378_v21  ;;  %v580_v48 = vadd.s32 10, %v2181_v61 }
 0x13d   : > { %v1392_v1 = vadd.f32 %v1391_v52, %v1390_v23  ;;  %v1256_v22 = vadd.f32 %v1237_v29, %v1177_v41  ;;  %v519_v29 = vshrl.u32 %v2163_v14, 16  ;;  %v482_v40 = vmul.u32 10, %v481_v4 }
 0x13e   : > { %v1428_v59 = vsel %vm1385_vm5, %v1416_v31, 0.0  ;;  %1463 = vst.msk [vmem:[%s2036_s23 + $0xc] sm:$0xf] %vm1459_vm3, %v1452_v0  ;;  %v508_v7 = vadd.s32 %v507_v12, %v497_v55  ;;  %v1086_v31 = vpop.f32.mrf.mxu1  ;;  %v526_v10 = vshrl.u32 %v522_v9, 16 }
 0x13f   : > { %v1429_v5 = vadd.f32 %v1428_v59, %v1427_v35  ;;  %v1335_v45 = vadd.f32 %v1316_v24, %v1256_v22  ;;  %v499_v24 = vshrl.u32 %v2156_v2, 16  ;;  %v523_v60 = vmul.u32 52429, %v519_v29  ;;  %v1242_v38 = vpop.f32.mrf.mxu3 }
 0x140   : > { %v524_v43 = vmul.u32 52428, %v519_v29  ;;  %v483_v54 = vsub.s32 %v2029_v50, %v482_v40  ;;  %v1101_v55 = vadd.f32 %v1086_v31, %v1908_v49 }
 0x141   : > { %v1349_v3 = vadd.f32 %v1987_v25, %v1335_v45  ;;  %v509_v2 = vadd.s32 %v508_v7, %v499_v24  ;;  %v527_v28 = vshll.u32 %v523_v60, 16  ;;  %v528_v50 = vshrl.u32 %v523_v60, 16 }
 0x142   : > { %v1160_v23 = vpop.f32.mrf.mxu2  ;;  %vm551_vm7 = vcmp.ne.s32.totalorder %v483_v54, 0  ;;  %vm561_vm8 = vcmp.lt.s32.totalorder %v483_v54, 0 }
 0x143   : > { %v1379_v11 = vsel %vm598_vm13, %v1349_v3, 0.0  ;;  %v1178_v47 = vadd.f32 %v1160_v23, %v1099_v42  ;;  %v525_v42 = vshll.u32 %v522_v9, 16  ;;  %v581_v23 = vadd.s32 10, %v483_v54  ;;  %vm2222_vm10 = vmand %vm561_vm8, %vm551_vm7 }
 0x144   : > { %v1393_v32 = vsel %vm1385_vm5, %v1379_v11, 0.0  ;;  %v1417_v8 = vmul.f32 %v1379_v11, %v1379_v11  ;;  %v1453_v58 = vpack.c.bf16 %v1379_v11, %v1379_v11 }
 0x145   : > { %v1394_v35 = vadd.f32 %v1393_v32, %v1392_v1  ;;  %v1257_v39 = vadd.f32 %v1239_v13, %v1178_v47  ;;  %vm529_vm2 = vc.u32 %v521_v17, %v525_v42  ;;  %v531_v21 = vadd.s32 %v525_v42, %v521_v17 }
 0x146   : > { %v1430_v37 = vsel %vm1385_vm5, %v1417_v8, 0.0  ;;  %1464 = vst.msk [vmem:[%s2036_s23 + $0x10] sm:$0xf] %vm1459_vm3, %v1453_v58  ;;  %v530_v52 = vsel %vm529_vm2, 1, %v1685_v33  ;;  %v510_v13 = vshrl.u32 %v509_v2, 3  ;;  %v1089_v60 = vpop.f32.mrf.mxu1  ;;  %v591_v17 = vsel %vm2222_vm10, %v581_v23, %v483_v54 }
 0x147   : > { %v1431_v44 = vadd.f32 %v1430_v37, %v1429_v5  ;;  %v1336_v57 = vadd.f32 %v1318_v36, %v1257_v39  ;;  %v532_v1 = vadd.s32 %v530_v52, %v524_v43  ;;  %vm533_vm6 = vc.u32 %v531_v21, %v527_v28 }
 0x148   : > { %v534_v53 = vsel %vm533_vm6, 1, %v1685_v33  ;;  %v590_v5 = vsel %vm2208_vm4, %v580_v48, %v2181_v61  ;;  %v511_v26 = vmul.u32 10, %v510_v13  ;;  %v1244_v33 = vpop.f32.mrf.mxu3  ;;  %v1323_v61 = vpop.f32.mrf.mxu0  ;;  %vm601_vm13 = vcmp.lt.s32.totalorder %v591_v17, 8 }
 0x149   : > { %v1350_v41 = vadd.f32 %v1987_v25, %v1336_v57  ;;  %v536_v6 = vadd.s32 %v534_v53, %v532_v1  ;;  %vm600_vm9 = vcmp.lt.s32.totalorder %v590_v5, 8  ;;  %v1102_v37 = vadd.f32 %v1089_v60, %v1934_v27 }
 0x14a   : > { %v1163_v20 = vpop.f32.mrf.mxu2  ;;  %v512_v9 = vsub.s32 %v2120_v62, %v511_v26  ;;  %vm1411_vm6 = vcmask 122880  }
 0x14b   : > { %v1380_v22 = vsel %vm599_vm1, %v1350_v41, 0.0  ;;  %v1179_v15 = vadd.f32 %v1163_v20, %v1100_v56  ;;  %v537_v16 = vadd.s32 %v536_v6, %v526_v10 }
 0x14c   : > { %v1395_v30 = vsel %vm1385_vm5, %v1380_v22, 0.0  ;;  %v1418_v59 = vmul.f32 %v1380_v22, %v1380_v22  ;;  %v1454_v36 = vpack.c.bf16 %v1380_v22, %v1380_v22  ;;  %vm552_vm11 = vcmp.ne.s32.totalorder %v512_v9, 0 }
 0x14d   : > { %v1396_v29 = vadd.f32 %v1395_v30, %v1394_v35  ;;  %v1258_v45 = vadd.f32 %v1242_v38, %v1179_v15  ;;  %v538_v3 = vadd.s32 %v537_v16, %v528_v50  ;;  %vm562_vm12 = vcmp.lt.s32.totalorder %v512_v9, 0 }
 0x14e   : > { %v1432_v19 = vsel %vm1385_vm5, %v1418_v59, 0.0  ;;  %1465 = vst.msk [vmem:[%s2036_s23 + $0x14] sm:$0xf] %vm1459_vm3, %v1454_v36  ;;  %v582_v43 = vadd.s32 10, %v512_v9  ;;  %vm2235_vm14 = vmand %vm562_vm12, %vm552_vm11  ;;  %v1091_v31 = vpop.f32.mrf.mxu1 }
 0x14f   : > { %v1433_v4 = vadd.f32 %v1432_v19, %v1431_v44  ;;  %v1337_v51 = vadd.f32 %v1321_v46, %v1258_v45  ;;  %v539_v12 = vshrl.u32 %v538_v3, 3 }
 0x150   : > { %v1247_v42 = vpop.f32.mrf.mxu3  ;;  %v1326_v48 = vpop.f32.mrf.mxu0  ;;  %v592_v54 = vsel %vm2235_vm14, %v582_v43, %v512_v9 }
 0x151   : > { %v1351_v34 = vadd.f32 %v1987_v25, %v1337_v51  ;;  %v540_v7 = vmul.u32 10, %v539_v12  ;;  %vm602_vm1 = vcmp.lt.s32.totalorder %v592_v54, 8 }
 0x152   : > { %v1165_v18 = vpop.f32.mrf.mxu2 }
 0x153   : > { %v1381_v11 = vsel %vm600_vm9, %v1351_v34, 0.0  ;;  %v1180_v47 = vadd.f32 %v1165_v18, %v1101_v55  ;;  %v541_v56 = vsub.s32 %v2163_v14, %v540_v7  ;;  %v1103_v14 = vadd.f32 %v1091_v31, %v1967_v63 }
 0x154   : > { %v1397_v32 = vsel %vm1385_vm5, %v1381_v11, 0.0  ;;  %v1419_v8 = vmul.f32 %v1381_v11, %v1381_v11  ;;  %v1455_v49 = vpack.c.bf16 %v1381_v11, %v1381_v11 }
 0x155   : > { %v1398_v58 = vadd.f32 %v1397_v32, %v1396_v29  ;;  %v1259_v35 = vadd.f32 %v1244_v33, %v1180_v47  ;;  %vm553_vm15 = vcmp.ne.s32.totalorder %v541_v56, 0  ;;  %vm563_vm0 = vcmp.lt.s32.totalorder %v541_v56, 0 }
 0x156   : > { %v1434_v39 = vsel %vm1385_vm5, %v1419_v8, 0.0  ;;  %1466 = vst.msk [vmem:[%s2036_s23 + $0x18] sm:$0xf] %vm1459_vm3, %v1455_v49  ;;  %v583_v1 = vadd.s32 10, %v541_v56  ;;  %vm2248_vm2 = vmand %vm563_vm0, %vm553_vm15 }
 0x157   : > { %v1435_v40 = vadd.f32 %v1434_v39, %v1433_v4  ;;  %v1338_v62 = vadd.f32 %v1323_v61, %v1259_v35 }
 0x158   : > { %v1249_v6 = vpop.f32.mrf.mxu3  ;;  %v593_v63 = vsel %vm2248_vm2, %v583_v1, %v541_v56  ;;  %v1328_v19 = vpop.f32.mrf.mxu0 }
 0x159   : > { %v1352_v38 = vadd.f32 %v1987_v25, %v1338_v62  ;;  %vm603_vm4 = vcmp.lt.s32.totalorder %v593_v63, 8 }
 0x15a   : > { %v1168_v57 = vpop.f32.mrf.mxu2 }
 0x15b   : > { %v1382_v2 = vsel %vm601_vm13, %v1352_v38, 0.0  ;;  %v1181_v28 = vadd.f32 %v1168_v57, %v1102_v37 }
 0x15c   : > { %v1399_v46 = vsel %vm1385_vm5, %v1382_v2, 0.0  ;;  %v1420_v21 = vmul.f32 %v1382_v2, %v1382_v2  ;;  %v1456_v41 = vpack.c.bf16 %v1382_v2, %v1382_v2 }
 0x15d   : > { %v1400_v27 = vadd.f32 %v1399_v46, %v1398_v58  ;;  %v1260_v52 = vadd.f32 %v1247_v42, %v1181_v28 }
 0x15e   : > { %v1436_v0 = vsel %vm1385_vm5, %v1420_v21, 0.0  ;;  %1467 = vst.msk [vmem:[%s2036_s23 + $0x1c] sm:$0xf] %vm1459_vm3, %v1456_v41 }
 0x15f   : > { %v1437_v20 = vadd.f32 %v1436_v0, %v1435_v40  ;;  %v1339_v13 = vadd.f32 %v1326_v48, %v1260_v52 }
 0x161   : > { %v1353_v10 = vadd.f32 %v1987_v25, %v1339_v13 }
 0x162   : > { %v1170_v15 = vpop.f32.mrf.mxu2 }
 0x163   : > { %v1383_v50 = vsel %vm602_vm1, %v1353_v10, 0.0  ;;  %v1182_v53 = vadd.f32 %v1170_v15, %v1103_v14 }
 0x164   : > { %v1401_v30 = vsel %vm1385_vm5, %v1383_v50, 0.0  ;;  %v1421_v59 = vmul.f32 %v1383_v50, %v1383_v50  ;;  %v1457_v36 = vpack.c.bf16 %v1383_v50, %v1383_v50 }
 0x165   : > { %v1402_v29 = vadd.f32 %v1401_v30, %v1400_v27  ;;  %v1261_v5 = vadd.f32 %v1249_v6, %v1182_v53 }
 0x166   : > { %v1438_v45 = vsel %vm1385_vm5, %v1421_v59, 0.0  ;;  %1468 = vst.msk [vmem:[%s2036_s23 + $0x20] sm:$0xf] %vm1459_vm3, %v1457_v36 }
 0x167   : > { %v1439_v26 = vadd.f32 %v1438_v45, %v1437_v20  ;;  %v1340_v16 = vadd.f32 %v1328_v19, %v1261_v5 }
 0x169   : > { %v1354_v4 = vadd.f32 %v1987_v25, %v1340_v16 }
 0x16b   : > { %v1384_v51 = vsel %vm603_vm4, %v1354_v4, 0.0 }
 0x16c   : > { %v1403_v33 = vsel %vm1385_vm5, %v1384_v51, 0.0  ;;  %v1422_v3 = vmul.f32 %v1384_v51, %v1384_v51  ;;  %v1458_v55 = vpack.c.bf16 %v1384_v51, %v1384_v51 }
 0x16d   : > { %v1404_v34 = vadd.f32 %v1403_v33, %v1402_v29 }
 0x16e   : > { %v1440_v23 = vsel %vm1385_vm5, %v1422_v3, 0.0  ;;  %1469 = vst.msk [vmem:[%s2036_s23 + $0x24] sm:$0xf] %vm1459_vm3, %v1458_v55 }
 0x16f   : > { %v1405_v61 = vrot.slane %v1404_v34, 4  ;;  %v1441_v24 = vadd.f32 %v1440_v23, %v1439_v26 }
 0x171   : > { %v1406_v18 = vadd.f32 %v1405_v61, %v1404_v34  ;;  %v1442_v9 = vrot.slane %v1441_v24, 4 }
 0x173   : > { %v1407_v11 = vrot.slane %v1406_v18, 2  ;;  %v1443_v47 = vadd.f32 %v1442_v9, %v1441_v24 }
 0x175   : > { %v1408_v12 = vadd.f32 %v1407_v11, %v1406_v18  ;;  %v1444_v25 = vrot.slane %v1443_v47, 2 }
 0x177   : > { %v1409_v60 = vrot.slane %v1408_v12, 1  ;;  %v1445_v32 = vadd.f32 %v1444_v25, %v1443_v47 }
 0x179   : > { %v1410_v8 = vadd.f32 %v1409_v60, %v1408_v12  ;;  %v1446_v49 = vrot.slane %v1445_v32, 1 }
 0x17b   : > { %1412 = vst.msk [vmem:[%s238_s26] sm:$0x1] %vm1411_vm6, %v1410_v8  ;;  %v1447_v58 = vadd.f32 %v1446_v49, %v1445_v32 }
 0x17d   : > { %1448 = vst.msk [vmem:[%s241_s29] sm:$0x1] %vm1411_vm6, %v1447_v58 }
 0x17e PF: > { %s16_s18 = sadd.s32 1, %s1682_s18  }
 0x17f   : > { %p13_p4 = scmp.ge.s32.totalorder %s16_s18, 4  }
 0x181   :  { %15 = sbr.rel (!%p13_p4) target bundleno = 1 (0x1), region = 94 }

// kernel: encoder_forward.9
= control target key start
LH: loop header
LB: loop body
LE: loop exit
PB: predicated region body
PF: predicated region fallthrough
CT: control target
= control target key end

     0   :  { %s1916_s24 = smov 0   ;;  %s2378_s0 = inlined_call_operand.vmem [shape: bf16[2,80,16], index: 0, kind: input, shape index: {}]   ;;  %s2379_s1 = inlined_call_operand.vmem [shape: bf16[3,3,16,16], index: 1, kind: input, shape index: {}]   ;;  %s2380_s2 = inlined_call_operand.vmem [shape: f32[1,16], index: 2, kind: input, shape index: {}]   ;;  %s2381_s3 = inlined_call_operand.vmem [shape: f32[1,16], index: 3, kind: input, shape index: {}]   ;;  %s2382_s4 = inlined_call_operand.vmem [shape: f32[1,16], index: 4, kind: input, shape index: {}]   ;;  %s2383_s5 = inlined_call_operand.vmem [shape: bf16[2,80,16], index: 5, kind: output, shape index: {0}]   ;;  %s2384_s6 = inlined_call_operand.vmem [shape: f32[2,1,16], index: 6, kind: output, shape index: {1}]   ;;  %s2385_s7 = inlined_call_operand.vmem [shape: f32[2,1,16], index: 7, kind: output, shape index: {2}]  }
   0x1 LB: > { %s1710_s25 = sadd.s32 4294967295, %s1872_s24   ;;  %p1714_p0 = scmp.ge.s32.totalorder %s1872_s24, 1  ;;  %s1872_s24 = sphi %s1916_s24, %s18_s24  }
   0x2   : > { %p242_p1 = scmp.lt.s32.totalorder %s1872_s24, 3 }
   0x4   : > { %p243_p2 = pnand %p1714_p0, %p242_p1 }
   0x5   : > { %p280_p3 = scmp.lt.s32.totalorder (!%p243_p2), %s1710_s25, 1 }
   0x6   : > { %246 = sbr.rel (%p243_p2) target bundleno = 442 (0x1ba), region = 40 }
   0xb   : > { %v1817_v0 = vld [vmem:[%s2379_s1 + $0x8] sm:$0xff]  ;;  %v297_v1 = vlaneseq  ;;  %s2407_s25 = smov (!%p280_p3, %s1710_s25), 1  ;;  %vm658_vm0 = vcmask 130048   ;;  %v1874_v7 = vmov 0.0   ;;  %v1875_v29 = vmov 0  }
   0xc   : > { %1849 = vmatpush.bf16.msra.mxu1 %v1817_v0  ;;  %1850 = vmatpush.bf16.msra.mxu2 %v1817_v0  ;;  %660 = vst.msk [vmem:[#allocation2 + $0x8] sm:$0xff] %vm658_vm0, %v1874_v7  ;;  %s1852_s28 = smul.u32 40, %s2407_s25  ;;  %v1993_v49 = vld [vmem:[%s2381_s3] ss:$0 sm:$0xff]  ;;  %s292_s15 = scalar_lea.vmem %s2384_s6, %s2407_s25 }
   0xd   : > { %v1927_v2 = vshrl.u32 %v297_v1, 7  ;;  %1851 = vmatpush.bf16.msra.mxu3 %v1817_v0  ;;  %835 = vmatpush.bf16.msra.mxu0 %v1817_v0  ;;  %661 = vst.msk [vmem:[#allocation2 + $0x10] sm:$0xff] %vm658_vm0, %v1874_v7  ;;  %v2004_v57 = vld [vmem:[%s2382_s4] ss:$0 sm:$0xff]  ;;  %s295_s18 = scalar_lea.vmem %s2385_s7, %s2407_s25 }
   0xe   : > { %662 = vst.msk [vmem:[#allocation2 + $0x18] sm:$0xff] %vm658_vm0, %v1874_v7  ;;  %s1973_s8 = scalar_lea.vmem %s2378_s0, %s1852_s28  ;;  %s2288_s13 = scalar_lea.vmem %s2383_s5, %s1852_s28 }
   0xf   : > { %v1932_v3 = vadd.s32 8, %v1927_v2  ;;  %v1935_v4 = vadd.s32 16, %v1927_v2  ;;  %v311_v5 = vand.u32 65535, %v1927_v2  ;;  %v312_v6 = vshrl.u32 %v1927_v2, 16  ;;  %663 = vst.msk [vmem:[#allocation2 + $0x20] sm:$0xff] %vm658_vm0, %v1874_v7  ;;  %v1826_v44 = vld [vmem:[%s1973_s8] sm:$0xff]  }
  0x10   : > { %v1944_v8 = vadd.s32 24, %v1927_v2  ;;  %v1947_v9 = vadd.s32 32, %v1927_v2  ;;  %659 = vst.msk [vmem:[#allocation2] sm:$0xff] %vm658_vm0, %v1874_v7  ;;  %v1988_v48 = vld [vmem:[%s1973_s8 + $0x8] sm:$0xff]   ;;  %v1827_v55 = vunpack.c.l.bf16 %v1826_v44  ;;  %v1828_v56 = vunpack.c.h.bf16 %v1826_v44 }
  0x11   : > { %v314_v10 = vmul.u32 52429, %v311_v5  ;;  %v315_v11 = vmul.u32 52428, %v311_v5  ;;  %v1949_v12 = vmul.u32 52429, %v312_v6  ;;  %v317_v13 = vmul.u32 52428, %v312_v6  ;;  %664 = vst.msk [vmem:[#allocation2 + $0x28] sm:$0xff] %vm658_vm0, %v1874_v7 }
  0x12   : > { %v340_v14 = vand.u32 65535, %v1932_v3  ;;  %v341_v15 = vshrl.u32 %v1932_v3, 16  ;;  %v369_v16 = vand.u32 65535, %v1935_v4  ;;  %v370_v17 = vshrl.u32 %v1935_v4, 16  ;;  %665 = vst.msk [vmem:[#allocation2 + $0x30] sm:$0xff] %vm658_vm0, %v1874_v7 }
  0x13   : > { %v318_v18 = vshll.u32 %v315_v11, 16  ;;  %v319_v19 = vshrl.u32 %v315_v11, 16  ;;  %v320_v20 = vshll.u32 %v1949_v12, 16  ;;  %v321_v21 = vshrl.u32 %v1949_v12, 16  ;;  %666 = vst.msk [vmem:[#allocation2 + $0x38] sm:$0xff] %vm658_vm0, %v1874_v7 }
  0x14   : > { %v343_v22 = vmul.u32 52429, %v340_v14  ;;  %v344_v23 = vmul.u32 52428, %v340_v14  ;;  %v345_v24 = vmul.u32 52429, %v341_v15  ;;  %v346_v25 = vmul.u32 52428, %v341_v15  ;;  %667 = vst.msk [vmem:[#allocation2 + $0x40] sm:$0xff] %vm658_vm0, %v1874_v7 }
  0x15   : > { %vm322_vm1 = vc.u32 %v314_v10, %v318_v18  ;;  %v324_v26 = vadd.s32 %v318_v18, %v314_v10  ;;  %v372_v27 = vmul.u32 52429, %v369_v16  ;;  %v373_v28 = vmul.u32 52428, %v369_v16  ;;  %668 = vst.msk [vmem:[#allocation2 + $0x48] sm:$0xff] %vm658_vm0, %v1874_v7 }
  0x16   : > { %v323_v30 = vsel %vm322_vm1, 1, %v1875_v29  ;;  %v347_v31 = vshll.u32 %v344_v23, 16  ;;  %v348_v32 = vshrl.u32 %v344_v23, 16  ;;  %v349_v33 = vshll.u32 %v345_v24, 16  ;;  %669 = vst.msk [vmem:[#allocation2 + $0x50] sm:$0xff] %vm658_vm0, %v1874_v7 }
  0x17   : > { %v325_v34 = vadd.s32 %v323_v30, %v317_v13  ;;  %vm326_vm2 = vc.u32 %v324_v26, %v320_v20  ;;  %v350_v35 = vshrl.u32 %v345_v24, 16  ;;  %v374_v36 = vmul.u32 52429, %v370_v17  ;;  %670 = vst.msk [vmem:[#allocation2 + $0x58] sm:$0xff] %vm658_vm0, %v1874_v7 }
  0x18   : > { %v327_v37 = vsel %vm326_vm2, 1, %v1875_v29  ;;  %vm351_vm3 = vc.u32 %v343_v22, %v347_v31  ;;  %v353_v38 = vadd.s32 %v347_v31, %v343_v22  ;;  %v375_v39 = vmul.u32 52428, %v370_v17  ;;  %671 = vst.msk [vmem:[#allocation2 + $0x60] sm:$0xff] %vm658_vm0, %v1874_v7 }
  0x19   : > { %v329_v40 = vadd.s32 %v327_v37, %v325_v34  ;;  %v352_v41 = vsel %vm351_vm3, 1, %v1875_v29  ;;  %v376_v42 = vshll.u32 %v373_v28, 16  ;;  %v377_v43 = vshrl.u32 %v373_v28, 16 }
  0x1a   : > { %v354_v45 = vadd.s32 %v352_v41, %v346_v25  ;;  %vm355_vm4 = vc.u32 %v353_v38, %v349_v33  ;;  %v378_v46 = vshll.u32 %v374_v36, 16  ;;  %v379_v47 = vshrl.u32 %v374_v36, 16 }
  0x1b   : > { %v330_v50 = vadd.s32 %v329_v40, %v319_v19  ;;  %v356_v51 = vsel %vm355_vm4, 1, %v1875_v29  ;;  %vm380_vm5 = vc.u32 %v372_v27, %v376_v42  ;;  %v382_v52 = vadd.s32 %v376_v42, %v372_v27 }
  0x1c   : > { %v358_v53 = vadd.s32 %v356_v51, %v354_v45  ;;  %v381_v54 = vsel %vm380_vm5, 1, %v1875_v29  ;;  %v1831_v60 = vunpack.c.l.bf16 %v1988_v48  ;;  %v698_v63 = vmul.f32 %v1993_v49, %v1827_v55  ;;  %v2037_v55 = vld [vmem:[%s1973_s8 + $0x10] sm:$0xff]  }
  0x1d   : > { %v331_v58 = vadd.s32 %v330_v50, %v321_v21  ;;  %v383_v59 = vadd.s32 %v381_v54, %v375_v39  ;;  %vm384_vm6 = vc.u32 %v382_v52, %v378_v46  ;;  %v699_v0 = vmul.f32 %v1993_v49, %v1828_v56 }
  0x1e   : > { %v359_v61 = vadd.s32 %v358_v53, %v348_v32  ;;  %v385_v62 = vsel %vm384_vm6, 1, %v1875_v29  ;;  %v700_v6 = vmul.f32 %v1993_v49, %v1831_v60  ;;  %v398_v7 = vand.u32 65535, %v1944_v8 }
  0x1f   : > { %v332_v1 = vshrl.u32 %v331_v58, 3  ;;  %v387_v5 = vadd.s32 %v385_v62, %v383_v59  ;;  %v712_v11 = vadd.f32 %v2004_v57, %v698_v63  ;;  %v713_v12 = vadd.f32 %v2004_v57, %v699_v0 }
  0x20   : > { %v360_v10 = vadd.s32 %v359_v61, %v350_v35  ;;  %v399_v13 = vshrl.u32 %v1944_v8, 16  ;;  %v714_v16 = vadd.f32 %v2004_v57, %v700_v6  ;;  %v401_v17 = vmul.u32 52429, %v398_v7 }
  0x21   : > { %v333_v14 = vmul.u32 10, %v332_v1  ;;  %v388_v15 = vadd.s32 %v387_v5, %v377_v43  ;;  %v722_v19 = vmax.f32 %v712_v11, 0.0  ;;  %v723_v20 = vmax.f32 %v713_v12, 0.0 }
  0x22   : > { %v361_v18 = vshrl.u32 %v360_v10, 3  ;;  %v402_v21 = vmul.u32 52428, %v398_v7  ;;  %v724_v24 = vmax.f32 %v714_v16, 0.0  ;;  %v403_v25 = vmul.u32 52429, %v399_v13  ;;  %v1818_v10 = vld [vmem:[%s2379_s1 + $0x10] sm:$0xff] }
  0x23   : > { %v334_v22 = vsub.s32 %v1927_v2, %v333_v14  ;;  %v389_v23 = vadd.s32 %v388_v15, %v379_v47  ;;  %v404_v27 = vmul.u32 52428, %v399_v13  ;;  %v427_v46 = vand.u32 65535, %v1947_v9  ;;  %963 = vmatpush.bf16.msrb.mxu2 %v1818_v10 }
  0x24   : > { %v362_v26 = vmul.u32 10, %v361_v18  ;;  %v405_v28 = vshll.u32 %v402_v21, 16  ;;  %v406_v30 = vshrl.u32 %v402_v21, 16  ;;  %v407_v34 = vshll.u32 %v403_v25, 16 }
  0x25   : > { %v390_v31 = vshrl.u32 %v389_v23, 3  ;;  %vm598_vm7 = vcmp.ne.s32.totalorder %v334_v22, 0  ;;  %vm608_vm8 = vcmp.lt.s32.totalorder %v334_v22, 0  ;;  %v628_v32 = vadd.s32 10, %v334_v22 }
  0x26   : > { %v363_v33 = vsub.s32 %v1932_v3, %v362_v26  ;;  %vm618_vm9 = vmand %vm608_vm8, %vm598_vm7  ;;  %v408_v35 = vshrl.u32 %v403_v25, 16  ;;  %vm409_vm10 = vc.u32 %v401_v17, %v405_v28  ;;  %v411_v39 = vadd.s32 %v405_v28, %v401_v17 }
  0x27   : > { %v391_v36 = vmul.u32 10, %v390_v31  ;;  %v638_v37 = vsel %vm618_vm9, %v628_v32, %v334_v22  ;;  %v410_v38 = vsel %vm409_vm10, 1, %v1875_v29  ;;  %v428_v47 = vshrl.u32 %v1947_v9, 16 }
  0x28   : > { %vm599_vm11 = vcmp.ne.s32.totalorder %v363_v33, 0  ;;  %vm609_vm12 = vcmp.lt.s32.totalorder %v363_v33, 0  ;;  %v629_v40 = vadd.s32 10, %v363_v33  ;;  %vm2019_vm13 = vcmp.lt.s32.totalorder %v638_v37, 8 }
  0x29   : > { %v392_v42 = vsub.s32 %v1935_v4, %v391_v36  ;;  %vm619_vm14 = vmand %vm609_vm12, %vm599_vm11  ;;  %v752_v3 = vsel %vm2019_vm13, %v722_v19, 0.0  ;;  %v412_v43 = vadd.s32 %v410_v38, %v404_v27  ;;  %vm413_vm15 = vc.u32 %v411_v39, %v407_v34 }
  0x2a   : > { %v639_v44 = vsel %vm619_vm14, %v629_v40, %v363_v33  ;;  %762 = vst.msk [vmem:[#allocation2 + $0xb] sm:$0xff] %vm658_vm0, %v752_v3  ;;  %v414_v45 = vsel %vm413_vm15, 1, %v1875_v29  ;;  %v430_v53 = vmul.u32 52429, %v427_v46  ;;  %v431_v54 = vmul.u32 52428, %v427_v46 }
  0x2b   : > { %vm600_vm1 = vcmp.ne.s32.totalorder %v392_v42, 0  ;;  %vm610_vm2 = vcmp.lt.s32.totalorder %v392_v42, 0  ;;  %v630_v50 = vadd.s32 10, %v392_v42  ;;  %vm2030_vm3 = vcmp.lt.s32.totalorder %v639_v44, 8 }
  0x2c   : > { %vm620_vm4 = vmand %vm610_vm2, %vm600_vm1  ;;  %v753_v51 = vsel %vm2030_vm3, %v723_v20, 0.0  ;;  %v416_v52 = vadd.s32 %v414_v45, %v412_v43  ;;  %v432_v58 = vmul.u32 52429, %v428_v47  ;;  %v433_v59 = vmul.u32 52428, %v428_v47 }
  0x2d   : > { %v640_v56 = vsel %vm620_vm4, %v630_v50, %v392_v42  ;;  %763 = vst.msk [vmem:[#allocation2 + $0x13] sm:$0xff] %vm658_vm0, %v753_v51  ;;  %v1832_v60 = vunpack.c.h.bf16 %v1988_v48  ;;  %v434_v63 = vshll.u32 %v431_v54, 16  ;;  %v435_v0 = vshrl.u32 %v431_v54, 16 }
  0x2e   : > { %vm2041_vm5 = vcmp.lt.s32.totalorder %v640_v56, 8  ;;  %v417_v62 = vadd.s32 %v416_v52, %v406_v30  ;;  %v436_v5 = vshll.u32 %v432_v58, 16  ;;  %v437_v6 = vshrl.u32 %v432_v58, 16 }
  0x2f   : > { %v754_v1 = vsel %vm2041_vm5, %v724_v24, 0.0  ;;  %v1835_v7 = vunpack.c.l.bf16 %v2037_v55  ;;  %vm438_vm6 = vc.u32 %v430_v53, %v434_v63  ;;  %v440_v11 = vadd.s32 %v434_v63, %v430_v53 }
  0x30   : > { %764 = vst.msk [vmem:[#allocation2 + $0x1b] sm:$0xff] %vm658_vm0, %v754_v1  ;;  %v418_v48 = vadd.s32 %v417_v62, %v408_v35  ;;  %v701_v12 = vmul.f32 %v1993_v49, %v1832_v60  ;;  %v439_v13 = vsel %vm438_vm6, 1, %v1875_v29  ;;  %v2056_v15 = vadd.s32 48, %v1927_v2 }
  0x31   : > { %v702_v14 = vmul.f32 %v1993_v49, %v1835_v7  ;;  %v2059_v16 = vadd.s32 56, %v1927_v2  ;;  %v441_v18 = vadd.s32 %v439_v13, %v433_v59  ;;  %vm442_vm7 = vc.u32 %v440_v11, %v436_v5 }
  0x32   : > { %v419_v17 = vshrl.u32 %v418_v48, 3  ;;  %v715_v19 = vadd.f32 %v2004_v57, %v701_v12  ;;  %v443_v20 = vsel %vm442_vm7, 1, %v1875_v29  ;;  %v2067_v22 = vadd.s32 64, %v1927_v2 }
  0x33   : > { %v2064_v21 = vadd.f32 %v2004_v57, %v702_v14  ;;  %v485_v23 = vand.u32 65535, %v2056_v15  ;;  %v445_v25 = vadd.s32 %v443_v20, %v441_v18  ;;  %v486_v27 = vshrl.u32 %v2056_v15, 16 }
  0x34   : > { %v420_v24 = vmul.u32 10, %v419_v17  ;;  %v725_v26 = vmax.f32 %v715_v19, 0.0  ;;  %v791_v28 = vld [vmem:[#allocation2 + $0x11] sm:$0xff]  ;;  %v514_v33 = vand.u32 65535, %v2059_v16  ;;  %v515_v42 = vshrl.u32 %v2059_v16, 16 }
  0x35   : > { %v726_v30 = vmax.f32 %v2064_v21, 0.0  ;;  %v488_v31 = vmul.u32 52429, %v485_v23  ;;  %v489_v32 = vmul.u32 52428, %v485_v23  ;;  %v446_v35 = vadd.s32 %v445_v25, %v435_v0 }
  0x36   : > { %v421_v34 = vsub.s32 %v1944_v8, %v420_v24  ;;  %v490_v36 = vmul.u32 52429, %v486_v27  ;;  %v491_v37 = vmul.u32 52428, %v486_v27  ;;  %v517_v3 = vmul.u32 52429, %v514_v33 }
  0x37   : > { %v792_v38 = vld [vmem:[#allocation2 + $0x19] sm:$0xff]  ;;  %v492_v39 = vshll.u32 %v489_v32, 16  ;;  %v493_v40 = vshrl.u32 %v489_v32, 16  ;;  %v447_v44 = vadd.s32 %v446_v35, %v437_v6  ;;  %v518_v52 = vmul.u32 52428, %v514_v33 }
  0x38   : > { %v800_v43 = vpack.c.bf16 %v792_v38, %v791_v28  ;;  %vm601_vm8 = vcmp.ne.s32.totalorder %v421_v34, 0  ;;  %vm611_vm9 = vcmp.lt.s32.totalorder %v421_v34, 0  ;;  %v631_v45 = vadd.s32 10, %v421_v34  ;;  %v1847_v32 = vld [vmem:[%s1973_s8 + $0x18] sm:$0xff]  }
  0x39   : > { %vm621_vm10 = vmand %vm611_vm9, %vm601_vm8  ;;  %v494_v46 = vshll.u32 %v490_v36, 16  ;;  %v495_v47 = vshrl.u32 %v490_v36, 16  ;;  %vm496_vm11 = vc.u32 %v488_v31, %v492_v39  ;;  %v448_v8 = vshrl.u32 %v447_v44, 3  ;;  %v2100_v36 = vld [vmem:[%s1973_s8 + $0x20] sm:$0xff]  }
  0x3a   : > { %1724 = vmatmul.msk.bf16.vlgmr.msra.gmra.mxu1 %vm658_vm0, %v800_v43  ;;  %v497_v50 = vsel %vm496_vm11, 1, %v1875_v29  ;;  %v498_v51 = vadd.s32 %v492_v39, %v488_v31  ;;  %v641_v53 = vsel %vm621_vm10, %v631_v45, %v421_v34  ;;  %v519_v56 = vmul.u32 52429, %v515_v42 }
  0x3b   : > { %v499_v54 = vadd.s32 %v497_v50, %v491_v37  ;;  %v520_v58 = vmul.u32 52428, %v515_v42  ;;  %v449_v59 = vmul.u32 10, %v448_v8  ;;  %vm2077_vm12 = vcmp.lt.s32.totalorder %v641_v53, 8  ;;  %v1816_v37 = vld [vmem:[%s2379_s1] sm:$0xff] }
  0x3c   : > { %vm500_vm14 = vc.u32 %v498_v51, %v494_v46  ;;  %v521_v62 = vshll.u32 %v518_v52, 16  ;;  %v755_v63 = vsel %vm2077_vm12, %v725_v26, 0.0  ;;  %v522_v1 = vshrl.u32 %v518_v52, 16  ;;  %890 = vmatpush.bf16.msrb.mxu1 %v1816_v37  ;;  %v789_v37 = vld [vmem:[#allocation2 + $0x1] sm:$0xff] }
  0x3d   : > { %v501_v0 = vsel %vm500_vm14, 1, %v1875_v29  ;;  %v523_v5 = vshll.u32 %v519_v56, 16  ;;  %v450_v6 = vsub.s32 %v1947_v9, %v449_v59  ;;  %765 = vst.msk [vmem:[#allocation2 + $0x23] sm:$0xff] %vm658_vm0, %v755_v63  ;;  %v524_v10 = vshrl.u32 %v519_v56, 16 }
  0x3e   : > { %v503_v7 = vadd.s32 %v501_v0, %v499_v54  ;;  %vm525_vm15 = vc.u32 %v517_v3, %v521_v62  ;;  %v527_v11 = vadd.s32 %v521_v62, %v517_v3  ;;  %v543_v12 = vand.u32 65535, %v2067_v22 }
  0x3f   : > { %v526_v48 = vsel %vm525_vm15, 1, %v1875_v29  ;;  %v544_v13 = vshrl.u32 %v2067_v22, 16  ;;  %vm602_vm1 = vcmp.ne.s32.totalorder %v450_v6, 0  ;;  %vm612_vm2 = vcmp.lt.s32.totalorder %v450_v6, 0 }
  0x40   : > { %v632_v14 = vadd.s32 10, %v450_v6  ;;  %v504_v17 = vadd.s32 %v503_v7, %v493_v40  ;;  %vm622_vm4 = vmand %vm612_vm2, %vm602_vm1  ;;  %v528_v18 = vadd.s32 %v526_v48, %v520_v58  ;;  %vm529_vm6 = vc.u32 %v527_v11, %v523_v5 }
  0x41   : > { %v546_v9 = vmul.u32 52429, %v543_v12  ;;  %v547_v19 = vmul.u32 52428, %v543_v12  ;;  %v530_v24 = vsel %vm529_vm6, 1, %v1875_v29  ;;  %v548_v25 = vmul.u32 52429, %v544_v13 }
  0x42   : > { %v642_v20 = vsel %vm622_vm4, %v632_v14, %v450_v6  ;;  %v505_v23 = vadd.s32 %v504_v17, %v495_v47  ;;  %v532_v27 = vadd.s32 %v530_v24, %v528_v18  ;;  %v549_v28 = vmul.u32 52428, %v544_v13  ;;  %v772_v24 = vld [vmem:[#allocation2] sm:$0xff] }
  0x43   : > { %vm2090_vm7 = vcmp.lt.s32.totalorder %v642_v20, 8  ;;  %v550_v31 = vshll.u32 %v547_v19, 16  ;;  %v552_v35 = vshll.u32 %v548_v25, 16  ;;  %v551_v39 = vshrl.u32 %v547_v19, 16 }
  0x44   : > { %v756_v33 = vsel %vm2090_vm7, %v726_v30, 0.0  ;;  %v506_v34 = vshrl.u32 %v505_v23, 3  ;;  %v533_v38 = vadd.s32 %v532_v27, %v522_v1  ;;  %v1839_v3 = vunpack.c.l.bf16 %v1847_v32  ;;  %v793_v56 = vld [vmem:[#allocation2 + $0x21] sm:$0xff] }
  0x45   : > { %766 = vst.msk [vmem:[#allocation2 + $0x2b] sm:$0xff] %vm658_vm0, %v756_v33  ;;  %vm554_vm8 = vc.u32 %v546_v9, %v550_v31  ;;  %v556_v40 = vadd.s32 %v550_v31, %v546_v9  ;;  %v1840_v43 = vunpack.c.h.bf16 %v1847_v32  ;;  %v1843_v45 = vunpack.c.l.bf16 %v2100_v36 }
  0x46   : > { %v507_v42 = vmul.u32 10, %v506_v34  ;;  %v555_v21 = vsel %vm554_vm8, 1, %v1875_v29  ;;  %v534_v30 = vadd.s32 %v533_v38, %v524_v10  ;;  %v704_v8 = vmul.f32 %v1993_v49, %v1839_v3  ;;  %v790_v38 = vld [vmem:[#allocation2 + $0x9] sm:$0xff] }
  0x47   : > { %v557_v44 = vadd.s32 %v555_v21, %v549_v28  ;;  %vm558_vm9 = vc.u32 %v556_v40, %v552_v35  ;;  %v705_v50 = vmul.f32 %v1993_v49, %v1840_v43  ;;  %v553_v52 = vshrl.u32 %v548_v25, 16  ;;  %v773_v25 = vld [vmem:[#allocation2 + $0x8] sm:$0xff] }
  0x48   : > { %v508_v46 = vsub.s32 %v2056_v15, %v507_v42  ;;  %v559_v47 = vsel %vm558_vm9, 1, %v1875_v29  ;;  %v535_v51 = vshrl.u32 %v534_v30, 3  ;;  %v2113_v54 = vadd.s32 40, %v1927_v2  ;;  %v1819_v42 = vld [vmem:[%s2379_s1 + $0x18] sm:$0xff]  ;;  %v1820_v30 = vld [vmem:[%s2379_s1 + $0x20] sm:$0xff] }
  0x49   : > { %v561_v53 = vadd.s32 %v559_v47, %v557_v44  ;;  %v718_v59 = vadd.f32 %v2004_v57, %v704_v8  ;;  %v706_v63 = vmul.f32 %v1993_v49, %v1843_v45  ;;  %v719_v0 = vadd.f32 %v2004_v57, %v705_v50  ;;  %1046 = vmatpush.bf16.msrb.mxu3 %v1819_v42 }
  0x4a   : > { %vm604_vm10 = vcmp.ne.s32.totalorder %v508_v46, 0  ;;  %vm614_vm11 = vcmp.lt.s32.totalorder %v508_v46, 0  ;;  %v634_v58 = vadd.s32 10, %v508_v46  ;;  %v536_v62 = vmul.u32 10, %v535_v51  ;;  %1129 = vmatpush.bf16.msrb.mxu0 %v1820_v30 }
  0x4b   : > { %v562_v15 = vadd.s32 %v561_v53, %v551_v39  ;;  %vm624_vm14 = vmand %vm614_vm11, %vm604_vm10  ;;  %v728_v6 = vmax.f32 %v718_v59, 0.0  ;;  %v456_v7 = vand.u32 65535, %v2113_v54  ;;  %v457_v10 = vshrl.u32 %v2113_v54, 16 }
  0x4c   : > { %v794_v1 = vld [vmem:[#allocation2 + $0x29] sm:$0xff]  ;;  %v644_v5 = vsel %vm624_vm14, %v634_v58, %v508_v46  ;;  %v537_v11 = vsub.s32 %v2059_v16, %v536_v62  ;;  %v729_v14 = vmax.f32 %v719_v0, 0.0  ;;  %v720_v16 = vadd.f32 %v2004_v57, %v706_v63  ;;  %v775_v63 = vld [vmem:[#allocation2 + $0x18] sm:$0xff] }
  0x4d   : > { %v801_v48 = vpack.c.bf16 %v794_v1, %v793_v56  ;;  %v563_v12 = vadd.s32 %v562_v15, %v553_v52  ;;  %vm2121_vm15 = vcmp.lt.s32.totalorder %v644_v5, 8  ;;  %v459_v19 = vmul.u32 52429, %v456_v7  ;;  %v774_v15 = vld [vmem:[#allocation2 + $0x10] sm:$0xff] }
  0x4e   : > { %v758_v17 = vsel %vm2121_vm15, %v728_v6, 0.0  ;;  %vm605_vm1 = vcmp.ne.s32.totalorder %v537_v11, 0  ;;  %vm615_vm2 = vcmp.lt.s32.totalorder %v537_v11, 0  ;;  %v635_v9 = vadd.s32 10, %v537_v11 }
  0x4f   : > { %1725 = vmatmul.msk.bf16.vlgmr.msra.gmra.mxu2 %vm658_vm0, %v801_v48  ;;  %v564_v18 = vshrl.u32 %v563_v12, 3  ;;  %768 = vst.msk [vmem:[#allocation2 + $0x3b] sm:$0xff] %vm658_vm0, %v758_v17  ;;  %vm625_vm4 = vmand %vm615_vm2, %vm605_vm1  ;;  %v460_v20 = vmul.u32 52428, %v456_v7  ;;  %v461_v23 = vmul.u32 52429, %v457_v10  ;;  %v782_v31 = vpack.c.bf16 %v773_v25, %v772_v24  ;;  %v1084_v12 = vld [vmem:[#allocation2 + $0x13] sm:$0xff]  ;;  %v776_v25 = vld [vmem:[#allocation2 + $0x20] sm:$0xff] }
  0x50   : > { %v645_v28 = vsel %vm625_vm4, %v635_v9, %v537_v11  ;;  %v462_v33 = vmul.u32 52428, %v457_v10  ;;  %v730_v21 = vmax.f32 %v720_v16, 0.0  ;;  %v799_v43 = vpack.c.bf16 %v790_v38, %v789_v37  ;;  %v1083_v11 = vld [vmem:[#allocation2 + $0xb] sm:$0xff] }
  0x51   : > { %v565_v27 = vmul.u32 10, %v564_v18  ;;  %vm2130_vm6 = vcmp.lt.s32.totalorder %v645_v28, 8  ;;  %v463_v34 = vshll.u32 %v460_v20, 16  ;;  %v465_v35 = vshll.u32 %v461_v23, 16  ;;  %1732 = vmatmul.msk.bf16.vlgmr.msrb.gmra.mxu1 %vm658_vm0, %v782_v31  ;;  %v1823_v18 = vld [vmem:[%s2379_s1 + $0x38] sm:$0xff]  ;;  %v1821_v9 = vld [vmem:[%s2379_s1 + $0x28] sm:$0xff] }
  0x52   : > { %v759_v40 = vsel %vm2130_vm6, %v729_v14, 0.0  ;;  %v464_v45 = vshrl.u32 %v460_v20, 16  ;;  %1723 = vmatmul.msk.bf16.vlgmr.msra.gmra.mxu0 %vm658_vm0, %v799_v43  ;;  %v466_v51 = vshrl.u32 %v461_v23, 16  ;;  %v1836_v53 = vunpack.c.h.bf16 %v2037_v55  ;;  %v1822_v14 = vld [vmem:[%s2379_s1 + $0x30] sm:$0xff]  ;;  %1212 = vmatpush.bf16.msra.mxu1 %v1821_v9 }
  0x53   : > { %v566_v39 = vsub.s32 %v2067_v22, %v565_v27  ;;  %769 = vst.msk [vmem:[#allocation2 + $0x43] sm:$0xff] %vm658_vm0, %v759_v40  ;;  %vm467_vm8 = vc.u32 %v459_v19, %v463_v34  ;;  %v469_v3 = vadd.s32 %v463_v34, %v459_v19  ;;  %v783_v5 = vpack.c.bf16 %v775_v63, %v774_v15  ;;  %v1824_v19 = vld [vmem:[%s2379_s1 + $0x40] sm:$0xff]  ;;  %v777_v27 = vld [vmem:[#allocation2 + $0x28] sm:$0xff]  ;;  %v2181_v31 = vld [vmem:[#allocation2 + $0x12] sm:$0xff] }
  0x54   : > { %v468_v44 = vsel %vm467_vm8, 1, %v1875_v29  ;;  %v703_v62 = vmul.f32 %v1993_v49, %v1836_v53  ;;  %v1093_v17 = vpack.c.bf16 %v1084_v12, %v1083_v11  ;;  %1295 = vmatpush.bf16.msra.mxu2 %v1822_v14  ;;  %1461 = vmatpush.bf16.msra.mxu0 %v1824_v19  ;;  %v1000_v28 = vld [vmem:[#allocation2 + $0xa] sm:$0xff] }
  0x55   : > { %vm606_vm9 = vcmp.ne.s32.totalorder %v566_v39, 0  ;;  %vm616_vm10 = vcmp.lt.s32.totalorder %v566_v39, 0  ;;  %v636_v22 = vadd.s32 10, %v566_v39  ;;  %v470_v46 = vadd.s32 %v468_v44, %v462_v33  ;;  %v1086_v40 = vld [vmem:[#allocation2 + $0x23] sm:$0xff] }
  0x56   : > { %vm626_vm11 = vmand %vm616_vm10, %vm606_vm9  ;;  %vm471_vm14 = vc.u32 %v469_v3, %v465_v35  ;;  %v717_v7 = vadd.f32 %v2004_v57, %v703_v62  ;;  %v784_v33 = vpack.c.bf16 %v777_v27, %v776_v25  ;;  %v1010_v37 = vpack.c.bf16 %v2181_v31, %v1000_v28 }
  0x57   : > { %v646_v47 = vsel %vm626_vm11, %v636_v22, %v566_v39  ;;  %v472_v8 = vsel %vm471_vm14, 1, %v1875_v29  ;;  %v1085_v39 = vld [vmem:[#allocation2 + $0x1b] sm:$0xff] }
  0x58   : > { %vm2148_vm1 = vcmp.lt.s32.totalorder %v646_v47, 8  ;;  %v474_v52 = vadd.s32 %v472_v8, %v470_v46  ;;  %v727_v16 = vmax.f32 %v717_v7, 0.0  ;;  %v1094_v42 = vpack.c.bf16 %v1086_v40, %v1085_v39  ;;  %v917_v22 = vld [vmem:[#allocation2 + $0x2] sm:$0xff] }
  0x59   : > { %v760_v56 = vsel %vm2148_vm1, %v730_v21, 0.0  ;;  %v307_v21 = vadd.s32 72, %v1927_v2 }
  0x5a   : > { %770 = vst.msk [vmem:[#allocation2 + $0x4b] sm:$0xff] %vm658_vm0, %v760_v56  ;;  %v475_v58 = vadd.s32 %v474_v52, %v464_v45  ;;  %v797_v1 = vld [vmem:[#allocation2 + $0x41] sm:$0xff] }
  0x5b   : > { %v572_v3 = vand.u32 65535, %v307_v21  ;;  %v573_v43 = vshrl.u32 %v307_v21, 16  ;;  %v2189_v52 = vld [vmem:[#allocation2 + $0x22] sm:$0xff] }
  0x5c   : > { %v476_v59 = vadd.s32 %v475_v58, %v466_v51  ;;  %v1002_v51 = vld [vmem:[#allocation2 + $0x1a] sm:$0xff] }
  0x5d   : > { %v576_v30 = vmul.u32 52428, %v572_v3  ;;  %v575_v46 = vmul.u32 52429, %v572_v3  ;;  %v577_v47 = vmul.u32 52429, %v573_v43  ;;  %v578_v53 = vmul.u32 52428, %v573_v43 }
  0x5e   : > { %v477_v0 = vshrl.u32 %v476_v59, 3  ;;  %v927_v59 = vpack.c.bf16 %v1000_v28, %v917_v22  ;;  %v1011_v15 = vpack.c.bf16 %v2189_v52, %v1002_v51  ;;  %v928_v25 = vpack.c.bf16 %v1002_v51, %v2181_v31 }
  0x5f   : > { %v579_v8 = vshll.u32 %v576_v30, 16  ;;  %v581_v56 = vshll.u32 %v577_v47, 16 }
  0x60   : > { %v478_v6 = vmul.u32 10, %v477_v0 }
  0x61   : > { %v798_v10 = vld [vmem:[#allocation2 + $0x49] sm:$0xff]  ;;  %1733 = vmatmul.msk.bf16.gmra.mxu1 %vm658_vm0, %v783_v5  ;;  %vm583_vm10 = vc.u32 %v575_v46, %v579_v8  ;;  %v585_v58 = vadd.s32 %v579_v8, %v575_v46 }
  0x62   : > { %v803_v48 = vpack.c.bf16 %v798_v10, %v797_v1  ;;  %v479_v55 = vsub.s32 %v2113_v54, %v478_v6  ;;  %1765 = vmatmul.msk.bf16.vlgmr.msrb.gmra.mxu0 %vm658_vm0, %v1093_v17  ;;  %v584_v2 = vsel %vm583_vm10, 1, %v1875_v29  ;;  %v1087_v1 = vld [vmem:[#allocation2 + $0x2b] sm:$0xff]  ;;  %v580_v6 = vshrl.u32 %v576_v30, 16  ;;  %v780_v17 = vld [vmem:[#allocation2 + $0x40] sm:$0xff] }
  0x63   : > { %v586_v63 = vadd.s32 %v584_v2, %v578_v53  ;;  %vm587_vm11 = vc.u32 %v585_v58, %v581_v56  ;;  %v1091_v43 = vld [vmem:[#allocation2 + $0x4b] sm:$0xff]  ;;  %v1415_v53 = vld [vmem:[#allocation2 + $0x16] sm:$0xff]  ;;  %v1416_v56 = vld [vmem:[#allocation2 + $0x1e] sm:$0xff]  ;;  %vm672_vm10 = vcmask 125952  }
  0x64   : > { %1727 = vmatmul.msk.bf16.vlgmr.msra.gmra.mxu3 %vm658_vm0, %v803_v48  ;;  %vm603_vm2 = vcmp.ne.s32.totalorder %v479_v55, 0  ;;  %vm613_vm4 = vcmp.lt.s32.totalorder %v479_v55, 0  ;;  %v633_v54 = vadd.s32 10, %v479_v55  ;;  %v588_v0 = vsel %vm587_vm11, 1, %v1875_v29  ;;  %v1008_v46 = vld [vmem:[#allocation2 + $0x4a] sm:$0xff] }
  0x65   : > { %vm623_vm8 = vmand %vm613_vm4, %vm603_vm2  ;;  %1378 = vmatpush.bf16.msra.mxu3 %v1823_v18  ;;  %v590_v7 = vadd.s32 %v588_v0, %v586_v63  ;;  %v582_v48 = vshrl.u32 %v577_v47, 16  ;;  %v1844_v29 = vunpack.c.h.bf16 %v2100_v36  ;;  %v781_v18 = vld [vmem:[#allocation2 + $0x48] sm:$0xff]  ;;  %v1425_v58 = vpack.c.bf16 %v1416_v56, %v1415_v53  ;;  %v1333_v63 = vld [vmem:[#allocation2 + $0x1d] sm:$0xff] }
  0x66   : > { %v643_v20 = vsel %vm623_vm8, %v633_v54, %v479_v55  ;;  %v786_v27 = vpack.c.bf16 %v781_v18, %v780_v17 }
  0x67   : > { %vm2174_vm9 = vcmp.lt.s32.totalorder %v643_v20, 8  ;;  %v591_v55 = vadd.s32 %v590_v7, %v580_v6  ;;  %v707_v54 = vmul.f32 %v1993_v49, %v1844_v29  ;;  %v1090_v49 = vld [vmem:[#allocation2 + $0x43] sm:$0xff] }
  0x68   : > { %v757_v24 = vsel %vm2174_vm9, %v727_v16, 0.0  ;;  %v1004_v16 = vld [vmem:[#allocation2 + $0x2a] sm:$0xff] }
  0x69   : > { %767 = vst.msk [vmem:[#allocation2 + $0x33] sm:$0xff] %vm658_vm0, %v757_v24  ;;  %v592_v11 = vadd.s32 %v591_v55, %v582_v48  ;;  %v721_v24 = vadd.f32 %v2004_v57, %v707_v54  ;;  %v929_v39 = vpack.c.bf16 %v1004_v16, %v2189_v52  ;;  %v1417_v6 = vld [vmem:[#allocation2 + $0x26] sm:$0xff]  ;;  %v1172_v55 = vld [vmem:[#allocation2 + $0x3c] sm:$0xff] }
  0x6b   : > { %v593_v12 = vshrl.u32 %v592_v11, 3  ;;  %v2229_v11 = vld [vmem:[#allocation2 + $0x44] sm:$0xff] }
  0x6c   : > { %v1179_v17 = vpack.c.bf16 %v2229_v11, %v1172_v55 }
  0x6d   : > { %v594_v14 = vmul.u32 10, %v593_v12  ;;  %v1334_v12 = vld [vmem:[#allocation2 + $0x25] sm:$0xff] }
  0x6f   : > { %v595_v9 = vsub.s32 %v307_v21, %v594_v14  ;;  %v1167_v21 = vld [vmem:[#allocation2 + $0x14] sm:$0xff] }
  0x70   : > { %v795_v34 = vld [vmem:[#allocation2 + $0x31] sm:$0xff]  ;;  %v796_v35 = vld [vmem:[#allocation2 + $0x39] sm:$0xff] }
  0x71   : > { %v802_v38 = vpack.c.bf16 %v796_v35, %v795_v34  ;;  %1734 = vmatmul.msk.bf16.gmra.mxu1 %vm658_vm0, %v784_v33  ;;  %v778_v44 = vld [vmem:[#allocation2 + $0x30] sm:$0xff]  ;;  %v779_v45 = vld [vmem:[#allocation2 + $0x38] sm:$0xff]  ;;  %vm607_vm14 = vcmp.ne.s32.totalorder %v595_v9, 0  ;;  %vm617_vm2 = vcmp.lt.s32.totalorder %v595_v9, 0  ;;  %v637_v20 = vadd.s32 10, %v595_v9 }
  0x72   : > { %1766 = vmatmul.msk.bf16.gmra.mxu0 %vm658_vm0, %v1094_v42  ;;  %v785_v62 = vpack.c.bf16 %v779_v45, %v778_v44  ;;  %v1088_v5 = vld [vmem:[#allocation2 + $0x33] sm:$0xff]  ;;  %vm627_vm4 = vmand %vm617_vm2, %vm607_vm14  ;;  %v731_v34 = vmax.f32 %v721_v24, 0.0  ;;  %v1089_v35 = vld [vmem:[#allocation2 + $0x3b] sm:$0xff] }
  0x73   : > { %1726 = vmatmul.msk.bf16.gmra.mxu2 %vm658_vm0, %v802_v38  ;;  %v1095_v10 = vpack.c.bf16 %v1088_v5, %v1087_v1  ;;  %v1005_v19 = vld [vmem:[#allocation2 + $0x32] sm:$0xff]  ;;  %v647_v33 = vsel %vm627_vm4, %v637_v20, %v595_v9  ;;  %v1096_v57 = vpack.c.bf16 %v1090_v49, %v1089_v35  ;;  %v1006_v31 = vld [vmem:[#allocation2 + $0x3a] sm:$0xff]  ;;  %v1007_v38 = vld [vmem:[#allocation2 + $0x42] sm:$0xff] }
  0x74   : > { %1754 = vmatmul.msk.bf16.vlgmr.msrb.gmra.mxu3 %vm658_vm0, %v1010_v37  ;;  %v1012_v28 = vpack.c.bf16 %v1005_v19, %v1004_v16  ;;  %vm2202_vm8 = vcmp.lt.s32.totalorder %v647_v33, 8  ;;  %v1013_v40 = vpack.c.bf16 %v1007_v38, %v1006_v31  ;;  %v1166_v42 = vld [vmem:[#allocation2 + $0xc] sm:$0xff]  ;;  %v1168_v44 = vld [vmem:[#allocation2 + $0x1c] sm:$0xff]  ;;  %v1169_v45 = vld [vmem:[#allocation2 + $0x24] sm:$0xff]  ;;  %v930_v8 = vpack.c.bf16 %v1006_v31, %v1005_v19 }
  0x75   : > { %v761_v37 = vsel %vm2202_vm8, %v731_v34, 0.0  ;;  %v1176_v3 = vpack.c.bf16 %v1167_v21, %v1166_v42  ;;  %v1177_v51 = vpack.c.bf16 %v1169_v45, %v1168_v44  ;;  %v2222_v2 = vld [vmem:[#allocation2 + $0x34] sm:$0xff]  ;;  %v931_v0 = vpack.c.bf16 %v1008_v46, %v1007_v38  ;;  %v1420_v16 = vld [vmem:[#allocation2 + $0x3e] sm:$0xff]  ;;  %v1421_v42 = vld [vmem:[#allocation2 + $0x46] sm:$0xff] }
  0x76   : > { %771 = vst.msk [vmem:[#allocation2 + $0x53] sm:$0xff] %vm658_vm0, %v761_v37  ;;  %v1418_v7 = vld [vmem:[#allocation2 + $0x2e] sm:$0xff]  ;;  %v1259_v29 = vpack.c.bf16 %v1168_v44, %v1167_v21  ;;  %v1419_v54 = vld [vmem:[#allocation2 + $0x36] sm:$0xff] }
  0x77   : > { %v1335_v14 = vld [vmem:[#allocation2 + $0x2d] sm:$0xff]  ;;  %v1427_v20 = vpack.c.bf16 %v1420_v16, %v1419_v54  ;;  %v1336_v33 = vld [vmem:[#allocation2 + $0x35] sm:$0xff]  ;;  %v1337_v34 = vld [vmem:[#allocation2 + $0x3d] sm:$0xff] }
  0x78   : > { %v1343_v18 = vpack.c.bf16 %v1335_v14, %v1334_v12  ;;  %v1344_v31 = vpack.c.bf16 %v1337_v34, %v1336_v33 }
  0x7d   : > { %v1092_v30 = vld [vmem:[#allocation2 + $0x53] sm:$0xff] }
  0x7e   : > { %v1097_v22 = vpack.c.bf16 %v1092_v30, %v1091_v43  ;;  %v1009_v47 = vld [vmem:[#allocation2 + $0x52] sm:$0xff] }
  0x7f   : > { %v1014_v52 = vpack.c.bf16 %v1009_v47, %v1008_v46  ;;  %v1174_v35 = vld [vmem:[#allocation2 + $0x4c] sm:$0xff]  ;;  %v2238_v49 = vld [vmem:[#allocation2 + $0x54] sm:$0xff] }
  0x80   : > { %v1422_v21 = vld [vmem:[#allocation2 + $0x4e] sm:$0xff]  ;;  %v1338_v46 = vld [vmem:[#allocation2 + $0x45] sm:$0xff] }
  0x81   : > { %1735 = vmatmul.msk.bf16.gmra.mxu1 %vm658_vm0, %v785_v62  ;;  %v1170_v62 = vld [vmem:[#allocation2 + $0x2c] sm:$0xff] }
  0x82   : > { %1767 = vmatmul.msk.bf16.gmra.mxu0 %vm658_vm0, %v1095_v10  ;;  %v1178_v1 = vpack.c.bf16 %v2222_v2, %v1170_v62  ;;  %v1426_v10 = vpack.c.bf16 %v1418_v7, %v1417_v6  ;;  %v1260_v37 = vpack.c.bf16 %v1170_v62, %v1169_v45  ;;  %v1339_v47 = vld [vmem:[#allocation2 + $0x4d] sm:$0xff]  ;;  %v1424_v62 = vld [vmem:[#allocation2 + $0x5e] sm:$0xff]  ;;  %v1340_v7 = vld [vmem:[#allocation2 + $0x55] sm:$0xff] }
  0x83   : > { %1743 = vmatmul.msk.bf16.vlgmr.msrb.gmra.mxu2 %vm658_vm0, %v927_v59  ;;  %v1345_v53 = vpack.c.bf16 %v1339_v47, %v1338_v46 }
  0x84   : > { %1755 = vmatmul.msk.bf16.gmra.mxu3 %vm658_vm0, %v1011_v15  ;;  %v1332_v15 = vld [vmem:[#allocation2 + $0x15] sm:$0xff] }
  0x85   : > { %v1342_v5 = vpack.c.bf16 %v1333_v63, %v1332_v15 }
  0x91   : > { %1736 = vmatmul.msk.bf16.gmra.mxu1 %vm658_vm0, %v786_v27 }
  0x92   : > { %1768 = vmatmul.msk.bf16.gmra.mxu0 %vm658_vm0, %v1096_v57  ;;  %v1180_v57 = vpack.c.bf16 %v2238_v49, %v1174_v35 }
  0x93   : > { %1744 = vmatmul.msk.bf16.gmra.mxu2 %vm658_vm0, %v928_v25 }
  0x94   : > { %1756 = vmatmul.msk.bf16.gmra.mxu3 %vm658_vm0, %v1012_v28 }
  0xa1   : > { %1776 = vmatmul.msk.bf16.vlgmr.msra.gmra.mxu1 %vm658_vm0, %v1176_v3  ;;  %v1428_v3 = vpack.c.bf16 %v1422_v21, %v1421_v42 }
  0xa2   : > { %1769 = vmatmul.msk.bf16.gmra.mxu0 %vm658_vm0, %v1097_v22 }
  0xa3   : > { %1745 = vmatmul.msk.bf16.gmra.mxu2 %vm658_vm0, %v929_v39 }
  0xa4   : > { %1757 = vmatmul.msk.bf16.gmra.mxu3 %vm658_vm0, %v1013_v40 }
  0xb1   : > { %1777 = vmatmul.msk.bf16.gmra.mxu1 %vm658_vm0, %v1177_v51  ;;  %v1261_v51 = vpack.c.bf16 %v1172_v55, %v2222_v2  ;;  %v1341_v2 = vld [vmem:[#allocation2 + $0x5d] sm:$0xff] }
  0xb2   : > { %1809 = vmatmul.msk.bf16.vlgmr.msra.gmra.mxu0 %vm658_vm0, %v1425_v58  ;;  %v1346_v12 = vpack.c.bf16 %v1341_v2, %v1340_v7 }
  0xb3   : > { %1746 = vmatmul.msk.bf16.gmra.mxu2 %vm658_vm0, %v930_v8 }
  0xb4   : > { %1758 = vmatmul.msk.bf16.gmra.mxu3 %vm658_vm0, %v1014_v52 }
  0xb7   : > { %v842_v59 = vpop.f32.mrf.mxu1 }
  0xbf   : > { %v844_v48 = vpop.f32.mrf.mxu1 }
  0xc1   : > { %1778 = vmatmul.msk.bf16.gmra.mxu1 %vm658_vm0, %v1178_v1 }
  0xc2   : > { %1810 = vmatmul.msk.bf16.gmra.mxu0 %vm658_vm0, %v1426_v10 }
  0xc3   : > { %1747 = vmatmul.msk.bf16.gmra.mxu2 %vm658_vm0, %v931_v0 }
  0xc4   : > { %1798 = vmatmul.msk.bf16.vlgmr.msra.gmra.mxu3 %vm658_vm0, %v1342_v5 }
  0xce   : > { %v892_v9 = vpop.f32.mrf.mxu1 }
  0xcf   : > { %v837_v19 = vpop.f32.mrf.mxu0 }
  0xd0   : > { %v893_v24 = vadd.f32 %v892_v9, %v837_v19 }
  0xd1   : > { %1779 = vmatmul.msk.bf16.gmra.mxu1 %vm658_vm0, %v1179_v17 }
  0xd2   : > { %1811 = vmatmul.msk.bf16.gmra.mxu0 %vm658_vm0, %v1427_v20  ;;  %v847_v40 = vpop.f32.mrf.mxu2 }
  0xd3   : > { %1787 = vmatmul.msk.bf16.vlgmr.msra.gmra.mxu2 %vm658_vm0, %v1259_v29 }
  0xd4   : > { %1799 = vmatmul.msk.bf16.gmra.mxu3 %vm658_vm0, %v1343_v18 }
  0xd6   : > { %v894_v25 = vpop.f32.mrf.mxu1 }
  0xd7   : > { %v839_v27 = vpop.f32.mrf.mxu0 }
  0xd8   : > { %v2236_v28 = vadd.f32 %v894_v25, %v839_v27  ;;  %v1258_v27 = vld [vmem:[#allocation2 + $0x5c] sm:$0xff] }
  0xda   : > { %v849_v45 = vpop.f32.mrf.mxu2 }
  0xde   : > { %v897_v38 = vpop.f32.mrf.mxu1 }
  0xdf   : > { %v2241_v39 = vadd.f32 %v897_v38, %v842_v59  ;;  %v1131_v43 = vpop.f32.mrf.mxu0  ;;  %v1423_v59 = vld [vmem:[#allocation2 + $0x56] sm:$0xff] }
  0xe0   : > { %v1429_v15 = vpack.c.bf16 %v1424_v62, %v1423_v59 }
  0xe1   : > { %1780 = vmatmul.msk.bf16.gmra.mxu1 %vm658_vm0, %v1180_v57 }
  0xe2   : > { %1812 = vmatmul.msk.bf16.gmra.mxu0 %vm658_vm0, %v1428_v3 }
  0xe3   : > { %1788 = vmatmul.msk.bf16.gmra.mxu2 %vm658_vm0, %v1260_v37 }
  0xe4   : > { %1800 = vmatmul.msk.bf16.gmra.mxu3 %vm658_vm0, %v1344_v31 }
  0xe6   : > { %v899_v22 = vpop.f32.mrf.mxu1 }
  0xe7   : > { %v857_v30 = vpop.f32.mrf.mxu3  ;;  %v900_v44 = vadd.f32 %v899_v22, %v844_v48  ;;  %v1133_v8 = vpop.f32.mrf.mxu0  ;;  %v1262_v48 = vpack.c.bf16 %v1174_v35, %v2229_v11  ;;  %v1263_v35 = vpack.c.bf16 %v1258_v27, %v2238_v49 }
  0xee   : > { %v902_v56 = vpop.f32.mrf.mxu1 }
  0xef   : > { %v859_v52 = vpop.f32.mrf.mxu3  ;;  %v903_v58 = vadd.f32 %v902_v56, %v847_v40  ;;  %v1136_v1 = vpop.f32.mrf.mxu0 }
  0xf2   : > { %1813 = vmatmul.msk.bf16.gmra.mxu0 %vm658_vm0, %v1429_v15 }
  0xf3   : > { %1789 = vmatmul.msk.bf16.gmra.mxu2 %vm658_vm0, %v1261_v51 }
  0xf4   : > { %1801 = vmatmul.msk.bf16.gmra.mxu3 %vm658_vm0, %v1345_v53 }
  0xf6   : > { %v852_v63 = vpop.f32.mrf.mxu2  ;;  %v904_v5 = vpop.f32.mrf.mxu1 }
  0xf7   : > { %v1048_v0 = vpop.f32.mrf.mxu3  ;;  %v905_v6 = vadd.f32 %v904_v5, %v849_v45  ;;  %v1138_v17 = vpop.f32.mrf.mxu0 }
  0xfe   : > { %v854_v10 = vpop.f32.mrf.mxu2  ;;  %v907_v14 = vpop.f32.mrf.mxu1 }
  0xff   : > { %v1050_v55 = vpop.f32.mrf.mxu3  ;;  %v908_v29 = vadd.f32 %v907_v14, %v852_v63  ;;  %v1141_v33 = vpop.f32.mrf.mxu0 }
 0x103   : > { %1790 = vmatmul.msk.bf16.gmra.mxu2 %vm658_vm0, %v1262_v48 }
 0x104   : > { %1802 = vmatmul.msk.bf16.gmra.mxu3 %vm658_vm0, %v1346_v12 }
 0x106   : > { %v965_v18 = vpop.f32.mrf.mxu2  ;;  %v909_v16 = vpop.f32.mrf.mxu1 }
 0x107   : > { %v990_v9 = vadd.f32 %v965_v18, %v893_v24  ;;  %v1053_v54 = vpop.f32.mrf.mxu3  ;;  %v910_v20 = vadd.f32 %v909_v16, %v854_v10  ;;  %v1143_v42 = vpop.f32.mrf.mxu0 }
 0x109   : > { %v1073_v19 = vadd.f32 %v1048_v0, %v990_v9 }
 0x10b   : > { %v2254_v25 = vadd.f32 %v1131_v43, %v1073_v19 }
 0x10e   : > { %v967_v11 = vpop.f32.mrf.mxu2  ;;  %v912_v57 = vpop.f32.mrf.mxu1 }
 0x10f   : > { %v991_v34 = vadd.f32 %v967_v11, %v2236_v28  ;;  %v1055_v37 = vpop.f32.mrf.mxu3  ;;  %v913_v38 = vadd.f32 %v912_v57, %v857_v30  ;;  %v1146_v51 = vpop.f32.mrf.mxu0 }
 0x111   : > { %v1074_v31 = vadd.f32 %v1050_v55, %v991_v34 }
 0x113   : > { %1791 = vmatmul.msk.bf16.gmra.mxu2 %vm658_vm0, %v1263_v35  ;;  %v1157_v24 = vadd.f32 %v1133_v8, %v1074_v31 }
 0x116   : > { %v970_v40 = vpop.f32.mrf.mxu2  ;;  %v914_v43 = vpop.f32.mrf.mxu1 }
 0x117   : > { %v992_v21 = vadd.f32 %v970_v40, %v2241_v39  ;;  %v1058_v3 = vpop.f32.mrf.mxu3  ;;  %v915_v45 = vadd.f32 %v914_v43, %v859_v52  ;;  %v1148_v15 = vpop.f32.mrf.mxu0  ;;  %v2280_v43 = vld [vmem:[%s2380_s2] ss:$0 sm:$0xff] }
 0x119   : > { %v1075_v22 = vadd.f32 %v1053_v54, %v992_v21 }
 0x11b   : > { %v2260_v46 = vadd.f32 %v1136_v1, %v1075_v22 }
 0x11e   : > { %v972_v28 = vpop.f32.mrf.mxu2  ;;  %v1214_v18 = vpop.f32.mrf.mxu1 }
 0x11f   : > { %v993_v47 = vadd.f32 %v972_v28, %v900_v44  ;;  %v1060_v49 = vpop.f32.mrf.mxu3  ;;  %v1151_v44 = vpop.f32.mrf.mxu0 }
 0x121   : > { %v1076_v53 = vadd.f32 %v1055_v37, %v993_v47 }
 0x123   : > { %v2262_v56 = vadd.f32 %v1138_v17, %v1076_v53 }
 0x126   : > { %v975_v30 = vpop.f32.mrf.mxu2  ;;  %v1216_v11 = vpop.f32.mrf.mxu1 }
 0x127   : > { %v994_v59 = vadd.f32 %v975_v30, %v903_v58  ;;  %v1063_v8 = vpop.f32.mrf.mxu3  ;;  %v1153_v12 = vpop.f32.mrf.mxu0  ;;  %v1240_v47 = vadd.f32 %v1216_v11, %v1157_v24 }
 0x129   : > { %v1077_v62 = vadd.f32 %v1058_v3, %v994_v59 }
 0x12b   : > { %v2264_v63 = vadd.f32 %v1141_v33, %v1077_v62 }
 0x12e   : > { %v977_v39 = vpop.f32.mrf.mxu2  ;;  %v1219_v40 = vpop.f32.mrf.mxu1 }
 0x12f   : > { %v995_v0 = vadd.f32 %v977_v39, %v905_v6  ;;  %v1065_v5 = vpop.f32.mrf.mxu3  ;;  %v1463_v27 = vpop.f32.mrf.mxu0 }
 0x131   : > { %v1078_v52 = vadd.f32 %v1060_v49, %v995_v0 }
 0x133   : > { %v2266_v1 = vadd.f32 %v1143_v42, %v1078_v52  ;;  %v1239_v42 = vadd.f32 %v1214_v18, %v2254_v25 }
 0x136   : > { %v980_v7 = vpop.f32.mrf.mxu2 }
 0x137   : > { %v996_v2 = vadd.f32 %v980_v7, %v908_v29  ;;  %v1068_v10 = vpop.f32.mrf.mxu3  ;;  %v1465_v31 = vpop.f32.mrf.mxu0 }
 0x139   : > { %v1079_v48 = vadd.f32 %v1063_v8, %v996_v2 }
 0x13b   : > { %v2268_v55 = vadd.f32 %v1146_v51, %v1079_v48  ;;  %v1221_v51 = vpop.f32.mrf.mxu1 }
 0x13e   : > { %v982_v58 = vpop.f32.mrf.mxu2 }
 0x13f   : > { %v997_v14 = vadd.f32 %v982_v58, %v910_v20  ;;  %v1070_v17 = vpop.f32.mrf.mxu3 }
 0x141   : > { %v1080_v9 = vadd.f32 %v1065_v5, %v997_v14 }
 0x143   : > { %v2270_v54 = vadd.f32 %v1148_v15, %v1080_v9  ;;  %v1241_v15 = vadd.f32 %v1219_v40, %v2260_v46  ;;  %v1224_v58 = vpop.f32.mrf.mxu1  ;;  %v1242_v9 = vadd.f32 %v1221_v51, %v2262_v56 }
 0x146   : > { %v985_v6 = vpop.f32.mrf.mxu2 }
 0x147   : > { %v998_v16 = vadd.f32 %v985_v6, %v913_v38  ;;  %v1380_v19 = vpop.f32.mrf.mxu3 }
 0x149   : > { %v1081_v33 = vadd.f32 %v1068_v10, %v998_v16 }
 0x14b   : > { %v2272_v34 = vadd.f32 %v1151_v44, %v1081_v33  ;;  %v1226_v56 = vpop.f32.mrf.mxu1 }
 0x14c   : > { %v1244_v60 = vadd.f32 %v1226_v56, %v2266_v1 }
 0x14e   : > { %v987_v29 = vpop.f32.mrf.mxu2 }
 0x14f   : > { %v999_v35 = vadd.f32 %v987_v29, %v915_v45  ;;  %v1382_v37 = vpop.f32.mrf.mxu3  ;;  %v1468_v45 = vpop.f32.mrf.mxu0 }
 0x151   : > { %v1082_v57 = vadd.f32 %v1070_v17, %v999_v35 }
 0x153   : > { %v2274_v20 = vadd.f32 %v1153_v12, %v1082_v57 }
 0x156   : > { %v1297_v21 = vpop.f32.mrf.mxu2 }
 0x157   : > { %v1322_v3 = vadd.f32 %v1297_v21, %v1239_v42  ;;  %v1385_v22 = vpop.f32.mrf.mxu3  ;;  %v1470_v52 = vpop.f32.mrf.mxu0 }
 0x159   : > { %v1405_v38 = vadd.f32 %v1380_v19, %v1322_v3  ;;  %v1243_v3 = vadd.f32 %v1224_v58, %v2264_v63 }
 0x15b   : > { %v1488_v28 = vadd.f32 %v1463_v27, %v1405_v38 }
 0x15d   : > { %v1502_v49 = vadd.f32 %v2280_v43, %v1488_v28 }
 0x15e   : > { %v1299_v53 = vpop.f32.mrf.mxu2 }
 0x15f   : > { %v1512_v25 = vsel %vm2019_vm13, %v1502_v49, 0.0  ;;  %v1323_v30 = vadd.f32 %v1299_v53, %v1240_v47  ;;  %v1387_v62 = vpop.f32.mrf.mxu3  ;;  %vm1547_vm13 = vcmask 122880  }
 0x160   : > { %v1585_v59 = vpack.c.bf16 %v1512_v25, %v1512_v25  ;;  %v1549_v0 = vmul.f32 %v1512_v25, %v1512_v25  ;;  %v1522_v7 = vsel %vm658_vm0, %v1512_v25, 0.0 }
 0x161   : > { %v1406_v8 = vadd.f32 %v1382_v37, %v1323_v30  ;;  %v1473_v37 = vpop.f32.mrf.mxu0 }
 0x162   : > { %1595 = vst.msk [vmem:[%s2288_s13] sm:$0xf] %vm672_vm10, %v1585_v59  ;;  %v1559_v46 = vsel %vm658_vm0, %v1549_v0, 0.0 }
 0x163   : > { %v1489_v24 = vadd.f32 %v1465_v31, %v1406_v8 }
 0x165   : > { %v1503_v39 = vadd.f32 %v2280_v43, %v1489_v24  ;;  %v1229_v24 = vpop.f32.mrf.mxu1 }
 0x166   : > { %v1302_v5 = vpop.f32.mrf.mxu2 }
 0x167   : > { %v1513_v41 = vsel %vm2030_vm3, %v1503_v39, 0.0  ;;  %v1324_v44 = vadd.f32 %v1302_v5, %v1241_v15  ;;  %v1390_v19 = vpop.f32.mrf.mxu3 }
 0x168   : > { %v1523_v2 = vsel %vm658_vm0, %v1513_v41, 0.0  ;;  %v1550_v10 = vmul.f32 %v1513_v41, %v1513_v41  ;;  %v1586_v48 = vpack.c.bf16 %v1513_v41, %v1513_v41 }
 0x169   : > { %v1524_v12 = vadd.f32 %v1523_v2, %v1522_v7  ;;  %v1407_v14 = vadd.f32 %v1385_v22, %v1324_v44  ;;  %v1475_v63 = vpop.f32.mrf.mxu0 }
 0x16a   : > { %v1560_v17 = vsel %vm658_vm0, %v1550_v10, 0.0  ;;  %1596 = vst.msk [vmem:[%s2288_s13 + $0x4] sm:$0xf] %vm672_vm10, %v1586_v48 }
 0x16b   : > { %v1561_v18 = vadd.f32 %v1560_v17, %v1559_v46  ;;  %v1490_v4 = vadd.f32 %v1468_v45, %v1407_v14 }
 0x16d   : > { %v1504_v6 = vadd.f32 %v2280_v43, %v1490_v4  ;;  %v1231_v14 = vpop.f32.mrf.mxu1 }
 0x16e   : > { %v1304_v16 = vpop.f32.mrf.mxu2 }
 0x16f   : > { %v1514_v27 = vsel %vm2041_vm5, %v1504_v6, 0.0  ;;  %v1325_v33 = vadd.f32 %v1304_v16, %v1242_v9  ;;  %v1392_v51 = vpop.f32.mrf.mxu3 }
 0x170   : > { %v1525_v11 = vsel %vm658_vm0, %v1514_v27, 0.0  ;;  %v1551_v29 = vmul.f32 %v1514_v27, %v1514_v27  ;;  %v1587_v35 = vpack.c.bf16 %v1514_v27, %v1514_v27 }
 0x171   : > { %v1526_v57 = vadd.f32 %v1525_v11, %v1524_v12  ;;  %v1408_v31 = vadd.f32 %v1387_v62, %v1325_v33  ;;  %v1478_v58 = vpop.f32.mrf.mxu0  ;;  %v1245_v12 = vadd.f32 %v1229_v24, %v2268_v55 }
 0x172   : > { %v1562_v40 = vsel %vm658_vm0, %v1551_v29, 0.0  ;;  %1597 = vst.msk [vmem:[%s2288_s13 + $0x8] sm:$0xf] %vm672_vm10, %v1587_v35  ;;  %v1246_v29 = vadd.f32 %v1231_v14, %v2270_v54 }
 0x173   : > { %v1563_v42 = vadd.f32 %v1562_v40, %v1561_v18  ;;  %v1491_v21 = vadd.f32 %v1470_v52, %v1408_v31 }
 0x175   : > { %v1505_v61 = vadd.f32 %v2280_v43, %v1491_v21  ;;  %v1234_v40 = vpop.f32.mrf.mxu1 }
 0x176   : > { %v1307_v38 = vpop.f32.mrf.mxu2 }
 0x177   : > { %v1515_v22 = vsel %vm2077_vm12, %v1505_v61, 0.0  ;;  %v1326_v28 = vadd.f32 %v1307_v38, %v1243_v3  ;;  %v1395_v10 = vpop.f32.mrf.mxu3 }
 0x178   : > { %v1527_v45 = vsel %vm658_vm0, %v1515_v22, 0.0  ;;  %v1552_v47 = vmul.f32 %v1515_v22, %v1515_v22  ;;  %v1588_v49 = vpack.c.bf16 %v1515_v22, %v1515_v22 }
 0x179   : > { %v1528_v53 = vadd.f32 %v1527_v45, %v1526_v57  ;;  %v1409_v25 = vadd.f32 %v1390_v19, %v1326_v28  ;;  %v1480_v35 = vpop.f32.mrf.mxu0  ;;  %v1247_v28 = vadd.f32 %v1234_v40, %v2272_v34 }
 0x17a   : > { %v1564_v30 = vsel %vm658_vm0, %v1552_v47, 0.0  ;;  %1598 = vst.msk [vmem:[%s2288_s13 + $0xc] sm:$0xf] %vm672_vm10, %v1588_v49 }
 0x17b   : > { %v1565_v59 = vadd.f32 %v1564_v30, %v1563_v42  ;;  %v1492_v8 = vadd.f32 %v1473_v37, %v1409_v25 }
 0x17d   : > { %v1506_v62 = vadd.f32 %v2280_v43, %v1492_v8  ;;  %v1236_v24 = vpop.f32.mrf.mxu1 }
 0x17e   : > { %v1309_v15 = vpop.f32.mrf.mxu2 }
 0x17f   : > { %v1516_v39 = vsel %vm2090_vm7, %v1506_v62, 0.0  ;;  %v1327_v0 = vadd.f32 %v1309_v15, %v1244_v60  ;;  %v1397_v11 = vpop.f32.mrf.mxu3  ;;  %v1248_v15 = vadd.f32 %v1236_v24, %v2274_v20 }
 0x180   : > { %v1529_v5 = vsel %vm658_vm0, %v1516_v39, 0.0  ;;  %v1553_v52 = vmul.f32 %v1516_v39, %v1516_v39  ;;  %v1589_v41 = vpack.c.bf16 %v1516_v39, %v1516_v39 }
 0x181   : > { %v1530_v44 = vadd.f32 %v1529_v5, %v1528_v53  ;;  %v1410_v7 = vadd.f32 %v1392_v51, %v1327_v0 }
 0x182   : > { %v1566_v2 = vsel %vm658_vm0, %v1553_v52, 0.0  ;;  %1599 = vst.msk [vmem:[%s2288_s13 + $0x10] sm:$0xf] %vm672_vm10, %v1589_v41 }
 0x183   : > { %v1567_v1 = vadd.f32 %v1566_v2, %v1565_v59  ;;  %v1493_v48 = vadd.f32 %v1475_v63, %v1410_v7  ;;  %v1483_v63 = vpop.f32.mrf.mxu0 }
 0x185   : > { %v1507_v26 = vadd.f32 %v2280_v43, %v1493_v48 }
 0x186   : > { %v1312_v46 = vpop.f32.mrf.mxu2 }
 0x187   : > { %v1517_v17 = vsel %vm2174_vm9, %v1507_v26, 0.0  ;;  %v1328_v18 = vadd.f32 %v1312_v46, %v1245_v12  ;;  %v1400_v45 = vpop.f32.mrf.mxu3 }
 0x188   : > { %v1531_v4 = vsel %vm658_vm0, %v1517_v17, 0.0  ;;  %v1554_v9 = vmul.f32 %v1517_v17, %v1517_v17  ;;  %v1590_v6 = vpack.c.bf16 %v1517_v17, %v1517_v17 }
 0x189   : > { %v1532_v16 = vadd.f32 %v1531_v4, %v1530_v44  ;;  %v1411_v19 = vadd.f32 %v1395_v10, %v1328_v18 }
 0x18a   : > { %v1568_v27 = vsel %vm658_vm0, %v1554_v9, 0.0  ;;  %1600 = vst.msk [vmem:[%s2288_s13 + $0x14] sm:$0xf] %vm672_vm10, %v1590_v6 }
 0x18b   : > { %v1569_v33 = vadd.f32 %v1568_v27, %v1567_v1  ;;  %v1494_v55 = vadd.f32 %v1478_v58, %v1411_v19  ;;  %v1485_v20 = vpop.f32.mrf.mxu0 }
 0x18d   : > { %v1508_v23 = vadd.f32 %v2280_v43, %v1494_v55 }
 0x18e   : > { %v1314_v37 = vpop.f32.mrf.mxu2 }
 0x18f   : > { %v1518_v57 = vsel %vm2121_vm15, %v1508_v23, 0.0  ;;  %v1329_v31 = vadd.f32 %v1314_v37, %v1246_v29  ;;  %v1402_v7 = vpop.f32.mrf.mxu3 }
 0x190   : > { %v1533_v56 = vsel %vm658_vm0, %v1518_v57, 0.0  ;;  %v1555_v42 = vmul.f32 %v1518_v57, %v1518_v57  ;;  %v1591_v21 = vpack.c.bf16 %v1518_v57, %v1518_v57 }
 0x191   : > { %v1534_v3 = vadd.f32 %v1533_v56, %v1532_v16  ;;  %v1412_v61 = vadd.f32 %v1397_v11, %v1329_v31 }
 0x192   : > { %v1570_v38 = vsel %vm658_vm0, %v1555_v42, 0.0  ;;  %1601 = vst.msk [vmem:[%s2288_s13 + $0x18] sm:$0xf] %vm672_vm10, %v1591_v21 }
 0x193   : > { %v1571_v54 = vadd.f32 %v1570_v38, %v1569_v33  ;;  %v1495_v22 = vadd.f32 %v1480_v35, %v1412_v61 }
 0x195   : > { %v1509_v13 = vadd.f32 %v2280_v43, %v1495_v22 }
 0x196   : > { %v1317_v47 = vpop.f32.mrf.mxu2 }
 0x197   : > { %v1519_v49 = vsel %vm2130_vm6, %v1509_v13, 0.0  ;;  %v1330_v51 = vadd.f32 %v1317_v47, %v1247_v28 }
 0x198   : > { %v1535_v53 = vsel %vm658_vm0, %v1519_v49, 0.0  ;;  %v1556_v25 = vmul.f32 %v1519_v49, %v1519_v49  ;;  %v1592_v30 = vpack.c.bf16 %v1519_v49, %v1519_v49 }
 0x199   : > { %v1536_v59 = vadd.f32 %v1535_v53, %v1534_v3  ;;  %v1413_v8 = vadd.f32 %v1400_v45, %v1330_v51 }
 0x19a   : > { %v1572_v60 = vsel %vm658_vm0, %v1556_v25, 0.0  ;;  %1602 = vst.msk [vmem:[%s2288_s13 + $0x1c] sm:$0xf] %vm672_vm10, %v1592_v30 }
 0x19b   : > { %v1573_v34 = vadd.f32 %v1572_v60, %v1571_v54  ;;  %v1496_v62 = vadd.f32 %v1483_v63, %v1413_v8 }
 0x19d   : > { %v1510_v32 = vadd.f32 %v2280_v43, %v1496_v62 }
 0x19e   : > { %v1319_v39 = vpop.f32.mrf.mxu2 }
 0x19f   : > { %v1520_v0 = vsel %vm2148_vm1, %v1510_v32, 0.0  ;;  %v1331_v5 = vadd.f32 %v1319_v39, %v1248_v15 }
 0x1a0   : > { %v1537_v52 = vsel %vm658_vm0, %v1520_v0, 0.0  ;;  %v1557_v41 = vmul.f32 %v1520_v0, %v1520_v0  ;;  %v1593_v44 = vpack.c.bf16 %v1520_v0, %v1520_v0 }
 0x1a1   : > { %v1538_v2 = vadd.f32 %v1537_v52, %v1536_v59  ;;  %v1414_v10 = vadd.f32 %v1402_v7, %v1331_v5 }
 0x1a2   : > { %v1574_v1 = vsel %vm658_vm0, %v1557_v41, 0.0  ;;  %1603 = vst.msk [vmem:[%s2288_s13 + $0x20] sm:$0xf] %vm672_vm10, %v1593_v44 }
 0x1a3   : > { %v1575_v48 = vadd.f32 %v1574_v1, %v1573_v34  ;;  %v1497_v58 = vadd.f32 %v1485_v20, %v1414_v10 }
 0x1a5   : > { %v1511_v12 = vadd.f32 %v2280_v43, %v1497_v58 }
 0x1a7   : > { %v1521_v50 = vsel %vm2202_vm8, %v1511_v12, 0.0 }
 0x1a8   : > { %v1539_v26 = vsel %vm658_vm0, %v1521_v50, 0.0  ;;  %v1558_v14 = vmul.f32 %v1521_v50, %v1521_v50  ;;  %v1594_v46 = vpack.c.bf16 %v1521_v50, %v1521_v50 }
 0x1a9   : > { %v1540_v17 = vadd.f32 %v1539_v26, %v1538_v2 }
 0x1aa   : > { %v1576_v18 = vsel %vm658_vm0, %v1558_v14, 0.0  ;;  %1604 = vst.msk [vmem:[%s2288_s13 + $0x24] sm:$0xf] %vm672_vm10, %v1594_v46 }
 0x1ab   : > { %v1541_v4 = vrot.slane %v1540_v17, 4  ;;  %v1577_v9 = vadd.f32 %v1576_v18, %v1575_v48 }
 0x1ad   : > { %v1542_v6 = vadd.f32 %v1541_v4, %v1540_v17  ;;  %v1578_v16 = vrot.slane %v1577_v9, 4 }
 0x1af   : > { %v1543_v19 = vrot.slane %v1542_v6, 2  ;;  %v1579_v43 = vadd.f32 %v1578_v16, %v1577_v9 }
 0x1b1   : > { %v1544_v27 = vadd.f32 %v1543_v19, %v1542_v6  ;;  %v1580_v36 = vrot.slane %v1579_v43, 2 }
 0x1b3   : > { %v1545_v33 = vrot.slane %v1544_v27, 1  ;;  %v1581_v55 = vadd.f32 %v1580_v36, %v1579_v43 }
 0x1b5   : > { %v1546_v11 = vadd.f32 %v1545_v33, %v1544_v27  ;;  %v1582_v29 = vrot.slane %v1581_v55, 1 }
 0x1b7   : > { %1548 = vst.msk [vmem:[%s292_s15] sm:$0x1] %vm1547_vm13, %v1546_v11  ;;  %v1583_v23 = vadd.f32 %v1582_v29, %v1581_v55 }
 0x1b9   : > { %1584 = vst.msk [vmem:[%s295_s18] sm:$0x1] %vm1547_vm13, %v1583_v23 }
 0x1ba PF: > { %s18_s24 = sadd.s32 1, %s1872_s24  }
 0x1bb   : > { %p15_p4 = scmp.ge.s32.totalorder %s18_s24, 4  }
 0x1bd   :  { %17 = sbr.rel (!%p15_p4) target bundleno = 1 (0x1), region = 102 }

// kernel: encoder_forward.7
= control target key start
LH: loop header
LB: loop body
LE: loop exit
PB: predicated region body
PF: predicated region fallthrough
CT: control target
= control target key end

     0   :  { %s4686_s15 = smov 0   ;;  %s6647_s0 = inlined_call_operand.vmem [shape: bf16[2,288,3], index: 0, kind: input, shape index: {}]   ;;  %s6648_s1 = inlined_call_operand.vmem [shape: bf16[3,3,3,8], index: 1, kind: input, shape index: {}]   ;;  %s6649_s2 = inlined_call_operand.vmem [shape: f32[1,8], index: 2, kind: input, shape index: {}]   ;;  %s6650_s3 = inlined_call_operand.vmem [shape: bf16[2,288,8], index: 3, kind: output, shape index: {0}]   ;;  %s6651_s4 = inlined_call_operand.vmem [shape: bf16[2,80,8], index: 4, kind: output, shape index: {1}]  }
   0x1 LB: > { %s4361_s16 = sadd.s32 4294967295, %s4656_s15   ;;  %p4365_p0 = scmp.ge.s32.totalorder %s4656_s15, 1  ;;  %s4656_s15 = sphi %s4686_s15, %s15_s15  }
   0x2   : > { %p165_p1 = scmp.lt.s32.totalorder %s4656_s15, 3 }
   0x4   : > { %p166_p2 = pnand %p4365_p0, %p165_p1 }
   0x6   : > { %169 = sbr.rel (%p166_p2) target bundleno = 908 (0x38c), region = 32 }
   0xb   : > { %v4369_v0 = vld [vmem:[%s6648_s1 + $0x2] sm:$0x3]  ;;  %vm1826_vm0 = vcmask 1040384   ;;  %vm1827_vm1 = vcmask 1041408   ;;  %v4658_v1 = vmov 65535   ;;  %p196_p3 = scmp.lt.s32.totalorder %s4361_s16, 1 }
   0xc   : > { %v1828_v2 = vsel %vm1826_vm0, 4294967295, %v4658_v1  ;;  %vm1509_vm2 = vcmask 23552   ;;  %v4659_v4 = vmov 0.0   ;;  %v4406_v16 = vld [vmem:[%s6648_s1 + $0x4] sm:$0x3]  ;;  %vm4044_vm9 = vcmask 60416  }
   0xd   : > { %v4697_v3 = vsel %vm1827_vm1, %v1828_v2, 0  ;;  %1519 = vst.msk [vmem:[#allocation2 + $0x48] sm:$0xff] %vm1509_vm2, %v4659_v4  ;;  %s6747_s16 = smov (!%p196_p3, %s4361_s16), 1  ;;  %v1715_v18 = vld [vmem:[%s6648_s1] sm:$0x3] }
   0xe   : > { %v1831_v5 = vand.u32 %v4369_v0, %v4697_v3  ;;  %1520 = vst.msk [vmem:[#allocation2 + $0x50] sm:$0xff] %vm1509_vm2, %v4659_v4  ;;  %s4633_s19 = smul.u32 144, %s6747_s16  ;;  %v2199_v19 = vand.u32 %v4406_v16, %v4697_v3  ;;  %v1987_v20 = vand.u32 %v4697_v3, %v1715_v18  ;;  %v4444_v21 = vld [vmem:[%s6648_s1 + $0x8] sm:$0x3]  ;;  %v4425_v57 = vld [vmem:[%s6648_s1 + $0x6] sm:$0x3] }
   0xf   : > { %1521 = vst.msk [vmem:[#allocation2 + $0x58] sm:$0xff] %vm1509_vm2, %v4659_v4  ;;  %v2695_v22 = vand.u32 %v4444_v21, %v4697_v3  ;;  %v2447_v59 = vand.u32 %v4425_v57, %v4697_v3  ;;  %s4634_s13 = smul.u32 40, %s6747_s16 }
  0x10   : > { %4630 = vmatpush.bf16.msra.mxu1 %v1831_v5  ;;  %4631 = vmatpush.bf16.msra.mxu2 %v1831_v5  ;;  %1522 = vst.msk [vmem:[#allocation2 + $0x60] sm:$0xff] %vm1509_vm2, %v4659_v4  ;;  %s4718_s22 = scalar_lea.vmem %s6647_s0, %s4633_s19  ;;  %s5527_s24 = scalar_lea.vmem %s6650_s3, %s4633_s19 }
  0x11   : > { %1840 = vmatpush.bf16.msra.mxu0 %v1831_v5  ;;  %1510 = vst.msk [vmem:[#allocation2] sm:$0xff] %vm1509_vm2, %v4659_v4  ;;  %4632 = vmatpush.bf16.msra.mxu3 %v1831_v5  ;;  %v4723_v6 = vld [vmem:[%s4718_s22 + $0x18] sm:$0xff]   ;;  %v4616_v7 = vld [vmem:[%s4718_s22 + $0x20] sm:$0xff]   ;;  %v4621_v24 = vld [vmem:[%s4718_s22 + $0x48] sm:$0xff]   ;;  %s5278_s18 = scalar_lea.vmem %s6651_s4, %s4634_s13 }
  0x12   : > { %1511 = vst.msk [vmem:[#allocation2 + $0x8] sm:$0xff] %vm1509_vm2, %v4659_v4  ;;  %v4556_v8 = vunpack.c.h.bf16 %v4723_v6  ;;  %v4559_v9 = vunpack.c.l.bf16 %v4616_v7  ;;  %v4560_v10 = vunpack.c.h.bf16 %v4616_v7  ;;  %v4805_v23 = vld [vmem:[%s4718_s22 + $0x40] sm:$0xff]   ;;  %v4617_v26 = vld [vmem:[%s4718_s22 + $0x28] sm:$0xff]   ;;  %v4579_v27 = vunpack.c.l.bf16 %v4621_v24  ;;  %v4622_v29 = vld [vmem:[%s4718_s22 + $0x50] sm:$0xff]  }
  0x13   : > { %1512 = vst.msk [vmem:[#allocation2 + $0x10] sm:$0xff] %vm1509_vm2, %v4659_v4  ;;  %v4576_v25 = vunpack.c.h.bf16 %v4805_v23  ;;  %v4580_v28 = vunpack.c.h.bf16 %v4621_v24  ;;  %v4563_v30 = vunpack.c.l.bf16 %v4617_v26  ;;  %v4564_v31 = vunpack.c.h.bf16 %v4617_v26  ;;  %v4542_v32 = vld [vmem:[%s4718_s22] sm:$0xff]   ;;  %v4826_v35 = vld [vmem:[%s4718_s22 + $0x68] sm:$0xff]   ;;  %v4626_v37 = vld [vmem:[%s4718_s22 + $0x70] sm:$0xff]  }
  0x14   : > { %1513 = vst.msk [vmem:[#allocation2 + $0x18] sm:$0xff] %vm1509_vm2, %v4659_v4  ;;  %2208 = vmatpush.bf16.msrb.mxu2 %v2199_v19  ;;  %1996 = vmatpush.bf16.msrb.mxu1 %v1987_v20  ;;  %v4583_v33 = vunpack.c.l.bf16 %v4622_v29  ;;  %v4584_v34 = vunpack.c.h.bf16 %v4622_v29  ;;  %v4543_v36 = vunpack.c.l.bf16 %v4542_v32  ;;  %v4544_v38 = vunpack.c.h.bf16 %v4542_v32  ;;  %v4618_v40 = vld [vmem:[%s4718_s22 + $0x30] sm:$0xff]   ;;  %v4623_v43 = vld [vmem:[%s4718_s22 + $0x58] sm:$0xff]   ;;  %v4613_v48 = vld [vmem:[%s4718_s22 + $0x8] sm:$0xff]  }
  0x15   : > { %1514 = vst.msk [vmem:[#allocation2 + $0x20] sm:$0xff] %vm1509_vm2, %v4659_v4  ;;  %2704 = vmatpush.bf16.msrb.mxu0 %v2695_v22  ;;  %v4596_v39 = vunpack.c.h.bf16 %v4826_v35  ;;  %v4599_v41 = vunpack.c.l.bf16 %v4626_v37  ;;  %v4600_v42 = vunpack.c.h.bf16 %v4626_v37  ;;  %v4567_v45 = vunpack.c.l.bf16 %v4618_v40  ;;  %v4627_v54 = vld [vmem:[%s4718_s22 + $0x78] sm:$0xff]   ;;  %2456 = vmatpush.bf16.msrb.mxu3 %v2447_v59  ;;  %v4624_v1 = vld [vmem:[%s4718_s22 + $0x60] sm:$0xff]  }
  0x16   : > { %1632 = vst.msk [vmem:[#allocation2 + $0x4b] sm:$0xff] %vm1509_vm2, %v4556_v8  ;;  %v4568_v47 = vunpack.c.h.bf16 %v4618_v40  ;;  %v4587_v51 = vunpack.c.l.bf16 %v4623_v43  ;;  %v4588_v53 = vunpack.c.h.bf16 %v4623_v43  ;;  %v4547_v56 = vunpack.c.l.bf16 %v4613_v48  ;;  %v4619_v60 = vld [vmem:[%s4718_s22 + $0x38] sm:$0xff]   ;;  %v4614_v8 = vld [vmem:[%s4718_s22 + $0x10] sm:$0xff]   ;;  %v4628_v20 = vld [vmem:[%s4718_s22 + $0x80] sm:$0xff]  }
  0x17   : > { %1633 = vst.msk [vmem:[#allocation2 + $0x53] sm:$0xff] %vm1509_vm2, %v4559_v9  ;;  %v4548_v58 = vunpack.c.h.bf16 %v4613_v48  ;;  %v4603_v62 = vunpack.c.l.bf16 %v4627_v54  ;;  %v4604_v0 = vunpack.c.h.bf16 %v4627_v54  ;;  %v4572_v7 = vunpack.c.h.bf16 %v4619_v60  ;;  %v4463_v54 = vld [vmem:[%s6648_s1 + $0xa] sm:$0x3] }
  0x18   : > { %1634 = vst.msk [vmem:[#allocation2 + $0x5b] sm:$0xff] %vm1509_vm2, %v4560_v10  ;;  %v4591_v10 = vunpack.c.l.bf16 %v4624_v1  ;;  %v4552_v16 = vunpack.c.h.bf16 %v4614_v8  ;;  %v4607_v22 = vunpack.c.l.bf16 %v4628_v20  ;;  %v4608_v24 = vunpack.c.h.bf16 %v4628_v20 }
  0x19   : > { %1515 = vst.msk [vmem:[#allocation2 + $0x28] sm:$0xff] %vm1509_vm2, %v4659_v4  ;;  %v1716_v14 = vld [vmem:[#allocation2 + $0x1] sm:$0xff]  ;;  %v2943_v57 = vand.u32 %v4463_v54, %v4697_v3 }
  0x1a   : > { %1516 = vst.msk [vmem:[#allocation2 + $0x30] sm:$0xff] %vm1509_vm2, %v4659_v4  ;;  %v1717_v15 = vld [vmem:[#allocation2 + $0x9] sm:$0xff] }
  0x1b   : > { %1517 = vst.msk [vmem:[#allocation2 + $0x38] sm:$0xff] %vm1509_vm2, %v4659_v4  ;;  %v1752_v17 = vpack.c.bf16 %v1717_v15, %v1716_v14 }
  0x1c   : > { %1518 = vst.msk [vmem:[#allocation2 + $0x40] sm:$0xff] %vm1509_vm2, %v4659_v4 }
  0x1d   : > { %1523 = vst.msk [vmem:[#allocation2 + $0x68] sm:$0xff] %vm1509_vm2, %v4659_v4  ;;  %4370 = vmatmul.msk.bf16.vlgmr.msra.gmra.mxu0 %vm1509_vm2, %v1752_v17 }
  0x1e   : > { %v1726_v11 = vld [vmem:[#allocation2 + $0x51] sm:$0xff]  ;;  %1524 = vst.msk [vmem:[#allocation2 + $0x70] sm:$0xff] %vm1509_vm2, %v4659_v4 }
  0x1f   : > { %v1727_v12 = vld [vmem:[#allocation2 + $0x59] sm:$0xff]  ;;  %1525 = vst.msk [vmem:[#allocation2 + $0x78] sm:$0xff] %vm1509_vm2, %v4659_v4 }
  0x20   : > { %v1757_v13 = vpack.c.bf16 %v1727_v12, %v1726_v11  ;;  %1526 = vst.msk [vmem:[#allocation2 + $0x80] sm:$0xff] %vm1509_vm2, %v4659_v4  ;;  %v4592_v12 = vunpack.c.h.bf16 %v4624_v1 }
  0x21   : > { %1527 = vst.msk [vmem:[#allocation2 + $0x88] sm:$0xff] %vm1509_vm2, %v4659_v4 }
  0x22   : > { %4375 = vmatmul.msk.bf16.vlgmr.msra.gmra.mxu1 %vm1509_vm2, %v1757_v13  ;;  %1528 = vst.msk [vmem:[#allocation2 + $0x90] sm:$0xff] %vm1509_vm2, %v4659_v4  ;;  %v4551_v13 = vunpack.c.l.bf16 %v4614_v8 }
  0x23   : > { %1529 = vst.msk [vmem:[#allocation2 + $0x98] sm:$0xff] %vm1509_vm2, %v4659_v4  ;;  %2952 = vmatpush.bf16.msra.mxu1 %v2943_v57 }
  0x24   : > { %1530 = vst.msk [vmem:[#allocation2 + $0xa0] sm:$0xff] %vm1509_vm2, %v4659_v4 }
  0x25   : > { %1531 = vst.msk [vmem:[#allocation2 + $0xa8] sm:$0xff] %vm1509_vm2, %v4659_v4 }
  0x26   : > { %1532 = vst.msk [vmem:[#allocation2 + $0xb0] sm:$0xff] %vm1509_vm2, %v4659_v4 }
  0x27   : > { %1533 = vst.msk [vmem:[#allocation2 + $0xb8] sm:$0xff] %vm1509_vm2, %v4659_v4 }
  0x28   : > { %1534 = vst.msk [vmem:[#allocation2 + $0xc0] sm:$0xff] %vm1509_vm2, %v4659_v4 }
  0x29   : > { %1535 = vst.msk [vmem:[#allocation2 + $0xc8] sm:$0xff] %vm1509_vm2, %v4659_v4 }
  0x2a   : > { %1536 = vst.msk [vmem:[#allocation2 + $0xd0] sm:$0xff] %vm1509_vm2, %v4659_v4 }
  0x2b   : > { %1537 = vst.msk [vmem:[#allocation2 + $0xd8] sm:$0xff] %vm1509_vm2, %v4659_v4 }
  0x2c   : > { %1538 = vst.msk [vmem:[#allocation2 + $0xe0] sm:$0xff] %vm1509_vm2, %v4659_v4 }
  0x2d   : > { %1539 = vst.msk [vmem:[#allocation2 + $0xe8] sm:$0xff] %vm1509_vm2, %v4659_v4 }
  0x2e   : > { %1540 = vst.msk [vmem:[#allocation2 + $0xf0] sm:$0xff] %vm1509_vm2, %v4659_v4 }
  0x2f   : > { %1541 = vst.msk [vmem:[#allocation2 + $0xf8] sm:$0xff] %vm1509_vm2, %v4659_v4 }
  0x30   : > { %1542 = vst.msk [vmem:[#allocation2 + $0x100] sm:$0xff] %vm1509_vm2, %v4659_v4 }
  0x31   : > { %1543 = vst.msk [vmem:[#allocation2 + $0x108] sm:$0xff] %vm1509_vm2, %v4659_v4 }
  0x32   : > { %1544 = vst.msk [vmem:[#allocation2 + $0x110] sm:$0xff] %vm1509_vm2, %v4659_v4 }
  0x33   : > { %1545 = vst.msk [vmem:[#allocation2 + $0x118] sm:$0xff] %vm1509_vm2, %v4659_v4 }
  0x34   : > { %1546 = vst.msk [vmem:[#allocation2 + $0x120] sm:$0xff] %vm1509_vm2, %v4659_v4 }
  0x35   : > { %1547 = vst.msk [vmem:[#allocation2 + $0x128] sm:$0xff] %vm1509_vm2, %v4659_v4 }
  0x36   : > { %1548 = vst.msk [vmem:[#allocation2 + $0x130] sm:$0xff] %vm1509_vm2, %v4659_v4 }
  0x37   : > { %1549 = vst.msk [vmem:[#allocation2 + $0x138] sm:$0xff] %vm1509_vm2, %v4659_v4 }
  0x38   : > { %1550 = vst.msk [vmem:[#allocation2 + $0x140] sm:$0xff] %vm1509_vm2, %v4659_v4  ;;  %v4571_v4 = vunpack.c.l.bf16 %v4619_v60 }
  0x39   : > { %1642 = vst.msk [vmem:[#allocation2 + $0x9b] sm:$0xff] %vm1509_vm2, %v4576_v25 }
  0x3a   : > { %1643 = vst.msk [vmem:[#allocation2 + $0xa3] sm:$0xff] %vm1509_vm2, %v4579_v27  ;;  %v4575_v27 = vunpack.c.l.bf16 %v4805_v23 }
  0x3b   : > { %1644 = vst.msk [vmem:[#allocation2 + $0xab] sm:$0xff] %vm1509_vm2, %v4580_v28 }
  0x3c   : > { %1635 = vst.msk [vmem:[#allocation2 + $0x63] sm:$0xff] %vm1509_vm2, %v4563_v30 }
  0x3d   : > { %1636 = vst.msk [vmem:[#allocation2 + $0x6b] sm:$0xff] %vm1509_vm2, %v4564_v31  ;;  %v4595_v31 = vunpack.c.l.bf16 %v4826_v35 }
  0x3e   : > { %1645 = vst.msk [vmem:[#allocation2 + $0xb3] sm:$0xff] %vm1509_vm2, %v4583_v33  ;;  %v4555_v33 = vunpack.c.l.bf16 %v4723_v6 }
  0x3f   : > { %1646 = vst.msk [vmem:[#allocation2 + $0xbb] sm:$0xff] %vm1509_vm2, %v4584_v34 }
  0x40   : > { %1625 = vst.msk [vmem:[#allocation2 + $0x13] sm:$0xff] %vm1509_vm2, %v4543_v36 }
  0x41   : > { %v1736_v44 = vld [vmem:[#allocation2 + $0xa1] sm:$0xff]  ;;  %1626 = vst.msk [vmem:[#allocation2 + $0x1b] sm:$0xff] %vm1509_vm2, %v4544_v38 }
  0x42   : > { %v1737_v46 = vld [vmem:[#allocation2 + $0xa9] sm:$0xff]  ;;  %1652 = vst.msk [vmem:[#allocation2 + $0xeb] sm:$0xff] %vm1509_vm2, %v4596_v39 }
  0x43   : > { %v1762_v49 = vpack.c.bf16 %v1737_v46, %v1736_v44  ;;  %v1728_v50 = vld [vmem:[#allocation2 + $0x61] sm:$0xff]  ;;  %1653 = vst.msk [vmem:[#allocation2 + $0xf3] sm:$0xff] %vm1509_vm2, %v4599_v41 }
  0x44   : > { %v1729_v52 = vld [vmem:[#allocation2 + $0x69] sm:$0xff]  ;;  %1654 = vst.msk [vmem:[#allocation2 + $0xfb] sm:$0xff] %vm1509_vm2, %v4600_v42 }
  0x45   : > { %4380 = vmatmul.msk.bf16.vlgmr.msra.gmra.mxu2 %vm1509_vm2, %v1762_v49  ;;  %v1758_v55 = vpack.c.bf16 %v1729_v52, %v1728_v50  ;;  %1637 = vst.msk [vmem:[#allocation2 + $0x73] sm:$0xff] %vm1509_vm2, %v4567_v45  ;;  %v1738_v14 = vld [vmem:[#allocation2 + $0xb1] sm:$0xff]  ;;  %v4482_v52 = vld [vmem:[%s6648_s1 + $0xc] sm:$0x3] }
  0x46   : > { %1638 = vst.msk [vmem:[#allocation2 + $0x7b] sm:$0xff] %vm1509_vm2, %v4568_v47  ;;  %v1739_v15 = vld [vmem:[#allocation2 + $0xb9] sm:$0xff]  ;;  %v2347_v54 = vld [vmem:[#allocation2 + $0x6a] sm:$0xff] }
  0x47   : > { %4376 = vmatmul.msk.bf16.gmra.mxu1 %vm1509_vm2, %v1758_v55  ;;  %v1718_v61 = vld [vmem:[#allocation2 + $0x11] sm:$0xff]  ;;  %1647 = vst.msk [vmem:[#allocation2 + $0xc3] sm:$0xff] %vm1509_vm2, %v4587_v51  ;;  %v1763_v19 = vpack.c.bf16 %v1739_v15, %v1738_v14  ;;  %v3191_v55 = vand.u32 %v4482_v52, %v4697_v3 }
  0x48   : > { %v1719_v63 = vld [vmem:[#allocation2 + $0x19] sm:$0xff]  ;;  %1648 = vst.msk [vmem:[#allocation2 + $0xcb] sm:$0xff] %vm1509_vm2, %v4588_v53  ;;  %v4501_v53 = vld [vmem:[%s6648_s1 + $0xe] sm:$0x3]  ;;  %v1663_v15 = vld [vmem:[#allocation2 + $0x10] sm:$0xff] }
  0x49   : > { %v1753_v2 = vpack.c.bf16 %v1719_v63, %v1718_v61  ;;  %1627 = vst.msk [vmem:[#allocation2 + $0x23] sm:$0xff] %vm1509_vm2, %v4547_v56  ;;  %v3439_v56 = vand.u32 %v4501_v53, %v4697_v3  ;;  %v2336_v60 = vld [vmem:[#allocation2 + $0x12] sm:$0xff]  ;;  %v2337_v61 = vld [vmem:[#allocation2 + $0x1a] sm:$0xff]  ;;  %3200 = vmatpush.bf16.msra.mxu2 %v3191_v55  ;;  %v2089_v14 = vld [vmem:[#allocation2 + $0xa] sm:$0xff] }
  0x4a   : > { %v1746_v5 = vld [vmem:[#allocation2 + $0xf1] sm:$0xff]  ;;  %1628 = vst.msk [vmem:[#allocation2 + $0x2b] sm:$0xff] %vm1509_vm2, %v4548_v58  ;;  %v2372_v63 = vpack.c.bf16 %v2337_v61, %v2336_v60  ;;  %v2346_v53 = vld [vmem:[#allocation2 + $0x62] sm:$0xff] }
  0x4b   : > { %4371 = vmatmul.msk.bf16.gmra.mxu0 %vm1509_vm2, %v1753_v2  ;;  %v1747_v9 = vld [vmem:[#allocation2 + $0xf9] sm:$0xff]  ;;  %1655 = vst.msk [vmem:[#allocation2 + $0x103] sm:$0xff] %vm1509_vm2, %v4603_v62  ;;  %v4520_v58 = vld [vmem:[%s6648_s1 + $0x10] sm:$0x3]  ;;  %v2377_v57 = vpack.c.bf16 %v2347_v54, %v2346_v53 }
  0x4c   : > { %v1767_v11 = vpack.c.bf16 %v1747_v9, %v1746_v5  ;;  %1656 = vst.msk [vmem:[#allocation2 + $0x10b] sm:$0xff] %vm1509_vm2, %v4604_v0  ;;  %v1730_v17 = vld [vmem:[#allocation2 + $0x71] sm:$0xff]  ;;  %v3687_v62 = vand.u32 %v4520_v58, %v4697_v3  ;;  %v1661_v2 = vld [vmem:[#allocation2] sm:$0xff] }
  0x4d   : > { %1639 = vst.msk [vmem:[#allocation2 + $0x83] sm:$0xff] %vm1509_vm2, %v4571_v4  ;;  %v1731_v18 = vld [vmem:[#allocation2 + $0x79] sm:$0xff]  ;;  %v1662_v4 = vld [vmem:[#allocation2 + $0x8] sm:$0xff]  ;;  %v1671_v61 = vld [vmem:[#allocation2 + $0x50] sm:$0xff] }
  0x4e   : > { %4385 = vmatmul.msk.bf16.vlgmr.msra.gmra.mxu3 %vm1509_vm2, %v1767_v11  ;;  %1640 = vst.msk [vmem:[#allocation2 + $0x8b] sm:$0xff] %vm1509_vm2, %v4572_v7  ;;  %v1759_v21 = vpack.c.bf16 %v1731_v18, %v1730_v17  ;;  %v1740_v23 = vld [vmem:[#allocation2 + $0xc1] sm:$0xff]  ;;  %3696 = vmatpush.bf16.msra.mxu0 %v3687_v62  ;;  %v1697_v7 = vpack.c.bf16 %v1662_v4, %v1661_v2  ;;  %v2584_v8 = vld [vmem:[#allocation2 + $0x13] sm:$0xff]  ;;  %v2595_v4 = vld [vmem:[#allocation2 + $0x6b] sm:$0xff] }
  0x4f   : > { %1649 = vst.msk [vmem:[#allocation2 + $0xd3] sm:$0xff] %vm1509_vm2, %v4591_v10  ;;  %v1741_v34 = vld [vmem:[#allocation2 + $0xc9] sm:$0xff]  ;;  %3448 = vmatpush.bf16.msra.mxu3 %v3439_v56  ;;  %v2585_v9 = vld [vmem:[#allocation2 + $0x1b] sm:$0xff] }
  0x50   : > { %1650 = vst.msk [vmem:[#allocation2 + $0xdb] sm:$0xff] %vm1509_vm2, %v4592_v12  ;;  %v1720_v25 = vld [vmem:[#allocation2 + $0x21] sm:$0xff]  ;;  %v1764_v38 = vpack.c.bf16 %v1741_v34, %v1740_v23  ;;  %v2620_v3 = vpack.c.bf16 %v2585_v9, %v2584_v8  ;;  %v1672_v62 = vld [vmem:[#allocation2 + $0x58] sm:$0xff] }
  0x51   : > { %1629 = vst.msk [vmem:[#allocation2 + $0x33] sm:$0xff] %vm1509_vm2, %v4551_v13  ;;  %v1721_v26 = vld [vmem:[#allocation2 + $0x29] sm:$0xff]  ;;  %v2349_v8 = vld [vmem:[#allocation2 + $0x7a] sm:$0xff] }
  0x52   : > { %1630 = vst.msk [vmem:[#allocation2 + $0x3b] sm:$0xff] %vm1509_vm2, %v4552_v16  ;;  %v1754_v28 = vpack.c.bf16 %v1721_v26, %v1720_v25  ;;  %v1748_v29 = vld [vmem:[#allocation2 + $0x101] sm:$0xff]  ;;  %v2339_v11 = vld [vmem:[#allocation2 + $0x2a] sm:$0xff]  ;;  %v1664_v16 = vld [vmem:[#allocation2 + $0x18] sm:$0xff] }
  0x53   : > { %1657 = vst.msk [vmem:[#allocation2 + $0x113] sm:$0xff] %vm1509_vm2, %v4607_v22  ;;  %v1749_v30 = vld [vmem:[#allocation2 + $0x109] sm:$0xff]  ;;  %v1698_v18 = vpack.c.bf16 %v1664_v16, %v1663_v15  ;;  %v1665_v26 = vld [vmem:[#allocation2 + $0x20] sm:$0xff] }
  0x54   : > { %1658 = vst.msk [vmem:[#allocation2 + $0x11b] sm:$0xff] %vm1509_vm2, %v4608_v24  ;;  %v1768_v32 = vpack.c.bf16 %v1749_v30, %v1748_v29  ;;  %v1732_v36 = vld [vmem:[#allocation2 + $0x81] sm:$0xff]  ;;  %v2587_v20 = vld [vmem:[#allocation2 + $0x2b] sm:$0xff] }
  0x55   : > { %4381 = vmatmul.msk.bf16.gmra.mxu2 %vm1509_vm2, %v1763_v19  ;;  %1641 = vst.msk [vmem:[#allocation2 + $0x93] sm:$0xff] %vm1509_vm2, %v4575_v27  ;;  %v1733_v37 = vld [vmem:[#allocation2 + $0x89] sm:$0xff]  ;;  %v1673_v15 = vld [vmem:[#allocation2 + $0x60] sm:$0xff] }
  0x56   : > { %1651 = vst.msk [vmem:[#allocation2 + $0xe3] sm:$0xff] %vm1509_vm2, %v4595_v31  ;;  %v1760_v39 = vpack.c.bf16 %v1733_v37, %v1732_v36  ;;  %v1742_v44 = vld [vmem:[#allocation2 + $0xd1] sm:$0xff]  ;;  %v2338_v10 = vld [vmem:[#allocation2 + $0x22] sm:$0xff] }
  0x57   : > { %4377 = vmatmul.msk.bf16.gmra.mxu1 %vm1509_vm2, %v1759_v21  ;;  %1631 = vst.msk [vmem:[#allocation2 + $0x43] sm:$0xff] %vm1509_vm2, %v4555_v33  ;;  %v1743_v45 = vld [vmem:[#allocation2 + $0xd9] sm:$0xff]  ;;  %v2373_v12 = vpack.c.bf16 %v2339_v11, %v2338_v10  ;;  %v2088_v13 = vld [vmem:[#allocation2 + $0x2] sm:$0xff] }
  0x58   : > { %v1722_v40 = vld [vmem:[#allocation2 + $0x31] sm:$0xff]  ;;  %v1765_v48 = vpack.c.bf16 %v1743_v45, %v1742_v44  ;;  %v2124_v17 = vpack.c.bf16 %v2089_v14, %v2088_v13  ;;  %v2586_v19 = vld [vmem:[#allocation2 + $0x23] sm:$0xff] }
  0x59   : > { %v1723_v41 = vld [vmem:[#allocation2 + $0x39] sm:$0xff]  ;;  %v2621_v21 = vpack.c.bf16 %v2587_v20, %v2586_v19  ;;  %v1666_v27 = vld [vmem:[#allocation2 + $0x28] sm:$0xff]  ;;  %v1667_v36 = vld [vmem:[#allocation2 + $0x30] sm:$0xff] }
  0x5a   : > { %v1755_v35 = vpack.c.bf16 %v1723_v41, %v1722_v40  ;;  %v1750_v42 = vld [vmem:[#allocation2 + $0x111] sm:$0xff]  ;;  %v2341_v24 = vld [vmem:[#allocation2 + $0x3a] sm:$0xff]  ;;  %v2594_v2 = vld [vmem:[#allocation2 + $0x63] sm:$0xff] }
  0x5b   : > { %4372 = vmatmul.msk.bf16.gmra.mxu0 %vm1509_vm2, %v1754_v28  ;;  %v1751_v43 = vld [vmem:[#allocation2 + $0x119] sm:$0xff]  ;;  %v1699_v28 = vpack.c.bf16 %v1666_v27, %v1665_v26  ;;  %v2591_v41 = vld [vmem:[#allocation2 + $0x4b] sm:$0xff] }
  0x5c   : > { %v1769_v6 = vpack.c.bf16 %v1751_v43, %v1750_v42  ;;  %v1734_v46 = vld [vmem:[#allocation2 + $0x91] sm:$0xff]  ;;  %v1735_v47 = vld [vmem:[#allocation2 + $0x99] sm:$0xff]  ;;  %v1674_v16 = vld [vmem:[#allocation2 + $0x68] sm:$0xff] }
  0x5d   : > { %v1761_v49 = vpack.c.bf16 %v1735_v47, %v1734_v46  ;;  %v1744_v0 = vld [vmem:[#allocation2 + $0xe1] sm:$0xff]  ;;  %v1745_v1 = vld [vmem:[#allocation2 + $0xe9] sm:$0xff]  ;;  %v2340_v22 = vld [vmem:[#allocation2 + $0x32] sm:$0xff] }
  0x5e   : > { %4386 = vmatmul.msk.bf16.gmra.mxu3 %vm1509_vm2, %v1768_v32  ;;  %v1724_v50 = vld [vmem:[#allocation2 + $0x41] sm:$0xff]  ;;  %v1725_v51 = vld [vmem:[#allocation2 + $0x49] sm:$0xff]  ;;  %v1766_v5 = vpack.c.bf16 %v1745_v1, %v1744_v0  ;;  %v2374_v25 = vpack.c.bf16 %v2341_v24, %v2340_v22  ;;  %v2588_v29 = vld [vmem:[#allocation2 + $0x33] sm:$0xff]  ;;  %v1702_v0 = vpack.c.bf16 %v1672_v62, %v1671_v61 }
  0x5f   : > { %v1756_v59 = vpack.c.bf16 %v1725_v51, %v1724_v50  ;;  %v2589_v30 = vld [vmem:[#allocation2 + $0x3b] sm:$0xff]  ;;  %v2343_v33 = vld [vmem:[#allocation2 + $0x4a] sm:$0xff]  ;;  %v2344_v42 = vld [vmem:[#allocation2 + $0x52] sm:$0xff] }
  0x60   : > { %v2622_v31 = vpack.c.bf16 %v2589_v30, %v2588_v29  ;;  %v2342_v32 = vld [vmem:[#allocation2 + $0x42] sm:$0xff]  ;;  %v1668_v37 = vld [vmem:[#allocation2 + $0x38] sm:$0xff] }
  0x61   : > { %v2375_v23 = vpack.c.bf16 %v2343_v33, %v2342_v32  ;;  %v2590_v40 = vld [vmem:[#allocation2 + $0x43] sm:$0xff]  ;;  %v2345_v43 = vld [vmem:[#allocation2 + $0x5a] sm:$0xff]  ;;  %v1675_v33 = vld [vmem:[#allocation2 + $0x70] sm:$0xff] }
  0x62   : > { %v2376_v44 = vpack.c.bf16 %v2345_v43, %v2344_v42  ;;  %v1669_v46 = vld [vmem:[#allocation2 + $0x40] sm:$0xff]  ;;  %v1670_v47 = vld [vmem:[#allocation2 + $0x48] sm:$0xff]  ;;  %v2592_v50 = vld [vmem:[#allocation2 + $0x53] sm:$0xff] }
  0x63   : > { %v2593_v51 = vld [vmem:[#allocation2 + $0x5b] sm:$0xff]  ;;  %v2596_v20 = vld [vmem:[#allocation2 + $0x73] sm:$0xff]  ;;  %v1678_v54 = vld [vmem:[#allocation2 + $0x88] sm:$0xff] }
  0x64   : > { %v2624_v52 = vpack.c.bf16 %v2593_v51, %v2592_v50  ;;  %v2350_v24 = vld [vmem:[#allocation2 + $0x82] sm:$0xff]  ;;  %v2352_v42 = vld [vmem:[#allocation2 + $0x92] sm:$0xff]  ;;  %v2353_v43 = vld [vmem:[#allocation2 + $0x9a] sm:$0xff] }
  0x65   : > { %4382 = vmatmul.msk.bf16.gmra.mxu2 %vm1509_vm2, %v1764_v38  ;;  %v1700_v38 = vpack.c.bf16 %v1668_v37, %v1667_v36  ;;  %v1677_v53 = vld [vmem:[#allocation2 + $0x80] sm:$0xff] }
  0x66   : > { %v1705_v61 = vpack.c.bf16 %v1678_v54, %v1677_v53 }
  0x67   : > { %4378 = vmatmul.msk.bf16.gmra.mxu1 %vm1509_vm2, %v1760_v39 }
  0x6b   : > { %4373 = vmatmul.msk.bf16.gmra.mxu0 %vm1509_vm2, %v1755_v35  ;;  %v2623_v35 = vpack.c.bf16 %v2591_v41, %v2590_v40  ;;  %v2598_v40 = vld [vmem:[#allocation2 + $0x83] sm:$0xff]  ;;  %v2599_v41 = vld [vmem:[#allocation2 + $0x8b] sm:$0xff] }
  0x6e   : > { %4387 = vmatmul.msk.bf16.gmra.mxu3 %vm1509_vm2, %v1769_v6 }
  0x75   : > { %4383 = vmatmul.msk.bf16.gmra.mxu2 %vm1509_vm2, %v1765_v48  ;;  %v1701_v48 = vpack.c.bf16 %v1670_v47, %v1669_v46 }
  0x77   : > { %4379 = vmatmul.msk.bf16.gmra.mxu1 %vm1509_vm2, %v1761_v49 }
  0x7b   : > { %4374 = vmatmul.msk.bf16.gmra.mxu0 %vm1509_vm2, %v1756_v59 }
  0x7e   : > { %4426 = vmatmul.msk.bf16.vlgmr.msrb.gmra.mxu3 %vm1509_vm2, %v2372_v63 }
  0x85   : > { %4384 = vmatmul.msk.bf16.gmra.mxu2 %vm1509_vm2, %v1766_v5  ;;  %v2625_v5 = vpack.c.bf16 %v2595_v4, %v2594_v2  ;;  %v2601_v2 = vld [vmem:[#allocation2 + $0x9b] sm:$0xff] }
  0x87   : > { %4388 = vmatmul.msk.bf16.vlgmr.msrb.gmra.mxu1 %vm1509_vm2, %v1697_v7  ;;  %v2348_v7 = vld [vmem:[#allocation2 + $0x72] sm:$0xff] }
  0x88   : > { %v2378_v11 = vpack.c.bf16 %v2349_v8, %v2348_v7  ;;  %v2355_v7 = vld [vmem:[#allocation2 + $0xaa] sm:$0xff] }
  0x8b   : > { %4445 = vmatmul.msk.bf16.vlgmr.msrb.gmra.mxu0 %vm1509_vm2, %v2620_v3 }
  0x8e   : > { %4427 = vmatmul.msk.bf16.gmra.mxu3 %vm1509_vm2, %v2373_v12 }
  0x95   : > { %4407 = vmatmul.msk.bf16.vlgmr.msrb.gmra.mxu2 %vm1509_vm2, %v2124_v17 }
  0x97   : > { %4389 = vmatmul.msk.bf16.gmra.mxu1 %vm1509_vm2, %v1698_v18  ;;  %v1703_v18 = vpack.c.bf16 %v1674_v16, %v1673_v15 }
  0x9a   : > { %v4919_v39 = vpop.f32.mrf.mxu0 }
  0x9b   : > { %4446 = vmatmul.msk.bf16.gmra.mxu0 %vm1509_vm2, %v2621_v21  ;;  %v2597_v21 = vld [vmem:[#allocation2 + $0x7b] sm:$0xff] }
  0x9c   : > { %v2626_v22 = vpack.c.bf16 %v2597_v21, %v2596_v20 }
  0x9e   : > { %4428 = vmatmul.msk.bf16.gmra.mxu3 %vm1509_vm2, %v2374_v25 }
  0x9f   : > { %v4917_v34 = vpop.f32.mrf.mxu1 }
  0xa2   : > { %v4926_v45 = vpop.f32.mrf.mxu0 }
  0xa5   : > { %4408 = vmatmul.msk.bf16.gmra.mxu2 %vm1509_vm2, %v2372_v63 }
  0xa7   : > { %4390 = vmatmul.msk.bf16.gmra.mxu1 %vm1509_vm2, %v1699_v28  ;;  %v4923_v6 = vpop.f32.mrf.mxu1 }
  0xab   : > { %4447 = vmatmul.msk.bf16.gmra.mxu0 %vm1509_vm2, %v2622_v31 }
  0xae   : > { %4429 = vmatmul.msk.bf16.gmra.mxu3 %vm1509_vm2, %v2375_v23 }
  0xb5   : > { %4409 = vmatmul.msk.bf16.gmra.mxu2 %vm1509_vm2, %v2373_v12 }
  0xb7   : > { %4391 = vmatmul.msk.bf16.gmra.mxu1 %vm1509_vm2, %v1700_v38 }
  0xbb   : > { %4448 = vmatmul.msk.bf16.gmra.mxu0 %vm1509_vm2, %v2623_v35  ;;  %v2627_v35 = vpack.c.bf16 %v2599_v41, %v2598_v40  ;;  %v2603_v40 = vld [vmem:[#allocation2 + $0xab] sm:$0xff] }
  0xbe   : > { %4430 = vmatmul.msk.bf16.gmra.mxu3 %vm1509_vm2, %v2376_v44 }
  0xc4   : > { %v4929_v49 = vpop.f32.mrf.mxu1 }
  0xc5   : > { %4410 = vmatmul.msk.bf16.gmra.mxu2 %vm1509_vm2, %v2374_v25  ;;  %v2351_v25 = vld [vmem:[#allocation2 + $0x8a] sm:$0xff] }
  0xc6   : > { %v2379_v29 = vpack.c.bf16 %v2351_v25, %v2350_v24  ;;  %v1680_v24 = vld [vmem:[#allocation2 + $0x98] sm:$0xff] }
  0xc7   : > { %4392 = vmatmul.msk.bf16.gmra.mxu1 %vm1509_vm2, %v1701_v48  ;;  %v2380_v48 = vpack.c.bf16 %v2353_v43, %v2352_v42  ;;  %v2356_v42 = vld [vmem:[#allocation2 + $0xb2] sm:$0xff]  ;;  %v2357_v43 = vld [vmem:[#allocation2 + $0xba] sm:$0xff] }
  0xc8   : > { %v4933_v55 = vpop.f32.mrf.mxu2  ;;  %v4935_v56 = vpop.f32.mrf.mxu0 }
  0xcb   : > { %4449 = vmatmul.msk.bf16.gmra.mxu0 %vm1509_vm2, %v2624_v52 }
  0xcc   : > { %v4938_v58 = vpop.f32.mrf.mxu1 }
  0xce   : > { %4431 = vmatmul.msk.bf16.gmra.mxu3 %vm1509_vm2, %v2377_v57 }
  0xd0   : > { %v4941_v59 = vpop.f32.mrf.mxu2  ;;  %v4943_v60 = vpop.f32.mrf.mxu0 }
  0xd1   : > { %v4945_v63 = vpop.f32.mrf.mxu3 }
  0xd4   : > { %v4947_v1 = vpop.f32.mrf.mxu1 }
  0xd5   : > { %4411 = vmatmul.msk.bf16.gmra.mxu2 %vm1509_vm2, %v2375_v23  ;;  %v1676_v23 = vld [vmem:[#allocation2 + $0x78] sm:$0xff] }
  0xd6   : > { %v1704_v37 = vpack.c.bf16 %v1676_v23, %v1675_v33 }
  0xd7   : > { %4393 = vmatmul.msk.bf16.gmra.mxu1 %vm1509_vm2, %v1702_v0  ;;  %v2600_v0 = vld [vmem:[#allocation2 + $0x93] sm:$0xff] }
  0xd8   : > { %v4951_v9 = vpop.f32.mrf.mxu2  ;;  %v4953_v3 = vpop.f32.mrf.mxu0  ;;  %v2628_v4 = vpack.c.bf16 %v2601_v2, %v2600_v0  ;;  %v5019_v2 = vpack.c.bf16 %v2357_v43, %v2356_v42  ;;  %v2605_v43 = vld [vmem:[#allocation2 + $0xbb] sm:$0xff] }
  0xd9   : > { %v4955_v10 = vpop.f32.mrf.mxu3 }
  0xdb   : > { %4450 = vmatmul.msk.bf16.gmra.mxu0 %vm1509_vm2, %v2625_v5  ;;  %v2354_v5 = vld [vmem:[#allocation2 + $0xa2] sm:$0xff] }
  0xdc   : > { %v4958_v12 = vpop.f32.mrf.mxu1 }
  0xde   : > { %4432 = vmatmul.msk.bf16.gmra.mxu3 %vm1509_vm2, %v2378_v11 }
  0xe0   : > { %v4961_v13 = vpop.f32.mrf.mxu2  ;;  %v4963_v14 = vpop.f32.mrf.mxu0 }
  0xe1   : > { %v4965_v17 = vpop.f32.mrf.mxu3 }
  0xe4   : > { %v4967_v19 = vpop.f32.mrf.mxu1 }
  0xe5   : > { %4412 = vmatmul.msk.bf16.gmra.mxu2 %vm1509_vm2, %v2376_v44 }
  0xe7   : > { %4394 = vmatmul.msk.bf16.gmra.mxu1 %vm1509_vm2, %v1703_v18  ;;  %v5009_v18 = vpack.c.bf16 %v2355_v7, %v2354_v5 }
  0xe8   : > { %v4971_v26 = vpop.f32.mrf.mxu2  ;;  %v4973_v27 = vpop.f32.mrf.mxu0 }
  0xe9   : > { %v4975_v28 = vpop.f32.mrf.mxu3 }
  0xeb   : > { %4451 = vmatmul.msk.bf16.gmra.mxu0 %vm1509_vm2, %v2626_v22  ;;  %v1679_v22 = vld [vmem:[#allocation2 + $0x90] sm:$0xff] }
  0xec   : > { %v4978_v30 = vpop.f32.mrf.mxu1  ;;  %v1706_v33 = vpack.c.bf16 %v1680_v24, %v1679_v22  ;;  %v1681_v22 = vld [vmem:[#allocation2 + $0xa0] sm:$0xff]  ;;  %v1682_v24 = vld [vmem:[#allocation2 + $0xa8] sm:$0xff] }
  0xee   : > { %4433 = vmatmul.msk.bf16.gmra.mxu3 %vm1509_vm2, %v2379_v29 }
  0xf0   : > { %v4981_v31 = vpop.f32.mrf.mxu2  ;;  %v4983_v32 = vpop.f32.mrf.mxu0 }
  0xf1   : > { %v4985_v36 = vpop.f32.mrf.mxu3 }
  0xf4   : > { %v4987_v38 = vpop.f32.mrf.mxu1 }
  0xf5   : > { %4413 = vmatmul.msk.bf16.gmra.mxu2 %vm1509_vm2, %v2377_v57 }
  0xf7   : > { %4395 = vmatmul.msk.bf16.gmra.mxu1 %vm1509_vm2, %v1704_v37  ;;  %v2602_v37 = vld [vmem:[#allocation2 + $0xa3] sm:$0xff] }
  0xf8   : > { %v4991_v44 = vpop.f32.mrf.mxu2  ;;  %v4993_v46 = vpop.f32.mrf.mxu0 }
  0xf9   : > { %v4995_v47 = vpop.f32.mrf.mxu3 }
  0xfb   : > { %4452 = vmatmul.msk.bf16.gmra.mxu0 %vm1509_vm2, %v2627_v35  ;;  %v2629_v35 = vpack.c.bf16 %v2603_v40, %v2602_v37 }
  0xfc   : > { %v4998_v50 = vpop.f32.mrf.mxu1 }
  0xfe   : > { %4434 = vmatmul.msk.bf16.gmra.mxu3 %vm1509_vm2, %v2380_v48 }
 0x100   : > { %v5001_v51 = vpop.f32.mrf.mxu2  ;;  %v5003_v52 = vpop.f32.mrf.mxu0 }
 0x101   : > { %v2458_v57 = vpop.f32.mrf.mxu3 }
 0x104   : > { %v1998_v62 = vpop.f32.mrf.mxu1 }
 0x105   : > { %4414 = vmatmul.msk.bf16.gmra.mxu2 %vm1509_vm2, %v2378_v11  ;;  %v1999_v41 = vadd.f32 %v1998_v62, %v4919_v39 }
 0x107   : > { %4396 = vmatmul.msk.bf16.gmra.mxu1 %vm1509_vm2, %v1705_v61 }
 0x108   : > { %v5007_v8 = vpop.f32.mrf.mxu2  ;;  %v2706_v15 = vpop.f32.mrf.mxu0 }
 0x109   : > { %v2460_v16 = vpop.f32.mrf.mxu3 }
 0x10b   : > { %4453 = vmatmul.msk.bf16.gmra.mxu0 %vm1509_vm2, %v2628_v4 }
 0x10c   : > { %v2000_v20 = vpop.f32.mrf.mxu1 }
 0x10d   : > { %v2001_v39 = vadd.f32 %v2000_v20, %v4926_v45  ;;  %v2358_v20 = vld [vmem:[#allocation2 + $0xc2] sm:$0xff] }
 0x10e   : > { %4435 = vmatmul.msk.bf16.gmra.mxu3 %vm1509_vm2, %v5009_v18 }
 0x110   : > { %v5014_v21 = vpop.f32.mrf.mxu2  ;;  %v2708_v11 = vpop.f32.mrf.mxu0 }
 0x111   : > { %v2463_v25 = vpop.f32.mrf.mxu3 }
 0x114   : > { %v2003_v23 = vpop.f32.mrf.mxu1 }
 0x115   : > { %4415 = vmatmul.msk.bf16.gmra.mxu2 %vm1509_vm2, %v2379_v29 }
 0x117   : > { %4397 = vmatmul.msk.bf16.gmra.mxu1 %vm1509_vm2, %v1706_v33 }
 0x118   : > { %v2210_v53 = vpop.f32.mrf.mxu2  ;;  %v2711_v54 = vpop.f32.mrf.mxu0 }
 0x119   : > { %v2300_v61 = vadd.f32 %v2210_v53, %v1999_v41  ;;  %v2465_v0 = vpop.f32.mrf.mxu3  ;;  %v1707_v41 = vpack.c.bf16 %v1682_v24, %v1681_v22  ;;  %v2359_v53 = vld [vmem:[#allocation2 + $0xca] sm:$0xff] }
 0x11b   : > { %v2548_v4 = vadd.f32 %v2458_v57, %v2300_v61  ;;  %4454 = vmatmul.msk.bf16.gmra.mxu0 %vm1509_vm2, %v2629_v35  ;;  %v2604_v57 = vld [vmem:[#allocation2 + $0xb3] sm:$0xff]  ;;  %v2004_v35 = vadd.f32 %v2003_v23, %v4935_v56 }
 0x11c   : > { %v2005_v5 = vpop.f32.mrf.mxu1  ;;  %v2630_v45 = vpack.c.bf16 %v2605_v43, %v2604_v57 }
 0x11d   : > { %v5022_v7 = vadd.f32 %v2706_v15, %v2548_v4  ;;  %v2006_v56 = vadd.f32 %v2005_v5, %v4943_v60  ;;  %v2360_v5 = vld [vmem:[#allocation2 + $0xd2] sm:$0xff] }
 0x11e   : > { %4436 = vmatmul.msk.bf16.gmra.mxu3 %vm1509_vm2, %v5019_v2 }
 0x120   : > { %v2212_v29 = vpop.f32.mrf.mxu2  ;;  %v2713_v62 = vpop.f32.mrf.mxu0 }
 0x121   : > { %v2301_v33 = vadd.f32 %v2212_v29, %v2001_v39  ;;  %v2468_v37 = vpop.f32.mrf.mxu3 }
 0x123   : > { %v2549_v40 = vadd.f32 %v2460_v16, %v2301_v33  ;;  %v5032_v16 = vpack.c.bf16 %v2359_v53, %v2358_v20  ;;  %v1683_v33 = vld [vmem:[#allocation2 + $0xb0] sm:$0xff] }
 0x124   : > { %v2008_v42 = vpop.f32.mrf.mxu1  ;;  %v2607_v53 = vld [vmem:[#allocation2 + $0xcb] sm:$0xff] }
 0x125   : > { %4416 = vmatmul.msk.bf16.gmra.mxu2 %vm1509_vm2, %v2380_v48  ;;  %v5028_v15 = vadd.f32 %v2708_v11, %v2549_v40  ;;  %v1684_v40 = vld [vmem:[#allocation2 + $0xb8] sm:$0xff] }
 0x127   : > { %4398 = vmatmul.msk.bf16.gmra.mxu1 %vm1509_vm2, %v1707_v41 }
 0x128   : > { %v2215_v61 = vpop.f32.mrf.mxu2  ;;  %v2716_v4 = vpop.f32.mrf.mxu0 }
 0x129   : > { %v2302_v39 = vadd.f32 %v2215_v61, %v2004_v35  ;;  %v2470_v29 = vpop.f32.mrf.mxu3  ;;  %v1708_v35 = vpack.c.bf16 %v1684_v40, %v1683_v33  ;;  %v2361_v61 = vld [vmem:[#allocation2 + $0xda] sm:$0xff] }
 0x12b   : > { %v2550_v22 = vadd.f32 %v2463_v25, %v2302_v39  ;;  %4455 = vmatmul.msk.bf16.gmra.mxu0 %vm1509_vm2, %v2630_v45  ;;  %v2606_v25 = vld [vmem:[#allocation2 + $0xc3] sm:$0xff]  ;;  %v2009_v45 = vadd.f32 %v2008_v42, %v4953_v3 }
 0x12c   : > { %v2010_v24 = vpop.f32.mrf.mxu1  ;;  %v2631_v60 = vpack.c.bf16 %v2607_v53, %v2606_v25 }
 0x12d   : > { %v5035_v48 = vadd.f32 %v2711_v54, %v2550_v22  ;;  %v2011_v3 = vadd.f32 %v2010_v24, %v4963_v14  ;;  %v2362_v24 = vld [vmem:[#allocation2 + $0xe2] sm:$0xff] }
 0x12e   : > { %4437 = vmatmul.msk.bf16.gmra.mxu3 %vm1509_vm2, %v5032_v16 }
 0x130   : > { %v2217_v11 = vpop.f32.mrf.mxu2  ;;  %v2718_v23 = vpop.f32.mrf.mxu0 }
 0x131   : > { %v2303_v41 = vadd.f32 %v2217_v11, %v2006_v56  ;;  %v2473_v57 = vpop.f32.mrf.mxu3  ;;  %v5046_v11 = vpack.c.bf16 %v2361_v61, %v2360_v5  ;;  %v2609_v61 = vld [vmem:[#allocation2 + $0xdb] sm:$0xff] }
 0x133   : > { %v2551_v43 = vadd.f32 %v2465_v0, %v2303_v41  ;;  %v1685_v41 = vld [vmem:[#allocation2 + $0xc0] sm:$0xff] }
 0x134   : > { %v2013_v20 = vpop.f32.mrf.mxu1 }
 0x135   : > { %4417 = vmatmul.msk.bf16.gmra.mxu2 %vm1509_vm2, %v5009_v18  ;;  %v5042_v54 = vadd.f32 %v2713_v62, %v2551_v43  ;;  %v1686_v43 = vld [vmem:[#allocation2 + $0xc8] sm:$0xff] }
 0x137   : > { %4399 = vmatmul.msk.bf16.gmra.mxu1 %vm1509_vm2, %v1708_v35 }
 0x138   : > { %v2220_v39 = vpop.f32.mrf.mxu2  ;;  %v2721_v22 = vpop.f32.mrf.mxu0 }
 0x139   : > { %v2304_v56 = vadd.f32 %v2220_v39, %v2009_v45  ;;  %v2475_v0 = vpop.f32.mrf.mxu3  ;;  %v1709_v45 = vpack.c.bf16 %v1686_v43, %v1685_v41  ;;  %v2363_v39 = vld [vmem:[#allocation2 + $0xea] sm:$0xff] }
 0x13b   : > { %v2552_v33 = vadd.f32 %v2468_v37, %v2304_v56  ;;  %4456 = vmatmul.msk.bf16.gmra.mxu0 %vm1509_vm2, %v2631_v60  ;;  %v2608_v37 = vld [vmem:[#allocation2 + $0xd3] sm:$0xff]  ;;  %v2014_v60 = vadd.f32 %v2013_v20, %v4973_v27 }
 0x13c   : > { %v2015_v40 = vpop.f32.mrf.mxu1  ;;  %v2632_v14 = vpack.c.bf16 %v2609_v61, %v2608_v37 }
 0x13d   : > { %v5049_v18 = vadd.f32 %v2716_v4, %v2552_v33  ;;  %v2016_v27 = vadd.f32 %v2015_v40, %v4983_v32  ;;  %v2364_v40 = vld [vmem:[#allocation2 + $0xf2] sm:$0xff] }
 0x13e   : > { %4438 = vmatmul.msk.bf16.gmra.mxu3 %vm1509_vm2, %v5046_v11 }
 0x140   : > { %v2222_v62 = vpop.f32.mrf.mxu2  ;;  %v2723_v42 = vpop.f32.mrf.mxu0 }
 0x141   : > { %v2305_v35 = vadd.f32 %v2222_v62, %v2011_v3  ;;  %v2478_v25 = vpop.f32.mrf.mxu3  ;;  %v5060_v62 = vpack.c.bf16 %v2363_v39, %v2362_v24  ;;  %v2611_v39 = vld [vmem:[#allocation2 + $0xeb] sm:$0xff] }
 0x143   : > { %v2553_v53 = vadd.f32 %v2470_v29, %v2305_v35  ;;  %v1687_v35 = vld [vmem:[#allocation2 + $0xd0] sm:$0xff] }
 0x144   : > { %v2018_v5 = vpop.f32.mrf.mxu1 }
 0x145   : > { %4418 = vmatmul.msk.bf16.gmra.mxu2 %vm1509_vm2, %v5019_v2  ;;  %v5056_v4 = vadd.f32 %v2718_v23, %v2553_v53  ;;  %v1688_v53 = vld [vmem:[#allocation2 + $0xd8] sm:$0xff] }
 0x147   : > { %4400 = vmatmul.msk.bf16.gmra.mxu1 %vm1509_vm2, %v1709_v45 }
 0x148   : > { %v2225_v56 = vpop.f32.mrf.mxu2  ;;  %v2726_v33 = vpop.f32.mrf.mxu0 }
 0x149   : > { %v2306_v3 = vadd.f32 %v2225_v56, %v2014_v60  ;;  %v2480_v29 = vpop.f32.mrf.mxu3  ;;  %v1710_v60 = vpack.c.bf16 %v1688_v53, %v1687_v35  ;;  %v2365_v56 = vld [vmem:[#allocation2 + $0xfa] sm:$0xff] }
 0x14b   : > { %v2554_v41 = vadd.f32 %v2473_v57, %v2306_v3  ;;  %4457 = vmatmul.msk.bf16.gmra.mxu0 %vm1509_vm2, %v2632_v14  ;;  %v2610_v57 = vld [vmem:[#allocation2 + $0xe3] sm:$0xff]  ;;  %v2019_v14 = vadd.f32 %v2018_v5, %v4993_v46 }
 0x14c   : > { %v2020_v43 = vpop.f32.mrf.mxu1  ;;  %v2633_v32 = vpack.c.bf16 %v2611_v39, %v2610_v57 }
 0x14d   : > { %v5063_v2 = vadd.f32 %v2721_v22, %v2554_v41  ;;  %v2021_v46 = vadd.f32 %v2020_v43, %v5003_v52  ;;  %v2366_v43 = vld [vmem:[#allocation2 + $0x102] sm:$0xff] }
 0x14e   : > { %4439 = vmatmul.msk.bf16.gmra.mxu3 %vm1509_vm2, %v5060_v62 }
 0x150   : > { %v2227_v23 = vpop.f32.mrf.mxu2  ;;  %v2728_v20 = vpop.f32.mrf.mxu0 }
 0x151   : > { %v2307_v45 = vadd.f32 %v2227_v23, %v2016_v27  ;;  %v2483_v37 = vpop.f32.mrf.mxu3  ;;  %v5074_v23 = vpack.c.bf16 %v2365_v56, %v2364_v40  ;;  %v2613_v56 = vld [vmem:[#allocation2 + $0xfb] sm:$0xff] }
 0x153   : > { %v2555_v61 = vadd.f32 %v2475_v0, %v2307_v45  ;;  %v1689_v45 = vld [vmem:[#allocation2 + $0xe0] sm:$0xff] }
 0x154   : > { %v2023_v24 = vpop.f32.mrf.mxu1 }
 0x155   : > { %4419 = vmatmul.msk.bf16.gmra.mxu2 %vm1509_vm2, %v5032_v16  ;;  %v5070_v22 = vadd.f32 %v2723_v42, %v2555_v61  ;;  %v1690_v61 = vld [vmem:[#allocation2 + $0xe8] sm:$0xff] }
 0x157   : > { %4401 = vmatmul.msk.bf16.gmra.mxu1 %vm1509_vm2, %v1710_v60 }
 0x158   : > { %v2230_v3 = vpop.f32.mrf.mxu2  ;;  %v2731_v41 = vpop.f32.mrf.mxu0 }
 0x159   : > { %v2308_v27 = vadd.f32 %v2230_v3, %v2019_v14  ;;  %v2485_v0 = vpop.f32.mrf.mxu3  ;;  %v1711_v14 = vpack.c.bf16 %v1690_v61, %v1689_v45  ;;  %v2367_v3 = vld [vmem:[#allocation2 + $0x10a] sm:$0xff] }
 0x15b   : > { %v2556_v35 = vadd.f32 %v2478_v25, %v2308_v27  ;;  %4458 = vmatmul.msk.bf16.gmra.mxu0 %vm1509_vm2, %v2633_v32  ;;  %v2612_v25 = vld [vmem:[#allocation2 + $0xf3] sm:$0xff]  ;;  %v2024_v32 = vadd.f32 %v2023_v24, %v4917_v34 }
 0x15c   : > { %v2025_v53 = vpop.f32.mrf.mxu1  ;;  %v2634_v52 = vpack.c.bf16 %v2613_v56, %v2612_v25  ;;  %v4629_v56 = vld [vmem:[%s4718_s22 + $0x88] sm:$0xff]  }
 0x15d   : > { %v5077_v16 = vadd.f32 %v2726_v33, %v2556_v35  ;;  %v2026_v34 = vadd.f32 %v2025_v53, %v4923_v6 }
 0x15e   : > { %4440 = vmatmul.msk.bf16.gmra.mxu3 %vm1509_vm2, %v5074_v23 }
 0x160   : > { %v2232_v42 = vpop.f32.mrf.mxu2  ;;  %v2733_v5 = vpop.f32.mrf.mxu0 }
 0x161   : > { %v2309_v60 = vadd.f32 %v2232_v42, %v2021_v46  ;;  %v2488_v57 = vpop.f32.mrf.mxu3  ;;  %v5088_v42 = vpack.c.bf16 %v2367_v3, %v2366_v43  ;;  %v4612_v3 = vunpack.c.h.bf16 %v4629_v56 }
 0x163   : > { %v2557_v39 = vadd.f32 %v2480_v29, %v2309_v60  ;;  %v1691_v60 = vld [vmem:[#allocation2 + $0xf0] sm:$0xff]  ;;  %1660 = vst.msk [vmem:[#allocation2 + $0x12b] sm:$0xff] %vm1509_vm2, %v4612_v3 }
 0x164   : > { %v2028_v40 = vpop.f32.mrf.mxu1 }
 0x165   : > { %4420 = vmatmul.msk.bf16.gmra.mxu2 %vm1509_vm2, %v5046_v11  ;;  %v5084_v33 = vadd.f32 %v2728_v20, %v2557_v39  ;;  %v1692_v39 = vld [vmem:[#allocation2 + $0xf8] sm:$0xff]  ;;  %v2029_v53 = vadd.f32 %v2028_v40, %v4929_v49 }
 0x166   : > { %v1712_v43 = vpack.c.bf16 %v1692_v39, %v1691_v60 }
 0x167   : > { %4402 = vmatmul.msk.bf16.gmra.mxu1 %vm1509_vm2, %v1711_v14 }
 0x168   : > { %v2235_v27 = vpop.f32.mrf.mxu2  ;;  %v2736_v35 = vpop.f32.mrf.mxu0 }
 0x169   : > { %v2310_v29 = vadd.f32 %v2235_v27, %v2024_v32  ;;  %v2490_v46 = vpop.f32.mrf.mxu3  ;;  %v2614_v27 = vld [vmem:[#allocation2 + $0x103] sm:$0xff] }
 0x16b   : > { %v2558_v45 = vadd.f32 %v2483_v37, %v2310_v29  ;;  %4459 = vmatmul.msk.bf16.gmra.mxu0 %vm1509_vm2, %v2634_v52  ;;  %v4611_v37 = vunpack.c.l.bf16 %v4629_v56  ;;  %v2368_v29 = vld [vmem:[#allocation2 + $0x112] sm:$0xff] }
 0x16c   : > { %v2030_v11 = vpop.f32.mrf.mxu1 }
 0x16d   : > { %v5091_v20 = vadd.f32 %v2731_v41, %v2558_v45  ;;  %v2615_v41 = vld [vmem:[#allocation2 + $0x10b] sm:$0xff]  ;;  %1659 = vst.msk [vmem:[#allocation2 + $0x123] sm:$0xff] %vm1509_vm2, %v4611_v37  ;;  %v2369_v45 = vld [vmem:[#allocation2 + $0x11a] sm:$0xff]  ;;  %v2031_v49 = vadd.f32 %v2030_v11, %v4938_v58 }
 0x16e   : > { %4441 = vmatmul.msk.bf16.gmra.mxu3 %vm1509_vm2, %v5088_v42  ;;  %v1694_v37 = vld [vmem:[#allocation2 + $0x108] sm:$0xff] }
 0x170   : > { %v2237_v24 = vpop.f32.mrf.mxu2  ;;  %v2738_v61 = vpop.f32.mrf.mxu0 }
 0x171   : > { %v2311_v14 = vadd.f32 %v2237_v24, %v2026_v34  ;;  %v2493_v25 = vpop.f32.mrf.mxu3 }
 0x173   : > { %v2559_v32 = vadd.f32 %v2485_v0, %v2311_v14  ;;  %v2635_v0 = vpack.c.bf16 %v2615_v41, %v2614_v27  ;;  %v5105_v14 = vpack.c.bf16 %v2369_v45, %v2368_v29  ;;  %v2617_v45 = vld [vmem:[#allocation2 + $0x11b] sm:$0xff] }
 0x174   : > { %v2033_v52 = vpop.f32.mrf.mxu1  ;;  %v2370_v11 = vld [vmem:[#allocation2 + $0x122] sm:$0xff] }
 0x175   : > { %4421 = vmatmul.msk.bf16.gmra.mxu2 %vm1509_vm2, %v5060_v62  ;;  %v5100_v6 = vadd.f32 %v2733_v5, %v2559_v32 }
 0x177   : > { %4403 = vmatmul.msk.bf16.gmra.mxu1 %vm1509_vm2, %v1712_v43  ;;  %v1693_v43 = vld [vmem:[#allocation2 + $0x100] sm:$0xff] }
 0x178   : > { %v2240_v34 = vpop.f32.mrf.mxu2  ;;  %v2741_v24 = vpop.f32.mrf.mxu0 }
 0x179   : > { %v2312_v60 = vadd.f32 %v2240_v34, %v2029_v53  ;;  %v2495_v39 = vpop.f32.mrf.mxu3  ;;  %v1713_v53 = vpack.c.bf16 %v1694_v37, %v1693_v43  ;;  %v2371_v34 = vld [vmem:[#allocation2 + $0x12a] sm:$0xff] }
 0x17b   : > { %v2560_v62 = vadd.f32 %v2488_v57, %v2312_v60  ;;  %4460 = vmatmul.msk.bf16.gmra.mxu0 %vm1509_vm2, %v2635_v0  ;;  %v2616_v57 = vld [vmem:[#allocation2 + $0x113] sm:$0xff]  ;;  %v2034_v0 = vadd.f32 %v2033_v52, %v4947_v1 }
 0x17c   : > { %v2035_v5 = vpop.f32.mrf.mxu1  ;;  %v2636_v58 = vpack.c.bf16 %v2617_v45, %v2616_v57  ;;  %v1695_v52 = vld [vmem:[#allocation2 + $0x110] sm:$0xff] }
 0x17d   : > { %v5108_v56 = vadd.f32 %v2736_v35, %v2560_v62  ;;  %v2036_v1 = vadd.f32 %v2035_v5, %v4958_v12  ;;  %v3328_v5 = vld [vmem:[#allocation2 + $0x25] sm:$0xff] }
 0x17e   : > { %4442 = vmatmul.msk.bf16.gmra.mxu3 %vm1509_vm2, %v5105_v14 }
 0x180   : > { %v2242_v40 = vpop.f32.mrf.mxu2  ;;  %v2743_v32 = vpop.f32.mrf.mxu0 }
 0x181   : > { %v2313_v3 = vadd.f32 %v2242_v40, %v2031_v49  ;;  %v2498_v27 = vpop.f32.mrf.mxu3  ;;  %v2389_v40 = vpack.c.bf16 %v2371_v34, %v2370_v11  ;;  %v2618_v11 = vld [vmem:[#allocation2 + $0x123] sm:$0xff]  ;;  %v3329_v34 = vld [vmem:[#allocation2 + $0x2d] sm:$0xff] }
 0x183   : > { %v2561_v41 = vadd.f32 %v2490_v46, %v2313_v3 }
 0x184   : > { %v2038_v29 = vpop.f32.mrf.mxu1 }
 0x185   : > { %4422 = vmatmul.msk.bf16.gmra.mxu2 %vm1509_vm2, %v5074_v23  ;;  %v5115_v35 = vadd.f32 %v2738_v61, %v2561_v41  ;;  %v1696_v41 = vld [vmem:[#allocation2 + $0x118] sm:$0xff] }
 0x187   : > { %4404 = vmatmul.msk.bf16.gmra.mxu1 %vm1509_vm2, %v1713_v53 }
 0x188   : > { %v2245_v60 = vpop.f32.mrf.mxu2  ;;  %v2746_v62 = vpop.f32.mrf.mxu0 }
 0x189   : > { %v2314_v49 = vadd.f32 %v2245_v60, %v2034_v0  ;;  %v2500_v46 = vpop.f32.mrf.mxu3  ;;  %v1714_v0 = vpack.c.bf16 %v1696_v41, %v1695_v52 }
 0x18b   : > { %v2562_v43 = vadd.f32 %v2493_v25, %v2314_v49  ;;  %4461 = vmatmul.msk.bf16.gmra.mxu0 %vm1509_vm2, %v2636_v58  ;;  %v2619_v25 = vld [vmem:[#allocation2 + $0x12b] sm:$0xff]  ;;  %v2039_v58 = vadd.f32 %v2038_v29, %v4967_v19  ;;  %v2832_v29 = vld [vmem:[#allocation2 + $0x14] sm:$0xff] }
 0x18c   : > { %v2040_v37 = vpop.f32.mrf.mxu1  ;;  %v2637_v12 = vpack.c.bf16 %v2619_v25, %v2618_v11 }
 0x18d   : > { %v5120_v3 = vadd.f32 %v2741_v24, %v2562_v43  ;;  %v2041_v19 = vadd.f32 %v2040_v37, %v4978_v30  ;;  %v3330_v37 = vld [vmem:[#allocation2 + $0x35] sm:$0xff] }
 0x18e   : > { %4443 = vmatmul.msk.bf16.gmra.mxu3 %vm1509_vm2, %v2389_v40 }
 0x190   : > { %v2247_v23 = vpop.f32.mrf.mxu2  ;;  %v2748_v61 = vpop.f32.mrf.mxu0 }
 0x191   : > { %v2315_v53 = vadd.f32 %v2247_v23, %v2036_v1  ;;  %v2503_v57 = vpop.f32.mrf.mxu3  ;;  %v3364_v1 = vpack.c.bf16 %v3329_v34, %v3328_v5  ;;  %v3576_v5 = vld [vmem:[#allocation2 + $0x26] sm:$0xff]  ;;  %v3331_v34 = vld [vmem:[#allocation2 + $0x3d] sm:$0xff] }
 0x193   : > { %v2563_v45 = vadd.f32 %v2495_v39, %v2315_v53  ;;  %v2833_v53 = vld [vmem:[#allocation2 + $0x1c] sm:$0xff] }
 0x194   : > { %v2043_v60 = vpop.f32.mrf.mxu1  ;;  %v2868_v25 = vpack.c.bf16 %v2833_v53, %v2832_v29 }
 0x195   : > { %4423 = vmatmul.msk.bf16.gmra.mxu2 %vm1509_vm2, %v5088_v42  ;;  %v5126_v24 = vadd.f32 %v2743_v32, %v2563_v45 }
 0x197   : > { %4405 = vmatmul.msk.bf16.gmra.mxu1 %vm1509_vm2, %v1714_v0 }
 0x198   : > { %v2250_v49 = vpop.f32.mrf.mxu2  ;;  %v2751_v40 = vpop.f32.mrf.mxu0 }
 0x199   : > { %v2316_v43 = vadd.f32 %v2250_v49, %v2039_v58  ;;  %v2505_v39 = vpop.f32.mrf.mxu3 }
 0x19b   : > { %v2564_v23 = vadd.f32 %v2498_v27, %v2316_v43  ;;  %4462 = vmatmul.msk.bf16.gmra.mxu0 %vm1509_vm2, %v2637_v12  ;;  %v3577_v27 = vld [vmem:[#allocation2 + $0x2e] sm:$0xff]  ;;  %v2044_v12 = vadd.f32 %v2043_v60, %v4987_v38 }
 0x19c   : > { %v2045_v52 = vpop.f32.mrf.mxu1  ;;  %v3612_v30 = vpack.c.bf16 %v3577_v27, %v3576_v5 }
 0x19d   : > { %v5131_v41 = vadd.f32 %v2746_v62, %v2564_v23  ;;  %v3365_v23 = vpack.c.bf16 %v3331_v34, %v3330_v37  ;;  %v2046_v38 = vadd.f32 %v2045_v52, %v4998_v50  ;;  %v3332_v34 = vld [vmem:[#allocation2 + $0x45] sm:$0xff]  ;;  %v3333_v50 = vld [vmem:[#allocation2 + $0x4d] sm:$0xff] }
 0x19e   : > { %4502 = vmatmul.msk.bf16.vlgmr.msra.gmra.mxu3 %vm1509_vm2, %v3364_v1 }
 0x1a0   : > { %v2252_v42 = vpop.f32.mrf.mxu2  ;;  %v2753_v32 = vpop.f32.mrf.mxu0 }
 0x1a1   : > { %v2317_v45 = vadd.f32 %v2252_v42, %v2041_v19  ;;  %v2508_v0 = vpop.f32.mrf.mxu3 }
 0x1a3   : > { %v2565_v11 = vadd.f32 %v2500_v46, %v2317_v45 }
 0x1a4   : > { %v2048_v58 = vpop.f32.mrf.mxu1 }
 0x1a5   : > { %4424 = vmatmul.msk.bf16.gmra.mxu2 %vm1509_vm2, %v5105_v14  ;;  %v5137_v62 = vadd.f32 %v2748_v61, %v2565_v11  ;;  %v3080_v14 = vld [vmem:[#allocation2 + $0x24] sm:$0xff]  ;;  %v3081_v61 = vld [vmem:[#allocation2 + $0x2c] sm:$0xff] }
 0x1a6   : > { %v3116_v11 = vpack.c.bf16 %v3081_v61, %v3080_v14 }
 0x1a7   : > { %4464 = vmatmul.msk.bf16.vlgmr.msra.gmra.mxu1 %vm1509_vm2, %v2868_v25 }
 0x1a8   : > { %v2255_v49 = vpop.f32.mrf.mxu2  ;;  %v2756_v43 = vpop.f32.mrf.mxu0 }
 0x1a9   : > { %v2318_v1 = vadd.f32 %v2255_v49, %v2044_v12  ;;  %v2510_v46 = vpop.f32.mrf.mxu3  ;;  %v3578_v12 = vld [vmem:[#allocation2 + $0x36] sm:$0xff] }
 0x1ab   : > { %v2566_v19 = vadd.f32 %v2503_v57, %v2318_v1  ;;  %4521 = vmatmul.msk.bf16.vlgmr.msra.gmra.mxu0 %vm1509_vm2, %v3612_v30  ;;  %v3579_v57 = vld [vmem:[#allocation2 + $0x3e] sm:$0xff] }
 0x1ac   : > { %v2050_v42 = vpop.f32.mrf.mxu1  ;;  %v3613_v37 = vpack.c.bf16 %v3579_v57, %v3578_v12 }
 0x1ad   : > { %v5142_v29 = vadd.f32 %v2751_v40, %v2566_v19  ;;  %v2049_v40 = vadd.f32 %v2048_v58, %v4933_v55  ;;  %v3366_v19 = vpack.c.bf16 %v3333_v50, %v3332_v34  ;;  %v2051_v55 = vadd.f32 %v2050_v42, %v4941_v59  ;;  %v3334_v50 = vld [vmem:[#allocation2 + $0x55] sm:$0xff]  ;;  %v3335_v59 = vld [vmem:[#allocation2 + $0x5d] sm:$0xff] }
 0x1ae   : > { %4503 = vmatmul.msk.bf16.gmra.mxu3 %vm1509_vm2, %v3365_v23 }
 0x1b0   : > { %v2257_v60 = vpop.f32.mrf.mxu2  ;;  %v2758_v53 = vpop.f32.mrf.mxu0 }
 0x1b1   : > { %v2319_v45 = vadd.f32 %v2257_v60, %v2046_v38  ;;  %v2513_v25 = vpop.f32.mrf.mxu3  ;;  %v3083_v38 = vld [vmem:[#allocation2 + $0x3c] sm:$0xff] }
 0x1b3   : > { %v2567_v5 = vadd.f32 %v2505_v39, %v2319_v45 }
 0x1b4   : > { %v2053_v27 = vpop.f32.mrf.mxu1 }
 0x1b5   : > { %4483 = vmatmul.msk.bf16.vlgmr.msra.gmra.mxu2 %vm1509_vm2, %v3116_v11  ;;  %v5147_v30 = vadd.f32 %v2753_v32, %v2567_v5  ;;  %v3082_v32 = vld [vmem:[#allocation2 + $0x34] sm:$0xff] }
 0x1b7   : > { %4465 = vmatmul.msk.bf16.gmra.mxu1 %vm1509_vm2, %v3116_v11  ;;  %v3117_v11 = vpack.c.bf16 %v3083_v38, %v3082_v32 }
 0x1b8   : > { %v2260_v52 = vpop.f32.mrf.mxu2  ;;  %v2761_v49 = vpop.f32.mrf.mxu0 }
 0x1b9   : > { %v2320_v1 = vadd.f32 %v2260_v52, %v2049_v40  ;;  %v2515_v23 = vpop.f32.mrf.mxu3  ;;  %v3580_v40 = vld [vmem:[#allocation2 + $0x46] sm:$0xff] }
 0x1bb   : > { %v2568_v39 = vadd.f32 %v2508_v0, %v2320_v1  ;;  %4522 = vmatmul.msk.bf16.gmra.mxu0 %vm1509_vm2, %v3613_v37  ;;  %v3581_v0 = vld [vmem:[#allocation2 + $0x4e] sm:$0xff] }
 0x1bc   : > { %v2055_v14 = vpop.f32.mrf.mxu1  ;;  %v3614_v34 = vpack.c.bf16 %v3581_v0, %v3580_v40 }
 0x1bd   : > { %v5152_v61 = vadd.f32 %v2756_v43, %v2568_v39  ;;  %v2054_v43 = vadd.f32 %v2053_v27, %v4951_v9  ;;  %v3367_v39 = vpack.c.bf16 %v3335_v59, %v3334_v50  ;;  %v2056_v9 = vadd.f32 %v2055_v14, %v4961_v13  ;;  %v3336_v59 = vld [vmem:[#allocation2 + $0x65] sm:$0xff]  ;;  %v3337_v13 = vld [vmem:[#allocation2 + $0x6d] sm:$0xff] }
 0x1be   : > { %4504 = vmatmul.msk.bf16.gmra.mxu3 %vm1509_vm2, %v3366_v19 }
 0x1bf   : > { %6654 = vst [vmem:[#allocation4_spill] sm:$0xff] %v5152_v61 }
 0x1c0   : > { %v2262_v58 = vpop.f32.mrf.mxu2  ;;  %v2763_v60 = vpop.f32.mrf.mxu0 }
 0x1c1   : > { %v2321_v45 = vadd.f32 %v2262_v58, %v2051_v55  ;;  %v2518_v5 = vpop.f32.mrf.mxu3  ;;  %v3085_v55 = vld [vmem:[#allocation2 + $0x4c] sm:$0xff] }
 0x1c3   : > { %v2569_v12 = vadd.f32 %v2510_v46, %v2321_v45 }
 0x1c4   : > { %v2058_v57 = vpop.f32.mrf.mxu1 }
 0x1c5   : > { %4484 = vmatmul.msk.bf16.gmra.mxu2 %vm1509_vm2, %v3117_v11  ;;  %v5157_v37 = vadd.f32 %v2758_v53, %v2569_v12  ;;  %v3084_v53 = vld [vmem:[#allocation2 + $0x44] sm:$0xff] }
 0x1c7   : > { %6655 = vst [vmem:[#allocation5_spill] sm:$0xff] %v5157_v37  ;;  %4466 = vmatmul.msk.bf16.gmra.mxu1 %vm1509_vm2, %v3117_v11  ;;  %v3118_v11 = vpack.c.bf16 %v3085_v55, %v3084_v53 }
 0x1c8   : > { %v2265_v42 = vpop.f32.mrf.mxu2  ;;  %v2766_v52 = vpop.f32.mrf.mxu0 }
 0x1c9   : > { %v2322_v1 = vadd.f32 %v2265_v42, %v2054_v43  ;;  %v2520_v19 = vpop.f32.mrf.mxu3  ;;  %v3582_v43 = vld [vmem:[#allocation2 + $0x56] sm:$0xff] }
 0x1cb   : > { %v2570_v46 = vadd.f32 %v2513_v25, %v2322_v1  ;;  %4523 = vmatmul.msk.bf16.gmra.mxu0 %vm1509_vm2, %v3614_v34  ;;  %v3583_v25 = vld [vmem:[#allocation2 + $0x5e] sm:$0xff] }
 0x1cc   : > { %v2060_v32 = vpop.f32.mrf.mxu1  ;;  %v3615_v50 = vpack.c.bf16 %v3583_v25, %v3582_v43 }
 0x1cd   : > { %v5162_v38 = vadd.f32 %v2761_v49, %v2570_v46  ;;  %v2059_v49 = vadd.f32 %v2058_v57, %v4971_v26  ;;  %v3368_v46 = vpack.c.bf16 %v3337_v13, %v3336_v59  ;;  %v2061_v26 = vadd.f32 %v2060_v32, %v4981_v31  ;;  %v3338_v13 = vld [vmem:[#allocation2 + $0x75] sm:$0xff]  ;;  %v3339_v31 = vld [vmem:[#allocation2 + $0x7d] sm:$0xff] }
 0x1ce   : > { %4505 = vmatmul.msk.bf16.gmra.mxu3 %vm1509_vm2, %v3367_v39 }
 0x1cf   : > { %6656 = vst [vmem:[#allocation6_spill] sm:$0xff] %v5162_v38 }
 0x1d0   : > { %v2267_v27 = vpop.f32.mrf.mxu2  ;;  %v2768_v58 = vpop.f32.mrf.mxu0 }
 0x1d1   : > { %v2323_v45 = vadd.f32 %v2267_v27, %v2056_v9  ;;  %v2523_v12 = vpop.f32.mrf.mxu3  ;;  %v3087_v9 = vld [vmem:[#allocation2 + $0x5c] sm:$0xff] }
 0x1d3   : > { %v2571_v40 = vadd.f32 %v2515_v23, %v2323_v45 }
 0x1d4   : > { %v2063_v0 = vpop.f32.mrf.mxu1 }
 0x1d5   : > { %4485 = vmatmul.msk.bf16.gmra.mxu2 %vm1509_vm2, %v3118_v11  ;;  %v5167_v34 = vadd.f32 %v2763_v60, %v2571_v40  ;;  %v3086_v60 = vld [vmem:[#allocation2 + $0x54] sm:$0xff] }
 0x1d7   : > { %6657 = vst [vmem:[#allocation7_spill] sm:$0xff] %v5167_v34  ;;  %4467 = vmatmul.msk.bf16.gmra.mxu1 %vm1509_vm2, %v3118_v11  ;;  %v3119_v11 = vpack.c.bf16 %v3087_v9, %v3086_v60 }
 0x1d8   : > { %v2270_v14 = vpop.f32.mrf.mxu2  ;;  %v2771_v42 = vpop.f32.mrf.mxu0 }
 0x1d9   : > { %v2324_v1 = vadd.f32 %v2270_v14, %v2059_v49  ;;  %v2525_v39 = vpop.f32.mrf.mxu3  ;;  %v3584_v49 = vld [vmem:[#allocation2 + $0x66] sm:$0xff] }
 0x1db   : > { %v2572_v23 = vadd.f32 %v2518_v5, %v2324_v1  ;;  %4524 = vmatmul.msk.bf16.gmra.mxu0 %vm1509_vm2, %v3615_v50  ;;  %v3585_v5 = vld [vmem:[#allocation2 + $0x6e] sm:$0xff] }
 0x1dc   : > { %v2065_v53 = vpop.f32.mrf.mxu1  ;;  %v3616_v59 = vpack.c.bf16 %v3585_v5, %v3584_v49 }
 0x1dd   : > { %v5172_v55 = vadd.f32 %v2766_v52, %v2572_v23  ;;  %v2064_v52 = vadd.f32 %v2063_v0, %v4991_v44  ;;  %v3369_v23 = vpack.c.bf16 %v3339_v31, %v3338_v13  ;;  %v2066_v44 = vadd.f32 %v2065_v53, %v5001_v51  ;;  %v3340_v31 = vld [vmem:[#allocation2 + $0x85] sm:$0xff]  ;;  %v3341_v51 = vld [vmem:[#allocation2 + $0x8d] sm:$0xff] }
 0x1de   : > { %4506 = vmatmul.msk.bf16.gmra.mxu3 %vm1509_vm2, %v3368_v46 }
 0x1df   : > { %6658 = vst [vmem:[#allocation8_spill] sm:$0xff] %v5172_v55 }
 0x1e0   : > { %v2272_v57 = vpop.f32.mrf.mxu2  ;;  %v2773_v27 = vpop.f32.mrf.mxu0 }
 0x1e1   : > { %v2325_v45 = vadd.f32 %v2272_v57, %v2061_v26  ;;  %v2528_v40 = vpop.f32.mrf.mxu3  ;;  %v3089_v26 = vld [vmem:[#allocation2 + $0x6c] sm:$0xff] }
 0x1e3   : > { %v2573_v43 = vadd.f32 %v2520_v19, %v2325_v45 }
 0x1e4   : > { %v2068_v25 = vpop.f32.mrf.mxu1 }
 0x1e5   : > { %4486 = vmatmul.msk.bf16.gmra.mxu2 %vm1509_vm2, %v3119_v11  ;;  %v5177_v50 = vadd.f32 %v2768_v58, %v2573_v43  ;;  %v3088_v58 = vld [vmem:[#allocation2 + $0x64] sm:$0xff] }
 0x1e7   : > { %6659 = vst [vmem:[#allocation9_spill] sm:$0xff] %v5177_v50  ;;  %4468 = vmatmul.msk.bf16.gmra.mxu1 %vm1509_vm2, %v3119_v11  ;;  %v3120_v11 = vpack.c.bf16 %v3089_v26, %v3088_v58 }
 0x1e8   : > { %v2275_v32 = vpop.f32.mrf.mxu2  ;;  %v2776_v14 = vpop.f32.mrf.mxu0 }
 0x1e9   : > { %v2326_v1 = vadd.f32 %v2275_v32, %v2064_v52  ;;  %v2530_v46 = vpop.f32.mrf.mxu3  ;;  %v3586_v52 = vld [vmem:[#allocation2 + $0x76] sm:$0xff] }
 0x1eb   : > { %v2574_v19 = vadd.f32 %v2523_v12, %v2326_v1  ;;  %4525 = vmatmul.msk.bf16.gmra.mxu0 %vm1509_vm2, %v3616_v59  ;;  %v3587_v12 = vld [vmem:[#allocation2 + $0x7e] sm:$0xff] }
 0x1ec   : > { %v2070_v60 = vpop.f32.mrf.mxu1  ;;  %v3617_v13 = vpack.c.bf16 %v3587_v12, %v3586_v52 }
 0x1ed   : > { %v5182_v9 = vadd.f32 %v2771_v42, %v2574_v19  ;;  %v2069_v42 = vadd.f32 %v2068_v25, %v5007_v8  ;;  %v2071_v8 = vadd.f32 %v2070_v60, %v5014_v21 }
 0x1ee   : > { %4507 = vmatmul.msk.bf16.gmra.mxu3 %vm1509_vm2, %v3369_v23 }
 0x1ef   : > { %6660 = vst [vmem:[#allocation10_spill] sm:$0xff] %v5182_v9 }
 0x1f0   : > { %v2277_v0 = vpop.f32.mrf.mxu2  ;;  %v2778_v57 = vpop.f32.mrf.mxu0 }
 0x1f1   : > { %v2327_v45 = vadd.f32 %v2277_v0, %v2066_v44  ;;  %v2533_v43 = vpop.f32.mrf.mxu3  ;;  %v3091_v44 = vld [vmem:[#allocation2 + $0x7c] sm:$0xff] }
 0x1f3   : > { %v2575_v49 = vadd.f32 %v2525_v39, %v2327_v45  ;;  %v3370_v39 = vpack.c.bf16 %v3341_v51, %v3340_v31  ;;  %v3342_v51 = vld [vmem:[#allocation2 + $0x95] sm:$0xff] }
 0x1f4   : > { %v2073_v5 = vpop.f32.mrf.mxu1 }
 0x1f5   : > { %4487 = vmatmul.msk.bf16.gmra.mxu2 %vm1509_vm2, %v3120_v11  ;;  %v5187_v59 = vadd.f32 %v2773_v27, %v2575_v49  ;;  %v3090_v27 = vld [vmem:[#allocation2 + $0x74] sm:$0xff]  ;;  %v2074_v21 = vadd.f32 %v2073_v5, %v4945_v63 }
 0x1f7   : > { %6661 = vst [vmem:[#allocation11_spill] sm:$0xff] %v5187_v59  ;;  %4469 = vmatmul.msk.bf16.gmra.mxu1 %vm1509_vm2, %v3120_v11  ;;  %v3121_v11 = vpack.c.bf16 %v3091_v44, %v3090_v27 }
 0x1f8   : > { %v2280_v53 = vpop.f32.mrf.mxu2  ;;  %v2781_v32 = vpop.f32.mrf.mxu0 }
 0x1f9   : > { %v2328_v1 = vadd.f32 %v2280_v53, %v2069_v42  ;;  %v5191_v23 = vpop.f32.mrf.mxu3  ;;  %v3588_v42 = vld [vmem:[#allocation2 + $0x86] sm:$0xff]  ;;  %v3343_v53 = vld [vmem:[#allocation2 + $0x9d] sm:$0xff] }
 0x1fb   : > { %v2576_v19 = vadd.f32 %v2528_v40, %v2328_v1  ;;  %4526 = vmatmul.msk.bf16.gmra.mxu0 %vm1509_vm2, %v3617_v13  ;;  %v212_v40 = vlaneseq  ;;  %v3589_v13 = vld [vmem:[#allocation2 + $0x8e] sm:$0xff] }
 0x1fc   : > { %v2075_v58 = vpop.f32.mrf.mxu1  ;;  %v3618_v60 = vpack.c.bf16 %v3589_v13, %v3588_v42 }
 0x1fd   : > { %v5194_v26 = vadd.f32 %v2776_v14, %v2576_v19  ;;  %v5203_v14 = vshrl.u32 %v212_v40, 7  ;;  %v3093_v40 = vld [vmem:[#allocation2 + $0x8c] sm:$0xff] }
 0x1fe   : > { %4508 = vmatmul.msk.bf16.gmra.mxu3 %vm1509_vm2, %v3370_v39 }
 0x1ff   : > { %6662 = vst [vmem:[#allocation12_spill] sm:$0xff] %v5194_v26  ;;  %v252_v1 = vand.u32 65535, %v5203_v14  ;;  %v253_v44 = vshrl.u32 %v5203_v14, 16 }
 0x200   : > { %v2282_v25 = vpop.f32.mrf.mxu2  ;;  %v5198_v0 = vpop.f32.mrf.mxu0 }
 0x201   : > { %v2329_v45 = vadd.f32 %v2282_v25, %v2071_v8  ;;  %v5200_v49 = vpop.f32.mrf.mxu3  ;;  %v256_v8 = vmul.u32 58254, %v252_v1  ;;  %v255_v63 = vmul.u32 14564, %v252_v1  ;;  %v257_v5 = vmul.u32 14564, %v253_v44 }
 0x202   : > { %v258_v42 = vmul.u32 58254, %v253_v44 }
 0x203   : > { %v2577_v52 = vadd.f32 %v2530_v46, %v2329_v45  ;;  %v259_v45 = vshll.u32 %v256_v8, 16  ;;  %v261_v13 = vshll.u32 %v257_v5, 16 }
 0x204   : > { %v2078_v12 = vpop.f32.mrf.mxu1 }
 0x205   : > { %4488 = vmatmul.msk.bf16.gmra.mxu2 %vm1509_vm2, %v3121_v11  ;;  %v5205_v31 = vadd.f32 %v2778_v57, %v2577_v52  ;;  %v3371_v57 = vpack.c.bf16 %v3343_v53, %v3342_v51  ;;  %v3092_v52 = vld [vmem:[#allocation2 + $0x84] sm:$0xff]  ;;  %vm263_vm3 = vc.u32 %v255_v63, %v259_v45 }
 0x207   : > { %6663 = vst [vmem:[#allocation13_spill] sm:$0xff] %v5205_v31  ;;  %4470 = vmatmul.msk.bf16.gmra.mxu1 %vm1509_vm2, %v3121_v11 }
 0x208   : > { %v2285_v46 = vpop.f32.mrf.mxu2  ;;  %v5210_v39 = vpop.f32.mrf.mxu0 }
 0x209   : > { %v2330_v19 = vadd.f32 %v2285_v46, %v2074_v21  ;;  %v5212_v27 = vpop.f32.mrf.mxu3  ;;  %v265_v21 = vadd.s32 %v259_v45, %v255_v63  ;;  %v5220_v46 = vadd.s32 8, %v5203_v14  ;;  %v260_v45 = vshrl.u32 %v256_v8, 16 }
 0x20b   : > { %v2578_v25 = vadd.f32 %v2533_v43, %v2330_v19  ;;  %4527 = vmatmul.msk.bf16.gmra.mxu0 %vm1509_vm2, %v3618_v60  ;;  %v2076_v43 = vadd.f32 %v2075_v58, %v4955_v10  ;;  %v6652_v60 = vmov 0   ;;  %v3122_v19 = vpack.c.bf16 %v3093_v40, %v3092_v52  ;;  %v3590_v40 = vld [vmem:[#allocation2 + $0x96] sm:$0xff] }
 0x20c   : > { %v5216_v11 = vpop.f32.mrf.mxu1  ;;  %v264_v53 = vsel %vm263_vm3, 1, %v6652_v60  ;;  %vm267_vm4 = vc.u32 %v265_v21, %v261_v13  ;;  %v281_v26 = vand.u32 65535, %v5220_v46  ;;  %v262_v13 = vshrl.u32 %v257_v5, 16 }
 0x20d   : > { %v5222_v51 = vadd.f32 %v2781_v32, %v2578_v25  ;;  %v266_v44 = vadd.s32 %v264_v53, %v258_v42  ;;  %v268_v32 = vsel %vm267_vm4, 1, %v6652_v60  ;;  %v282_v25 = vshrl.u32 %v5220_v46, 16  ;;  %v3591_v42 = vld [vmem:[#allocation2 + $0x9e] sm:$0xff]  ;;  %v3345_v60 = vld [vmem:[#allocation2 + $0xad] sm:$0xff] }
 0x20e   : > { %4509 = vmatmul.msk.bf16.gmra.mxu3 %vm1509_vm2, %v3371_v57  ;;  %v285_v58 = vmul.u32 58254, %v281_v26  ;;  %v284_v59 = vmul.u32 14564, %v281_v26  ;;  %v3619_v26 = vpack.c.bf16 %v3591_v42, %v3590_v40  ;;  %v6665_v5 = vmov 0  }
 0x20f   : > { %6664 = vst [vmem:[#allocation14_spill] sm:$0xff] %v5222_v51  ;;  %v270_v10 = vadd.s32 %v268_v32, %v266_v44  ;;  %v286_v53 = vmul.u32 14564, %v282_v25  ;;  %v287_v8 = vmul.u32 58254, %v282_v25  ;;  %v2079_v44 = vadd.f32 %v2078_v12, %v4965_v17 }
 0x210   : > { %v2287_v1 = vpop.f32.mrf.mxu2  ;;  %v5226_v31 = vpop.f32.mrf.mxu0  ;;  %4118 = vst.msk [vmem:[%s5278_s18] sm:$0xf] %vm4044_vm9, %v6665_v5 }
 0x211   : > { %v2331_v57 = vadd.f32 %v2287_v1, %v2076_v43  ;;  %v5229_v63 = vpop.f32.mrf.mxu3  ;;  %v271_v21 = vadd.s32 %v270_v10, %v260_v45  ;;  %v288_v43 = vshll.u32 %v285_v58, 16  ;;  %v5238_v1 = vadd.s32 16, %v5203_v14  ;;  %4119 = vst.msk [vmem:[%s5278_s18 + $0x4] sm:$0xf] %vm4044_vm9, %v6665_v5 }
 0x212   : > { %v290_v32 = vshll.u32 %v286_v53, 16  ;;  %4120 = vst.msk [vmem:[%s5278_s18 + $0x8] sm:$0xf] %vm4044_vm9, %v6665_v5 }
 0x213   : > { %v2579_v51 = vadd.f32 %v5191_v23, %v2331_v57  ;;  %vm292_vm5 = vc.u32 %v284_v59, %v288_v43  ;;  %v294_v23 = vadd.s32 %v288_v43, %v284_v59  ;;  %v3344_v57 = vld [vmem:[#allocation2 + $0xa5] sm:$0xff]  ;;  %v310_v10 = vand.u32 65535, %v5238_v1  ;;  %4121 = vst.msk [vmem:[%s5278_s18 + $0xc] sm:$0xf] %vm4044_vm9, %v6665_v5 }
 0x214   : > { %v5234_v52 = vpop.f32.mrf.mxu1  ;;  %v293_v45 = vsel %vm292_vm5, 1, %v6665_v5  ;;  %v272_v55 = vadd.s32 %v271_v21, %v262_v13  ;;  %v311_v42 = vshrl.u32 %v5238_v1, 16  ;;  %v3372_v43 = vpack.c.bf16 %v3345_v60, %v3344_v57  ;;  %v3094_v57 = vld [vmem:[#allocation2 + $0x94] sm:$0xff]  ;;  %4122 = vst.msk [vmem:[%s5278_s18 + $0x10] sm:$0xf] %vm4044_vm9, %v6665_v5 }
 0x215   : > { %4489 = vmatmul.msk.bf16.gmra.mxu2 %vm1509_vm2, %v3122_v19  ;;  %v5245_v9 = vadd.f32 %v5198_v0, %v2579_v51  ;;  %v295_v17 = vadd.s32 %v293_v45, %v287_v8  ;;  %vm296_vm6 = vc.u32 %v294_v23, %v290_v32  ;;  %v314_v38 = vmul.u32 58254, %v310_v10  ;;  %v3095_v45 = vld [vmem:[#allocation2 + $0x9c] sm:$0xff]  ;;  %4123 = vst.msk [vmem:[%s5278_s18 + $0x14] sm:$0xf] %vm4044_vm9, %v6665_v5 }
 0x216   : > { %v297_v40 = vsel %vm296_vm6, 1, %v6665_v5  ;;  %v313_v51 = vmul.u32 14564, %v310_v10  ;;  %v5255_v13 = vmul.u32 14564, %v311_v42  ;;  %v273_v8 = vshrl.u32 %v272_v55, 4  ;;  %4124 = vst.msk [vmem:[%s5278_s18 + $0x18] sm:$0xf] %vm4044_vm9, %v6665_v5 }
 0x217   : > { %4471 = vmatmul.msk.bf16.gmra.mxu1 %vm1509_vm2, %v3122_v19  ;;  %6666 = vst [vmem:[#allocation15_spill] sm:$0xff] %v5245_v9  ;;  %v289_v19 = vshrl.u32 %v285_v58, 16  ;;  %v299_v34 = vadd.s32 %v297_v40, %v295_v17  ;;  %v291_v58 = vshrl.u32 %v286_v53, 16  ;;  %v316_v23 = vmul.u32 58254, %v311_v42  ;;  %v5467_v9 = vld [vmem:[%s6649_s2] ss:$0 sm:$0xff] }
 0x218   : > { %v2290_v25 = vpop.f32.mrf.mxu2  ;;  %v5247_v50 = vpop.f32.mrf.mxu0  ;;  %v2081_v60 = vadd.f32 %v5216_v11, %v4975_v28  ;;  %v5265_v10 = vadd.s32 24, %v5203_v14  ;;  %v3123_v17 = vpack.c.bf16 %v3095_v45, %v3094_v57  ;;  %v320_v45 = vshrl.u32 %v5255_v13, 16  ;;  %4125 = vst.msk [vmem:[%s5278_s18 + $0x1c] sm:$0xf] %vm4044_vm9, %v6665_v5 }
 0x219   : > { %v2332_v12 = vadd.f32 %v2290_v25, %v2079_v44  ;;  %v5249_v59 = vpop.f32.mrf.mxu3  ;;  %v317_v44 = vshll.u32 %v314_v38, 16  ;;  %v300_v32 = vadd.s32 %v299_v34, %v289_v19  ;;  %v274_v25 = vmul.u32 18, %v273_v8  ;;  %4126 = vst.msk [vmem:[%s5278_s18 + $0x20] sm:$0xf] %vm4044_vm9, %v6665_v5 }
 0x21a   : > { %v340_v42 = vshrl.u32 %v5265_v10, 16  ;;  %v318_v8 = vshrl.u32 %v314_v38, 16  ;;  %4127 = vst.msk [vmem:[%s5278_s18 + $0x24] sm:$0xf] %vm4044_vm9, %v6665_v5 }
 0x21b   : > { %v2580_v0 = vadd.f32 %v5200_v49, %v2332_v12  ;;  %4528 = vmatmul.msk.bf16.gmra.mxu0 %vm1509_vm2, %v3619_v26  ;;  %v319_v49 = vshll.u32 %v5255_v13, 16  ;;  %vm321_vm7 = vc.u32 %v313_v51, %v317_v44  ;;  %v323_v26 = vadd.s32 %v317_v44, %v313_v51  ;;  %v3097_v51 = vld [vmem:[#allocation2 + $0xac] sm:$0xff] }
 0x21c   : > { %v5257_v21 = vpop.f32.mrf.mxu1  ;;  %v322_v28 = vsel %vm321_vm7, 1, %v6665_v5  ;;  %v301_v19 = vadd.s32 %v300_v32, %v291_v58  ;;  %v3592_v58 = vld [vmem:[#allocation2 + $0xa6] sm:$0xff]  ;;  %v3593_v32 = vld [vmem:[#allocation2 + $0xae] sm:$0xff] }
 0x21d   : > { %v5268_v55 = vadd.f32 %v5210_v39, %v2580_v0  ;;  %v324_v40 = vadd.s32 %v322_v28, %v316_v23  ;;  %vm325_vm8 = vc.u32 %v323_v26, %v319_v49  ;;  %v339_v39 = vand.u32 65535, %v5265_v10  ;;  %v3096_v0 = vld [vmem:[#allocation2 + $0xa4] sm:$0xff] }
 0x21e   : > { %4510 = vmatmul.msk.bf16.gmra.mxu3 %vm1509_vm2, %v3372_v43  ;;  %v5286_v23 = vsub.s32 %v5203_v14, %v274_v25  ;;  %v326_v57 = vsel %vm325_vm8, 1, %v6665_v5  ;;  %v302_v38 = vshrl.u32 %v301_v19, 4  ;;  %v5298_v25 = vpack.c.bf16 %v3097_v51, %v3096_v0 }
 0x21f   : > { %6667 = vst [vmem:[#allocation16_spill] sm:$0xff] %v5268_v55  ;;  %v328_v49 = vadd.s32 %v326_v57, %v324_v40  ;;  %v5294_v26 = vmul.u32 58254, %v339_v39  ;;  %v342_v28 = vmul.u32 14564, %v339_v39  ;;  %v3620_v19 = vpack.c.bf16 %v3593_v32, %v3592_v58 }
 0x220   : > { %v2292_v34 = vpop.f32.mrf.mxu2  ;;  %v5270_v53 = vpop.f32.mrf.mxu0  ;;  %v345_v51 = vmul.u32 58254, %v340_v42  ;;  %vm1293_vm10 = vcmp.ne.s32.totalorder %v5286_v23, 0  ;;  %v303_v57 = vmul.u32 18, %v302_v38  ;;  %vm1329_vm13 = vcmp.lt.s32.totalorder %v5286_v23, 0 }
 0x221   : > { %v2333_v11 = vadd.f32 %v2292_v34, %v2081_v60  ;;  %v5273_v12 = vpop.f32.mrf.mxu3  ;;  %v3346_v60 = vld [vmem:[#allocation2 + $0xb5] sm:$0xff]  ;;  %v2084_v34 = vadd.f32 %v5234_v52, %v4985_v36  ;;  %v329_v13 = vadd.s32 %v328_v49, %v318_v8  ;;  %v346_v40 = vshll.u32 %v5294_v26, 16  ;;  %vm5373_vm14 = vmand %vm1329_vm13, %vm1293_vm10 }
 0x222   : > { %v5311_v36 = vadd.s32 32, %v5203_v14  ;;  %v347_v38 = vshrl.u32 %v5294_v26, 16  ;;  %vm4081_vm8 = vcmask 64512  }
 0x223   : > { %v2581_v43 = vadd.f32 %v5212_v27, %v2333_v11  ;;  %v3347_v27 = vld [vmem:[#allocation2 + $0xbd] sm:$0xff]  ;;  %v5303_v11 = vmul.u32 14564, %v340_v42  ;;  %v330_v49 = vadd.s32 %v329_v13, %v320_v45  ;;  %vm350_vm11 = vc.u32 %v342_v28, %v346_v40 }
 0x224   : > { %v5283_v44 = vpop.f32.mrf.mxu1  ;;  %v3373_v39 = vpack.c.bf16 %v3347_v27, %v3346_v60  ;;  %v352_v42 = vadd.s32 %v346_v40, %v342_v28  ;;  %v351_v45 = vsel %vm350_vm11, 1, %v6665_v5 }
 0x225   : > { %4490 = vmatmul.msk.bf16.gmra.mxu2 %vm1509_vm2, %v3123_v17  ;;  %v5320_v58 = vadd.f32 %v5226_v31, %v2581_v43  ;;  %v368_v31 = vand.u32 65535, %v5311_v36  ;;  %v369_v43 = vshrl.u32 %v5311_v36, 16  ;;  %v331_v27 = vshrl.u32 %v330_v49, 4 }
 0x226   : > { %v353_v28 = vadd.s32 %v351_v45, %v345_v51  ;;  %v2086_v49 = vadd.f32 %v5257_v21, %v4995_v47  ;;  %v5381_v47 = vld [vmem:[#allocation2 + $0xbe] sm:$0xff] }
 0x227   : > { %4472 = vmatmul.msk.bf16.gmra.mxu1 %vm1509_vm2, %v3123_v17  ;;  %v348_v17 = vshll.u32 %v5303_v11, 16  ;;  %6668 = vst [vmem:[#allocation17_spill] sm:$0xff] %v5320_v58  ;;  %v371_v13 = vmul.u32 14564, %v368_v31  ;;  %v332_v26 = vmul.u32 18, %v331_v27  ;;  %v5379_v27 = vld [vmem:[#allocation2 + $0xb6] sm:$0xff] }
 0x228   : > { %v2295_v52 = vpop.f32.mrf.mxu2  ;;  %v5313_v0 = vpop.f32.mrf.mxu0 }
 0x229   : > { %v2334_v8 = vadd.f32 %v2295_v52, %v2084_v34  ;;  %v5326_v32 = vpop.f32.mrf.mxu3  ;;  %vm354_vm12 = vc.u32 %v352_v42, %v348_v17  ;;  %v349_v52 = vshrl.u32 %v5303_v11, 16  ;;  %v5360_v17 = vmul.u32 14564, %v369_v43  ;;  %v3349_v11 = vld [vmem:[#allocation2 + $0xcd] sm:$0xff] }
 0x22a   : > { %v355_v40 = vsel %vm354_vm12, 1, %v6665_v5 }
 0x22b   : > { %v2582_v60 = vadd.f32 %v5229_v63, %v2334_v8  ;;  %4529 = vmatmul.msk.bf16.gmra.mxu0 %vm1509_vm2, %v3620_v19  ;;  %v5345_v63 = vmul.u32 58254, %v368_v31  ;;  %v5352_v19 = vsub.s32 %v5220_v46, %v303_v57  ;;  %v357_v51 = vadd.s32 %v355_v40, %v353_v28 }
 0x22c   : > { %v5343_v34 = vpop.f32.mrf.mxu1  ;;  %v1401_v46 = vadd.s32 18, %v5286_v23  ;;  %v374_v57 = vmul.u32 58254, %v369_v43  ;;  %v377_v43 = vshll.u32 %v5360_v17, 16  ;;  %v5388_v28 = vsub.s32 %v5238_v1, %v332_v26 }
 0x22d   : > { %v375_v8 = vshll.u32 %v5345_v63, 16  ;;  %v5367_v42 = vadd.f32 %v5247_v50, %v2582_v60  ;;  %v358_v21 = vadd.s32 %v357_v51, %v347_v38  ;;  %vm1294_vm0 = vcmp.ne.s32.totalorder %v5352_v19, 0 }
 0x22e   : > { %4511 = vmatmul.msk.bf16.gmra.mxu3 %vm1509_vm2, %v3373_v39  ;;  %v5391_v40 = vadd.s32 40, %v5203_v14  ;;  %vm1330_vm1 = vcmp.lt.s32.totalorder %v5352_v19, 0  ;;  %v3621_v1 = vpack.c.bf16 %v5381_v47, %v5379_v27  ;;  %v1402_v26 = vadd.s32 18, %v5352_v19 }
 0x22f   : > { %6669 = vst [vmem:[#allocation18_spill] sm:$0xff] %v5367_v42  ;;  %vm379_vm15 = vc.u32 %v371_v13, %v375_v8  ;;  %v381_v50 = vadd.s32 %v375_v8, %v371_v13  ;;  %v359_v42 = vadd.s32 %v358_v21, %v349_v52  ;;  %v3044_v13 = vadd.f32 %v5283_v44, %v5022_v7  ;;  %vm5410_vm4 = vmand %vm1330_vm1, %vm1294_vm0  ;;  %v3099_v44 = vld [vmem:[#allocation2 + $0xbc] sm:$0xff] }
 0x230   : > { %v2297_v31 = vpop.f32.mrf.mxu2  ;;  %v5377_v39 = vpop.f32.mrf.mxu0  ;;  %v380_v38 = vsel %vm379_vm15, 1, %v6665_v5  ;;  %v1437_v8 = vsel %vm5373_vm14, %v1401_v46, %v5286_v23  ;;  %v376_v52 = vshrl.u32 %v5345_v63, 16  ;;  %vm1295_vm5 = vcmp.ne.s32.totalorder %v5388_v28, 0 }
 0x231   : > { %v2335_v60 = vadd.f32 %v2297_v31, %v2086_v49  ;;  %v5385_v45 = vpop.f32.mrf.mxu3  ;;  %vm383_vm3 = vc.u32 %v381_v50, %v377_v43  ;;  %v382_v31 = vadd.s32 %v380_v38, %v374_v57  ;;  %vm1331_vm6 = vcmp.lt.s32.totalorder %v5388_v28, 0  ;;  %v3348_v57 = vld [vmem:[#allocation2 + $0xc5] sm:$0xff] }
 0x232   : > { %v384_v21 = vsel %vm383_vm3, 1, %v6665_v5  ;;  %v397_v23 = vand.u32 65535, %v5391_v40  ;;  %v398_v63 = vshrl.u32 %v5391_v40, 16  ;;  %vm5418_vm7 = vcmp.lt.s32.totalorder %v1437_v8, 16  ;;  %vm5451_vm10 = vmand %vm1331_vm6, %vm1295_vm5 }
 0x233   : > { %v2583_v51 = vadd.f32 %v5249_v59, %v2335_v60  ;;  %v3098_v59 = vld [vmem:[#allocation2 + $0xb4] sm:$0xff]  ;;  %v360_v27 = vshrl.u32 %v359_v42, 4  ;;  %v378_v47 = vshrl.u32 %v5360_v17, 16  ;;  %v386_v43 = vadd.s32 %v384_v21, %v382_v31 }
 0x234   : > { %v2959_v49 = vpop.f32.mrf.mxu1  ;;  %v400_v60 = vmul.u32 14564, %v397_v23  ;;  %v5428_v38 = vmul.u32 58254, %v397_v23  ;;  %v5430_v58 = vmul.u32 14564, %v398_v63  ;;  %v5433_v8 = vadd.s32 48, %v5203_v14  ;;  %v5460_v23 = vld [vmem:[#allocation2 + $0xce] sm:$0xff] }
 0x235   : > { %4491 = vmatmul.msk.bf16.gmra.mxu2 %vm1509_vm2, %v5298_v25  ;;  %v5424_v50 = vadd.f32 %v5270_v53, %v2583_v51  ;;  %v1438_v17 = vsel %vm5410_vm4, %v1402_v26, %v5352_v19  ;;  %v5440_v53 = vpack.c.bf16 %v3099_v44, %v3098_v59  ;;  %v5443_v51 = vadd.s32 18, %v5388_v28  ;;  %v3100_v59 = vld [vmem:[#allocation2 + $0xc4] sm:$0xff] }
 0x236   : > { %v3045_v21 = vadd.f32 %v5343_v34, %v5028_v15  ;;  %v3374_v26 = vpack.c.bf16 %v3349_v11, %v3348_v57  ;;  %v404_v44 = vshll.u32 %v5428_v38, 16  ;;  %v403_v34 = vmul.u32 58254, %v398_v63 }
 0x237   : > { %6676 = vst [vmem:[#allocation19_spill] sm:$0xff] %v5424_v50  ;;  %4473 = vmatmul.msk.bf16.gmra.mxu1 %vm1509_vm2, %v5298_v25  ;;  %v387_v25 = vadd.s32 %v386_v43, %v376_v52  ;;  %v361_v52 = vmul.u32 18, %v360_v27  ;;  %v406_v43 = vshll.u32 %v5430_v58, 16  ;;  %v426_v11 = vand.u32 65535, %v5433_v8 }
 0x238   : > { %v3202_v55 = vpop.f32.mrf.mxu2  ;;  %v5438_v42 = vpop.f32.mrf.mxu0  ;;  %vm408_vm11 = vc.u32 %v400_v60, %v404_v44  ;;  %v410_v57 = vadd.s32 %v404_v44, %v400_v60  ;;  %vm5487_vm12 = vcmp.lt.s32.totalorder %v1438_v17, 16 }
 0x239   : > { %v3292_v31 = vadd.f32 %v3202_v55, %v3044_v13  ;;  %v5455_v19 = vpop.f32.mrf.mxu3  ;;  %v3101_v55 = vld [vmem:[#allocation2 + $0xcc] sm:$0xff]  ;;  %v388_v15 = vadd.s32 %v387_v25, %v378_v47  ;;  %v427_v25 = vshrl.u32 %v5433_v8, 16 }
 0x23a   : > { %v5458_v13 = vld [vmem:[#allocation2 + $0xc6] sm:$0xff]  ;;  %v5483_v60 = vpack.c.bf16 %v3101_v55, %v3100_v59  ;;  %vm412_vm13 = vc.u32 %v410_v57, %v406_v43 }
 0x23b   : > { %v3540_v50 = vadd.f32 %v5273_v12, %v3292_v31  ;;  %4530 = vmatmul.msk.bf16.gmra.mxu0 %vm1509_vm2, %v3621_v1  ;;  %v389_v47 = vshrl.u32 %v388_v15, 4  ;;  %v409_v12 = vsel %vm408_vm11, 1, %v6665_v5  ;;  %v5481_v1 = vadd.f32 %v2959_v49, %v5035_v48 }
 0x23c   : > { %v5475_v27 = vpop.f32.mrf.mxu1  ;;  %v3622_v44 = vpack.c.bf16 %v5460_v23, %v5458_v13  ;;  %v5493_v15 = vsub.s32 %v5265_v10, %v361_v52  ;;  %v411_v61 = vadd.s32 %v409_v12, %v403_v34  ;;  %v413_v49 = vsel %vm412_vm13, 1, %v6665_v5  ;;  %v5514_v12 = vld [vmem:[#allocation2 + $0xdd] sm:$0xff] }
 0x23d   : > { %v3788_v31 = vadd.f32 %v5313_v0, %v3540_v50  ;;  %v390_v63 = vmul.u32 18, %v389_v47  ;;  %v405_v0 = vshrl.u32 %v5428_v38, 16  ;;  %v5498_v50 = vmul.u32 58254, %v426_v11  ;;  %v5512_v47 = vld [vmem:[#allocation2 + $0xd5] sm:$0xff] }
 0x23e   : > { %4512 = vmatmul.msk.bf16.gmra.mxu3 %vm1509_vm2, %v3374_v26  ;;  %v407_v26 = vshrl.u32 %v5430_v58, 16  ;;  %v415_v55 = vadd.s32 %v413_v49, %v411_v61  ;;  %v429_v10 = vmul.u32 14564, %v426_v11  ;;  %v5503_v52 = vmul.u32 14564, %v427_v25 }
 0x23f   : > { %v3828_v48 = vadd.f32 %v5467_v9, %v3788_v31  ;;  %v5510_v38 = vsub.s32 %v5311_v36, %v390_v63  ;;  %v433_v31 = vshll.u32 %v5498_v50, 16  ;;  %vm1296_vm14 = vcmp.ne.s32.totalorder %v5493_v15, 0 }
 0x240   : > { %v3204_v17 = vpop.f32.mrf.mxu2  ;;  %v5500_v59 = vpop.f32.mrf.mxu0  ;;  %vm1332_vm15 = vcmp.lt.s32.totalorder %v5493_v15, 0  ;;  %v5520_v61 = vadd.s32 56, %v5203_v14  ;;  %v5531_v46 = vadd.s32 18, %v5493_v15  ;;  %v432_v11 = vmul.u32 58254, %v427_v25 }
 0x241   : > { %v3936_v34 = vsel %vm5418_vm7, %v3828_v48, 0.0  ;;  %v3293_v43 = vadd.f32 %v3204_v17, %v3045_v21  ;;  %v5507_v57 = vpop.f32.mrf.mxu3  ;;  %v416_v21 = vadd.s32 %v415_v55, %v405_v0  ;;  %v3375_v49 = vpack.c.bf16 %v5514_v12, %v5512_v47  ;;  %vm5571_vm5 = vmand %vm1332_vm15, %vm1296_vm14 }
 0x242   : > { %v3972_v58 = vmax.f32 %v3936_v34, 0.0  ;;  %v435_v17 = vshll.u32 %v5503_v52, 16  ;;  %vm437_vm0 = vc.u32 %v429_v10, %v433_v31  ;;  %vm1297_vm1 = vcmp.ne.s32.totalorder %v5510_v38, 0 }
 0x243   : > { %v3541_v36 = vadd.f32 %v5326_v32, %v3293_v43  ;;  %v417_v32 = vadd.s32 %v416_v21, %v407_v26  ;;  %v434_v25 = vshrl.u32 %v5498_v50, 16  ;;  %vm1333_vm3 = vcmp.lt.s32.totalorder %v5510_v38, 0 }
 0x244   : > { %v4008_v63 = vpack.c.bf16 %v3972_v58, %v3972_v58  ;;  %4082 = vst.msk [vmem:[#allocation3] sm:$0xff] %vm4081_vm8, %v3972_v58  ;;  %v5534_v48 = vpop.f32.mrf.mxu1  ;;  %v438_v0 = vsel %vm437_vm0, 1, %v6665_v5  ;;  %v439_v55 = vadd.s32 %v433_v31, %v429_v10  ;;  %v455_v43 = vand.u32 65535, %v5520_v61  ;;  %vm5595_vm7 = vmand %vm1333_vm3, %vm1297_vm1 }
 0x245   : > { %v3789_v34 = vadd.f32 %v5377_v39, %v3541_v36  ;;  %4492 = vmatmul.msk.bf16.gmra.mxu2 %vm1509_vm2, %v5440_v53  ;;  %v418_v39 = vshrl.u32 %v417_v32, 4  ;;  %v440_v12 = vadd.s32 %v438_v0, %v432_v11  ;;  %v456_v26 = vshrl.u32 %v5520_v61, 16 }
 0x246   : > { %4045 = vst.msk [vmem:[%s5527_s24] sm:$0xf] %vm4044_vm9, %v4008_v63  ;;  %v5556_v36 = vadd.s32 18, %v5510_v38  ;;  %v436_v21 = vshrl.u32 %v5503_v52, 16  ;;  %vm441_vm4 = vc.u32 %v439_v55, %v435_v17  ;;  %v5559_v10 = vmul.u32 58254, %v455_v43  ;;  %v3103_v52 = vld [vmem:[#allocation2 + $0xdc] sm:$0xff] }
 0x247   : > { %v3829_v47 = vadd.f32 %v5467_v9, %v3789_v34  ;;  %4474 = vmatmul.msk.bf16.gmra.mxu1 %vm1509_vm2, %v5440_v53  ;;  %v419_v11 = vmul.u32 18, %v418_v39  ;;  %v442_v34 = vsel %vm441_vm4, 1, %v6665_v5  ;;  %v458_v0 = vmul.u32 14564, %v455_v43 }
 0x248   : > { %v3207_v58 = vpop.f32.mrf.mxu2  ;;  %v5553_v50 = vpop.f32.mrf.mxu0  ;;  %v444_v17 = vadd.s32 %v442_v34, %v440_v12  ;;  %v5575_v37 = vmul.u32 14564, %v456_v26  ;;  %v3047_v12 = vadd.f32 %v5475_v27, %v5042_v54  ;;  %v3102_v34 = vld [vmem:[#allocation2 + $0xd4] sm:$0xff] }
 0x249   : > { %v3937_v31 = vsel %vm5487_vm12, %v3829_v47, 0.0  ;;  %v3294_v53 = vadd.f32 %v3207_v58, %v5481_v1  ;;  %v5564_v63 = vpop.f32.mrf.mxu3  ;;  %v6683_v1 = vsel %vm5451_vm10, %v5443_v51, %v5388_v28  ;;  %v462_v28 = vshll.u32 %v5559_v10, 16 }
 0x24a   : > { %v3973_v32 = vmax.f32 %v3937_v31, 0.0  ;;  %vm5582_vm6 = vcmp.lt.s32.totalorder %v6683_v1, 16  ;;  %v5601_v51 = vadd.s32 64, %v5203_v14  ;;  %v5605_v13 = vsub.s32 %v5391_v40, %v419_v11 }
 0x24b   : > { %v3542_v47 = vadd.f32 %v5385_v45, %v3294_v53  ;;  %4531 = vmatmul.msk.bf16.gmra.mxu0 %vm1509_vm2, %v3622_v44  ;;  %v445_v23 = vadd.s32 %v444_v17, %v434_v25  ;;  %v461_v44 = vmul.u32 58254, %v456_v26  ;;  %v1440_v58 = vsel %vm5571_vm5, %v5531_v46, %v5493_v15  ;;  %v3598_v17 = vld [vmem:[#allocation2 + $0xd6] sm:$0xff] }
 0x24c   : > { %v4009_v43 = vpack.c.bf16 %v3973_v32, %v3973_v32  ;;  %4083 = vst.msk [vmem:[#allocation3 + $0x8] sm:$0xff] %vm4081_vm8, %v3973_v32  ;;  %v2966_v45 = vpop.f32.mrf.mxu1  ;;  %v464_v31 = vshll.u32 %v5575_v37, 16  ;;  %v1441_v40 = vsel %vm5595_vm7, %v5556_v36, %v5510_v38  ;;  %v463_v25 = vshrl.u32 %v5559_v10, 16 }
 0x24d   : > { %v3790_v39 = vadd.f32 %v5438_v42, %v3542_v47  ;;  %v446_v42 = vadd.s32 %v445_v23, %v436_v21  ;;  %vm466_vm10 = vc.u32 %v458_v0, %v462_v28  ;;  %v468_v15 = vadd.s32 %v462_v28, %v458_v0  ;;  %v3599_v28 = vld [vmem:[#allocation2 + $0xde] sm:$0xff]  ;;  %v3353_v23 = vld [vmem:[#allocation2 + $0xed] sm:$0xff] }
 0x24e   : > { %4046 = vst.msk [vmem:[%s5527_s24 + $0x4] sm:$0xf] %vm4044_vm9, %v4009_v43  ;;  %4513 = vmatmul.msk.bf16.gmra.mxu3 %vm1509_vm2, %v3375_v49  ;;  %v467_v27 = vsel %vm466_vm10, 1, %v6665_v5  ;;  %v484_v46 = vand.u32 65535, %v5601_v51  ;;  %vm1298_vm11 = vcmp.ne.s32.totalorder %v5605_v13, 0  ;;  %v485_v49 = vshrl.u32 %v5601_v51, 16 }
 0x24f   : > { %v3830_v54 = vadd.f32 %v5467_v9, %v3790_v39  ;;  %v447_v11 = vshrl.u32 %v446_v42, 4  ;;  %v469_v38 = vadd.s32 %v467_v27, %v461_v44  ;;  %vm1334_vm12 = vcmp.lt.s32.totalorder %v5605_v13, 0  ;;  %v5641_v43 = vld [vmem:[#allocation2 + $0xe5] sm:$0xff] }
 0x250   : > { %v3209_v26 = vpop.f32.mrf.mxu2  ;;  %v5626_v53 = vpop.f32.mrf.mxu0  ;;  %vm470_vm13 = vc.u32 %v468_v15, %v464_v31  ;;  %v465_v1 = vshrl.u32 %v5575_v37, 16  ;;  %v5639_v55 = vadd.s32 18, %v5605_v13  ;;  %v5643_v39 = vmul.u32 58254, %v484_v46  ;;  %vm5654_vm15 = vmand %vm1334_vm12, %vm1298_vm11 }
 0x251   : > { %v3938_v36 = vsel %vm5582_vm6, %v3830_v54, 0.0  ;;  %v3295_v21 = vadd.f32 %v3209_v26, %v3047_v12  ;;  %v5633_v10 = vpop.f32.mrf.mxu3  ;;  %v448_v0 = vmul.u32 18, %v447_v11  ;;  %v471_v47 = vsel %vm470_vm13, 1, %v6665_v5 }
 0x252   : > { %v3974_v32 = vmax.f32 %v3938_v36, 0.0  ;;  %v473_v44 = vadd.s32 %v471_v47, %v469_v38  ;;  %vm5646_vm14 = vcmp.lt.s32.totalorder %v1440_v58, 16  ;;  %v5663_v54 = vmul.u32 14564, %v485_v49 }
 0x253   : > { %v3543_v7 = vadd.f32 %v5455_v19, %v3295_v21  ;;  %v5661_v42 = vsub.s32 %v5433_v8, %v448_v0  ;;  %v3048_v27 = vadd.f32 %v5534_v48, %v5049_v18  ;;  %v5670_v15 = vpack.c.bf16 %v3103_v52, %v3102_v34 }
 0x254   : > { %v4010_v12 = vpack.c.bf16 %v3974_v32, %v3974_v32  ;;  %4084 = vst.msk [vmem:[#allocation3 + $0x10] sm:$0xff] %vm4081_vm8, %v3974_v32  ;;  %v5658_v31 = vpop.f32.mrf.mxu1  ;;  %v474_v26 = vadd.s32 %v473_v44, %v463_v25  ;;  %vm5674_vm0 = vcmp.lt.s32.totalorder %v1441_v40, 16  ;;  %v3049_v8 = vadd.f32 %v2966_v45, %v5056_v4  ;;  %v3105_v44 = vld [vmem:[#allocation2 + $0xec] sm:$0xff] }
 0x255   : > { %v3791_v58 = vadd.f32 %v5500_v59, %v3543_v7  ;;  %4493 = vmatmul.msk.bf16.gmra.mxu2 %vm1509_vm2, %v5483_v60  ;;  %v3623_v38 = vpack.c.bf16 %v3599_v28, %v3598_v17  ;;  %v3376_v59 = vpack.c.bf16 %v3353_v23, %v5641_v43  ;;  %v487_v36 = vmul.u32 14564, %v484_v46  ;;  %v3104_v23 = vld [vmem:[#allocation2 + $0xe4] sm:$0xff] }
 0x256   : > { %4047 = vst.msk [vmem:[%s5527_s24 + $0x8] sm:$0xf] %vm4044_vm9, %v4010_v12  ;;  %v1442_v48 = vsel %vm5654_vm15, %v5639_v55, %v5605_v13  ;;  %v475_v40 = vadd.s32 %v474_v26, %v465_v1  ;;  %v491_v25 = vshll.u32 %v5643_v39, 16  ;;  %vm1299_vm1 = vcmp.ne.s32.totalorder %v5661_v42, 0 }
 0x257   : > { %v3831_v18 = vadd.f32 %v5467_v9, %v3791_v58  ;;  %4475 = vmatmul.msk.bf16.gmra.mxu1 %vm1509_vm2, %v5483_v60  ;;  %v490_v4 = vmul.u32 58254, %v485_v49  ;;  %v493_v45 = vshll.u32 %v5663_v54, 16  ;;  %v5693_v46 = vadd.s32 72, %v5203_v14  ;;  %v5711_v58 = vld [vmem:[#allocation2 + $0xe6] sm:$0xff] }
 0x258   : > { %v3212_v21 = vpop.f32.mrf.mxu2  ;;  %v5688_v34 = vpop.f32.mrf.mxu0  ;;  %vm1335_vm3 = vcmp.lt.s32.totalorder %v5661_v42, 0  ;;  %v476_v52 = vshrl.u32 %v475_v40, 4  ;;  %vm495_vm4 = vc.u32 %v487_v36, %v491_v25  ;;  %v497_v0 = vadd.s32 %v491_v25, %v487_v36 }
 0x259   : > { %v3939_v13 = vsel %vm5646_vm14, %v3831_v18, 0.0  ;;  %v3296_v32 = vadd.f32 %v3212_v21, %v3048_v27  ;;  %v5698_v60 = vpop.f32.mrf.mxu3  ;;  %v513_v1 = vand.u32 65535, %v5693_v46  ;;  %v496_v7 = vsel %vm495_vm4, 1, %v6665_v5  ;;  %v5713_v27 = vld [vmem:[#allocation2 + $0xee] sm:$0xff]  ;;  %vm5736_vm7 = vmand %vm1335_vm3, %vm1299_vm1 }
 0x25a   : > { %v3975_v17 = vmax.f32 %v3939_v13, 0.0  ;;  %v477_v47 = vmul.u32 18, %v476_v52  ;;  %v514_v55 = vshrl.u32 %v5693_v46, 16  ;;  %v492_v12 = vshrl.u32 %v5643_v39, 16 }
 0x25b   : > { %v3544_v49 = vadd.f32 %v5507_v57, %v3296_v32  ;;  %4532 = vmatmul.msk.bf16.gmra.mxu0 %vm1509_vm2, %v3623_v38  ;;  %v498_v37 = vadd.s32 %v496_v7, %v490_v4  ;;  %vm499_vm5 = vc.u32 %v497_v0, %v493_v45  ;;  %v1407_v19 = vadd.s32 18, %v5661_v42 }
 0x25c   : > { %v4011_v28 = vpack.c.bf16 %v3975_v17, %v3975_v17  ;;  %4085 = vst.msk [vmem:[#allocation3 + $0x18] sm:$0xff] %vm4081_vm8, %v3975_v17  ;;  %v5706_v43 = vpop.f32.mrf.mxu1  ;;  %v494_v26 = vshrl.u32 %v5663_v54, 16  ;;  %v500_v38 = vsel %vm499_vm5, 1, %v6665_v5  ;;  %v5721_v39 = vsub.s32 %v5520_v61, %v477_v47 }
 0x25d   : > { %v3792_v57 = vadd.f32 %v5553_v50, %v3544_v49  ;;  %v502_v36 = vadd.s32 %v500_v38, %v498_v37  ;;  %v5723_v18 = vmul.u32 58254, %v513_v1  ;;  %v5725_v50 = vmul.u32 14564, %v514_v55 }
 0x25e   : > { %4048 = vst.msk [vmem:[%s5527_s24 + $0xc] sm:$0xf] %vm4044_vm9, %v4011_v28  ;;  %4514 = vmatmul.msk.bf16.gmra.mxu3 %vm1509_vm2, %v3376_v59  ;;  %vm5728_vm6 = vcmp.lt.s32.totalorder %v1442_v48, 16  ;;  %v5740_v61 = vpack.c.bf16 %v3105_v44, %v3104_v23  ;;  %v516_v59 = vmul.u32 14564, %v513_v1  ;;  %v3050_v4 = vadd.f32 %v5658_v31, %v5063_v2  ;;  %v4128_v44 = vld [vmem:[#allocation3] ss:$2 sm:$0xff] }
 0x25f   : > { %v3832_v40 = vadd.f32 %v5467_v9, %v3792_v57  ;;  %v3624_v48 = vpack.c.bf16 %v5713_v27, %v5711_v58  ;;  %v503_v13 = vadd.s32 %v502_v36, %v492_v12  ;;  %v520_v32 = vshll.u32 %v5723_v18, 16  ;;  %v4130_v12 = vld [vmem:[#allocation3 + $0x1] ss:$2 sm:$0xff] }
 0x260   : > { %v3214_v21 = vpop.f32.mrf.mxu2  ;;  %v5744_v45 = vpop.f32.mrf.mxu0  ;;  %v519_v49 = vmul.u32 58254, %v514_v55  ;;  %v522_v1 = vshll.u32 %v5725_v50, 16  ;;  %v1443_v2 = vsel %vm5736_vm7, %v1407_v19, %v5661_v42  ;;  %vm1300_vm10 = vcmp.ne.s32.totalorder %v5721_v39, 0  ;;  %v3355_v36 = vld [vmem:[#allocation2 + $0xfd] sm:$0xff] }
 0x261   : > { %v3940_v52 = vsel %vm5674_vm0, %v3832_v40, 0.0  ;;  %v3297_v17 = vadd.f32 %v3214_v21, %v3049_v8  ;;  %v5751_v0 = vpop.f32.mrf.mxu3  ;;  %v504_v31 = vadd.s32 %v503_v13, %v494_v26  ;;  %vm1336_vm11 = vcmp.lt.s32.totalorder %v5721_v39, 0 }
 0x262   : > { %v3976_v47 = vmax.f32 %v3940_v52, 0.0  ;;  %vm524_vm12 = vc.u32 %v516_v59, %v520_v32  ;;  %v526_v11 = vadd.s32 %v520_v32, %v516_v59  ;;  %v5765_v42 = vadd.s32 80, %v5203_v14  ;;  %vm5791_vm15 = vmand %vm1336_vm11, %vm1300_vm10 }
 0x263   : > { %v3545_v7 = vadd.f32 %v5564_v63, %v3297_v17  ;;  %v505_v28 = vshrl.u32 %v504_v31, 4  ;;  %v525_v23 = vsel %vm524_vm12, 1, %v6665_v5  ;;  %v521_v37 = vshrl.u32 %v5723_v18, 16 }
 0x264   : > { %v4012_v8 = vpack.c.bf16 %v3976_v47, %v3976_v47  ;;  %4086 = vst.msk [vmem:[#allocation3 + $0x20] sm:$0xff] %vm4081_vm8, %v3976_v47  ;;  %v5761_v55 = vpop.f32.mrf.mxu1  ;;  %v527_v57 = vadd.s32 %v525_v23, %v519_v49  ;;  %vm528_vm13 = vc.u32 %v526_v11, %v522_v1  ;;  %v1408_v19 = vadd.s32 18, %v5721_v39 }
 0x265   : > { %v3793_v63 = vadd.f32 %v5626_v53, %v3545_v7  ;;  %4494 = vmatmul.msk.bf16.gmra.mxu2 %vm1509_vm2, %v5670_v15  ;;  %v506_v58 = vmul.u32 18, %v505_v28  ;;  %v529_v27 = vsel %vm528_vm13, 1, %v6665_v5  ;;  %v542_v26 = vand.u32 65535, %v5765_v42  ;;  %v3354_v53 = vld [vmem:[#allocation2 + $0xf5] sm:$0xff] }
 0x266   : > { %4049 = vst.msk [vmem:[%s5527_s24 + $0x10] sm:$0xf] %vm4044_vm9, %v4012_v8  ;;  %v523_v18 = vshrl.u32 %v5725_v50, 16  ;;  %v531_v40 = vadd.s32 %v529_v27, %v527_v57  ;;  %v543_v54 = vshrl.u32 %v5765_v42, 16  ;;  %v4135_v59 = vmax.f32 %v4128_v44, %v4130_v12  ;;  %v3107_v57 = vld [vmem:[#allocation2 + $0xfc] sm:$0xff] }
 0x267   : > { %v3833_v38 = vadd.f32 %v5467_v9, %v3793_v63  ;;  %4476 = vmatmul.msk.bf16.gmra.mxu1 %vm1509_vm2, %v5670_v15  ;;  %vm5781_vm14 = vcmp.lt.s32.totalorder %v1443_v2, 16  ;;  %v3051_v32 = vadd.f32 %v5706_v43, %v5070_v22  ;;  %v5797_v52 = vmul.u32 58254, %v542_v26  ;;  %v3602_v15 = vld [vmem:[#allocation2 + $0xf6] sm:$0xff] }
 0x268   : > { %v3217_v13 = vpop.f32.mrf.mxu2  ;;  %v5795_v50 = vpop.f32.mrf.mxu0  ;;  %v5802_v1 = vsub.s32 %v5601_v51, %v506_v58  ;;  %v532_v43 = vadd.s32 %v531_v40, %v521_v37  ;;  %v3377_v2 = vpack.c.bf16 %v3355_v36, %v3354_v53  ;;  %v545_v31 = vmul.u32 14564, %v542_v26 }
 0x269   : > { %v3941_v17 = vsel %vm5728_vm6, %v3833_v38, 0.0  ;;  %v3298_v49 = vadd.f32 %v3217_v13, %v3050_v4  ;;  %v5804_v22 = vpop.f32.mrf.mxu3  ;;  %v5806_v7 = vmul.u32 14564, %v543_v54  ;;  %v1444_v25 = vsel %vm5791_vm15, %v1408_v19, %v5721_v39 }
 0x26a   : > { %v3977_v47 = vmax.f32 %v3941_v17, 0.0  ;;  %v533_v51 = vadd.s32 %v532_v43, %v523_v18  ;;  %v549_v4 = vshll.u32 %v5797_v52, 16  ;;  %v548_v63 = vmul.u32 58254, %v543_v54  ;;  %v3603_v17 = vld [vmem:[#allocation2 + $0xfe] sm:$0xff] }
 0x26b   : > { %v4132_v11 = vld [vmem:[#allocation3 + $0x12] ss:$2 sm:$0xff]  ;;  %v4134_v8 = vld [vmem:[#allocation3 + $0x13] ss:$2 sm:$0xff]  ;;  %v3546_v28 = vadd.f32 %v5633_v10, %v3298_v49  ;;  %4533 = vmatmul.msk.bf16.gmra.mxu0 %vm1509_vm2, %v3624_v48  ;;  %v5816_v37 = vadd.s32 88, %v5203_v14  ;;  %vm1301_vm0 = vcmp.ne.s32.totalorder %v5802_v1, 0  ;;  %v3052_v21 = vadd.f32 %v5761_v55, %v5077_v16 }
 0x26c   : > { %v4136_v23 = vmax.f32 %v4132_v11, %v4134_v8  ;;  %v4013_v44 = vpack.c.bf16 %v3977_v47, %v3977_v47  ;;  %4087 = vst.msk [vmem:[#allocation3 + $0x28] sm:$0xff] %vm4081_vm8, %v3977_v47  ;;  %v2976_v12 = vpop.f32.mrf.mxu1  ;;  %vm1337_vm1 = vcmp.lt.s32.totalorder %v5802_v1, 0  ;;  %v534_v39 = vshrl.u32 %v533_v51, 4  ;;  %v3106_v48 = vld [vmem:[#allocation2 + $0xf4] sm:$0xff] }
 0x26d   : > { %v3794_v10 = vadd.f32 %v5688_v34, %v3546_v28  ;;  %vm5823_vm3 = vcmp.lt.s32.totalorder %v1444_v25, 16  ;;  %v1409_v27 = vadd.s32 18, %v5802_v1  ;;  %v551_v34 = vshll.u32 %v5806_v7, 16  ;;  %vm5836_vm5 = vmand %vm1337_vm1, %vm1301_vm0 }
 0x26e   : > { %v4137_v19 = vmax.f32 %v4135_v59, %v4136_v23  ;;  %4050 = vst.msk [vmem:[%s5527_s24 + $0x14] sm:$0xf] %vm4044_vm9, %v4013_v44  ;;  %4515 = vmatmul.msk.bf16.gmra.mxu3 %vm1509_vm2, %v3377_v2  ;;  %vm553_vm4 = vc.u32 %v545_v31, %v549_v4  ;;  %v535_v38 = vmul.u32 18, %v534_v39  ;;  %v555_v36 = vadd.s32 %v549_v4, %v545_v31  ;;  %v3357_v39 = vld [vmem:[#allocation2 + $0x10d] sm:$0xff] }
 0x26f   : > { %v3834_v26 = vadd.f32 %v5467_v9, %v3794_v10  ;;  %v554_v53 = vsel %vm553_vm4, 1, %v6665_v5  ;;  %v5842_v13 = vpack.c.bf16 %v3107_v57, %v3106_v48  ;;  %v550_v49 = vshrl.u32 %v5797_v52, 16  ;;  %v3356_v10 = vld [vmem:[#allocation2 + $0x105] sm:$0xff] }
 0x270   : > { %v4138_v18 = vpack.c.bf16 %v4137_v19, %v4137_v19  ;;  %v3219_v40 = vpop.f32.mrf.mxu2  ;;  %v5840_v59 = vpop.f32.mrf.mxu0  ;;  %v556_v43 = vadd.s32 %v554_v53, %v548_v63  ;;  %vm557_vm6 = vc.u32 %v555_v36, %v551_v34  ;;  %v571_v11 = vand.u32 65535, %v5816_v37 }
 0x271   : > { %v3942_v47 = vsel %vm5781_vm14, %v3834_v26, 0.0  ;;  %v3299_v2 = vadd.f32 %v3219_v40, %v3051_v32  ;;  %v5847_v31 = vpop.f32.mrf.mxu3  ;;  %v5853_v28 = vsub.s32 %v5693_v46, %v535_v38  ;;  %v558_v25 = vsel %vm557_vm6, 1, %v6665_v5 }
 0x272   : > { %4139 = vst.msk [vmem:[%s5278_s18] sm:$0xf] %vm4044_vm9, %v4138_v18  ;;  %v3978_v8 = vmax.f32 %v3942_v47, 0.0  ;;  %v572_v52 = vshrl.u32 %v5816_v37, 16  ;;  %v1445_v32 = vsel %vm5836_vm5, %v1409_v27, %v5802_v1  ;;  %v3625_v4 = vpack.c.bf16 %v3603_v17, %v3602_v15 }
 0x273   : > { %v3547_v51 = vadd.f32 %v5698_v60, %v3299_v2  ;;  %v552_v44 = vshrl.u32 %v5806_v7, 16  ;;  %v560_v63 = vadd.s32 %v558_v25, %v556_v43  ;;  %v5866_v60 = vadd.s32 96, %v5203_v14  ;;  %v3109_v25 = vld [vmem:[#allocation2 + $0x10c] sm:$0xff] }
 0x274   : > { %v4014_v23 = vpack.c.bf16 %v3978_v8, %v3978_v8  ;;  %4088 = vst.msk [vmem:[#allocation3 + $0x30] sm:$0xff] %vm4081_vm8, %v3978_v8  ;;  %v2979_v46 = vpop.f32.mrf.mxu1  ;;  %v574_v55 = vmul.u32 14564, %v571_v11  ;;  %v575_v1 = vmul.u32 58254, %v571_v11  ;;  %v5871_v48 = vmul.u32 14564, %v572_v52  ;;  %v3108_v8 = vld [vmem:[#allocation2 + $0x104] sm:$0xff] }
 0x275   : > { %v3795_v16 = vadd.f32 %v5744_v45, %v3547_v51  ;;  %4495 = vmatmul.msk.bf16.gmra.mxu2 %vm1509_vm2, %v5740_v61  ;;  %vm5875_vm7 = vcmp.lt.s32.totalorder %v1445_v32, 16  ;;  %v5880_v7 = vadd.f32 %v2976_v12, %v5084_v33  ;;  %vm1302_vm10 = vcmp.ne.s32.totalorder %v5853_v28, 0 }
 0x276   : > { %4051 = vst.msk [vmem:[%s5527_s24 + $0x18] sm:$0xf] %vm4044_vm9, %v4014_v23  ;;  %vm1338_vm11 = vcmp.lt.s32.totalorder %v5853_v28, 0  ;;  %v561_v45 = vadd.s32 %v560_v63, %v550_v49  ;;  %v3378_v27 = vpack.c.bf16 %v3357_v39, %v3356_v10  ;;  %v577_v34 = vmul.u32 58254, %v572_v52 }
 0x277   : > { %v3835_v19 = vadd.f32 %v5467_v9, %v3795_v16  ;;  %4477 = vmatmul.msk.bf16.gmra.mxu1 %vm1509_vm2, %v5740_v61  ;;  %v578_v26 = vshll.u32 %v575_v1, 16  ;;  %v1410_v53 = vadd.s32 18, %v5853_v28  ;;  %v579_v12 = vshrl.u32 %v575_v1, 16  ;;  %vm5897_vm12 = vmand %vm1338_vm11, %vm1302_vm10 }
 0x278   : > { %v3222_v38 = vpop.f32.mrf.mxu2  ;;  %v5888_v36 = vpop.f32.mrf.mxu0  ;;  %v562_v33 = vadd.s32 %v561_v45, %v552_v44  ;;  %v580_v18 = vshll.u32 %v5871_v48, 16  ;;  %v600_v58 = vand.u32 65535, %v5866_v60  ;;  %v601_v52 = vshrl.u32 %v5866_v60, 16 }
 0x279   : > { %v3943_v40 = vsel %vm5823_vm3, %v3835_v19, 0.0  ;;  %v3300_v54 = vadd.f32 %v3222_v38, %v3052_v21  ;;  %v5901_v15 = vpop.f32.mrf.mxu3  ;;  %vm582_vm13 = vc.u32 %v574_v55, %v578_v26  ;;  %v584_v17 = vadd.s32 %v578_v26, %v574_v55  ;;  %v5945_v26 = vld [vmem:[#allocation2 + $0x115] sm:$0xff] }
 0x27a   : > { %v3979_v49 = vmax.f32 %v3943_v40, 0.0  ;;  %v563_v43 = vshrl.u32 %v562_v33, 4  ;;  %v583_v47 = vsel %vm582_vm13, 1, %v6665_v5  ;;  %v1446_v21 = vsel %vm5897_vm12, %v1410_v53, %v5853_v28  ;;  %v5926_v28 = vld [vmem:[#allocation2 + $0x10e] sm:$0xff] }
 0x27b   : > { %v3548_v2 = vadd.f32 %v5751_v0, %v3300_v54  ;;  %4534 = vmatmul.msk.bf16.gmra.mxu0 %vm1509_vm2, %v3625_v4  ;;  %v585_v11 = vadd.s32 %v583_v47, %v577_v34  ;;  %vm586_vm14 = vc.u32 %v584_v17, %v580_v18  ;;  %v5915_v4 = vld [vmem:[#allocation2 + $0x106] sm:$0xff]  ;;  %v5917_v44 = vld [vmem:[#allocation3 + $0x24] ss:$2 sm:$0xff]  ;;  %v5919_v63 = vld [vmem:[#allocation3 + $0x25] ss:$2 sm:$0xff]  ;;  %v5923_v39 = vadd.f32 %v2979_v46, %v5091_v20 }
 0x27c   : > { %v4015_v51 = vpack.c.bf16 %v3979_v49, %v3979_v49  ;;  %4089 = vst.msk [vmem:[#allocation3 + $0x38] sm:$0xff] %vm4081_vm8, %v3979_v49  ;;  %v564_v32 = vmul.u32 18, %v563_v43  ;;  %v5912_v23 = vpop.f32.mrf.mxu1  ;;  %v587_v0 = vsel %vm586_vm14, 1, %v6665_v5  ;;  %v581_v16 = vshrl.u32 %v5871_v48, 16 }
 0x27d   : > { %v3796_v10 = vadd.f32 %v5795_v50, %v3548_v2  ;;  %v589_v55 = vadd.s32 %v587_v0, %v585_v11  ;;  %v5934_v45 = vpack.c.bf16 %v3109_v25, %v3108_v8  ;;  %v5936_v19 = vmul.u32 58254, %v600_v58 }
 0x27e   : > { %4052 = vst.msk [vmem:[%s5527_s24 + $0x1c] sm:$0xf] %vm4044_vm9, %v4015_v51  ;;  %v5931_v1 = vsub.s32 %v5765_v42, %v564_v32  ;;  %4516 = vmatmul.msk.bf16.gmra.mxu3 %vm1509_vm2, %v3378_v27  ;;  %v5938_v50 = vmul.u32 14564, %v601_v52  ;;  %vm5941_vm15 = vcmp.lt.s32.totalorder %v1446_v21, 16  ;;  %v603_v34 = vmul.u32 14564, %v600_v58  ;;  %v5947_v42 = vld [vmem:[#allocation2 + $0x11d] sm:$0xff] }
 0x27f   : > { %v3836_v20 = vadd.f32 %v5467_v9, %v3796_v10  ;;  %v590_v48 = vadd.s32 %v589_v55, %v579_v12  ;;  %v4148_v27 = vmax.f32 %v5917_v44, %v5919_v63  ;;  %v3626_v33 = vpack.c.bf16 %v5926_v28, %v5915_v4 }
 0x280   : > { %v3224_v38 = vpop.f32.mrf.mxu2  ;;  %v5951_v53 = vpop.f32.mrf.mxu0  ;;  %v607_v18 = vshll.u32 %v5936_v19, 16  ;;  %v5957_v40 = vadd.s32 104, %v5203_v14  ;;  %v606_v49 = vmul.u32 58254, %v601_v52  ;;  %vm1303_vm0 = vcmp.ne.s32.totalorder %v5931_v1, 0 }
 0x281   : > { %v3944_v12 = vsel %vm5875_vm7, %v3836_v20, 0.0  ;;  %v3301_v54 = vadd.f32 %v3224_v38, %v5880_v7  ;;  %v591_v61 = vadd.s32 %v590_v48, %v581_v16  ;;  %v5962_v17 = vpop.f32.mrf.mxu3  ;;  %v609_v47 = vshll.u32 %v5938_v50, 16 }
 0x282   : > { %v3980_v43 = vmax.f32 %v3944_v12, 0.0  ;;  %v3379_v58 = vpack.c.bf16 %v5947_v42, %v5945_v26  ;;  %vm1339_vm1 = vcmp.lt.s32.totalorder %v5931_v1, 0  ;;  %vm611_vm3 = vc.u32 %v603_v34, %v607_v18 }
 0x283   : > { %v3549_v2 = vadd.f32 %v5804_v22, %v3301_v54  ;;  %v592_v57 = vshrl.u32 %v591_v61, 4  ;;  %v612_v8 = vsel %vm611_vm3, 1, %v6665_v5  ;;  %v613_v25 = vadd.s32 %v607_v18, %v603_v34  ;;  %vm5990_vm5 = vmand %vm1339_vm1, %vm1303_vm0 }
 0x284   : > { %v4016_v7 = vpack.c.bf16 %v3980_v43, %v3980_v43  ;;  %4090 = vst.msk [vmem:[#allocation3 + $0x40] sm:$0xff] %vm4081_vm8, %v3980_v43  ;;  %v5971_v11 = vpop.f32.mrf.mxu1  ;;  %v629_v52 = vand.u32 65535, %v5957_v40  ;;  %v1411_v22 = vadd.s32 18, %v5931_v1  ;;  %v614_v32 = vadd.s32 %v612_v8, %v606_v49 }
 0x285   : > { %v3797_v51 = vadd.f32 %v5840_v59, %v3549_v2  ;;  %4496 = vmatmul.msk.bf16.gmra.mxu2 %vm1509_vm2, %v5842_v13  ;;  %v593_v21 = vmul.u32 18, %v592_v57  ;;  %v608_v0 = vshrl.u32 %v5936_v19, 16  ;;  %vm615_vm4 = vc.u32 %v613_v25, %v609_v47 }
 0x286   : > { %4053 = vst.msk [vmem:[%s5527_s24 + $0x20] sm:$0xf] %vm4044_vm9, %v4016_v7  ;;  %v630_v4 = vshrl.u32 %v5957_v40, 16  ;;  %v5983_v10 = vmul.u32 58254, %v629_v52  ;;  %v616_v28 = vsel %vm615_vm4, 1, %v6665_v5  ;;  %v632_v19 = vmul.u32 14564, %v629_v52 }
 0x287   : > { %v3837_v16 = vadd.f32 %v5467_v9, %v3797_v51  ;;  %v5995_v55 = vsub.s32 %v5816_v37, %v593_v21  ;;  %4478 = vmatmul.msk.bf16.gmra.mxu1 %vm1509_vm2, %v5842_v13  ;;  %v610_v34 = vshrl.u32 %v5938_v50, 16  ;;  %v618_v38 = vadd.s32 %v616_v28, %v614_v32 }
 0x288   : > { %v3227_v20 = vpop.f32.mrf.mxu2  ;;  %v6000_v48 = vpop.f32.mrf.mxu0  ;;  %v6003_v18 = vmul.u32 14564, %v630_v4  ;;  %v636_v12 = vshll.u32 %v5983_v10, 16  ;;  %vm4157_vm6 = vcmask 60417   ;;  %v1447_v50 = vsel %vm5990_vm5, %v1411_v22, %v5931_v1 }
 0x289   : > { %v3945_v37 = vsel %vm5941_vm15, %v3837_v16, 0.0  ;;  %v3302_v54 = vadd.f32 %v3227_v20, %v5923_v39  ;;  %vm1304_vm7 = vcmp.ne.s32.totalorder %v5995_v55, 0  ;;  %vm1340_vm10 = vcmp.lt.s32.totalorder %v5995_v55, 0  ;;  %v6011_v13 = vpop.f32.mrf.mxu3 }
 0x28a   : > { %v3981_v61 = vmax.f32 %v3945_v37, 0.0  ;;  %v619_v49 = vadd.s32 %v618_v38, %v608_v0  ;;  %v635_v43 = vmul.u32 58254, %v630_v4  ;;  %vm4159_vm11 = vcmask 57344   ;;  %vm6026_vm13 = vmand %vm1340_vm10, %vm1304_vm7  ;;  %v3111_v37 = vld [vmem:[#allocation2 + $0x11c] sm:$0xff] }
 0x28b   : > { %v4145_v47 = vld [vmem:[#allocation3 + $0x36] ss:$2 sm:$0xff]  ;;  %v4147_v2 = vld [vmem:[#allocation3 + $0x37] ss:$2 sm:$0xff]  ;;  %v3550_v46 = vadd.f32 %v5847_v31, %v3302_v54  ;;  %v3055_v39 = vadd.f32 %v5912_v23, %v5100_v6  ;;  %v1412_v57 = vadd.s32 18, %v5995_v55  ;;  %4535 = vmatmul.msk.bf16.gmra.mxu0 %vm1509_vm2, %v3626_v33  ;;  %vm640_vm12 = vc.u32 %v632_v19, %v636_v12  ;;  %v3606_v54 = vld [vmem:[#allocation2 + $0x116] sm:$0xff] }
 0x28c   : > { %v4149_v7 = vmax.f32 %v4145_v47, %v4147_v2  ;;  %v4017_v8 = vpack.c.bf16 %v3981_v61, %v3981_v61  ;;  %4091 = vst.msk [vmem:[#allocation3 + $0x48] sm:$0xff] %vm4081_vm8, %v3981_v61  ;;  %v620_v31 = vadd.s32 %v619_v49, %v610_v34  ;;  %v6030_v6 = vpop.f32.mrf.mxu1  ;;  %v638_v23 = vshll.u32 %v6003_v18, 16  ;;  %v3607_v2 = vld [vmem:[#allocation2 + $0x11e] sm:$0xff] }
 0x28d   : > { %vm6033_vm14 = vcmp.lt.s32.totalorder %v1447_v50, 16  ;;  %v3798_v25 = vadd.f32 %v5888_v36, %v3550_v46  ;;  %v637_v52 = vshrl.u32 %v5983_v10, 16  ;;  %v641_v51 = vsel %vm640_vm12, 1, %v6665_v5 }
 0x28e   : > { %v4150_v22 = vmax.f32 %v4148_v27, %v4149_v7  ;;  %4054 = vst.msk [vmem:[%s5527_s24 + $0x24] sm:$0xf] %vm4044_vm9, %v4017_v8  ;;  %v621_v21 = vshrl.u32 %v620_v31, 4  ;;  %4517 = vmatmul.msk.bf16.gmra.mxu3 %vm1509_vm2, %v3379_v58  ;;  %v642_v32 = vadd.s32 %v636_v12, %v632_v19  ;;  %v643_v0 = vadd.s32 %v641_v51, %v635_v43  ;;  %v3110_v12 = vld [vmem:[#allocation2 + $0x114] sm:$0xff] }
 0x28f   : > { %v3838_v36 = vadd.f32 %v5467_v9, %v3798_v25  ;;  %v1448_v4 = vsel %vm6026_vm13, %v1412_v57, %v5995_v55  ;;  %v639_v10 = vshrl.u32 %v6003_v18, 16  ;;  %v6055_v44 = vadd.s32 112, %v5203_v14  ;;  %v3361_v51 = vld [vmem:[#allocation2 + $0x12d] sm:$0xff] }
 0x290   : > { %v4151_v63 = vpack.c.bf16 %v4150_v22, %v4150_v22  ;;  %v3229_v27 = vpop.f32.mrf.mxu2  ;;  %v622_v16 = vmul.u32 18, %v621_v21  ;;  %v6057_v59 = vpop.f32.mrf.mxu0  ;;  %vm644_vm15 = vc.u32 %v642_v32, %v638_v23  ;;  %v6060_v26 = vadd.s32 120, %v5203_v14 }
 0x291   : > { %v3946_v9 = vsel %vm6033_vm14, %v3838_v36, 0.0  ;;  %v3303_v42 = vadd.f32 %v3229_v27, %v3055_v39  ;;  %v645_v58 = vsel %vm644_vm15, 1, %v6665_v5  ;;  %v6065_v55 = vpop.f32.mrf.mxu3  ;;  %v658_v28 = vand.u32 65535, %v6055_v44 }
 0x292   : > { %v4153_v19 = vrot.slane %v4151_v63, 7  ;;  %v3982_v20 = vmax.f32 %v3946_v9, 0.0  ;;  %v623_v34 = vsub.s32 %v5866_v60, %v622_v16  ;;  %v647_v38 = vadd.s32 %v645_v58, %v643_v0 }
 0x293   : > { %v3551_v18 = vadd.f32 %v5901_v15, %v3303_v42  ;;  %v659_v61 = vshrl.u32 %v6055_v44, 16  ;;  %v661_v50 = vmul.u32 14564, %v658_v28  ;;  %v6071_v49 = vmul.u32 58254, %v658_v28 }
 0x294   : > { %v4154_v43 = vrot.slane %v4153_v19, 4  ;;  %4158 = vst.msk [vmem:[%s5278_s18 + $0x4] sm:$0xe] %vm4157_vm6, %v4153_v19  ;;  %v4018_v47 = vpack.c.bf16 %v3982_v20, %v3982_v20  ;;  %vm1305_vm0 = vcmp.ne.s32.totalorder %v623_v34, 0  ;;  %vm1341_vm1 = vcmp.lt.s32.totalorder %v623_v34, 0  ;;  %v2989_v60 = vpop.f32.mrf.mxu1 }
 0x295   : > { %4092 = vst.msk [vmem:[#allocation3 + $0x50] sm:$0xff] %vm4081_vm8, %v3982_v20  ;;  %v3799_v15 = vadd.f32 %v5951_v53, %v3551_v18  ;;  %v3056_v46 = vadd.f32 %v5971_v11, %v5108_v56  ;;  %4497 = vmatmul.msk.bf16.gmra.mxu2 %vm1509_vm2, %v5934_v45  ;;  %vm6081_vm3 = vmand %vm1341_vm1, %vm1305_vm0  ;;  %v1413_v57 = vadd.s32 18, %v623_v34  ;;  %v648_v7 = vadd.s32 %v647_v38, %v637_v52  ;;  %v6101_v11 = vld [vmem:[%s6649_s2] ss:$0 sm:$0xff]  ;;  %v3360_v52 = vld [vmem:[#allocation2 + $0x125] sm:$0xff] }
 0x296   : > { %4160 = vst.msk [vmem:[%s5278_s18 + $0x8] sm:$0x1] %vm4159_vm11, %v4154_v43  ;;  %vm6087_vm4 = vcmp.lt.s32.totalorder %v1448_v4, 16  ;;  %v6091_v1 = vpack.c.bf16 %v3111_v37, %v3110_v12  ;;  %v6093_v53 = vmul.u32 14564, %v659_v61  ;;  %v665_v56 = vshll.u32 %v6071_v49, 16 }
 0x297   : > { %4055 = vst.msk [vmem:[%s5527_s24 + $0x28] sm:$0xf] %vm4044_vm9, %v4018_v47  ;;  %v3839_v31 = vadd.f32 %v6101_v11, %v3799_v15  ;;  %v649_v23 = vadd.s32 %v648_v7, %v639_v10  ;;  %4479 = vmatmul.msk.bf16.gmra.mxu1 %vm1509_vm2, %v5934_v45  ;;  %v3627_v33 = vpack.c.bf16 %v3607_v2, %v3606_v54  ;;  %v664_v25 = vmul.u32 58254, %v659_v61  ;;  %v3112_v47 = vld [vmem:[#allocation2 + $0x124] sm:$0xff]  ;;  %v3113_v2 = vld [vmem:[#allocation2 + $0x12c] sm:$0xff] }
 0x298   : > { %v1449_v22 = vsel %vm6081_vm3, %v1413_v57, %v623_v34  ;;  %v3232_v21 = vpop.f32.mrf.mxu2  ;;  %v6108_v32 = vpop.f32.mrf.mxu0  ;;  %v667_v0 = vshll.u32 %v6093_v53, 16  ;;  %vm669_vm5 = vc.u32 %v661_v50, %v665_v56  ;;  %v687_v36 = vand.u32 65535, %v6060_v26 }
 0x299   : > { %v3947_v4 = vsel %vm6087_vm4, %v3839_v31, 0.0  ;;  %v3304_v10 = vadd.f32 %v3232_v21, %v3056_v46  ;;  %v650_v45 = vshrl.u32 %v649_v23, 4  ;;  %v670_v63 = vsel %vm669_vm5, 1, %v6665_v5  ;;  %v6115_v27 = vpop.f32.mrf.mxu3 }
 0x29a   : > { %v3983_v16 = vmax.f32 %v3947_v4, 0.0  ;;  %v671_v9 = vadd.s32 %v665_v56, %v661_v50  ;;  %v3380_v42 = vpack.c.bf16 %v3361_v51, %v3360_v52  ;;  %v688_v58 = vshrl.u32 %v6060_v26, 16 }
 0x29b   : > { %vm6118_vm7 = vcmp.lt.s32.totalorder %v1449_v22, 16  ;;  %v3552_v19 = vadd.f32 %v5962_v17, %v3304_v10  ;;  %v651_v20 = vmul.u32 18, %v650_v45  ;;  %4536 = vmatmul.msk.bf16.gmra.mxu0 %vm1509_vm2, %v3627_v33  ;;  %v666_v34 = vshrl.u32 %v6071_v49, 16 }
 0x29c   : > { %v4019_v38 = vpack.c.bf16 %v3983_v16, %v3983_v16  ;;  %4093 = vst.msk [vmem:[#allocation3 + $0x58] sm:$0xff] %vm4081_vm8, %v3983_v16  ;;  %v672_v18 = vadd.s32 %v670_v63, %v664_v25  ;;  %vm673_vm10 = vc.u32 %v671_v9, %v667_v0  ;;  %v2991_v12 = vpop.f32.mrf.mxu1  ;;  %v6126_v37 = vmul.u32 58254, %v687_v36  ;;  %v6128_v54 = vld [vmem:[#allocation3 + $0x48] ss:$2 sm:$0xff]  ;;  %v6133_v49 = vld [vmem:[#allocation3 + $0x49] ss:$2 sm:$0xff] }
 0x29d   : > { %v3800_v61 = vadd.f32 %v6000_v48, %v3552_v19  ;;  %v652_v17 = vsub.s32 %v5957_v40, %v651_v20  ;;  %v668_v50 = vshrl.u32 %v6093_v53, 16  ;;  %v690_v43 = vmul.u32 14564, %v687_v36  ;;  %v3608_v9 = vld [vmem:[#allocation2 + $0x126] sm:$0xff]  ;;  %v3362_v19 = vld [vmem:[#allocation2 + $0x135] sm:$0xff]  ;;  %v3363_v20 = vld [vmem:[#allocation2 + $0x13d] sm:$0xff] }
 0x29e   : > { %4056 = vst.msk [vmem:[%s5527_s24 + $0x2c] sm:$0xf] %vm4044_vm9, %v4019_v38  ;;  %v3057_v15 = vadd.f32 %v6030_v6, %v5115_v35  ;;  %v3058_v46 = vadd.f32 %v2989_v60, %v5120_v3  ;;  %v674_v39 = vsel %vm673_vm10, 1, %v6665_v5  ;;  %4518 = vmatmul.msk.bf16.gmra.mxu3 %vm1509_vm2, %v3380_v42  ;;  %v6142_v48 = vmul.u32 14564, %v688_v58  ;;  %v3609_v42 = vld [vmem:[#allocation2 + $0x12e] sm:$0xff] }
 0x29f   : > { %v3840_v40 = vadd.f32 %v6101_v11, %v3800_v61  ;;  %vm1306_vm12 = vcmp.ne.s32.totalorder %v652_v17, 0  ;;  %vm1342_vm13 = vcmp.lt.s32.totalorder %v652_v17, 0  ;;  %v1414_v57 = vadd.s32 18, %v652_v17 }
 0x2a0   : > { %vm6145_vm14 = vmand %vm1342_vm13, %vm1306_vm12  ;;  %v3234_v8 = vpop.f32.mrf.mxu2  ;;  %v676_v53 = vadd.s32 %v674_v39, %v672_v18  ;;  %v6149_v35 = vpop.f32.mrf.mxu0  ;;  %v693_v3 = vmul.u32 58254, %v688_v58  ;;  %v694_v6 = vshll.u32 %v6126_v37, 16  ;;  %v6152_v60 = vpack.c.bf16 %v3113_v2, %v3112_v47 }
 0x2a1   : > { %v4169_v56 = vmax.f32 %v6128_v54, %v6133_v49  ;;  %v3948_v31 = vsel %vm6118_vm7, %v3840_v40, 0.0  ;;  %v3305_v23 = vadd.f32 %v3234_v8, %v3057_v15  ;;  %v696_v33 = vshll.u32 %v6142_v48, 16  ;;  %v6166_v4 = vpop.f32.mrf.mxu3 }
 0x2a2   : > { %v3984_v25 = vmax.f32 %v3948_v31, 0.0  ;;  %v1450_v52 = vsel %vm6145_vm14, %v1414_v57, %v652_v17  ;;  %v677_v51 = vadd.s32 %v676_v53, %v666_v34  ;;  %vm698_vm15 = vc.u32 %v690_v43, %v694_v6 }
 0x2a3   : > { %v3553_v22 = vadd.f32 %v6011_v13, %v3305_v23  ;;  %v6163_v21 = vadd.f32 %v2991_v12, %v5126_v24  ;;  %v699_v0 = vsel %vm698_vm15, 1, %v6665_v5  ;;  %v700_v36 = vadd.s32 %v694_v6, %v690_v43 }
 0x2a4   : > { %v4020_v10 = vpack.c.bf16 %v3984_v25, %v3984_v25  ;;  %4094 = vst.msk [vmem:[#allocation3 + $0x60] sm:$0xff] %vm4081_vm8, %v3984_v25  ;;  %v678_v45 = vadd.s32 %v677_v51, %v668_v50  ;;  %v701_v63 = vadd.s32 %v699_v0, %v693_v3  ;;  %v6169_v16 = vpop.f32.mrf.mxu1  ;;  %v6172_v13 = vadd.s32 128, %v5203_v14 }
 0x2a5   : > { %vm6174_vm0 = vcmp.lt.s32.totalorder %v1450_v52, 16  ;;  %v3801_v58 = vadd.f32 %v6057_v59, %v3553_v22  ;;  %4498 = vmatmul.msk.bf16.gmra.mxu2 %vm1509_vm2, %v6091_v1  ;;  %v695_v28 = vshrl.u32 %v6126_v37, 16  ;;  %vm702_vm1 = vc.u32 %v700_v36, %v696_v33 }
 0x2a6   : > { %4057 = vst.msk [vmem:[%s5527_s24 + $0x30] sm:$0xf] %vm4044_vm9, %v4020_v10  ;;  %v679_v34 = vshrl.u32 %v678_v45, 4  ;;  %v703_v38 = vsel %vm702_vm1, 1, %v6665_v5  ;;  %v716_v18 = vand.u32 65535, %v6172_v13  ;;  %v717_v12 = vshrl.u32 %v6172_v13, 16 }
 0x2a7   : > { %v3841_v61 = vadd.f32 %v6101_v11, %v3801_v58  ;;  %v697_v59 = vshrl.u32 %v6142_v48, 16  ;;  %v705_v17 = vadd.s32 %v703_v38, %v701_v63  ;;  %4480 = vmatmul.msk.bf16.gmra.mxu1 %vm1509_vm2, %v6091_v1  ;;  %v3628_v37 = vpack.c.bf16 %v3609_v42, %v3608_v9 }
 0x2a8   : > { %v680_v50 = vmul.u32 18, %v679_v34  ;;  %v3237_v43 = vpop.f32.mrf.mxu2  ;;  %v6191_v47 = vpop.f32.mrf.mxu0  ;;  %v6193_v2 = vmul.u32 58254, %v716_v18  ;;  %v6195_v15 = vmul.u32 14564, %v717_v12  ;;  %v3381_v39 = vpack.c.bf16 %v3363_v20, %v3362_v19 }
 0x2a9   : > { %v3949_v40 = vsel %vm6174_vm0, %v3841_v61, 0.0  ;;  %v3306_v57 = vadd.f32 %v3237_v43, %v3058_v46  ;;  %v706_v7 = vadd.s32 %v705_v17, %v695_v28  ;;  %v719_v48 = vmul.u32 14564, %v716_v18  ;;  %v6211_v22 = vpop.f32.mrf.mxu3 }
 0x2aa   : > { %v3985_v8 = vmax.f32 %v3949_v40, 0.0  ;;  %v681_v53 = vsub.s32 %v6055_v44, %v680_v50  ;;  %v723_v1 = vshll.u32 %v6193_v2, 16  ;;  %v6202_v3 = vadd.s32 136, %v5203_v14  ;;  %v3611_v50 = vld [vmem:[#allocation2 + $0x13e] sm:$0xff] }
 0x2ab   : > { %v3554_v6 = vadd.f32 %v6065_v55, %v3306_v57  ;;  %v707_v31 = vadd.s32 %v706_v7, %v697_v59  ;;  %4537 = vmatmul.msk.bf16.gmra.mxu0 %vm1509_vm2, %v3628_v37  ;;  %v722_v23 = vmul.u32 58254, %v717_v12  ;;  %v725_v33 = vshll.u32 %v6195_v15, 16  ;;  %v3610_v37 = vld [vmem:[#allocation2 + $0x136] sm:$0xff] }
 0x2ac   : > { %v4021_v46 = vpack.c.bf16 %v3985_v8, %v3985_v8  ;;  %4095 = vst.msk [vmem:[#allocation3 + $0x68] sm:$0xff] %vm4081_vm8, %v3985_v8  ;;  %vm1307_vm3 = vcmp.ne.s32.totalorder %v681_v53, 0  ;;  %vm1343_vm4 = vcmp.lt.s32.totalorder %v681_v53, 0  ;;  %v1415_v44 = vadd.s32 18, %v681_v53  ;;  %v6208_v25 = vpop.f32.mrf.mxu1 }
 0x2ad   : > { %vm1379_vm5 = vmand %vm1343_vm4, %vm1307_vm3  ;;  %v3802_v52 = vadd.f32 %v6108_v32, %v3554_v6  ;;  %v708_v51 = vshrl.u32 %v707_v31, 4  ;;  %vm727_vm7 = vc.u32 %v719_v48, %v723_v1  ;;  %v729_v55 = vadd.s32 %v723_v1, %v719_v48 }
 0x2ae   : > { %4058 = vst.msk [vmem:[%s5527_s24 + $0x34] sm:$0xf] %vm4044_vm9, %v4021_v46  ;;  %v1451_v0 = vsel %vm1379_vm5, %v1415_v44, %v681_v53  ;;  %v724_v36 = vshrl.u32 %v6193_v2, 16  ;;  %v728_v10 = vsel %vm727_vm7, 1, %v6665_v5  ;;  %4519 = vmatmul.msk.bf16.gmra.mxu3 %vm1509_vm2, %v3381_v39  ;;  %v745_v45 = vand.u32 65535, %v6202_v3 }
 0x2af   : > { %vm1487_vm10 = vcmp.lt.s32.totalorder %v1451_v0, 16  ;;  %v3842_v63 = vadd.f32 %v6101_v11, %v3802_v52  ;;  %v709_v32 = vmul.u32 18, %v708_v51  ;;  %v730_v9 = vadd.s32 %v728_v10, %v722_v23  ;;  %v6258_v0 = vld [vmem:[#allocation2 + $0x134] sm:$0xff] }
 0x2b0   : > { %v3239_v42 = vpop.f32.mrf.mxu2  ;;  %v726_v24 = vshrl.u32 %v6195_v15, 16  ;;  %vm731_vm12 = vc.u32 %v729_v55, %v725_v33  ;;  %v6221_v58 = vpop.f32.mrf.mxu0  ;;  %v746_v28 = vshrl.u32 %v6202_v3, 16  ;;  %v6224_v19 = vmul.u32 58254, %v745_v45 }
 0x2b1   : > { %vm4178_vm13 = vcmask 60418   ;;  %v3950_v20 = vsel %vm1487_vm10, %v3842_v63, 0.0  ;;  %v710_v34 = vsub.s32 %v6060_v26, %v709_v32  ;;  %v3307_v38 = vadd.f32 %v3239_v42, %v6163_v21  ;;  %v6250_v33 = vpop.f32.mrf.mxu3 }
 0x2b2   : > { %v732_v18 = vsel %vm731_vm12, 1, %v6665_v5  ;;  %v3986_v12 = vmax.f32 %v3950_v20, 0.0  ;;  %v748_v59 = vmul.u32 14564, %v745_v45  ;;  %v6229_v17 = vmul.u32 14564, %v746_v28 }
 0x2b3   : > { %v734_v61 = vadd.s32 %v732_v18, %v730_v9  ;;  %v4166_v43 = vld [vmem:[#allocation3 + $0x5a] ss:$2 sm:$0xff]  ;;  %v4168_v2 = vld [vmem:[#allocation3 + $0x5b] ss:$2 sm:$0xff]  ;;  %vm4180_vm14 = vcmask 58368   ;;  %vm1308_vm15 = vcmp.ne.s32.totalorder %v710_v34, 0  ;;  %v3555_v15 = vadd.f32 %v6115_v27, %v3307_v38 }
 0x2b4   : > { %vm1344_vm0 = vcmp.lt.s32.totalorder %v710_v34, 0  ;;  %v3060_v26 = vadd.f32 %v6169_v16, %v5131_v41  ;;  %v4170_v21 = vmax.f32 %v4166_v43, %v4168_v2  ;;  %v4022_v39 = vpack.c.bf16 %v3986_v12, %v3986_v12  ;;  %4096 = vst.msk [vmem:[#allocation3 + $0x70] sm:$0xff] %vm4081_vm8, %v3986_v12  ;;  %v2999_v7 = vpop.f32.mrf.mxu1 }
 0x2b5   : > { %vm1380_vm1 = vmand %vm1344_vm0, %vm1308_vm15  ;;  %v1416_v40 = vadd.s32 18, %v710_v34  ;;  %v735_v57 = vadd.s32 %v734_v61, %v724_v36  ;;  %v3803_v48 = vadd.f32 %v6149_v35, %v3555_v15  ;;  %4499 = vmatmul.msk.bf16.gmra.mxu2 %vm1509_vm2, %v6152_v60  ;;  %v751_v8 = vmul.u32 58254, %v746_v28  ;;  %v6260_v36 = vld [vmem:[#allocation2 + $0x13c] sm:$0xff] }
 0x2b6   : > { %v752_v53 = vshll.u32 %v6224_v19, 16  ;;  %v754_v27 = vshll.u32 %v6229_v17, 16  ;;  %v4171_v41 = vmax.f32 %v4169_v56, %v4170_v21  ;;  %4059 = vst.msk [vmem:[%s5527_s24 + $0x38] sm:$0xf] %vm4044_vm9, %v4022_v39  ;;  %v3629_v6 = vpack.c.bf16 %v3611_v50, %v3610_v37 }
 0x2b7   : > { %v1452_v16 = vsel %vm1380_vm1, %v1416_v40, %v710_v34  ;;  %v736_v1 = vadd.s32 %v735_v57, %v726_v24  ;;  %v3843_v35 = vadd.f32 %v6101_v11, %v3803_v48  ;;  %4481 = vmatmul.msk.bf16.gmra.mxu1 %vm1509_vm2, %v6152_v60  ;;  %v753_v46 = vshrl.u32 %v6224_v19, 16 }
 0x2b8   : > { %vm6245_vm3 = vcmp.lt.s32.totalorder %v1452_v16, 16  ;;  %vm756_vm4 = vc.u32 %v748_v59, %v752_v53  ;;  %v758_v23 = vadd.s32 %v752_v53, %v748_v59  ;;  %v4172_v54 = vpack.c.bf16 %v4171_v41, %v4171_v41  ;;  %v3242_v56 = vpop.f32.mrf.mxu2  ;;  %v6263_v32 = vpop.f32.mrf.mxu0 }
 0x2b9   : > { %v737_v49 = vshrl.u32 %v736_v1, 4  ;;  %v757_v44 = vsel %vm756_vm4, 1, %v6665_v5  ;;  %v3951_v52 = vsel %vm6245_vm3, %v3843_v35, 0.0  ;;  %v3308_v51 = vadd.f32 %v3242_v56, %v3060_v26  ;;  %v6296_v57 = vpop.f32.mrf.mxu3 }
 0x2ba   : > { %v759_v55 = vadd.s32 %v757_v44, %v751_v8  ;;  %vm760_vm5 = vc.u32 %v758_v23, %v754_v27  ;;  %v4174_v10 = vrot.slane %v4172_v54, 6  ;;  %v3987_v60 = vmax.f32 %v3951_v52, 0.0 }
 0x2bb   : > { %v738_v45 = vmul.u32 18, %v737_v49  ;;  %v761_v63 = vsel %vm760_vm5, 1, %v6665_v5  ;;  %v3556_v9 = vadd.f32 %v6166_v4, %v3308_v51  ;;  %v755_v42 = vshrl.u32 %v6229_v17, 16  ;;  %4538 = vmatmul.msk.bf16.gmra.mxu0 %vm1509_vm2, %v3629_v6 }
 0x2bc   : > { %v763_v24 = vadd.s32 %v761_v63, %v759_v55  ;;  %v6269_v28 = vadd.s32 144, %v5203_v14  ;;  %v4175_v19 = vrot.slane %v4174_v10, 4  ;;  %4179 = vst.msk [vmem:[%s5278_s18 + $0x8] sm:$0xc] %vm4178_vm13, %v4174_v10  ;;  %v4023_v20 = vpack.c.bf16 %v3987_v60, %v3987_v60  ;;  %v3001_v4 = vpop.f32.mrf.mxu1 }
 0x2bd   : > { %v739_v34 = vsub.s32 %v6172_v13, %v738_v45  ;;  %v3133_v38 = vpack.c.bf16 %v6260_v36, %v6258_v0  ;;  %4097 = vst.msk [vmem:[#allocation3 + $0x78] sm:$0xff] %vm4081_vm8, %v3987_v60  ;;  %v3804_v18 = vadd.f32 %v6191_v47, %v3556_v9  ;;  %v3061_v12 = vadd.f32 %v6208_v25, %v5137_v62 }
 0x2be   : > { %v764_v61 = vadd.s32 %v763_v24, %v753_v46  ;;  %v774_v59 = vand.u32 65535, %v6269_v28  ;;  %4181 = vst.msk [vmem:[%s5278_s18 + $0xc] sm:$0x3] %vm4180_vm14, %v4175_v19  ;;  %v6284_v13 = vadd.s32 152, %v5203_v14  ;;  %v3062_v50 = vadd.f32 %v2999_v7, %v5142_v29 }
 0x2bf   : > { %vm1309_vm7 = vcmp.ne.s32.totalorder %v739_v34, 0  ;;  %vm1345_vm10 = vcmp.lt.s32.totalorder %v739_v34, 0  ;;  %v1417_v17 = vadd.s32 18, %v739_v34  ;;  %4060 = vst.msk [vmem:[%s5527_s24 + $0x3c] sm:$0xf] %vm4044_vm9, %v4023_v20  ;;  %v3844_v37 = vadd.f32 %v6101_v11, %v3804_v18 }
 0x2c0   : > { %vm1381_vm12 = vmand %vm1345_vm10, %vm1309_vm7  ;;  %v765_v47 = vadd.s32 %v764_v61, %v755_v42  ;;  %v775_v62 = vshrl.u32 %v6269_v28, 16  ;;  %v3244_v43 = vpop.f32.mrf.mxu2  ;;  %v777_v2 = vmul.u32 14564, %v774_v59  ;;  %v778_v15 = vmul.u32 58254, %v774_v59  ;;  %v6304_v31 = vpop.f32.mrf.mxu0 }
 0x2c1   : > { %v1453_v25 = vsel %vm1381_vm12, %v1417_v17, %v739_v34  ;;  %v6292_v26 = vadd.s32 160, %v5203_v14  ;;  %v3309_v39 = vadd.f32 %v3244_v43, %v3061_v12  ;;  %v6299_v29 = vadd.f32 %v3001_v4, %v5147_v30  ;;  %v6324_v18 = vpop.f32.mrf.mxu3 }
 0x2c2   : > { %vm1489_vm15 = vcmp.lt.s32.totalorder %v1453_v25, 16  ;;  %v766_v21 = vshrl.u32 %v765_v47, 4  ;;  %v6294_v40 = vmul.u32 14564, %v775_v62  ;;  %v781_v8 = vshll.u32 %v778_v15, 16 }
 0x2c3   : > { %v3952_v48 = vsel %vm1489_vm15, %v3844_v37, 0.0  ;;  %v803_v7 = vand.u32 65535, %v6284_v13  ;;  %v3557_v41 = vadd.f32 %v6211_v22, %v3309_v39  ;;  %v780_v1 = vmul.u32 58254, %v775_v62 }
 0x2c4   : > { %v3988_v53 = vmax.f32 %v3952_v48, 0.0  ;;  %v767_v27 = vmul.u32 18, %v766_v21  ;;  %v783_v16 = vshll.u32 %v6294_v40, 16  ;;  %vm785_vm0 = vc.u32 %v777_v2, %v781_v8  ;;  %v3004_v23 = vpop.f32.mrf.mxu1  ;;  %v6307_v54 = vld [vmem:[#allocation3 + $0x6c] ss:$2 sm:$0xff] }
 0x2c5   : > { %v787_v6 = vadd.s32 %v781_v8, %v777_v2  ;;  %v804_v35 = vshrl.u32 %v6284_v13, 16  ;;  %v3805_v22 = vadd.f32 %v6221_v58, %v3557_v41  ;;  %v782_v56 = vshrl.u32 %v778_v15, 16  ;;  %v6312_v46 = vld [vmem:[#allocation3 + $0x6d] ss:$2 sm:$0xff]  ;;  %4500 = vmatmul.msk.bf16.gmra.mxu2 %vm1509_vm2, %v3133_v38 }
 0x2c6   : > { %v4024_v30 = vpack.c.bf16 %v3988_v53, %v3988_v53  ;;  %4098 = vst.msk [vmem:[#allocation3 + $0x80] sm:$0xff] %vm4081_vm8, %v3988_v53  ;;  %v768_v49 = vsub.s32 %v6202_v3, %v767_v27  ;;  %v786_v44 = vsel %vm785_vm0, 1, %v6665_v5  ;;  %v806_v52 = vmul.u32 14564, %v803_v7  ;;  %v6730_v53 = vld [vmem:[#allocation4_spill] sm:$0xff] }
 0x2c7   : > { %vm789_vm1 = vc.u32 %v787_v6, %v783_v16  ;;  %v807_v51 = vmul.u32 58254, %v803_v7  ;;  %v3845_v0 = vadd.f32 %v6101_v11, %v3805_v22  ;;  %v784_v3 = vshrl.u32 %v6294_v40, 16 }
 0x2c8   : > { %4061 = vst.msk [vmem:[%s5527_s24 + $0x40] sm:$0xf] %vm4044_vm9, %v4024_v30  ;;  %vm1310_vm3 = vcmp.ne.s32.totalorder %v768_v49, 0  ;;  %vm1346_vm4 = vcmp.lt.s32.totalorder %v768_v49, 0  ;;  %v1418_v55 = vadd.s32 18, %v768_v49  ;;  %v788_v58 = vadd.s32 %v786_v44, %v780_v1  ;;  %v3247_v10 = vpop.f32.mrf.mxu2  ;;  %v6333_v2 = vpop.f32.mrf.mxu0 }
 0x2c9   : > { %vm1382_vm5 = vmand %vm1346_vm4, %vm1310_vm3  ;;  %v790_v36 = vsel %vm789_vm1, 1, %v6665_v5  ;;  %v808_v60 = vmul.u32 14564, %v804_v35  ;;  %v3310_v63 = vadd.f32 %v3247_v10, %v3062_v50  ;;  %v809_v9 = vmul.u32 58254, %v804_v35 }
 0x2ca   : > { %v1454_v45 = vsel %vm1382_vm5, %v1418_v55, %v768_v49  ;;  %v810_v42 = vshll.u32 %v807_v51, 16  ;;  %v4190_v24 = vmax.f32 %v6307_v54, %v6312_v46  ;;  %v792_v19 = vadd.s32 %v790_v36, %v788_v58 }
 0x2cb   : > { %vm1490_vm2 = vcmp.lt.s32.totalorder %v1454_v45, 16  ;;  %v812_v20 = vshll.u32 %v808_v60, 16  ;;  %v3558_v38 = vadd.f32 %v6250_v33, %v3310_v63  ;;  %v811_v59 = vshrl.u32 %v807_v51, 16 }
 0x2cc   : > { %v3953_v34 = vsel %vm1490_vm2, %v3845_v0, 0.0  ;;  %vm814_vm7 = vc.u32 %v806_v52, %v810_v42  ;;  %v816_v4 = vadd.s32 %v810_v42, %v806_v52  ;;  %v793_v61 = vadd.s32 %v792_v19, %v782_v56  ;;  %v6327_v37 = vpop.f32.mrf.mxu1 }
 0x2cd   : > { %v3989_v12 = vmax.f32 %v3953_v34, 0.0  ;;  %v815_v17 = vsel %vm814_vm7, 1, %v6665_v5  ;;  %v3806_v47 = vadd.f32 %v6263_v32, %v3558_v38  ;;  %v832_v62 = vand.u32 65535, %v6292_v26 }
 0x2ce   : > { %v817_v50 = vadd.s32 %v815_v17, %v809_v9  ;;  %vm818_vm10 = vc.u32 %v816_v4, %v812_v20  ;;  %v794_v33 = vadd.s32 %v793_v61, %v784_v3  ;;  %v833_v15 = vshrl.u32 %v6292_v26, 16 }
 0x2cf   : > { %v4025_v25 = vpack.c.bf16 %v3989_v12, %v3989_v12  ;;  %4099 = vst.msk [vmem:[#allocation3 + $0x88] sm:$0xff] %vm4081_vm8, %v3989_v12  ;;  %v819_v43 = vsel %vm818_vm10, 1, %v6665_v5  ;;  %v813_v21 = vshrl.u32 %v808_v60, 16  ;;  %v835_v40 = vmul.u32 14564, %v832_v62 }
 0x2d0   : > { %v821_v39 = vadd.s32 %v819_v43, %v817_v50  ;;  %v836_v48 = vmul.u32 58254, %v832_v62  ;;  %v795_v32 = vshrl.u32 %v794_v33, 4  ;;  %v3846_v8 = vadd.f32 %v6101_v11, %v3806_v47  ;;  %v3249_v7 = vpop.f32.mrf.mxu2  ;;  %v6359_v12 = vpop.f32.mrf.mxu0 }
 0x2d1   : > { %4062 = vst.msk [vmem:[%s5527_s24 + $0x44] sm:$0xf] %vm4044_vm9, %v4025_v25  ;;  %v3064_v27 = vadd.f32 %v3004_v23, %v6730_v53  ;;  %v837_v41 = vmul.u32 14564, %v833_v15  ;;  %v3311_v1 = vadd.f32 %v3249_v7, %v6299_v29  ;;  %v838_v6 = vmul.u32 58254, %v833_v15  ;;  %v6731_v53 = vld [vmem:[#allocation5_spill] sm:$0xff] }
 0x2d2   : > { %v822_v16 = vadd.s32 %v821_v39, %v811_v59  ;;  %v839_v35 = vshll.u32 %v836_v48, 16  ;;  %v796_v30 = vmul.u32 18, %v795_v32  ;;  %v840_v49 = vshrl.u32 %v836_v48, 16 }
 0x2d3   : > { %v841_v22 = vshll.u32 %v837_v41, 16  ;;  %v6342_v56 = vadd.s32 168, %v5203_v14  ;;  %vm4199_vm12 = vcmask 60419   ;;  %v3559_v52 = vadd.f32 %v6296_v57, %v3311_v1  ;;  %v6352_v57 = vpop.f32.mrf.mxu3 }
 0x2d4   : > { %v823_v44 = vadd.s32 %v822_v16, %v813_v21  ;;  %vm843_vm15 = vc.u32 %v835_v40, %v839_v35  ;;  %v845_v51 = vadd.s32 %v839_v35, %v835_v40  ;;  %v797_v23 = vsub.s32 %v6269_v28, %v796_v30  ;;  %v6349_v3 = vpop.f32.mrf.mxu1 }
 0x2d5   : > { %v844_v55 = vsel %vm843_vm15, 1, %v6665_v5  ;;  %v861_v29 = vand.u32 65535, %v6342_v56  ;;  %v862_v0 = vshrl.u32 %v6342_v56, 16  ;;  %vm4201_vm0 = vcmask 59392  }
 0x2d6   : > { %v4187_v58 = vld [vmem:[#allocation3 + $0x7e] ss:$2 sm:$0xff]  ;;  %v4189_v36 = vld [vmem:[#allocation3 + $0x7f] ss:$2 sm:$0xff]  ;;  %v824_v10 = vshrl.u32 %v823_v44, 4  ;;  %v3807_v60 = vadd.f32 %v6304_v31, %v3559_v52  ;;  %v846_v45 = vadd.s32 %v844_v55, %v838_v6  ;;  %vm847_vm1 = vc.u32 %v845_v51, %v841_v22 }
 0x2d7   : > { %v4191_v63 = vmax.f32 %v4187_v58, %v4189_v36  ;;  %vm1311_vm3 = vcmp.ne.s32.totalorder %v797_v23, 0  ;;  %vm1347_vm4 = vcmp.lt.s32.totalorder %v797_v23, 0  ;;  %v1419_v28 = vadd.s32 18, %v797_v23 }
 0x2d8   : > { %vm1383_vm5 = vmand %vm1347_vm4, %vm1311_vm3  ;;  %v825_v9 = vmul.u32 18, %v824_v10  ;;  %v3847_v42 = vadd.f32 %v6101_v11, %v3807_v60  ;;  %v842_v19 = vshrl.u32 %v837_v41, 16  ;;  %v848_v20 = vsel %vm847_vm1, 1, %v6665_v5  ;;  %v3252_v4 = vpop.f32.mrf.mxu2  ;;  %v6381_v55 = vpop.f32.mrf.mxu0 }
 0x2d9   : > { %v4192_v34 = vmax.f32 %v4190_v24, %v4191_v63  ;;  %v1455_v31 = vsel %vm1383_vm5, %v1419_v28, %v797_v23  ;;  %v850_v38 = vadd.s32 %v848_v20, %v846_v45  ;;  %v865_v61 = vmul.u32 58254, %v861_v29  ;;  %v6732_v28 = vld [vmem:[#allocation6_spill] sm:$0xff] }
 0x2da   : > { %vm1491_vm2 = vcmp.lt.s32.totalorder %v1455_v31, 16  ;;  %v826_v59 = vsub.s32 %v6284_v13, %v825_v9  ;;  %v3312_v17 = vadd.f32 %v3252_v4, %v3064_v27  ;;  %v6362_v47 = vmul.u32 14564, %v862_v0 }
 0x2db   : > { %v4193_v50 = vpack.c.bf16 %v4192_v34, %v4192_v34  ;;  %v3954_v62 = vsel %vm1491_vm2, %v3846_v8, 0.0  ;;  %v851_v25 = vadd.s32 %v850_v38, %v840_v49  ;;  %v864_v33 = vmul.u32 14564, %v861_v29  ;;  %v3505_v1 = vpop.f32.mrf.mxu3  ;;  %v6733_v34 = vld [vmem:[#allocation7_spill] sm:$0xff] }
 0x2dc   : > { %v3990_v43 = vmax.f32 %v3954_v62, 0.0  ;;  %vm1312_vm7 = vcmp.ne.s32.totalorder %v826_v59, 0  ;;  %vm1348_vm10 = vcmp.lt.s32.totalorder %v826_v59, 0  ;;  %v1420_v54 = vadd.s32 18, %v826_v59  ;;  %v3011_v32 = vpop.f32.mrf.mxu1 }
 0x2dd   : > { %v4195_v46 = vrot.slane %v4193_v50, 5  ;;  %vm1384_vm15 = vmand %vm1348_vm10, %vm1312_vm7  ;;  %v852_v24 = vadd.s32 %v851_v25, %v842_v19  ;;  %v3560_v15 = vadd.f32 %v6324_v18, %v3312_v17  ;;  %v868_v21 = vshll.u32 %v865_v61, 16 }
 0x2de   : > { %v4026_v13 = vpack.c.bf16 %v3990_v43, %v3990_v43  ;;  %4100 = vst.msk [vmem:[#allocation3 + $0x90] sm:$0xff] %vm4081_vm8, %v3990_v43  ;;  %v1456_v39 = vsel %vm1384_vm15, %v1420_v54, %v826_v59  ;;  %v867_v40 = vmul.u32 58254, %v862_v0  ;;  %v870_v48 = vshll.u32 %v6362_v47, 16 }
 0x2df   : > { %v4196_v8 = vrot.slane %v4195_v46, 4  ;;  %4200 = vst.msk [vmem:[%s5278_s18 + $0xc] sm:$0x8] %vm4199_vm12, %v4195_v46  ;;  %vm1492_vm1 = vcmp.lt.s32.totalorder %v1456_v39, 16  ;;  %v853_v7 = vshrl.u32 %v852_v24, 4  ;;  %v3065_v27 = vadd.f32 %v6327_v37, %v6731_v53 }
 0x2e0   : > { %4063 = vst.msk [vmem:[%s5527_s24 + $0x48] sm:$0xf] %vm4044_vm9, %v4026_v13  ;;  %v3955_v18 = vsel %vm1492_vm1, %v3847_v42, 0.0  ;;  %v3808_v41 = vadd.f32 %v6333_v2, %v3560_v15  ;;  %vm872_vm3 = vc.u32 %v864_v33, %v868_v21  ;;  %v874_v16 = vadd.s32 %v868_v21, %v864_v33  ;;  %v3254_v22 = vpop.f32.mrf.mxu2  ;;  %v6734_v13 = vld [vmem:[#allocation8_spill] sm:$0xff] }
 0x2e1   : > { %4202 = vst.msk [vmem:[%s5278_s18 + $0x10] sm:$0x7] %vm4201_vm0, %v4196_v8  ;;  %v3991_v6 = vmax.f32 %v3955_v18, 0.0  ;;  %v854_v35 = vmul.u32 18, %v853_v7  ;;  %v869_v30 = vshrl.u32 %v865_v61, 16  ;;  %v873_v49 = vsel %vm872_vm3, 1, %v6665_v5 }
 0x2e2   : > { %v871_v44 = vshrl.u32 %v6362_v47, 16  ;;  %v875_v37 = vadd.s32 %v873_v49, %v867_v40  ;;  %vm876_vm4 = vc.u32 %v874_v16, %v870_v48  ;;  %v3313_v52 = vadd.f32 %v3254_v22, %v3065_v27  ;;  %v3755_v27 = vpop.f32.mrf.mxu0 }
 0x2e3   : > { %v4027_v51 = vpack.c.bf16 %v3991_v6, %v3991_v6  ;;  %4101 = vst.msk [vmem:[#allocation3 + $0x98] sm:$0xff] %vm4081_vm8, %v3991_v6  ;;  %v855_v2 = vsub.s32 %v6292_v26, %v854_v35  ;;  %v877_v23 = vsel %vm876_vm4, 1, %v6665_v5  ;;  %v6384_v29 = vadd.s32 176, %v5203_v14  ;;  %v3507_v54 = vpop.f32.mrf.mxu3 }
 0x2e4   : > { %v3848_v0 = vadd.f32 %v6101_v11, %v3808_v41  ;;  %v879_v58 = vadd.s32 %v877_v23, %v875_v37  ;;  %v3561_v36 = vadd.f32 %v6352_v57, %v3313_v52  ;;  %v6389_v10 = vadd.s32 184, %v5203_v14  ;;  %v3014_v59 = vpop.f32.mrf.mxu1 }
 0x2e5   : > { %4064 = vst.msk [vmem:[%s5527_s24 + $0x4c] sm:$0xf] %vm4044_vm9, %v4027_v51  ;;  %vm1313_vm5 = vcmp.ne.s32.totalorder %v855_v2, 0  ;;  %vm1349_vm2 = vcmp.lt.s32.totalorder %v855_v2, 0  ;;  %v1421_v26 = vadd.s32 18, %v855_v2  ;;  %v890_v60 = vand.u32 65535, %v6384_v29 }
 0x2e6   : > { %vm1385_vm7 = vmand %vm1349_vm2, %vm1313_vm5  ;;  %v880_v45 = vadd.s32 %v879_v58, %v869_v30  ;;  %v3809_v63 = vadd.f32 %v6359_v12, %v3561_v36  ;;  %v3066_v9 = vadd.f32 %v6349_v3, %v6732_v28  ;;  %v891_v42 = vshrl.u32 %v6384_v29, 16 }
 0x2e7   : > { %v1457_v57 = vsel %vm1385_vm7, %v1421_v26, %v855_v2  ;;  %v893_v19 = vmul.u32 14564, %v890_v60  ;;  %v894_v20 = vmul.u32 58254, %v890_v60  ;;  %v3067_v31 = vadd.f32 %v3011_v32, %v6733_v34 }
 0x2e8   : > { %vm1493_vm10 = vcmp.lt.s32.totalorder %v1457_v57, 16  ;;  %v881_v38 = vadd.s32 %v880_v45, %v871_v44  ;;  %v895_v4 = vmul.u32 14564, %v891_v42  ;;  %v919_v61 = vand.u32 65535, %v6389_v10  ;;  %v3257_v12 = vpop.f32.mrf.mxu2 }
 0x2e9   : > { %v3956_v17 = vsel %vm1493_vm10, %v3848_v0, 0.0  ;;  %v896_v47 = vmul.u32 58254, %v891_v42  ;;  %v897_v50 = vshll.u32 %v894_v20, 16  ;;  %v920_v62 = vshrl.u32 %v6389_v10, 16 }
 0x2ea   : > { %v3992_v3 = vmax.f32 %v3956_v17, 0.0  ;;  %v882_v25 = vshrl.u32 %v881_v38, 4  ;;  %v3849_v33 = vadd.f32 %v6101_v11, %v3809_v63  ;;  %v3314_v43 = vadd.f32 %v3257_v12, %v3066_v9  ;;  %v6402_v46 = vld [vmem:[#allocation3 + $0x90] ss:$2 sm:$0xff]  ;;  %v6404_v24 = vld [vmem:[#allocation3 + $0x91] ss:$2 sm:$0xff] }
 0x2eb   : > { %v898_v15 = vshrl.u32 %v894_v20, 16  ;;  %v899_v21 = vshll.u32 %v895_v4, 16  ;;  %vm901_vm15 = vc.u32 %v893_v19, %v897_v50  ;;  %v6407_v39 = vadd.f32 %v3014_v59, %v6734_v13 }
 0x2ec   : > { %v4028_v40 = vpack.c.bf16 %v3992_v3, %v3992_v3  ;;  %4102 = vst.msk [vmem:[#allocation3 + $0xa0] sm:$0xff] %vm4081_vm8, %v3992_v3  ;;  %v883_v48 = vmul.u32 18, %v882_v25  ;;  %v902_v32 = vsel %vm901_vm15, 1, %v6665_v5  ;;  %v903_v8 = vadd.s32 %v897_v50, %v893_v19  ;;  %v3016_v26 = vpop.f32.mrf.mxu1 }
 0x2ed   : > { %v904_v7 = vadd.s32 %v902_v32, %v896_v47  ;;  %v3562_v53 = vadd.f32 %v3505_v1, %v3314_v43  ;;  %v922_v18 = vmul.u32 14564, %v919_v61  ;;  %v923_v41 = vmul.u32 58254, %v919_v61  ;;  %v3758_v47 = vpop.f32.mrf.mxu0 }
 0x2ee   : > { %v4211_v16 = vmax.f32 %v6402_v46, %v6404_v24  ;;  %4065 = vst.msk [vmem:[%s5527_s24 + $0x50] sm:$0xf] %vm4044_vm9, %v4028_v40  ;;  %v884_v6 = vsub.s32 %v6342_v56, %v883_v48  ;;  %vm905_vm1 = vc.u32 %v903_v8, %v899_v21  ;;  %v924_v35 = vmul.u32 14564, %v920_v62 }
 0x2ef   : > { %v900_v30 = vshrl.u32 %v895_v4, 16  ;;  %v906_v49 = vsel %vm905_vm1, 1, %v6665_v5  ;;  %v925_v22 = vmul.u32 58254, %v920_v62  ;;  %v926_v44 = vshll.u32 %v923_v41, 16 }
 0x2f0   : > { %vm1314_vm3 = vcmp.ne.s32.totalorder %v884_v6, 0  ;;  %vm1350_vm4 = vcmp.lt.s32.totalorder %v884_v6, 0  ;;  %v1422_v1 = vadd.s32 18, %v884_v6  ;;  %v908_v37 = vadd.s32 %v906_v49, %v904_v7  ;;  %v3259_v23 = vpop.f32.mrf.mxu2 }
 0x2f1   : > { %vm1386_vm5 = vmand %vm1350_vm4, %vm1314_vm3  ;;  %v3810_v52 = vadd.f32 %v6381_v55, %v3562_v53  ;;  %v927_v51 = vshrl.u32 %v923_v41, 16  ;;  %v928_v2 = vshll.u32 %v924_v35, 16  ;;  %vm930_vm2 = vc.u32 %v922_v18, %v926_v44  ;;  %v3510_v55 = vpop.f32.mrf.mxu3 }
 0x2f2   : > { %v1458_v0 = vsel %vm1386_vm5, %v1422_v1, %v884_v6  ;;  %v909_v56 = vadd.s32 %v908_v37, %v898_v15  ;;  %v931_v58 = vsel %vm930_vm2, 1, %v6665_v5  ;;  %v932_v36 = vadd.s32 %v926_v44, %v922_v18 }
 0x2f3   : > { %vm1494_vm7 = vcmp.lt.s32.totalorder %v1458_v0, 16  ;;  %v933_v60 = vadd.s32 %v931_v58, %v925_v22  ;;  %v3315_v45 = vadd.f32 %v3259_v23, %v3067_v31  ;;  %v6420_v63 = vadd.s32 192, %v5203_v14 }
 0x2f4   : > { %v3957_v28 = vsel %vm1494_vm7, %v3849_v33, 0.0  ;;  %v910_v9 = vadd.s32 %v909_v56, %v900_v30  ;;  %v929_v42 = vshrl.u32 %v924_v35, 16  ;;  %vm934_vm10 = vc.u32 %v932_v36, %v928_v2  ;;  %v6735_v33 = vld [vmem:[#allocation9_spill] sm:$0xff]  ;;  %v3019_v6 = vpop.f32.mrf.mxu1  ;;  %v6447_v36 = vld [vmem:[%s6649_s2] ss:$0 sm:$0xff] }
 0x2f5   : > { %v3993_v57 = vmax.f32 %v3957_v28, 0.0  ;;  %v935_v19 = vsel %vm934_vm10, 1, %v6665_v5  ;;  %v3563_v20 = vadd.f32 %v3507_v54, %v3315_v45  ;;  %v948_v34 = vand.u32 65535, %v6420_v63 }
 0x2f6   : > { %v911_v38 = vshrl.u32 %v910_v9, 4  ;;  %v937_v4 = vadd.s32 %v935_v19, %v933_v60  ;;  %v949_v61 = vshrl.u32 %v6420_v63, 16  ;;  %v6426_v31 = vadd.s32 200, %v5203_v14  ;;  %v3760_v60 = vpop.f32.mrf.mxu0 }
 0x2f7   : > { %v4029_v59 = vpack.c.bf16 %v3993_v57, %v3993_v57  ;;  %4103 = vst.msk [vmem:[#allocation3 + $0xa8] sm:$0xff] %vm4081_vm8, %v3993_v57  ;;  %v3850_v17 = vadd.f32 %v6101_v11, %v3810_v52  ;;  %v951_v50 = vmul.u32 14564, %v948_v34  ;;  %v952_v12 = vmul.u32 58254, %v948_v34 }
 0x2f8   : > { %v912_v62 = vmul.u32 18, %v911_v38  ;;  %v938_v3 = vadd.s32 %v937_v4, %v927_v51  ;;  %v953_v25 = vmul.u32 14564, %v949_v61  ;;  %v6431_v43 = vadd.f32 %v3016_v26, %v6735_v33  ;;  %v3262_v40 = vpop.f32.mrf.mxu2 }
 0x2f9   : > { %4066 = vst.msk [vmem:[%s5527_s24 + $0x54] sm:$0xf] %vm4044_vm9, %v4029_v59  ;;  %v3811_v54 = vadd.f32 %v3755_v27, %v3563_v20  ;;  %v954_v15 = vmul.u32 58254, %v949_v61  ;;  %v955_v21 = vshll.u32 %v952_v12, 16  ;;  %v956_v13 = vshrl.u32 %v952_v12, 16  ;;  %v3512_v37 = vpop.f32.mrf.mxu3 }
 0x2fa   : > { %v913_v48 = vsub.s32 %v6384_v29, %v912_v62  ;;  %v939_v32 = vadd.s32 %v938_v3, %v929_v42  ;;  %v957_v11 = vshll.u32 %v953_v25, 16  ;;  %v977_v8 = vand.u32 65535, %v6426_v31 }
 0x2fb   : > { %vm959_vm15 = vc.u32 %v951_v50, %v955_v21  ;;  %v961_v7 = vadd.s32 %v955_v21, %v951_v50  ;;  %v3316_v53 = vadd.f32 %v3262_v40, %v6407_v39  ;;  %v978_v18 = vshrl.u32 %v6426_v31, 16 }
 0x2fc   : > { %vm1315_vm1 = vcmp.ne.s32.totalorder %v913_v48, 0  ;;  %vm1351_vm3 = vcmp.lt.s32.totalorder %v913_v48, 0  ;;  %v1423_v41 = vadd.s32 18, %v913_v48  ;;  %v940_v27 = vshrl.u32 %v939_v32, 4  ;;  %v3021_v62 = vpop.f32.mrf.mxu1 }
 0x2fd   : > { %vm1387_vm4 = vmand %vm1351_vm3, %vm1315_vm1  ;;  %v960_v35 = vsel %vm959_vm15, 1, %v6665_v5  ;;  %vm963_vm5 = vc.u32 %v961_v7, %v957_v11  ;;  %v3564_v29 = vadd.f32 %v3510_v55, %v3316_v53  ;;  %v980_v30 = vmul.u32 14564, %v977_v8  ;;  %v6736_v11 = vld [vmem:[#allocation10_spill] sm:$0xff]  ;;  %v6737_v53 = vld [vmem:[#allocation11_spill] sm:$0xff] }
 0x2fe   : > { %v1459_v49 = vsel %vm1387_vm4, %v1423_v41, %v913_v48  ;;  %v941_v22 = vmul.u32 18, %v940_v27  ;;  %v962_v44 = vadd.s32 %v960_v35, %v954_v15  ;;  %v964_v1 = vsel %vm963_vm5, 1, %v6665_v5 }
 0x2ff   : > { %vm1495_vm2 = vcmp.lt.s32.totalorder %v1459_v49, 16  ;;  %v3812_v39 = vadd.f32 %v3758_v47, %v3564_v29  ;;  %v981_v52 = vmul.u32 58254, %v977_v8  ;;  %v6441_v51 = vmul.u32 14564, %v978_v18 }
 0x300   : > { %v3958_v2 = vsel %vm1495_vm2, %v3850_v17, 0.0  ;;  %v942_v23 = vsub.s32 %v6389_v10, %v941_v22  ;;  %v958_v0 = vshrl.u32 %v953_v25, 16  ;;  %v966_v56 = vadd.s32 %v964_v1, %v962_v44  ;;  %v3264_v9 = vpop.f32.mrf.mxu2 }
 0x301   : > { %v3994_v58 = vmax.f32 %v3958_v2, 0.0  ;;  %v3851_v26 = vadd.f32 %v6447_v36, %v3811_v54  ;;  %v983_v45 = vmul.u32 58254, %v978_v18  ;;  %v984_v28 = vshll.u32 %v981_v52, 16 }
 0x302   : > { %vm1316_vm7 = vcmp.ne.s32.totalorder %v942_v23, 0  ;;  %vm1352_vm10 = vcmp.lt.s32.totalorder %v942_v23, 0  ;;  %v1424_v42 = vadd.s32 18, %v942_v23  ;;  %v967_v55 = vadd.s32 %v966_v56, %v956_v13  ;;  %v3515_v13 = vpop.f32.mrf.mxu3 }
 0x303   : > { %v4030_v10 = vpack.c.bf16 %v3994_v58, %v3994_v58  ;;  %4104 = vst.msk [vmem:[#allocation3 + $0xb0] sm:$0xff] %vm4081_vm8, %v3994_v58  ;;  %vm1388_vm15 = vmand %vm1352_vm10, %vm1316_vm7  ;;  %v6452_v57 = vadd.f32 %v6447_v36, %v3812_v39  ;;  %v986_v19 = vshll.u32 %v6441_v51, 16  ;;  %vm988_vm1 = vc.u32 %v980_v30, %v984_v28 }
 0x304   : > { %v1460_v20 = vsel %vm1388_vm15, %v1424_v42, %v942_v23  ;;  %v968_v34 = vadd.s32 %v967_v55, %v958_v0  ;;  %v989_v38 = vsel %vm988_vm1, 1, %v6665_v5  ;;  %v990_v4 = vadd.s32 %v984_v28, %v980_v30 }
 0x305   : > { %4067 = vst.msk [vmem:[%s5527_s24 + $0x58] sm:$0xf] %vm4044_vm9, %v4030_v10  ;;  %vm1496_vm3 = vcmp.lt.s32.totalorder %v1460_v20, 16  ;;  %v985_v61 = vshrl.u32 %v981_v52, 16  ;;  %v991_v59 = vadd.s32 %v989_v38, %v983_v45  ;;  %v3317_v17 = vadd.f32 %v3264_v9, %v6431_v43 }
 0x306   : > { %v3959_v47 = vsel %vm1496_vm3, %v3851_v26, 0.0  ;;  %v969_v50 = vshrl.u32 %v968_v34, 4  ;;  %vm992_vm4 = vc.u32 %v990_v4, %v986_v19  ;;  %v6460_v12 = vadd.s32 208, %v5203_v14  ;;  %v3024_v19 = vpop.f32.mrf.mxu1 }
 0x307   : > { %v3995_v3 = vmax.f32 %v3959_v47, 0.0  ;;  %v987_v25 = vshrl.u32 %v6441_v51, 16  ;;  %v993_v33 = vsel %vm992_vm4, 1, %v6665_v5  ;;  %v3565_v54 = vadd.f32 %v3512_v37, %v3317_v17 }
 0x308   : > { %v970_v15 = vmul.u32 18, %v969_v50  ;;  %v995_v21 = vadd.s32 %v993_v33, %v991_v59  ;;  %v1006_v40 = vand.u32 65535, %v6460_v12  ;;  %v1007_v43 = vshrl.u32 %v6460_v12, 16  ;;  %v3267_v7 = vpop.f32.mrf.mxu2 }
 0x309   : > { %v4031_v48 = vpack.c.bf16 %v3995_v3, %v3995_v3  ;;  %4105 = vst.msk [vmem:[#allocation3 + $0xb8] sm:$0xff] %vm4081_vm8, %v3995_v3  ;;  %v3813_v32 = vadd.f32 %v3760_v60, %v3565_v54  ;;  %v3070_v8 = vadd.f32 %v3019_v6, %v6736_v11  ;;  %v6469_v18 = vadd.f32 %v3021_v62, %v6737_v53  ;;  %v3763_v6 = vpop.f32.mrf.mxu0  ;;  %v6738_v54 = vld [vmem:[#allocation12_spill] sm:$0xff] }
 0x30a   : > { %v4208_v41 = vld [vmem:[#allocation3 + $0xa2] ss:$2 sm:$0xff]  ;;  %v4210_v27 = vld [vmem:[#allocation3 + $0xa3] ss:$2 sm:$0xff]  ;;  %v971_v35 = vsub.s32 %v6420_v63, %v970_v15  ;;  %v996_v29 = vadd.s32 %v995_v21, %v985_v61  ;;  %v1010_v30 = vmul.u32 58254, %v1006_v40  ;;  %v6473_v49 = vadd.s32 216, %v5203_v14 }
 0x30b   : > { %v4212_v22 = vmax.f32 %v4208_v41, %v4210_v27  ;;  %4068 = vst.msk [vmem:[%s5527_s24 + $0x5c] sm:$0xf] %vm4044_vm9, %v4031_v48  ;;  %v6478_v44 = vadd.f32 %v6447_v36, %v3813_v32  ;;  %v1009_v1 = vmul.u32 14564, %v1006_v40  ;;  %v1011_v37 = vmul.u32 14564, %v1007_v43 }
 0x30c   : > { %vm1317_vm5 = vcmp.ne.s32.totalorder %v971_v35, 0  ;;  %vm1353_vm2 = vcmp.lt.s32.totalorder %v971_v35, 0  ;;  %v1425_v39 = vadd.s32 18, %v971_v35  ;;  %v997_v52 = vadd.s32 %v996_v29, %v987_v25 }
 0x30d   : > { %v4213_v63 = vmax.f32 %v4211_v16, %v4212_v22  ;;  %vm1389_vm7 = vmand %vm1353_vm2, %vm1317_vm5  ;;  %v1012_v51 = vmul.u32 58254, %v1007_v43  ;;  %v1013_v2 = vshll.u32 %v1010_v30, 16  ;;  %v1015_v23 = vshll.u32 %v1011_v37, 16 }
 0x30e   : > { %v1461_v0 = vsel %vm1389_vm7, %v1425_v39, %v971_v35  ;;  %v998_v56 = vshrl.u32 %v997_v52, 4  ;;  %v1014_v58 = vshrl.u32 %v1010_v30, 16  ;;  %v3318_v26 = vadd.f32 %v3267_v7, %v3070_v8 }
 0x30f   : > { %v4214_v60 = vpack.c.bf16 %v4213_v63, %v4213_v63  ;;  %vm1497_vm10 = vcmp.lt.s32.totalorder %v1461_v0, 16  ;;  %vm1017_vm15 = vc.u32 %v1009_v1, %v1013_v2  ;;  %v1019_v45 = vadd.s32 %v1013_v2, %v1009_v1 }
 0x310   : > { %v3960_v28 = vsel %vm1497_vm10, %v6452_v57, 0.0  ;;  %v999_v9 = vmul.u32 18, %v998_v56  ;;  %v1018_v42 = vsel %vm1017_vm15, 1, %v6665_v5  ;;  %v3566_v46 = vadd.f32 %v3515_v13, %v3318_v26  ;;  %v3269_v10 = vpop.f32.mrf.mxu2  ;;  %v3517_v57 = vpop.f32.mrf.mxu3 }
 0x311   : > { %4215 = vst.msk [vmem:[%s5278_s18 + $0x14] sm:$0xf] %vm4044_vm9, %v4214_v60  ;;  %v3996_v24 = vmax.f32 %v3960_v28, 0.0  ;;  %v1020_v16 = vadd.s32 %v1018_v42, %v1012_v51  ;;  %vm1021_vm1 = vc.u32 %v1019_v45, %v1015_v23  ;;  %v1035_v55 = vand.u32 65535, %v6473_v49  ;;  %v3765_v3 = vpop.f32.mrf.mxu0  ;;  %v3026_v51 = vpop.f32.mrf.mxu1 }
 0x312   : > { %v1000_v20 = vsub.s32 %v6426_v31, %v999_v9  ;;  %v1016_v34 = vshrl.u32 %v1011_v37, 16  ;;  %v1022_v38 = vsel %vm1021_vm1, 1, %v6665_v5  ;;  %v1036_v4 = vshrl.u32 %v6473_v49, 16 }
 0x313   : > { %v4032_v61 = vpack.c.bf16 %v3996_v24, %v3996_v24  ;;  %4106 = vst.msk [vmem:[#allocation3 + $0xc0] sm:$0xff] %vm4081_vm8, %v3996_v24  ;;  %v1024_v59 = vadd.s32 %v1022_v38, %v1020_v16  ;;  %v3814_v17 = vadd.f32 %v3763_v6, %v3566_v46  ;;  %v1039_v47 = vmul.u32 58254, %v1035_v55 }
 0x314   : > { %vm1318_vm3 = vcmp.ne.s32.totalorder %v1000_v20, 0  ;;  %vm1354_vm4 = vcmp.lt.s32.totalorder %v1000_v20, 0  ;;  %v1426_v50 = vadd.s32 18, %v1000_v20  ;;  %v1038_v62 = vmul.u32 14564, %v1035_v55 }
 0x315   : > { %4069 = vst.msk [vmem:[%s5527_s24 + $0x60] sm:$0xf] %vm4044_vm9, %v4032_v61  ;;  %vm1390_vm5 = vmand %vm1354_vm4, %vm1318_vm3  ;;  %v1025_v31 = vadd.s32 %v1024_v59, %v1014_v58  ;;  %v1040_v25 = vmul.u32 14564, %v1036_v4  ;;  %v1042_v33 = vshll.u32 %v1039_v47, 16  ;;  %v3072_v15 = vadd.f32 %v3024_v19, %v6738_v54 }
 0x316   : > { %v1462_v21 = vsel %vm1390_vm5, %v1426_v50, %v1000_v20  ;;  %v1041_v13 = vmul.u32 58254, %v1036_v4  ;;  %v3319_v40 = vadd.f32 %v3269_v10, %v6469_v18  ;;  %v6497_v43 = vadd.s32 224, %v5203_v14 }
 0x317   : > { %vm1498_vm2 = vcmp.lt.s32.totalorder %v1462_v21, 16  ;;  %v1026_v48 = vadd.s32 %v1025_v31, %v1016_v34  ;;  %v3854_v32 = vadd.f32 %v6447_v36, %v3814_v17  ;;  %v1044_v11 = vshll.u32 %v1040_v25, 16  ;;  %v6739_v34 = vld [vmem:[#allocation13_spill] sm:$0xff] }
 0x318   : > { %v3961_v8 = vsel %vm1498_vm2, %v6478_v44, 0.0  ;;  %vm1046_vm7 = vc.u32 %v1038_v62, %v1042_v33  ;;  %v1048_v7 = vadd.s32 %v1042_v33, %v1038_v62  ;;  %v3567_v53 = vadd.f32 %v3517_v57, %v3319_v40  ;;  %v3272_v18 = vpop.f32.mrf.mxu2  ;;  %v3520_v0 = vpop.f32.mrf.mxu3 }
 0x319   : > { %v3997_v41 = vmax.f32 %v3961_v8, 0.0  ;;  %v1027_v27 = vshrl.u32 %v1026_v48, 4  ;;  %v1047_v35 = vsel %vm1046_vm7, 1, %v6665_v5  ;;  %v1064_v29 = vand.u32 65535, %v6497_v43  ;;  %v3768_v55 = vpop.f32.mrf.mxu0 }
 0x31a   : > { %v6503_v30 = vld [vmem:[#allocation3 + $0xb4] ss:$2 sm:$0xff]  ;;  %v6505_v22 = vld [vmem:[#allocation3 + $0xb5] ss:$2 sm:$0xff]  ;;  %v1043_v6 = vshrl.u32 %v1039_v47, 16  ;;  %v1049_v1 = vadd.s32 %v1047_v35, %v1041_v13  ;;  %vm1050_vm10 = vc.u32 %v1048_v7, %v1044_v11  ;;  %v1065_v44 = vshrl.u32 %v6497_v43, 16  ;;  %v3029_v11 = vpop.f32.mrf.mxu1 }
 0x31b   : > { %v4033_v37 = vpack.c.bf16 %v3997_v41, %v3997_v41  ;;  %4107 = vst.msk [vmem:[#allocation3 + $0xc8] sm:$0xff] %vm4081_vm8, %v3997_v41  ;;  %v1028_v39 = vmul.u32 18, %v1027_v27  ;;  %v1045_v52 = vshrl.u32 %v1040_v25, 16  ;;  %v1051_v63 = vsel %vm1050_vm10, 1, %v6665_v5 }
 0x31c   : > { %v1053_v2 = vadd.s32 %v1051_v63, %v1049_v1  ;;  %v3815_v23 = vadd.f32 %v3765_v3, %v3567_v53  ;;  %v1067_v56 = vmul.u32 14564, %v1064_v29  ;;  %v1068_v58 = vmul.u32 58254, %v1064_v29 }
 0x31d   : > { %v4224_v26 = vmax.f32 %v6503_v30, %v6505_v22  ;;  %4070 = vst.msk [vmem:[%s5527_s24 + $0x64] sm:$0xf] %vm4044_vm9, %v4033_v37  ;;  %v1029_v60 = vsub.s32 %v6460_v12, %v1028_v39  ;;  %v1069_v45 = vmul.u32 14564, %v1065_v44  ;;  %v1070_v28 = vmul.u32 58254, %v1065_v44 }
 0x31e   : > { %v1054_v9 = vadd.s32 %v1053_v2, %v1043_v6  ;;  %v1071_v42 = vshll.u32 %v1068_v58, 16  ;;  %v1072_v46 = vshrl.u32 %v1068_v58, 16  ;;  %v3320_v24 = vadd.f32 %v3272_v18, %v3072_v15 }
 0x31f   : > { %vm1319_vm15 = vcmp.ne.s32.totalorder %v1029_v60, 0  ;;  %vm1355_vm1 = vcmp.lt.s32.totalorder %v1029_v60, 0  ;;  %v1427_v16 = vadd.s32 18, %v1029_v60  ;;  %v1073_v10 = vshll.u32 %v1069_v45, 16 }
 0x320   : > { %vm1391_vm3 = vmand %vm1355_vm1, %vm1319_vm15  ;;  %v1055_v19 = vadd.s32 %v1054_v9, %v1045_v52  ;;  %vm1075_vm4 = vc.u32 %v1067_v56, %v1071_v42  ;;  %v1077_v20 = vadd.s32 %v1071_v42, %v1067_v56  ;;  %v3073_v38 = vadd.f32 %v3026_v51, %v6739_v34  ;;  %v3274_v59 = vpop.f32.mrf.mxu2  ;;  %v3522_v53 = vpop.f32.mrf.mxu3 }
 0x321   : > { %v1463_v57 = vsel %vm1391_vm3, %v1427_v16, %v1029_v60  ;;  %v1074_v4 = vshrl.u32 %v1069_v45, 16  ;;  %v1076_v12 = vsel %vm1075_vm4, 1, %v6665_v5  ;;  %v6518_v61 = vadd.s32 232, %v5203_v14  ;;  %v3770_v44 = vpop.f32.mrf.mxu0 }
 0x322   : > { %vm1499_vm5 = vcmp.lt.s32.totalorder %v1463_v57, 16  ;;  %v1056_v17 = vshrl.u32 %v1055_v19, 4  ;;  %v1078_v47 = vadd.s32 %v1076_v12, %v1070_v28  ;;  %vm1079_vm2 = vc.u32 %v1077_v20, %v1073_v10  ;;  %v6740_v28 = vld [vmem:[#allocation14_spill] sm:$0xff] }
 0x323   : > { %v3962_v50 = vsel %vm1499_vm5, %v3854_v32, 0.0  ;;  %v1080_v62 = vsel %vm1079_vm2, 1, %v6665_v5  ;;  %v3568_v31 = vadd.f32 %v3520_v0, %v3320_v24  ;;  %v1093_v3 = vand.u32 65535, %v6518_v61 }
 0x324   : > { %v3998_v25 = vmax.f32 %v3962_v50, 0.0  ;;  %v1057_v33 = vmul.u32 18, %v1056_v17  ;;  %v1082_v54 = vadd.s32 %v1080_v62, %v1078_v47  ;;  %v1094_v15 = vshrl.u32 %v6518_v61, 16  ;;  %v3031_v17 = vpop.f32.mrf.mxu1 }
 0x325   : > { %v3855_v21 = vadd.f32 %v6447_v36, %v3815_v23  ;;  %v1096_v13 = vmul.u32 14564, %v1093_v3  ;;  %v1097_v40 = vmul.u32 58254, %v1093_v3  ;;  %v3321_v48 = vadd.f32 %v3274_v59, %v3073_v38 }
 0x326   : > { %v4034_v8 = vpack.c.bf16 %v3998_v25, %v3998_v25  ;;  %4108 = vst.msk [vmem:[#allocation3 + $0xd0] sm:$0xff] %vm4081_vm8, %v3998_v25  ;;  %v1058_v32 = vsub.s32 %v6473_v49, %v1057_v33  ;;  %v1083_v7 = vadd.s32 %v1082_v54, %v1072_v46  ;;  %v1098_v41 = vmul.u32 14564, %v1094_v15 }
 0x327   : > { %v3816_v27 = vadd.f32 %v3768_v55, %v3568_v31  ;;  %v1099_v35 = vmul.u32 58254, %v1094_v15  ;;  %v1100_v29 = vshll.u32 %v1097_v40, 16  ;;  %v3569_v18 = vadd.f32 %v3522_v53, %v3321_v48  ;;  %v6741_v15 = vld [vmem:[#allocation15_spill] sm:$0xff] }
 0x328   : > { %4071 = vst.msk [vmem:[%s5527_s24 + $0x68] sm:$0xf] %vm4044_vm9, %v4034_v8  ;;  %vm1320_vm7 = vcmp.ne.s32.totalorder %v1058_v32, 0  ;;  %vm1356_vm10 = vcmp.lt.s32.totalorder %v1058_v32, 0  ;;  %v1428_v6 = vadd.s32 18, %v1058_v32  ;;  %v1084_v1 = vadd.s32 %v1083_v7, %v1074_v4  ;;  %v3277_v56 = vpop.f32.mrf.mxu2  ;;  %v3525_v62 = vpop.f32.mrf.mxu3 }
 0x329   : > { %vm1392_vm15 = vmand %vm1356_vm10, %vm1320_vm7  ;;  %v1101_v37 = vshrl.u32 %v1097_v40, 16  ;;  %v1102_v39 = vshll.u32 %v1098_v41, 16  ;;  %vm1104_vm1 = vc.u32 %v1096_v13, %v1100_v29  ;;  %v1106_v52 = vadd.s32 %v1100_v29, %v1096_v13 }
 0x32a   : > { %v1464_v49 = vsel %vm1392_vm15, %v1428_v6, %v1058_v32  ;;  %v1085_v63 = vshrl.u32 %v1084_v1, 4  ;;  %v1105_v51 = vsel %vm1104_vm1, 1, %v6665_v5  ;;  %v3817_v2 = vadd.f32 %v3770_v44, %v3569_v18 }
 0x32b   : > { %vm1500_vm3 = vcmp.lt.s32.totalorder %v1464_v49, 16  ;;  %v1103_v23 = vshrl.u32 %v1098_v41, 16  ;;  %v1107_v0 = vadd.s32 %v1105_v51, %v1099_v35  ;;  %vm1108_vm4 = vc.u32 %v1106_v52, %v1102_v39 }
 0x32c   : > { %v3963_v58 = vsel %vm1500_vm3, %v3855_v21, 0.0  ;;  %v1086_v60 = vmul.u32 18, %v1085_v63  ;;  %v1109_v45 = vsel %vm1108_vm4, 1, %v6665_v5  ;;  %v3074_v9 = vadd.f32 %v3029_v11, %v6740_v28  ;;  %v3773_v11 = vpop.f32.mrf.mxu0 }
 0x32d   : > { %v4221_v42 = vld [vmem:[#allocation3 + $0xc6] ss:$2 sm:$0xff]  ;;  %v4223_v46 = vld [vmem:[#allocation3 + $0xc7] ss:$2 sm:$0xff]  ;;  %v3999_v24 = vmax.f32 %v3963_v58, 0.0  ;;  %v3856_v16 = vadd.f32 %v6447_v36, %v3816_v27  ;;  %v1111_v55 = vadd.s32 %v1109_v45, %v1107_v0  ;;  %v6533_v10 = vadd.s32 240, %v5203_v14 }
 0x32e   : > { %v4225_v19 = vmax.f32 %v4221_v42, %v4223_v46  ;;  %v1087_v20 = vsub.s32 %v6497_v43, %v1086_v60  ;;  %v6537_v34 = vadd.f32 %v6447_v36, %v3817_v2  ;;  %v3322_v38 = vadd.f32 %v3277_v56, %v3074_v9 }
 0x32f   : > { %v4035_v57 = vpack.c.bf16 %v3999_v24, %v3999_v24  ;;  %4109 = vst.msk [vmem:[#allocation3 + $0xd8] sm:$0xff] %vm4081_vm8, %v3999_v24  ;;  %v1112_v4 = vadd.s32 %v1111_v55, %v1101_v37  ;;  %v1122_v12 = vand.u32 65535, %v6533_v10  ;;  %v1123_v59 = vshrl.u32 %v6533_v10, 16 }
 0x330   : > { %v4226_v47 = vmax.f32 %v4224_v26, %v4225_v19  ;;  %vm1321_vm5 = vcmp.ne.s32.totalorder %v1087_v20, 0  ;;  %vm1357_vm2 = vcmp.lt.s32.totalorder %v1087_v20, 0  ;;  %v1429_v43 = vadd.s32 18, %v1087_v20  ;;  %v3279_v6 = vpop.f32.mrf.mxu2  ;;  %v3527_v60 = vpop.f32.mrf.mxu3 }
 0x331   : > { %4072 = vst.msk [vmem:[%s5527_s24 + $0x6c] sm:$0xf] %vm4044_vm9, %v4035_v57  ;;  %vm1393_vm7 = vmand %vm1357_vm2, %vm1321_vm5  ;;  %v1113_v50 = vadd.s32 %v1112_v4, %v1103_v23  ;;  %v1125_v31 = vmul.u32 14564, %v1122_v12  ;;  %v1126_v3 = vmul.u32 58254, %v1122_v12  ;;  %v1127_v25 = vmul.u32 14564, %v1123_v59  ;;  %v3034_v19 = vpop.f32.mrf.mxu1 }
 0x332   : > { %v4227_v33 = vpack.c.bf16 %v4226_v47, %v4226_v47  ;;  %v1465_v54 = vsel %vm1393_vm7, %v1429_v43, %v1087_v20  ;;  %v3075_v21 = vadd.f32 %v3031_v17, %v6741_v15  ;;  %v6549_v13 = vadd.s32 248, %v5203_v14 }
 0x333   : > { %vm1501_vm10 = vcmp.lt.s32.totalorder %v1465_v54, 16  ;;  %v1114_v30 = vshrl.u32 %v1113_v50, 4  ;;  %v1128_v22 = vmul.u32 58254, %v1123_v59  ;;  %v1129_v26 = vshll.u32 %v1126_v3, 16 }
 0x334   : > { %v4229_v40 = vrot.slane %v4227_v33, 7  ;;  %v3964_v48 = vsel %vm1501_vm10, %v3856_v16, 0.0  ;;  %v1131_v8 = vshll.u32 %v1127_v25, 16  ;;  %v3570_v32 = vadd.f32 %v3525_v62, %v3322_v38  ;;  %v3775_v38 = vpop.f32.mrf.mxu0  ;;  %v6742_v33 = vld [vmem:[#allocation16_spill] sm:$0xff] }
 0x335   : > { %v4000_v7 = vmax.f32 %v3964_v48, 0.0  ;;  %v1115_v53 = vmul.u32 18, %v1114_v30  ;;  %vm1133_vm15 = vc.u32 %v1125_v31, %v1129_v26  ;;  %v1135_v41 = vadd.s32 %v1129_v26, %v1125_v31 }
 0x336   : > { %v4230_v27 = vrot.slane %v4229_v40, 4  ;;  %4233 = vst.msk [vmem:[%s5278_s18 + $0x18] sm:$0xe] %vm4157_vm6, %v4229_v40  ;;  %v1130_v35 = vshrl.u32 %v1126_v3, 16  ;;  %v1134_v29 = vsel %vm1133_vm15, 1, %v6665_v5  ;;  %v1151_v18 = vand.u32 65535, %v6549_v13 }
 0x337   : > { %v4036_v1 = vpack.c.bf16 %v4000_v7, %v4000_v7  ;;  %4110 = vst.msk [vmem:[#allocation3 + $0xe0] sm:$0xff] %vm4081_vm8, %v4000_v7  ;;  %v1116_v44 = vsub.s32 %v6518_v61, %v1115_v53  ;;  %v1136_v37 = vadd.s32 %v1134_v29, %v1128_v22  ;;  %vm1137_vm1 = vc.u32 %v1135_v41, %v1131_v8 }
 0x338   : > { %4234 = vst.msk [vmem:[%s5278_s18 + $0x1c] sm:$0x1] %vm4159_vm11, %v4230_v27  ;;  %v1132_v39 = vshrl.u32 %v1127_v25, 16  ;;  %v1138_v52 = vsel %vm1137_vm1, 1, %v6665_v5  ;;  %v3818_v49 = vadd.f32 %v3773_v11, %v3570_v32  ;;  %v1152_v63 = vshrl.u32 %v6549_v13, 16  ;;  %v3282_v62 = vpop.f32.mrf.mxu2  ;;  %v3530_v27 = vpop.f32.mrf.mxu3 }
 0x339   : > { %4073 = vst.msk [vmem:[%s5527_s24 + $0x70] sm:$0xf] %vm4044_vm9, %v4036_v1  ;;  %vm1322_vm6 = vcmp.ne.s32.totalorder %v1116_v44, 0  ;;  %vm1358_vm3 = vcmp.lt.s32.totalorder %v1116_v44, 0  ;;  %v1430_v51 = vadd.s32 18, %v1116_v44  ;;  %v1140_v2 = vadd.s32 %v1138_v52, %v1136_v37 }
 0x33a   : > { %vm1394_vm4 = vmand %vm1358_vm3, %vm1322_vm6  ;;  %v1154_v23 = vmul.u32 14564, %v1151_v18  ;;  %v1155_v0 = vmul.u32 58254, %v1151_v18  ;;  %v1156_v61 = vmul.u32 14564, %v1152_v63  ;;  %v3323_v45 = vadd.f32 %v3279_v6, %v3075_v21 }
 0x33b   : > { %v1466_v56 = vsel %vm1394_vm4, %v1430_v51, %v1116_v44  ;;  %v1141_v58 = vadd.s32 %v1140_v2, %v1130_v35  ;;  %v6564_v28 = vadd.s32 256, %v5203_v14  ;;  %v1157_v9 = vmul.u32 58254, %v1152_v63  ;;  %v3036_v44 = vpop.f32.mrf.mxu1 }
 0x33c   : > { %vm1502_vm11 = vcmp.lt.s32.totalorder %v1466_v56, 16  ;;  %v1158_v42 = vshll.u32 %v1155_v0, 16  ;;  %v1160_v46 = vshll.u32 %v1156_v61, 16  ;;  %v3858_v55 = vadd.f32 %v6447_v36, %v3818_v49  ;;  %v3778_v49 = vpop.f32.mrf.mxu0 }
 0x33d   : > { %v3965_v24 = vsel %vm1502_vm11, %v6537_v34, 0.0  ;;  %v1142_v16 = vadd.s32 %v1141_v58, %v1132_v39  ;;  %v1180_v4 = vand.u32 65535, %v6564_v28  ;;  %v1159_v59 = vshrl.u32 %v1155_v0, 16 }
 0x33e   : > { %v4001_v20 = vmax.f32 %v3965_v24, 0.0  ;;  %vm1162_vm5 = vc.u32 %v1154_v23, %v1158_v42  ;;  %v1164_v57 = vadd.s32 %v1158_v42, %v1154_v23  ;;  %v3571_v47 = vadd.f32 %v3527_v60, %v3323_v45 }
 0x33f   : > { %v1143_v12 = vshrl.u32 %v1142_v16, 4  ;;  %v1163_v17 = vsel %vm1162_vm5, 1, %v6665_v5  ;;  %v1181_v50 = vshrl.u32 %v6564_v28, 16  ;;  %v1161_v3 = vshrl.u32 %v1156_v61, 16 }
 0x340   : > { %v4037_v43 = vpack.c.bf16 %v4001_v20, %v4001_v20  ;;  %4111 = vst.msk [vmem:[#allocation3 + $0xe8] sm:$0xff] %vm4081_vm8, %v4001_v20  ;;  %v1165_v34 = vadd.s32 %v1163_v17, %v1157_v9  ;;  %vm1166_vm2 = vc.u32 %v1164_v57, %v1160_v46  ;;  %v3076_v54 = vadd.f32 %v3034_v19, %v6742_v33  ;;  %v3284_v46 = vpop.f32.mrf.mxu2 }
 0x341   : > { %v1144_v31 = vmul.u32 18, %v1143_v12  ;;  %v1167_v25 = vsel %vm1166_vm2, 1, %v6665_v5  ;;  %v1183_v21 = vmul.u32 14564, %v1180_v4  ;;  %v1184_v30 = vmul.u32 58254, %v1180_v4 }
 0x342   : > { %4074 = vst.msk [vmem:[%s5527_s24 + $0x74] sm:$0xf] %vm4044_vm9, %v4037_v43  ;;  %v1169_v15 = vadd.s32 %v1167_v25, %v1165_v34  ;;  %v1185_v22 = vmul.u32 14564, %v1181_v50  ;;  %v3819_v40 = vadd.f32 %v3775_v38, %v3571_v47  ;;  %v3324_v48 = vadd.f32 %v3282_v62, %v3076_v54  ;;  %v6743_v38 = vld [vmem:[#allocation17_spill] sm:$0xff] }
 0x343   : > { %v1145_v26 = vsub.s32 %v6533_v10, %v1144_v31  ;;  %v6578_v11 = vadd.s32 264, %v5203_v14  ;;  %v1186_v32 = vmul.u32 58254, %v1181_v50  ;;  %v1187_v7 = vshll.u32 %v1184_v30, 16  ;;  %v3039_v33 = vpop.f32.mrf.mxu1 }
 0x344   : > { %v1170_v8 = vadd.s32 %v1169_v15, %v1159_v59  ;;  %v1189_v53 = vshll.u32 %v1185_v22, 16  ;;  %v1188_v35 = vshrl.u32 %v1184_v30, 16  ;;  %v3572_v6 = vadd.f32 %v3530_v27, %v3324_v48 }
 0x345   : > { %vm1323_vm7 = vcmp.ne.s32.totalorder %v1145_v26, 0  ;;  %vm1359_vm10 = vcmp.lt.s32.totalorder %v1145_v26, 0  ;;  %v1431_v41 = vadd.s32 18, %v1145_v26  ;;  %vm1191_vm1 = vc.u32 %v1183_v21, %v1187_v7 }
 0x346   : > { %vm1395_vm15 = vmand %vm1359_vm10, %vm1323_vm7  ;;  %v1171_v29 = vadd.s32 %v1170_v8, %v1161_v3  ;;  %v1193_v18 = vadd.s32 %v1187_v7, %v1183_v21  ;;  %v1192_v1 = vsel %vm1191_vm1, 1, %v6665_v5  ;;  %v1209_v37 = vand.u32 65535, %v6578_v11  ;;  %v3532_v21 = vpop.f32.mrf.mxu3  ;;  %v4238_v7 = vld [vmem:[#allocation3 + $0xd9] ss:$2 sm:$0xff] }
 0x347   : > { %v1467_v10 = vsel %vm1395_vm15, %v1431_v41, %v1145_v26  ;;  %v1210_v39 = vshrl.u32 %v6578_v11, 16  ;;  %v1194_v63 = vadd.s32 %v1192_v1, %v1186_v32  ;;  %v1190_v2 = vshrl.u32 %v1185_v22, 16  ;;  %v4236_v32 = vld [vmem:[#allocation3 + $0xd8] ss:$2 sm:$0xff]  ;;  %v6744_v41 = vld [vmem:[#allocation18_spill] sm:$0xff] }
 0x348   : > { %vm1503_vm6 = vcmp.lt.s32.totalorder %v1467_v10, 16  ;;  %v1172_v52 = vshrl.u32 %v1171_v29, 4  ;;  %vm1195_vm3 = vc.u32 %v1193_v18, %v1189_v53  ;;  %v3820_v0 = vadd.f32 %v3778_v49, %v3572_v6 }
 0x349   : > { %v3966_v51 = vsel %vm1503_vm6, %v3858_v55, 0.0  ;;  %v1196_v23 = vsel %vm1195_vm3, 1, %v6665_v5  ;;  %v1213_v60 = vmul.u32 58254, %v1209_v37  ;;  %v3859_v45 = vadd.f32 %v6447_v36, %v3819_v40 }
 0x34a   : > { %v4002_v61 = vmax.f32 %v3966_v51, 0.0  ;;  %v1173_v56 = vmul.u32 18, %v1172_v52  ;;  %v1198_v58 = vadd.s32 %v1196_v23, %v1194_v63  ;;  %v1212_v9 = vmul.u32 14564, %v1209_v37 }
 0x34b   : > { %v1214_v42 = vmul.u32 14564, %v1210_v39  ;;  %v1216_v19 = vshll.u32 %v1213_v60, 16  ;;  %v6588_v20 = vadd.f32 %v6447_v36, %v3820_v0  ;;  %v3077_v57 = vadd.f32 %v3036_v44, %v6743_v38  ;;  %v3287_v44 = vpop.f32.mrf.mxu2 }
 0x34c   : > { %v4038_v24 = vpack.c.bf16 %v4002_v61, %v4002_v61  ;;  %4112 = vst.msk [vmem:[#allocation3 + $0xf0] sm:$0xff] %vm4081_vm8, %v4002_v61  ;;  %v1174_v16 = vsub.s32 %v6549_v13, %v1173_v56  ;;  %v1199_v55 = vadd.s32 %v1198_v58, %v1188_v35  ;;  %v1215_v4 = vmul.u32 58254, %v1210_v39  ;;  %v3780_v39 = vpop.f32.mrf.mxu0 }
 0x34d   : > { %v1218_v12 = vshll.u32 %v1214_v42, 16  ;;  %v1217_v47 = vshrl.u32 %v1213_v60, 16  ;;  %vm1220_vm2 = vc.u32 %v1212_v9, %v1216_v19  ;;  %v1222_v43 = vadd.s32 %v1216_v19, %v1212_v9 }
 0x34e   : > { %4075 = vst.msk [vmem:[%s5527_s24 + $0x78] sm:$0xf] %vm4044_vm9, %v4038_v24  ;;  %vm1324_vm4 = vcmp.ne.s32.totalorder %v1174_v16, 0  ;;  %vm1360_vm11 = vcmp.lt.s32.totalorder %v1174_v16, 0  ;;  %v1432_v59 = vadd.s32 18, %v1174_v16  ;;  %v1200_v17 = vadd.s32 %v1199_v55, %v1190_v2 }
 0x34f   : > { %vm1396_vm5 = vmand %vm1360_vm11, %vm1324_vm4  ;;  %v3325_v13 = vadd.f32 %v3284_v46, %v3077_v57  ;;  %v1221_v62 = vsel %vm1220_vm2, 1, %v6665_v5  ;;  %v6595_v31 = vadd.s32 272, %v5203_v14  ;;  %v1219_v3 = vshrl.u32 %v1214_v42, 16  ;;  %v3535_v57 = vpop.f32.mrf.mxu3 }
 0x350   : > { %v1468_v34 = vsel %vm1396_vm5, %v1432_v59, %v1174_v16  ;;  %v1201_v50 = vshrl.u32 %v1200_v17, 4  ;;  %v1223_v25 = vadd.s32 %v1221_v62, %v1215_v4  ;;  %vm1224_vm10 = vc.u32 %v1222_v43, %v1218_v12 }
 0x351   : > { %vm1504_vm7 = vcmp.lt.s32.totalorder %v1468_v34, 16  ;;  %v1225_v30 = vsel %vm1224_vm10, 1, %v6665_v5  ;;  %v1238_v22 = vand.u32 65535, %v6595_v31  ;;  %v3573_v48 = vadd.f32 %v3532_v21, %v3325_v13  ;;  %v3041_v13 = vpop.f32.mrf.mxu1 }
 0x352   : > { %v3967_v54 = vsel %vm1504_vm7, %v3859_v45, 0.0  ;;  %v1202_v15 = vmul.u32 18, %v1201_v50  ;;  %v1227_v40 = vadd.s32 %v1225_v30, %v1223_v25  ;;  %v1239_v8 = vshrl.u32 %v6595_v31, 16 }
 0x353   : > { %v4003_v26 = vmax.f32 %v3967_v54, 0.0  ;;  %v3078_v27 = vadd.f32 %v3039_v33, %v6744_v41  ;;  %v1241_v35 = vmul.u32 14564, %v1238_v22  ;;  %v1242_v29 = vmul.u32 58254, %v1238_v22 }
 0x354   : > { %v1203_v53 = vsub.s32 %v6564_v28, %v1202_v15  ;;  %v1228_v6 = vadd.s32 %v1227_v40, %v1217_v47  ;;  %v1243_v10 = vmul.u32 14564, %v1239_v8  ;;  %v1244_v1 = vmul.u32 58254, %v1239_v8  ;;  %v3783_v33 = vpop.f32.mrf.mxu0  ;;  %v6745_v40 = vld [vmem:[#allocation19_spill] sm:$0xff] }
 0x355   : > { %v4039_v18 = vpack.c.bf16 %v4003_v26, %v4003_v26  ;;  %4113 = vst.msk [vmem:[#allocation3 + $0xf8] sm:$0xff] %vm4081_vm8, %v4003_v26  ;;  %v1245_v52 = vshll.u32 %v1242_v29, 16  ;;  %v4243_v49 = vmax.f32 %v4236_v32, %v4238_v7  ;;  %v3821_v63 = vadd.f32 %v3780_v39, %v3573_v48  ;;  %v3289_v7 = vpop.f32.mrf.mxu2 }
 0x356   : > { %vm1325_vm15 = vcmp.ne.s32.totalorder %v1203_v53, 0  ;;  %vm1361_vm1 = vcmp.lt.s32.totalorder %v1203_v53, 0  ;;  %v1433_v37 = vadd.s32 18, %v1203_v53  ;;  %v1229_v28 = vadd.s32 %v1228_v6, %v1219_v3 }
 0x357   : > { %4076 = vst.msk [vmem:[%s5527_s24 + $0x7c] sm:$0xf] %vm4044_vm9, %v4039_v18  ;;  %vm1397_vm6 = vmand %vm1361_vm1, %vm1325_vm15  ;;  %v1247_v51 = vshll.u32 %v1243_v10, 16  ;;  %vm1249_vm3 = vc.u32 %v1241_v35, %v1245_v52  ;;  %v1251_v23 = vadd.s32 %v1245_v52, %v1241_v35  ;;  %v3326_v0 = vadd.f32 %v3287_v44, %v3078_v27 }
 0x358   : > { %v1469_v2 = vsel %vm1397_vm6, %v1433_v37, %v1203_v53  ;;  %v1230_v61 = vshrl.u32 %v1229_v28, 4  ;;  %v1250_v56 = vsel %vm1249_vm3, 1, %v6665_v5  ;;  %v6607_v58 = vadd.s32 280, %v5203_v14 }
 0x359   : > { %vm1505_vm4 = vcmp.lt.s32.totalorder %v1469_v2, 16  ;;  %v1246_v45 = vshrl.u32 %v1242_v29, 16  ;;  %v1252_v9 = vadd.s32 %v1250_v56, %v1244_v1  ;;  %vm1253_vm11 = vc.u32 %v1251_v23, %v1247_v51 }
 0x35a   : > { %v3968_v60 = vsel %vm1505_vm4, %v6588_v20, 0.0  ;;  %v1231_v46 = vmul.u32 18, %v1230_v61  ;;  %v1254_v24 = vsel %vm1253_vm11, 1, %v6665_v5  ;;  %v1267_v16 = vand.u32 65535, %v6607_v58 }
 0x35b   : > { %v4004_v42 = vmax.f32 %v3968_v60, 0.0  ;;  %v3861_v38 = vadd.f32 %v6447_v36, %v3821_v63  ;;  %v1248_v4 = vshrl.u32 %v1243_v10, 16  ;;  %v1256_v14 = vadd.s32 %v1254_v24, %v1252_v9  ;;  %v4649_v24 = vld [vmem:[%s6649_s2] ss:$0 sm:$0xff] }
 0x35c   : > { %v4240_v55 = vld [vmem:[#allocation3 + $0xea] ss:$2 sm:$0xff]  ;;  %v4242_v19 = vld [vmem:[#allocation3 + $0xeb] ss:$2 sm:$0xff]  ;;  %v1268_v12 = vshrl.u32 %v6607_v58, 16  ;;  %v1232_v17 = vsub.s32 %v6578_v11, %v1231_v46  ;;  %v3574_v47 = vadd.f32 %v3535_v57, %v3326_v0  ;;  %v1270_v34 = vmul.u32 14564, %v1267_v16  ;;  %v3785_v60 = vpop.f32.mrf.mxu0 }
 0x35d   : > { %v4244_v20 = vmax.f32 %v4240_v55, %v4242_v19  ;;  %v4040_v59 = vpack.c.bf16 %v4004_v42, %v4004_v42  ;;  %4114 = vst.msk [vmem:[#allocation3 + $0x100] sm:$0xff] %vm4081_vm8, %v4004_v42  ;;  %v1257_v43 = vadd.s32 %v1256_v14, %v1246_v45  ;;  %v1271_v50 = vmul.u32 58254, %v1267_v16 }
 0x35e   : > { %v1272_v62 = vmul.u32 14564, %v1268_v12  ;;  %vm1326_vm5 = vcmp.ne.s32.totalorder %v1232_v17, 0  ;;  %vm1362_vm2 = vcmp.lt.s32.totalorder %v1232_v17, 0  ;;  %v1434_v25 = vadd.s32 18, %v1232_v17 }
 0x35f   : > { %v4245_v3 = vmax.f32 %v4243_v49, %v4244_v20  ;;  %4077 = vst.msk [vmem:[%s5527_s24 + $0x80] sm:$0xf] %vm4044_vm9, %v4040_v59  ;;  %vm1398_vm7 = vmand %vm1362_vm2, %vm1326_vm5  ;;  %v1258_v54 = vadd.s32 %v1257_v43, %v1248_v4  ;;  %v1273_v15 = vmul.u32 58254, %v1268_v12  ;;  %v1274_v21 = vshll.u32 %v1271_v50, 16 }
 0x360   : > { %v1276_v30 = vshll.u32 %v1272_v62, 16  ;;  %v1470_v11 = vsel %vm1398_vm7, %v1434_v25, %v1232_v17  ;;  %v3822_v26 = vadd.f32 %v3783_v33, %v3574_v47  ;;  %v3079_v48 = vadd.f32 %v3041_v13, %v6745_v40 }
 0x361   : > { %v4246_v22 = vpack.c.bf16 %v4245_v3, %v4245_v3  ;;  %vm1506_vm10 = vcmp.lt.s32.totalorder %v1470_v11, 16  ;;  %v1259_v8 = vshrl.u32 %v1258_v54, 4  ;;  %vm1278_vm15 = vc.u32 %v1270_v34, %v1274_v21 }
 0x362   : > { %v1280_v32 = vadd.s32 %v1274_v21, %v1270_v34  ;;  %v3969_v41 = vsel %vm1506_vm10, %v3861_v38, 0.0  ;;  %v1275_v27 = vshrl.u32 %v1271_v50, 16  ;;  %v1279_v35 = vsel %vm1278_vm15, 1, %v6665_v5 }
 0x363   : > { %v4248_v53 = vrot.slane %v4246_v22, 6  ;;  %v4005_v29 = vmax.f32 %v3969_v41, 0.0  ;;  %v1260_v18 = vmul.u32 18, %v1259_v8  ;;  %v1281_v6 = vadd.s32 %v1279_v35, %v1273_v15 }
 0x364   : > { %vm1282_vm1 = vc.u32 %v1280_v32, %v1276_v30  ;;  %v3327_v44 = vadd.f32 %v3289_v7, %v3079_v48  ;;  %v1277_v52 = vshrl.u32 %v1272_v62, 16  ;;  %v3862_v28 = vadd.f32 %v6447_v36, %v3822_v26 }
 0x365   : > { %v4249_v10 = vrot.slane %v4248_v53, 4  ;;  %4252 = vst.msk [vmem:[%s5278_s18 + $0x1c] sm:$0xc] %vm4178_vm13, %v4248_v53  ;;  %v1283_v1 = vsel %vm1282_vm1, 1, %v6665_v5  ;;  %v4041_v37 = vpack.c.bf16 %v4005_v29, %v4005_v29  ;;  %v1261_v39 = vsub.s32 %v6595_v31, %v1260_v18  ;;  %v3537_v5 = vpop.f32.mrf.mxu3 }
 0x366   : > { %4115 = vst.msk [vmem:[#allocation3 + $0x108] sm:$0xff] %vm4081_vm8, %v4005_v29  ;;  %v1285_v49 = vadd.s32 %v1283_v1, %v1281_v6  ;;  %v3575_v0 = vadd.f32 %v3537_v5, %v3327_v44 }
 0x367   : > { %4253 = vst.msk [vmem:[%s5278_s18 + $0x20] sm:$0x3] %vm4180_vm14, %v4249_v10  ;;  %vm1327_vm6 = vcmp.ne.s32.totalorder %v1261_v39, 0  ;;  %vm1363_vm3 = vcmp.lt.s32.totalorder %v1261_v39, 0  ;;  %v1435_v63 = vadd.s32 18, %v1261_v39 }
 0x368   : > { %4078 = vst.msk [vmem:[%s5527_s24 + $0x84] sm:$0xf] %vm4044_vm9, %v4041_v37  ;;  %v1286_v51 = vadd.s32 %v1285_v49, %v1275_v27  ;;  %vm1399_vm13 = vmand %vm1363_vm3, %vm1327_vm6  ;;  %v3823_v9 = vadd.f32 %v3785_v60, %v3575_v0 }
 0x369   : > { %v1471_v2 = vsel %vm1399_vm13, %v1435_v63, %v1261_v39 }
 0x36a   : > { %v1287_v23 = vadd.s32 %v1286_v51, %v1277_v52  ;;  %vm1507_vm4 = vcmp.lt.s32.totalorder %v1471_v2, 16  ;;  %v3863_v16 = vadd.f32 %v4649_v24, %v3823_v9 }
 0x36b   : > { %v3970_v31 = vsel %vm1507_vm4, %v3862_v28, 0.0 }
 0x36c   : > { %v1288_v61 = vshrl.u32 %v1287_v23, 4  ;;  %v4006_v56 = vmax.f32 %v3970_v31, 0.0 }
 0x36d   : > { %v4257_v4 = vld [vmem:[#allocation3 + $0xfd] ss:$2 sm:$0xff] }
 0x36e   : > { %v1289_v45 = vmul.u32 18, %v1288_v61  ;;  %v4042_v36 = vpack.c.bf16 %v4006_v56, %v4006_v56  ;;  %4116 = vst.msk [vmem:[#allocation3 + $0x110] sm:$0xff] %vm4081_vm8, %v4006_v56 }
 0x370   : > { %v1290_v42 = vsub.s32 %v6607_v58, %v1289_v45  ;;  %4079 = vst.msk [vmem:[%s5527_s24 + $0x88] sm:$0xf] %vm4044_vm9, %v4042_v36  ;;  %v4255_v58 = vld [vmem:[#allocation3 + $0xfc] ss:$2 sm:$0xff] }
 0x371   : > { %v4262_v20 = vmax.f32 %v4255_v58, %v4257_v4 }
 0x372   : > { %vm1328_vm14 = vcmp.ne.s32.totalorder %v1290_v42, 0  ;;  %vm1364_vm11 = vcmp.lt.s32.totalorder %v1290_v42, 0  ;;  %v1436_v46 = vadd.s32 18, %v1290_v42 }
 0x373   : > { %vm1400_vm5 = vmand %vm1364_vm11, %vm1328_vm14 }
 0x374   : > { %v1472_v55 = vsel %vm1400_vm5, %v1436_v46, %v1290_v42 }
 0x375   : > { %vm1508_vm2 = vcmp.lt.s32.totalorder %v1472_v55, 16 }
 0x376   : > { %v3971_v19 = vsel %vm1508_vm2, %v3863_v16, 0.0 }
 0x377   : > { %v4007_v38 = vmax.f32 %v3971_v19, 0.0 }
 0x379   : > { %v4043_v57 = vpack.c.bf16 %v4007_v38, %v4007_v38  ;;  %4117 = vst.msk [vmem:[#allocation3 + $0x118] sm:$0xff] %vm4081_vm8, %v4007_v38 }
 0x37b   : > { %4080 = vst.msk [vmem:[%s5527_s24 + $0x8c] sm:$0xf] %vm4044_vm9, %v4043_v57 }
 0x380   : > { %v4259_v14 = vld [vmem:[#allocation3 + $0x10e] ss:$2 sm:$0xff]  ;;  %v4261_v12 = vld [vmem:[#allocation3 + $0x10f] ss:$2 sm:$0xff] }
 0x381   : > { %v4263_v59 = vmax.f32 %v4259_v14, %v4261_v12 }
 0x383   : > { %v4264_v17 = vmax.f32 %v4262_v20, %v4263_v59 }
 0x385   : > { %v4265_v47 = vpack.c.bf16 %v4264_v17, %v4264_v17 }
 0x387   : > { %v4267_v43 = vrot.slane %v4265_v47, 5 }
 0x389   : > { %v4268_v13 = vrot.slane %v4267_v43, 4  ;;  %4271 = vst.msk [vmem:[%s5278_s18 + $0x20] sm:$0x8] %vm4199_vm12, %v4267_v43 }
 0x38b   : > { %4272 = vst.msk [vmem:[%s5278_s18 + $0x24] sm:$0x7] %vm4201_vm0, %v4268_v13 }
 0x38c PF: > { %s15_s15 = sadd.s32 1, %s4656_s15  }
 0x38d   : > { %p12_p4 = scmp.ge.s32.totalorder %s15_s15, 4  }
 0x38f   :  { %14 = sbr.rel (!%p12_p4) target bundleno = 1 (0x1), region = 113 }

// kernel: encoder_forward.13
= control target key start
LH: loop header
LB: loop body
LE: loop exit
PB: predicated region body
PF: predicated region fallthrough
CT: control target
= control target key end

     0   :  { %s428_s12 = smov 0   ;;  %s487_s0 = inlined_call_operand.vmem [shape: bf16[2,24,32], index: 0, kind: input, shape index: {}]   ;;  %s488_s1 = inlined_call_operand.vmem [shape: f32[1,32], index: 1, kind: input, shape index: {}]   ;;  %s489_s2 = inlined_call_operand.vmem [shape: f32[1,32], index: 2, kind: input, shape index: {}]   ;;  %s490_s3 = inlined_call_operand.vmem [shape: bf16[2,24,32], index: 3, kind: output, shape index: {}]  }
   0x1 LB: > { %s374_s13 = sadd.s32 4294967295, %s405_s12   ;;  %p378_p0 = scmp.ge.s32.totalorder %s405_s12, 1  ;;  %s405_s12 = sphi %s428_s12, %s13_s12  }
   0x2   : > { %p137_p1 = scmp.lt.s32.totalorder %s405_s12, 3 }
   0x4   : > { %p138_p2 = pnand %p378_p0, %p137_p1 }
   0x5   : > { %p161_p3 = scmp.lt.s32.totalorder (!%p138_p2), %s374_s13, 1 }
   0x6   : > { %141 = sbr.rel (%p138_p2) target bundleno = 52 (0x34), region = 32 }
   0xb   : > { %v171_v0 = vlaneseq  ;;  %s492_s13 = smov (!%p161_p3, %s374_s13), 1  ;;  %v407_v20 = vmov 0   ;;  %v462_v23 = vld [vmem:[%s488_s1] ss:$0 sm:$0xff]  ;;  %vm315_vm9 = vcmask 257024  }
   0xc   : > { %s387_s14 = smul.u32 12, %s492_s13  ;;  %v398_v40 = vld [vmem:[%s489_s2] ss:$0 sm:$0xff] }
   0xd   : > { %v438_v1 = vshrl.u32 %v171_v0, 7 }
   0xe   : > { %s451_s17 = scalar_lea.vmem %s487_s0, %s387_s14  ;;  %s170_s24 = scalar_lea.vmem %s490_s3, %s387_s14 }
   0xf   : > { %v178_v2 = vand.u32 65535, %v438_v1  ;;  %v179_v3 = vshrl.u32 %v438_v1, 16  ;;  %v444_v4 = vadd.s32 8, %v438_v1  ;;  %v384_v13 = vld [vmem:[%s451_s17] sm:$0xff]   ;;  %v457_v15 = vadd.s32 16, %v438_v1 }
  0x10   : > { %v385_v22 = vunpack.c.l.bf16 %v384_v13  ;;  %v386_v33 = vunpack.c.h.bf16 %v384_v13  ;;  %v282_v53 = vld [vmem:[%s451_s17 + $0x8] sm:$0xf] }
  0x11   : > { %v181_v5 = vmul.u32 43691, %v178_v2  ;;  %v182_v6 = vmul.u32 43690, %v178_v2  ;;  %v183_v7 = vmul.u32 43691, %v179_v3  ;;  %v207_v8 = vand.u32 65535, %v444_v4 }
  0x12   : > { %v208_v9 = vshrl.u32 %v444_v4, 16  ;;  %v184_v10 = vmul.u32 43690, %v179_v3  ;;  %v236_v29 = vand.u32 65535, %v457_v15  ;;  %v290_v34 = vmul.f32 %v462_v23, %v385_v22 }
  0x13   : > { %v185_v11 = vshll.u32 %v182_v6, 16  ;;  %v187_v12 = vshll.u32 %v183_v7, 16  ;;  %v210_v14 = vmul.u32 43691, %v207_v8  ;;  %v211_v17 = vmul.u32 43690, %v207_v8 }
  0x14   : > { %v212_v18 = vmul.u32 43691, %v208_v9  ;;  %v186_v19 = vshrl.u32 %v182_v6, 16  ;;  %v213_v25 = vmul.u32 43690, %v208_v9  ;;  %v188_v30 = vshrl.u32 %v183_v7, 16 }
  0x15   : > { %vm189_vm0 = vc.u32 %v181_v5, %v185_v11  ;;  %v191_v16 = vadd.s32 %v185_v11, %v181_v5  ;;  %v214_v26 = vshll.u32 %v211_v17, 16  ;;  %v237_v36 = vshrl.u32 %v457_v15, 16 }
  0x16   : > { %v190_v21 = vsel %vm189_vm0, 1, %v407_v20  ;;  %v216_v28 = vshll.u32 %v212_v18, 16  ;;  %v215_v38 = vshrl.u32 %v211_v17, 16  ;;  %v239_v42 = vmul.u32 43691, %v236_v29 }
  0x17   : > { %v192_v24 = vadd.s32 %v190_v21, %v184_v10  ;;  %vm193_vm1 = vc.u32 %v191_v16, %v187_v12  ;;  %vm218_vm2 = vc.u32 %v210_v14, %v214_v26  ;;  %v220_v32 = vadd.s32 %v214_v26, %v210_v14 }
  0x18   : > { %v194_v27 = vsel %vm193_vm1, 1, %v407_v20  ;;  %v219_v35 = vsel %vm218_vm2, 1, %v407_v20  ;;  %v240_v43 = vmul.u32 43690, %v236_v29  ;;  %v241_v44 = vmul.u32 43691, %v237_v36 }
  0x19   : > { %v196_v31 = vadd.s32 %v194_v27, %v192_v24  ;;  %v221_v39 = vadd.s32 %v219_v35, %v213_v25  ;;  %vm222_vm3 = vc.u32 %v220_v32, %v216_v28  ;;  %v217_v46 = vshrl.u32 %v212_v18, 16 }
  0x1a   : > { %v223_v41 = vsel %vm222_vm3, 1, %v407_v20  ;;  %v242_v48 = vmul.u32 43690, %v237_v36  ;;  %v243_v49 = vshll.u32 %v240_v43, 16  ;;  %v245_v50 = vshll.u32 %v241_v44, 16 }
  0x1b   : > { %v197_v37 = vadd.s32 %v196_v31, %v186_v19  ;;  %v225_v47 = vadd.s32 %v223_v41, %v221_v39  ;;  %v297_v54 = vadd.f32 %v398_v40, %v290_v34  ;;  %v291_v55 = vmul.f32 %v462_v23, %v386_v33 }
  0x1c   : > { %vm247_vm4 = vc.u32 %v239_v42, %v243_v49  ;;  %v249_v56 = vadd.s32 %v243_v49, %v239_v42  ;;  %v244_v60 = vshrl.u32 %v240_v43, 16  ;;  %v285_v63 = vunpack.c.l.bf16 %v282_v53 }
  0x1d   : > { %v198_v45 = vadd.s32 %v197_v37, %v188_v30  ;;  %v226_v52 = vadd.s32 %v225_v47, %v215_v38  ;;  %v248_v59 = vsel %vm247_vm4, 1, %v407_v20  ;;  %v300_v3 = vmax.f32 %v297_v54, 0.0 }
  0x1e   : > { %v250_v61 = vadd.s32 %v248_v59, %v242_v48  ;;  %vm251_vm5 = vc.u32 %v249_v56, %v245_v50  ;;  %v298_v5 = vadd.f32 %v398_v40, %v291_v55  ;;  %v246_v6 = vshrl.u32 %v241_v44, 16 }
  0x1f   : > { %v199_v51 = vshrl.u32 %v198_v45, 2  ;;  %v227_v58 = vadd.s32 %v226_v52, %v217_v46  ;;  %v252_v2 = vsel %vm251_vm5, 1, %v407_v20  ;;  %v292_v14 = vmul.f32 %v462_v23, %v285_v63 }
  0x20   : > { %v254_v7 = vadd.s32 %v252_v2, %v250_v61 }
  0x21   : > { %v200_v57 = vmul.u32 6, %v199_v51  ;;  %v228_v0 = vshrl.u32 %v227_v58, 2  ;;  %v299_v21 = vadd.f32 %v398_v40, %v292_v14 }
  0x22   : > { %v255_v10 = vadd.s32 %v254_v7, %v244_v60 }
  0x23   : > { %v201_v62 = vsub.s32 %v438_v1, %v200_v57  ;;  %v229_v9 = vmul.u32 6, %v228_v0  ;;  %v301_v1 = vmax.f32 %v298_v5, 0.0  ;;  %v302_v26 = vmax.f32 %v299_v21, 0.0 }
  0x24   : > { %v256_v13 = vadd.s32 %v255_v10, %v246_v6 }
  0x25   : > { %vm262_vm6 = vcmp.ne.s32.totalorder %v201_v62, 0  ;;  %vm265_vm7 = vcmp.lt.s32.totalorder %v201_v62, 0  ;;  %v271_v8 = vadd.s32 6, %v201_v62  ;;  %v230_v12 = vsub.s32 %v444_v4, %v229_v9 }
  0x26   : > { %vm268_vm8 = vmand %vm265_vm7, %vm262_vm6  ;;  %v257_v19 = vshrl.u32 %v256_v13, 2 }
  0x27   : > { %v274_v11 = vsel %vm268_vm8, %v271_v8, %v201_v62  ;;  %vm263_vm11 = vcmp.ne.s32.totalorder %v230_v12, 0  ;;  %vm266_vm12 = vcmp.lt.s32.totalorder %v230_v12, 0  ;;  %v272_v17 = vadd.s32 6, %v230_v12 }
  0x28   : > { %vm277_vm10 = vcmp.lt.s32.totalorder %v274_v11, 4  ;;  %vm269_vm13 = vmand %vm266_vm12, %vm263_vm11  ;;  %v258_v4 = vmul.u32 6, %v257_v19 }
  0x29   : > { %v309_v16 = vsel %vm277_vm10, %v300_v3, 0.0  ;;  %v275_v20 = vsel %vm269_vm13, %v272_v17, %v230_v12 }
  0x2a   : > { %v312_v18 = vpack.c.bf16 %v309_v16, %v309_v16  ;;  %vm278_vm14 = vcmp.lt.s32.totalorder %v275_v20, 4  ;;  %v259_v24 = vsub.s32 %v457_v15, %v258_v4 }
  0x2b   : > { %v310_v22 = vsel %vm278_vm14, %v301_v1, 0.0 }
  0x2c   : > { %316 = vst.msk [vmem:[%s170_s24] sm:$0xf] %vm315_vm9, %v312_v18  ;;  %v313_v23 = vpack.c.bf16 %v310_v22, %v310_v22  ;;  %vm264_vm15 = vcmp.ne.s32.totalorder %v259_v24, 0  ;;  %vm267_vm0 = vcmp.lt.s32.totalorder %v259_v24, 0  ;;  %v273_v25 = vadd.s32 6, %v259_v24 }
  0x2d   : > { %vm270_vm1 = vmand %vm267_vm0, %vm264_vm15 }
  0x2e   : > { %317 = vst.msk [vmem:[%s170_s24 + $0x4] sm:$0xf] %vm315_vm9, %v313_v23  ;;  %v276_v27 = vsel %vm270_vm1, %v273_v25, %v259_v24 }
  0x2f   : > { %vm279_vm2 = vcmp.lt.s32.totalorder %v276_v27, 4 }
  0x30   : > { %v311_v28 = vsel %vm279_vm2, %v302_v26, 0.0 }
  0x31   : > { %v314_v29 = vpack.c.bf16 %v311_v28, %v311_v28 }
  0x33   : > { %318 = vst.msk [vmem:[%s170_s24 + $0x8] sm:$0xf] %vm315_vm9, %v314_v29 }
  0x34 PF: > { %s13_s12 = sadd.s32 1, %s405_s12  }
  0x35   : > { %p10_p4 = scmp.ge.s32.totalorder %s13_s12, 4  }
  0x37   :  { %12 = sbr.rel (!%p10_p4) target bundleno = 1 (0x1), region = 62 }

// kernel: encoder_forward.11
= control target key start
LH: loop header
LB: loop body
LE: loop exit
PB: predicated region body
PF: predicated region fallthrough
CT: control target
= control target key end

     0   :  { %s1033_s18 = smov 0   ;;  %s1200_s0 = inlined_call_operand.vmem [shape: bf16[2,24,16], index: 0, kind: input, shape index: {}]   ;;  %s1201_s1 = inlined_call_operand.vmem [shape: bf16[3,3,16,32], index: 1, kind: input, shape index: {}]   ;;  %s1202_s2 = inlined_call_operand.vmem [shape: f32[1,32], index: 2, kind: input, shape index: {}]   ;;  %s1203_s3 = inlined_call_operand.vmem [shape: bf16[2,24,32], index: 3, kind: output, shape index: {0}]   ;;  %s1204_s4 = inlined_call_operand.vmem [shape: f32[2,1,32], index: 4, kind: output, shape index: {1}]   ;;  %s1205_s5 = inlined_call_operand.vmem [shape: f32[2,1,32], index: 5, kind: output, shape index: {2}]  }
   0x1 LB: > { %s888_s19 = sadd.s32 4294967295, %s999_s18   ;;  %p892_p0 = scmp.ge.s32.totalorder %s999_s18, 1  ;;  %s999_s18 = sphi %s1033_s18, %s16_s18  }
   0x2   : > { %p192_p1 = scmp.lt.s32.totalorder %s999_s18, 3 }
   0x4   : > { %p193_p2 = pnand %p892_p0, %p192_p1 }
   0x5   : > { %p226_p3 = scmp.lt.s32.totalorder (!%p193_p2), %s888_s19, 1 }
   0x6   : > { %196 = sbr.rel (%p193_p2) target bundleno = 250 (0xfa), region = 32 }
   0xb   : > { %v968_v0 = vld [vmem:[%s1201_s1 + $0x8] sm:$0xff]  ;;  %vm352_vm0 = vcmask 130048   ;;  %v967_v1 = vld [vmem:[%s1201_s1] sm:$0xff]  ;;  %v1001_v2 = vmov 0.0   ;;  %v969_v3 = vld [vmem:[%s1201_s1 + $0x10] sm:$0xff]  ;;  %s1211_s19 = smov (!%p226_p3, %s888_s19), 1  ;;  %v243_v56 = vlaneseq }
   0xc   : > { %353 = vst.msk [vmem:[#allocation2] sm:$0xff] %vm352_vm0, %v1001_v2  ;;  %v970_v4 = vld [vmem:[%s1201_s1 + $0x18] sm:$0xff]  ;;  %v971_v5 = vld [vmem:[%s1201_s1 + $0x20] sm:$0xff]  ;;  %403 = vmatpush.bf16.msra.mxu0 %v968_v0  ;;  %980 = vmatpush.bf16.msra.mxu1 %v968_v0  ;;  %v973_v6 = vld [vmem:[%s1201_s1 + $0x30] sm:$0xff]  ;;  %s981_s9 = smul.u32 12, %s1211_s19  ;;  %vm779_vm13 = vcmask 257024   ;;  %s238_s26 = scalar_lea.vmem %s1204_s4, %s1211_s19 }
   0xd   : > { %354 = vst.msk [vmem:[#allocation2 + $0x8] sm:$0xff] %vm352_vm0, %v1001_v2  ;;  %v974_v7 = vld [vmem:[%s1201_s1 + $0x38] sm:$0xff]  ;;  %471 = vmatpush.bf16.msra.mxu2 %v969_v3  ;;  %512 = vmatpush.bf16.msra.mxu3 %v970_v4  ;;  %v972_v23 = vld [vmem:[%s1201_s1 + $0x28] sm:$0xff]  ;;  %v975_v24 = vld [vmem:[%s1201_s1 + $0x40] sm:$0xff]  ;;  %v1104_v58 = vshrl.u32 %v243_v56, 7  ;;  %s241_s29 = scalar_lea.vmem %s1205_s5, %s1211_s19 }
   0xe   : > { %355 = vst.msk [vmem:[#allocation2 + $0x10] sm:$0xff] %vm352_vm0, %v1001_v2  ;;  %s230_s12 = scalar_lea.vmem %s1200_s0, %s981_s9  ;;  %s1171_s23 = scalar_lea.vmem %s1203_s3, %s981_s9 }
   0xf   : > { %356 = vst.msk [vmem:[#allocation2 + $0x18] sm:$0xff] %vm352_vm0, %v1001_v2  ;;  %v977_v8 = vld [vmem:[%s230_s12] sm:$0xff]   ;;  %v362_v9 = vld [vmem:[%s230_s12 + $0x8] sm:$0xf]  ;;  %v250_v60 = vand.u32 65535, %v1104_v58  ;;  %v251_v62 = vshrl.u32 %v1104_v58, 16 }
  0x10   : > { %433 = vmatpush.bf16.msrb.mxu1 %v967_v1  ;;  %553 = vmatpush.bf16.msrb.mxu0 %v971_v5  ;;  %357 = vst.msk [vmem:[#allocation2 + $0x20] sm:$0xff] %vm352_vm0, %v1001_v2  ;;  %v978_v10 = vunpack.c.l.bf16 %v977_v8  ;;  %v979_v11 = vunpack.c.h.bf16 %v977_v8  ;;  %v365_v12 = vunpack.c.l.bf16 %v362_v9  ;;  %v1117_v3 = vadd.s32 8, %v1104_v58 }
  0x11   : > { %635 = vmatpush.bf16.msrb.mxu2 %v973_v6  ;;  %676 = vmatpush.bf16.msrb.mxu3 %v974_v7  ;;  %v254_v63 = vmul.u32 43690, %v250_v60  ;;  %v253_v4 = vmul.u32 43691, %v250_v60  ;;  %v255_v5 = vmul.u32 43691, %v251_v62 }
  0x12   : > { %366 = vst.msk [vmem:[#allocation2 + $0x7] sm:$0xff] %vm352_vm0, %v978_v10  ;;  %v279_v7 = vand.u32 65535, %v1117_v3  ;;  %v280_v8 = vshrl.u32 %v1117_v3, 16 }
  0x13   : > { %367 = vst.msk [vmem:[#allocation2 + $0xf] sm:$0xff] %vm352_vm0, %v979_v11  ;;  %v257_v6 = vshll.u32 %v254_v63, 16  ;;  %v259_v11 = vshll.u32 %v255_v5, 16 }
  0x14   : > { %368 = vst.msk [vmem:[#allocation2 + $0x17] sm:$0xff] %vm352_vm0, %v365_v12  ;;  %v283_v9 = vmul.u32 43690, %v279_v7 }
  0x15   : > { %vm261_vm1 = vc.u32 %v253_v4, %v257_v6  ;;  %v263_v12 = vadd.s32 %v257_v6, %v253_v4 }
  0x17   : > { %vm265_vm2 = vc.u32 %v263_v12, %v259_v11 }
  0x19   : > { %v376_v13 = vld [vmem:[#allocation2 + $0x1] sm:$0xff] }
  0x1a   : > { %v444_v14 = vld [vmem:[#allocation2 + $0x2] sm:$0xff]  ;;  %v445_v17 = vld [vmem:[#allocation2 + $0xa] sm:$0xff] }
  0x1b   : > { %v485_v15 = vld [vmem:[#allocation2 + $0x6] sm:$0xff]  ;;  %v486_v18 = vld [vmem:[#allocation2 + $0xe] sm:$0xff]  ;;  %v447_v21 = vpack.c.bf16 %v445_v17, %v444_v14  ;;  %v487_v31 = vld [vmem:[#allocation2 + $0x16] sm:$0xff] }
  0x1c   : > { %v377_v16 = vld [vmem:[#allocation2 + $0x9] sm:$0xff]  ;;  %v378_v20 = vld [vmem:[#allocation2 + $0x11] sm:$0xff]  ;;  %v488_v22 = vpack.c.bf16 %v486_v18, %v485_v15  ;;  %v369_v29 = vld [vmem:[#allocation2] sm:$0xff]  ;;  %v489_v35 = vpack.c.bf16 %v487_v31, %v487_v31  ;;  %v693_v48 = vpack.c.bf16 %v487_v31, %v486_v18  ;;  %v256_v15 = vmul.u32 43690, %v251_v62 }
  0x1d   : > { %v379_v19 = vpack.c.bf16 %v377_v16, %v376_v13  ;;  %v380_v25 = vpack.c.bf16 %v378_v20, %v378_v20  ;;  %915 = vmatmul.msk.bf16.vlgmr.msra.gmra.mxu2 %vm352_vm0, %v447_v21  ;;  %v526_v26 = vld [vmem:[#allocation2 + $0x7] sm:$0xff]  ;;  %v527_v27 = vld [vmem:[#allocation2 + $0xf] sm:$0xff]  ;;  %v528_v36 = vld [vmem:[#allocation2 + $0x17] sm:$0xff]  ;;  %v1128_v16 = vadd.s32 16, %v1104_v58  ;;  %v1002_v18 = vmov 0  }
  0x1e   : > { %923 = vmatmul.msk.bf16.vlgmr.msra.gmra.mxu3 %vm352_vm0, %v488_v22  ;;  %v446_v28 = vld [vmem:[#allocation2 + $0x12] sm:$0xff]  ;;  %v370_v30 = vld [vmem:[#allocation2 + $0x8] sm:$0xff]  ;;  %v529_v32 = vpack.c.bf16 %v527_v27, %v526_v26  ;;  %v530_v42 = vpack.c.bf16 %v528_v36, %v528_v36  ;;  %v610_v46 = vld [vmem:[#allocation2 + $0x1c] sm:$0xff]  ;;  %v282_v20 = vmul.u32 43691, %v279_v7  ;;  %v284_v21 = vmul.u32 43691, %v280_v8 }
  0x1f   : > { %901 = vmatmul.msk.bf16.vlgmr.msra.gmra.mxu0 %vm352_vm0, %v379_v19  ;;  %902 = vmatmul.msk.bf16.vlgmr.msra.gmra.mxu1 %vm352_vm0, %v380_v25  ;;  %v448_v33 = vpack.c.bf16 %v446_v28, %v446_v28  ;;  %v372_v34 = vpack.c.bf16 %v370_v30, %v369_v29  ;;  %v608_v37 = vld [vmem:[#allocation2 + $0xc] sm:$0xff]  ;;  %v609_v38 = vld [vmem:[#allocation2 + $0x14] sm:$0xff]  ;;  %v651_v47 = vld [vmem:[#allocation2 + $0x1d] sm:$0xff]  ;;  %v612_v49 = vpack.c.bf16 %v610_v46, %v610_v46  ;;  %v262_v19 = vsel %vm261_vm1, 1, %v1002_v18 }
  0x20   : > { %594 = vmatpush.bf16.msra.mxu1 %v972_v23  ;;  %717 = vmatpush.bf16.msra.mxu0 %v975_v24  ;;  %v371_v39 = vld [vmem:[#allocation2 + $0x10] sm:$0xff]  ;;  %v611_v43 = vpack.c.bf16 %v609_v38, %v608_v37  ;;  %v653_v51 = vpack.c.bf16 %v651_v47, %v651_v47  ;;  %v692_v52 = vld [vmem:[#allocation2 + $0x1e] sm:$0xff]  ;;  %v286_v22 = vshll.u32 %v283_v9, 16  ;;  %v308_v23 = vand.u32 65535, %v1128_v16 }
  0x21   : > { %v649_v40 = vld [vmem:[#allocation2 + $0xd] sm:$0xff]  ;;  %v650_v41 = vld [vmem:[#allocation2 + $0x15] sm:$0xff]  ;;  %v373_v44 = vpack.c.bf16 %v371_v39, %v371_v39  ;;  %v570_v50 = vpack.c.bf16 %v371_v39, %v370_v30  ;;  %v694_v54 = vpack.c.bf16 %v692_v52, %v692_v52  ;;  %v264_v24 = vadd.s32 %v262_v19, %v256_v15 }
  0x22   : > { %v652_v45 = vpack.c.bf16 %v650_v41, %v649_v40  ;;  %v569_v53 = vld [vmem:[#allocation2 + $0x18] sm:$0xff]  ;;  %v266_v25 = vsel %vm265_vm2, 1, %v1002_v18  ;;  %v288_v26 = vshll.u32 %v284_v21, 16  ;;  %vm290_vm3 = vc.u32 %v282_v20, %v286_v22 }
  0x23   : > { %v571_v55 = vpack.c.bf16 %v569_v53, %v569_v53  ;;  %v292_v27 = vadd.s32 %v286_v22, %v282_v20  ;;  %v309_v29 = vshrl.u32 %v1128_v16, 16  ;;  %v312_v30 = vmul.u32 43690, %v308_v23 }
  0x24   : > { %v291_v36 = vsel %vm290_vm3, 1, %v1002_v18  ;;  %v311_v38 = vmul.u32 43691, %v308_v23  ;;  %v289_v56 = vshrl.u32 %v284_v21, 16  ;;  %vm747_vm3 = vcmask 261120  }
  0x25   : > { %vm294_vm4 = vc.u32 %v292_v27, %v288_v26  ;;  %v313_v39 = vmul.u32 43691, %v309_v29  ;;  %v315_v40 = vshll.u32 %v312_v30, 16  ;;  %v314_v53 = vmul.u32 43690, %v309_v29 }
  0x26   : > { %v316_v12 = vshrl.u32 %v312_v30, 16 }
  0x27   : > { %v317_v46 = vshll.u32 %v313_v39, 16  ;;  %vm319_vm5 = vc.u32 %v311_v38, %v315_v40  ;;  %v321_v47 = vadd.s32 %v315_v40, %v311_v38  ;;  %v992_v38 = vld [vmem:[%s1202_s2] ss:$0 sm:$0xff] }
  0x29   : > { %vm323_vm6 = vc.u32 %v321_v47, %v317_v46 }
  0x2a   : > { %v324_v4 = vsel %vm323_vm6, 1, %v1002_v18 }
  0x2d   : > { %916 = vmatmul.msk.bf16.gmra.mxu2 %vm352_vm0, %v448_v33 }
  0x2e   : > { %924 = vmatmul.msk.bf16.gmra.mxu3 %vm352_vm0, %v489_v35  ;;  %v268_v35 = vadd.s32 %v266_v25, %v264_v24 }
  0x2f   : > { %931 = vmatmul.msk.bf16.vlgmr.msrb.gmra.mxu0 %vm352_vm0, %v529_v32  ;;  %907 = vmatmul.msk.bf16.vlgmr.msrb.gmra.mxu1 %vm352_vm0, %v372_v34  ;;  %v285_v32 = vmul.u32 43690, %v280_v8  ;;  %v258_v34 = vshrl.u32 %v254_v63, 16 }
  0x31   : > { %v293_v41 = vadd.s32 %v291_v36, %v285_v32 }
  0x3d   : > { %947 = vmatmul.msk.bf16.vlgmr.msrb.gmra.mxu2 %vm352_vm0, %v611_v43  ;;  %v269_v43 = vadd.s32 %v268_v35, %v258_v34 }
  0x3e   : > { %955 = vmatmul.msk.bf16.vlgmr.msrb.gmra.mxu3 %vm352_vm0, %v652_v45 }
  0x3f   : > { %932 = vmatmul.msk.bf16.gmra.mxu0 %vm352_vm0, %v530_v42  ;;  %908 = vmatmul.msk.bf16.gmra.mxu1 %vm352_vm0, %v373_v44  ;;  %v260_v42 = vshrl.u32 %v255_v5, 16  ;;  %v295_v44 = vsel %vm294_vm4, 1, %v1002_v18 }
  0x41   : > { %v270_v52 = vadd.s32 %v269_v43, %v260_v42 }
  0x43   : > { %v271_v63 = vshrl.u32 %v270_v52, 2 }
  0x45   : > { %v272_v11 = vmul.u32 6, %v271_v63 }
  0x4d   : > { %948 = vmatmul.msk.bf16.gmra.mxu2 %vm352_vm0, %v612_v49  ;;  %v287_v49 = vshrl.u32 %v283_v9, 16 }
  0x4e   : > { %956 = vmatmul.msk.bf16.gmra.mxu3 %vm352_vm0, %v653_v51 }
  0x4f   : > { %963 = vmatmul.msk.bf16.vlgmr.msra.gmra.mxu0 %vm352_vm0, %v693_v48  ;;  %939 = vmatmul.msk.bf16.vlgmr.msra.gmra.mxu1 %vm352_vm0, %v570_v50  ;;  %v297_v50 = vadd.s32 %v295_v44, %v293_v41 }
  0x51   : > { %v298_v60 = vadd.s32 %v297_v50, %v287_v49 }
  0x53   : > { %v299_v7 = vadd.s32 %v298_v60, %v289_v56 }
  0x55   : > { %v300_v22 = vshrl.u32 %v299_v7, 2 }
  0x57   : > { %v301_v26 = vmul.u32 6, %v300_v22 }
  0x59   : > { %v302_v34 = vsub.s32 %v1117_v3, %v301_v26 }
  0x5b   : > { %vm335_vm10 = vcmp.ne.s32.totalorder %v302_v34, 0  ;;  %vm338_vm11 = vcmp.lt.s32.totalorder %v302_v34, 0  ;;  %v344_v46 = vadd.s32 6, %v302_v34 }
  0x5c   : > { %vm1161_vm14 = vmand %vm338_vm11, %vm335_vm10 }
  0x5d   : > { %v347_v52 = vsel %vm1161_vm14, %v344_v46, %v302_v34 }
  0x5e   : > { %vm350_vm1 = vcmp.lt.s32.totalorder %v347_v52, 4 }
  0x5f   : > { %964 = vmatmul.msk.bf16.gmra.mxu0 %vm352_vm0, %v694_v54  ;;  %940 = vmatmul.msk.bf16.gmra.mxu1 %vm352_vm0, %v571_v55  ;;  %v320_v55 = vsel %vm319_vm5, 1, %v1002_v18  ;;  %vm759_vm5 = vcmask 253952  }
  0x9c   : > { %v1102_v57 = vpop.f32.mrf.mxu0  ;;  %v1106_v59 = vpop.f32.mrf.mxu1 }
  0xa0   : > { %v1109_v61 = vpop.f32.mrf.mxu2 }
  0xa1   : > { %v1112_v0 = vpop.f32.mrf.mxu3 }
  0xa4   : > { %v1114_v1 = vpop.f32.mrf.mxu0  ;;  %v412_v2 = vpop.f32.mrf.mxu1 }
  0xa5   : > { %v322_v2 = vadd.s32 %v320_v55, %v314_v53 }
  0xa7   : > { %v326_v15 = vadd.s32 %v324_v4, %v322_v2 }
  0xa8   : > { %v1121_v10 = vpop.f32.mrf.mxu2 }
  0xa9   : > { %v1123_v13 = vpop.f32.mrf.mxu3  ;;  %v327_v23 = vadd.s32 %v326_v15, %v316_v12 }
  0xac   : > { %v1125_v14 = vpop.f32.mrf.mxu0  ;;  %v435_v17 = vpop.f32.mrf.mxu1 }
  0xad   : > { %v436_v62 = vadd.f32 %v435_v17, %v1102_v57  ;;  %v273_v57 = vsub.s32 %v1104_v58, %v272_v11  ;;  %v318_v17 = vshrl.u32 %v313_v39, 16 }
  0xaf   : > { %v482_v8 = vadd.f32 %v1109_v61, %v436_v62  ;;  %vm334_vm7 = vcmp.ne.s32.totalorder %v273_v57, 0  ;;  %vm337_vm8 = vcmp.lt.s32.totalorder %v273_v57, 0  ;;  %v328_v29 = vadd.s32 %v327_v23, %v318_v17 }
  0xb0   : > { %v1131_v28 = vpop.f32.mrf.mxu2  ;;  %v343_v32 = vadd.s32 6, %v273_v57  ;;  %vm1148_vm9 = vmand %vm337_vm8, %vm334_vm7 }
  0xb1   : > { %v1134_v31 = vpop.f32.mrf.mxu3  ;;  %v523_v21 = vadd.f32 %v1112_v0, %v482_v8  ;;  %v329_v36 = vshrl.u32 %v328_v29, 2 }
  0xb3   : > { %v564_v61 = vadd.f32 %v1125_v14, %v523_v21  ;;  %v346_v14 = vsel %vm1148_vm9, %v343_v32, %v273_v57  ;;  %v330_v42 = vmul.u32 6, %v329_v36 }
  0xb4   : > { %v1136_v33 = vpop.f32.mrf.mxu0  ;;  %v437_v37 = vpop.f32.mrf.mxu1  ;;  %vm349_vm12 = vcmp.lt.s32.totalorder %v346_v14, 4 }
  0xb5   : > { %v438_v20 = vadd.f32 %v437_v37, %v1114_v1  ;;  %v331_v49 = vsub.s32 %v1128_v16, %v330_v42 }
  0xb7   : > { %v483_v24 = vadd.f32 %v1121_v10, %v438_v20  ;;  %vm336_vm15 = vcmp.ne.s32.totalorder %v331_v49, 0  ;;  %vm339_vm0 = vcmp.lt.s32.totalorder %v331_v49, 0  ;;  %v345_v2 = vadd.s32 6, %v331_v49 }
  0xb8   : > { %v480_v45 = vpop.f32.mrf.mxu2  ;;  %vm342_vm2 = vmand %vm339_vm0, %vm336_vm15 }
  0xb9   : > { %v521_v48 = vpop.f32.mrf.mxu3  ;;  %v524_v0 = vadd.f32 %v1123_v13, %v483_v24  ;;  %v348_v7 = vsel %vm342_vm2, %v345_v2, %v331_v49 }
  0xba   : > { %vm351_vm4 = vcmp.lt.s32.totalorder %v348_v7, 4 }
  0xbb   : > { %v565_v13 = vadd.f32 %v1136_v33, %v524_v0 }
  0xbc   : > { %v1138_v51 = vpop.f32.mrf.mxu0  ;;  %v440_v54 = vpop.f32.mrf.mxu1 }
  0xbd   : > { %v441_v10 = vadd.f32 %v440_v54, %v1106_v59 }
  0xbf   : > { %v484_v3 = vadd.f32 %v1131_v28, %v441_v10 }
  0xc0   : > { %v637_v5 = vpop.f32.mrf.mxu2 }
  0xc1   : > { %v678_v6 = vpop.f32.mrf.mxu3  ;;  %v525_v33 = vadd.f32 %v1134_v31, %v484_v3 }
  0xc3   : > { %v566_v55 = vadd.f32 %v1138_v51, %v525_v33 }
  0xc4   : > { %v562_v9 = vpop.f32.mrf.mxu0  ;;  %v442_v19 = vpop.f32.mrf.mxu1 }
  0xc8   : > { %v639_v18 = vpop.f32.mrf.mxu2 }
  0xc9   : > { %v680_v25 = vpop.f32.mrf.mxu3 }
  0xcc   : > { %v719_v27 = vpop.f32.mrf.mxu0  ;;  %v596_v30 = vpop.f32.mrf.mxu1 }
  0xcd   : > { %v605_v1 = vadd.f32 %v596_v30, %v564_v61 }
  0xcf   : > { %v646_v35 = vadd.f32 %v637_v5, %v605_v1 }
  0xd0   : > { %v642_v39 = vpop.f32.mrf.mxu2 }
  0xd1   : > { %v687_v37 = vadd.f32 %v678_v6, %v646_v35  ;;  %v683_v40 = vpop.f32.mrf.mxu3 }
  0xd3   : > { %v728_v41 = vadd.f32 %v719_v27, %v687_v37 }
  0xd4   : > { %v721_v59 = vpop.f32.mrf.mxu0  ;;  %v598_v43 = vpop.f32.mrf.mxu1 }
  0xd5   : > { %v735_v44 = vadd.f32 %v992_v38, %v728_v41  ;;  %v606_v45 = vadd.f32 %v598_v43, %v565_v13 }
  0xd7   : > { %v744_v28 = vsel %vm349_vm12, %v735_v44, 0.0  ;;  %v647_v48 = vadd.f32 %v639_v18, %v606_v45 }
  0xd8   : > { %v776_v50 = vpack.c.bf16 %v744_v28, %v744_v28  ;;  %v644_v54 = vpop.f32.mrf.mxu2  ;;  %v761_v12 = vmul.f32 %v744_v28, %v744_v28  ;;  %v748_v22 = vsel %vm747_vm3, %v744_v28, 0.0 }
  0xd9   : > { %v688_v53 = vadd.f32 %v680_v25, %v647_v48  ;;  %v685_v31 = vpop.f32.mrf.mxu3 }
  0xda   : > { %780 = vst.msk [vmem:[%s1171_s23] sm:$0xf] %vm779_vm13, %v776_v50  ;;  %v764_v23 = vsel %vm747_vm3, %v761_v12, 0.0 }
  0xdb   : > { %v729_v56 = vadd.f32 %v721_v59, %v688_v53 }
  0xdc   : > { %v724_v60 = vpop.f32.mrf.mxu0  ;;  %v601_v62 = vpop.f32.mrf.mxu1 }
  0xdd   : > { %v736_v63 = vadd.f32 %v992_v38, %v729_v56  ;;  %v607_v16 = vadd.f32 %v601_v62, %v566_v55 }
  0xdf   : > { %v745_v4 = vsel %vm350_vm1, %v736_v63, 0.0  ;;  %v648_v5 = vadd.f32 %v642_v39, %v607_v16 }
  0xe0   : > { %v777_v6 = vpack.c.bf16 %v745_v4, %v745_v4  ;;  %v762_v9 = vmul.f32 %v745_v4, %v745_v4  ;;  %v749_v15 = vsel %vm747_vm3, %v745_v4, 0.0 }
  0xe1   : > { %v689_v8 = vadd.f32 %v683_v40, %v648_v5  ;;  %v750_v57 = vadd.f32 %v749_v15, %v748_v22 }
  0xe2   : > { %781 = vst.msk [vmem:[%s1171_s23 + $0x4] sm:$0xf] %vm779_vm13, %v777_v6  ;;  %v765_v21 = vsel %vm747_vm3, %v762_v9, 0.0 }
  0xe3   : > { %v730_v51 = vadd.f32 %v724_v60, %v689_v8  ;;  %v766_v26 = vadd.f32 %v765_v21, %v764_v23 }
  0xe4   : > { %v726_v11 = vpop.f32.mrf.mxu0  ;;  %v603_v19 = vpop.f32.mrf.mxu1 }
  0xe5   : > { %v737_v20 = vadd.f32 %v992_v38, %v730_v51 }
  0xe7   : > { %v746_v17 = vsel %vm351_vm4, %v737_v20, 0.0 }
  0xe8   : > { %v751_v18 = vsel %vm747_vm3, %v746_v17, 0.0  ;;  %v763_v24 = vmul.f32 %v746_v17, %v746_v17  ;;  %v778_v25 = vpack.c.bf16 %v746_v17, %v746_v17 }
  0xe9   : > { %v752_v61 = vadd.f32 %v751_v18, %v750_v57 }
  0xea   : > { %v767_v27 = vsel %vm747_vm3, %v763_v24, 0.0  ;;  %782 = vst.msk [vmem:[%s1171_s23 + $0x8] sm:$0xf] %vm779_vm13, %v778_v25 }
  0xeb   : > { %v753_v29 = vrot.slane %v752_v61, 4  ;;  %v768_v30 = vadd.f32 %v767_v27, %v766_v26 }
  0xed   : > { %v754_v1 = vadd.f32 %v753_v29, %v752_v61  ;;  %v769_v32 = vrot.slane %v768_v30, 4 }
  0xef   : > { %v755_v0 = vrot.slane %v754_v1, 2  ;;  %v770_v58 = vadd.f32 %v769_v32, %v768_v30 }
  0xf1   : > { %v756_v34 = vadd.f32 %v755_v0, %v754_v1  ;;  %v771_v10 = vrot.slane %v770_v58, 2 }
  0xf3   : > { %v757_v35 = vrot.slane %v756_v34, 1  ;;  %v772_v36 = vadd.f32 %v771_v10, %v770_v58 }
  0xf5   : > { %v758_v14 = vadd.f32 %v757_v35, %v756_v34  ;;  %v773_v37 = vrot.slane %v772_v36, 1 }
  0xf7   : > { %760 = vst.msk [vmem:[%s238_s26] sm:$0x1] %vm759_vm5, %v758_v14  ;;  %v774_v38 = vadd.f32 %v773_v37, %v772_v36 }
  0xf9   : > { %775 = vst.msk [vmem:[%s241_s29] sm:$0x1] %vm759_vm5, %v774_v38 }
  0xfa PF: > { %s16_s18 = sadd.s32 1, %s999_s18  }
  0xfb   : > { %p13_p4 = scmp.ge.s32.totalorder %s16_s18, 4  }
  0xfd   :  { %15 = sbr.rel (!%p13_p4) target bundleno = 1 (0x1), region = 94 }

// kernel: encoder_forward.12
= control target key start
LH: loop header
LB: loop body
LE: loop exit
PB: predicated region body
PF: predicated region fallthrough
CT: control target
= control target key end

     0   :  { %s1251_s24 = smov 0   ;;  %s1436_s0 = inlined_call_operand.vmem [shape: bf16[2,24,32], index: 0, kind: input, shape index: {}]   ;;  %s1437_s1 = inlined_call_operand.vmem [shape: bf16[3,3,32,32], index: 1, kind: input, shape index: {}]   ;;  %s1438_s2 = inlined_call_operand.vmem [shape: f32[1,32], index: 2, kind: input, shape index: {}]   ;;  %s1439_s3 = inlined_call_operand.vmem [shape: f32[1,32], index: 3, kind: input, shape index: {}]   ;;  %s1440_s4 = inlined_call_operand.vmem [shape: f32[1,32], index: 4, kind: input, shape index: {}]   ;;  %s1441_s5 = inlined_call_operand.vmem [shape: bf16[2,24,32], index: 5, kind: output, shape index: {0}]   ;;  %s1442_s6 = inlined_call_operand.vmem [shape: f32[2,1,32], index: 6, kind: output, shape index: {1}]   ;;  %s1443_s7 = inlined_call_operand.vmem [shape: f32[2,1,32], index: 7, kind: output, shape index: {2}]  }
   0x1 LB: > { %s1032_s25 = sadd.s32 4294967295, %s1207_s24   ;;  %p1036_p0 = scmp.ge.s32.totalorder %s1207_s24, 1  ;;  %s1207_s24 = sphi %s1251_s24, %s18_s24  }
   0x2   : > { %p242_p1 = scmp.lt.s32.totalorder %s1207_s24, 3 }
   0x4   : > { %p243_p2 = pnand %p1036_p0, %p242_p1 }
   0x5   : > { %p280_p3 = scmp.lt.s32.totalorder (!%p243_p2), %s1032_s25, 1 }
   0x6   : > { %246 = sbr.rel (%p243_p2) target bundleno = 278 (0x116), region = 40 }
   0xb   : > { %v1166_v0 = vld [vmem:[%s1437_s1 + $0x18] sm:$0xff]  ;;  %v1168_v1 = vld [vmem:[%s1437_s1 + $0x28] sm:$0xff]  ;;  %v297_v2 = vlaneseq  ;;  %vm406_vm0 = vcmask 261120   ;;  %v1165_v4 = vld [vmem:[%s1437_s1 + $0x10] sm:$0xff]  ;;  %s1451_s25 = smov (!%p280_p3, %s1032_s25), 1  ;;  %v1209_v6 = vmov 0.0  }
   0xc   : > { %v1170_v3 = vld [vmem:[%s1437_s1 + $0x38] sm:$0xff]  ;;  %492 = vmatpush.bf16.msra.mxu0 %v1166_v0  ;;  %1185 = vmatpush.bf16.msra.mxu1 %v1166_v0  ;;  %407 = vst.msk [vmem:[#allocation2] sm:$0xff] %vm406_vm0, %v1209_v6  ;;  %s1187_s11 = smul.u32 12, %s1451_s25  ;;  %v1210_v24 = vmov 0   ;;  %v1304_v40 = vld [vmem:[%s1439_s3] ss:$0 sm:$0xff]  ;;  %s292_s13 = scalar_lea.vmem %s1442_s6, %s1451_s25 }
   0xd   : > { %v1273_v5 = vshrl.u32 %v297_v2, 7  ;;  %574 = vmatpush.bf16.msra.mxu2 %v1168_v1  ;;  %623 = vmatpush.bf16.msra.mxu3 %v1170_v3  ;;  %408 = vst.msk [vmem:[#allocation2 + $0x8] sm:$0xff] %vm406_vm0, %v1209_v6  ;;  %v1199_v54 = vld [vmem:[%s1440_s4] ss:$0 sm:$0xff]  ;;  %v1164_v59 = vld [vmem:[%s1437_s1 + $0x8] sm:$0xff]  ;;  %v1169_v60 = vld [vmem:[%s1437_s1 + $0x30] sm:$0xff]  ;;  %s295_s16 = scalar_lea.vmem %s1443_s7, %s1451_s25 }
   0xe   : > { %409 = vst.msk [vmem:[#allocation2 + $0x10] sm:$0xff] %vm406_vm0, %v1209_v6  ;;  %s1296_s14 = scalar_lea.vmem %s1436_s0, %s1187_s11  ;;  %v1167_v56 = vld [vmem:[%s1437_s1 + $0x20] sm:$0xff]  ;;  %v1172_v61 = vld [vmem:[%s1437_s1 + $0x48] sm:$0xff]  ;;  %s1405_s10 = scalar_lea.vmem %s1441_s5, %s1187_s11 }
   0xf   : > { %v1279_v7 = vadd.s32 8, %v1273_v5  ;;  %v304_v8 = vand.u32 65535, %v1273_v5  ;;  %v305_v9 = vshrl.u32 %v1273_v5, 16  ;;  %410 = vst.msk [vmem:[#allocation2 + $0x18] sm:$0xff] %vm406_vm0, %v1209_v6  ;;  %v1287_v13 = vadd.s32 16, %v1273_v5  ;;  %v1182_v29 = vld [vmem:[%s1296_s14] sm:$0xff]  }
  0x10   : > { %493 = vmatpush.bf16.msra.mxu0 %v1165_v4  ;;  %1186 = vmatpush.bf16.msra.mxu1 %v1165_v4  ;;  %411 = vst.msk [vmem:[#allocation2 + $0x20] sm:$0xff] %vm406_vm0, %v1209_v6  ;;  %v1183_v39 = vunpack.c.l.bf16 %v1182_v29  ;;  %v1184_v46 = vunpack.c.h.bf16 %v1182_v29  ;;  %v1176_v1 = vld [vmem:[%s1437_s1 + $0x68] sm:$0xff] }
  0x11   : > { %v307_v10 = vmul.u32 43691, %v304_v8  ;;  %v308_v11 = vmul.u32 43690, %v304_v8  ;;  %v309_v12 = vmul.u32 43691, %v305_v9  ;;  %v333_v14 = vand.u32 65535, %v1279_v7  ;;  %575 = vmatpush.bf16.msra.mxu2 %v1167_v56  ;;  %v416_v6 = vld [vmem:[%s1296_s14 + $0x8] sm:$0xf]  ;;  %624 = vmatpush.bf16.msra.mxu3 %v1169_v60 }
  0x12   : > { %v334_v15 = vshrl.u32 %v1279_v7, 16  ;;  %v310_v16 = vmul.u32 43690, %v305_v9  ;;  %v362_v23 = vand.u32 65535, %v1287_v13  ;;  %v363_v32 = vshrl.u32 %v1287_v13, 16  ;;  %v1163_v8 = vld [vmem:[%s1437_s1] sm:$0xff]  ;;  %v1178_v9 = vld [vmem:[%s1437_s1 + $0x78] sm:$0xff] }
  0x13   : > { %v311_v17 = vshll.u32 %v308_v11, 16  ;;  %v313_v18 = vshll.u32 %v309_v12, 16  ;;  %v336_v19 = vmul.u32 43691, %v333_v14  ;;  %v337_v20 = vmul.u32 43690, %v333_v14  ;;  %v1171_v14 = vld [vmem:[%s1437_s1 + $0x40] sm:$0xff] }
  0x14   : > { %v338_v21 = vmul.u32 43691, %v334_v15  ;;  %v339_v26 = vmul.u32 43690, %v334_v15  ;;  %v312_v30 = vshrl.u32 %v308_v11, 16  ;;  %v314_v33 = vshrl.u32 %v309_v12, 16  ;;  %528 = vmatpush.bf16.msrb.mxu1 %v1164_v59  ;;  %672 = vmatpush.bf16.msrb.mxu0 %v1172_v61 }
  0x15   : > { %vm315_vm1 = vc.u32 %v307_v10, %v311_v17  ;;  %v317_v22 = vadd.s32 %v311_v17, %v307_v10  ;;  %v340_v27 = vshll.u32 %v337_v20, 16  ;;  %v341_v37 = vshrl.u32 %v337_v20, 16  ;;  %770 = vmatpush.bf16.msrb.mxu2 %v1176_v1  ;;  %819 = vmatpush.bf16.msrb.mxu3 %v1178_v9 }
  0x16   : > { %v316_v25 = vsel %vm315_vm1, 1, %v1210_v24  ;;  %v342_v28 = vshll.u32 %v338_v21, 16  ;;  %v365_v42 = vmul.u32 43691, %v362_v23  ;;  %v366_v43 = vmul.u32 43690, %v362_v23 }
  0x17   : > { %v318_v31 = vadd.s32 %v316_v25, %v310_v16  ;;  %vm319_vm2 = vc.u32 %v317_v22, %v313_v18  ;;  %vm344_vm3 = vc.u32 %v336_v19, %v340_v27  ;;  %v346_v35 = vadd.s32 %v340_v27, %v336_v19 }
  0x18   : > { %v320_v34 = vsel %vm319_vm2, 1, %v1210_v24  ;;  %v345_v38 = vsel %vm344_vm3, 1, %v1210_v24  ;;  %v367_v47 = vmul.u32 43691, %v363_v32  ;;  %v343_v48 = vshrl.u32 %v338_v21, 16  ;;  %529 = vmatpush.bf16.msrb.mxu1 %v1163_v8  ;;  %673 = vmatpush.bf16.msrb.mxu0 %v1171_v14 }
  0x19   : > { %v322_v36 = vadd.s32 %v320_v34, %v318_v31  ;;  %v347_v41 = vadd.s32 %v345_v38, %v339_v26  ;;  %vm348_vm4 = vc.u32 %v346_v35, %v342_v28  ;;  %v368_v50 = vmul.u32 43690, %v363_v32  ;;  %v1175_v38 = vld [vmem:[%s1437_s1 + $0x60] sm:$0xff] }
  0x1a   : > { %v349_v45 = vsel %vm348_vm4, 1, %v1210_v24  ;;  %v369_v51 = vshll.u32 %v366_v43, 16  ;;  %v424_v53 = vmul.f32 %v1304_v40, %v1183_v39  ;;  %v371_v55 = vshll.u32 %v367_v47, 16  ;;  %771 = vmatpush.bf16.msrb.mxu2 %v1175_v38 }
  0x1b   : > { %v323_v44 = vadd.s32 %v322_v36, %v312_v30  ;;  %v351_v49 = vadd.s32 %v349_v45, %v347_v41  ;;  %v425_v63 = vmul.f32 %v1304_v40, %v1184_v46  ;;  %v370_v3 = vshrl.u32 %v366_v43, 16  ;;  %v1177_v41 = vld [vmem:[%s1437_s1 + $0x70] sm:$0xff] }
  0x1c   : > { %vm373_vm5 = vc.u32 %v365_v42, %v369_v51  ;;  %v375_v58 = vadd.s32 %v369_v51, %v365_v42  ;;  %v431_v11 = vadd.f32 %v1199_v54, %v424_v53  ;;  %v372_v16 = vshrl.u32 %v367_v47, 16  ;;  %820 = vmatpush.bf16.msrb.mxu3 %v1177_v41  ;;  %v1180_v47 = vld [vmem:[%s1437_s1 + $0x88] sm:$0xff] }
  0x1d   : > { %v324_v52 = vadd.s32 %v323_v44, %v314_v33  ;;  %v352_v57 = vadd.s32 %v351_v49, %v341_v37  ;;  %v374_v0 = vsel %vm373_vm5, 1, %v1210_v24  ;;  %v432_v19 = vadd.f32 %v1199_v54, %v425_v63 }
  0x1e   : > { %v376_v4 = vadd.s32 %v374_v0, %v368_v50  ;;  %vm377_vm6 = vc.u32 %v375_v58, %v371_v55  ;;  %v419_v20 = vunpack.c.l.bf16 %v416_v6  ;;  %v1174_v55 = vld [vmem:[%s1437_s1 + $0x58] sm:$0xff]  ;;  %v1179_v58 = vld [vmem:[%s1437_s1 + $0x80] sm:$0xff]  ;;  %vm412_vm4 = vcmask 257024  }
  0x1f   : > { %v325_v62 = vshrl.u32 %v324_v52, 2  ;;  %v353_v2 = vadd.s32 %v352_v57, %v343_v48  ;;  %v378_v12 = vsel %vm377_vm6, 1, %v1210_v24  ;;  %v434_v24 = vmax.f32 %v431_v11, 0.0  ;;  %v1173_v57 = vld [vmem:[%s1437_s1 + $0x50] sm:$0xff] }
  0x20   : > { %v380_v17 = vadd.s32 %v378_v12, %v376_v4  ;;  %v435_v28 = vmax.f32 %v432_v19, 0.0  ;;  %v426_v29 = vmul.f32 %v1304_v40, %v419_v20  ;;  %vm904_vm5 = vcmask 253952  }
  0x21   : > { %v326_v10 = vmul.u32 6, %v325_v62  ;;  %v354_v15 = vshrl.u32 %v353_v2, 2 }
  0x22   : > { %v381_v22 = vadd.s32 %v380_v17, %v370_v3  ;;  %v433_v35 = vadd.f32 %v1199_v54, %v426_v29 }
  0x23   : > { %v327_v18 = vsub.s32 %v1273_v5, %v326_v10  ;;  %v355_v21 = vmul.u32 6, %v354_v15 }
  0x24   : > { %v382_v26 = vadd.s32 %v381_v22, %v372_v16  ;;  %v436_v40 = vmax.f32 %v433_v35, 0.0 }
  0x25   : > { %vm388_vm7 = vcmp.ne.s32.totalorder %v327_v18, 0  ;;  %vm391_vm8 = vcmp.lt.s32.totalorder %v327_v18, 0  ;;  %v397_v23 = vadd.s32 6, %v327_v18  ;;  %v356_v25 = vsub.s32 %v1279_v7, %v355_v21 }
  0x26   : > { %vm394_vm9 = vmand %vm391_vm8, %vm388_vm7  ;;  %v383_v32 = vshrl.u32 %v382_v26, 2 }
  0x27   : > { %v400_v27 = vsel %vm394_vm9, %v397_v23, %v327_v18  ;;  %vm389_vm10 = vcmp.ne.s32.totalorder %v356_v25, 0  ;;  %vm392_vm11 = vcmp.lt.s32.totalorder %v356_v25, 0  ;;  %v398_v5 = vadd.s32 6, %v356_v25 }
  0x28   : > { %vm1339_vm12 = vcmp.lt.s32.totalorder %v400_v27, 4  ;;  %vm395_vm13 = vmand %vm392_vm11, %vm389_vm10  ;;  %v384_v34 = vmul.u32 6, %v383_v32 }
  0x29   : > { %v443_v31 = vsel %vm1339_vm12, %v434_v24, 0.0  ;;  %v401_v33 = vsel %vm395_vm13, %v398_v5, %v356_v25 }
  0x2a   : > { %446 = vst.msk [vmem:[#allocation2 + $0x7] sm:$0xff] %vm406_vm0, %v443_v31  ;;  %vm1346_vm14 = vcmp.lt.s32.totalorder %v401_v33, 4  ;;  %v385_v37 = vsub.s32 %v1287_v13, %v384_v34 }
  0x2b   : > { %v444_v36 = vsel %vm1346_vm14, %v435_v28, 0.0 }
  0x2c   : > { %447 = vst.msk [vmem:[#allocation2 + $0xf] sm:$0xff] %vm406_vm0, %v444_v36  ;;  %vm390_vm15 = vcmp.ne.s32.totalorder %v385_v37, 0  ;;  %vm393_vm1 = vcmp.lt.s32.totalorder %v385_v37, 0  ;;  %v399_v39 = vadd.s32 6, %v385_v37 }
  0x2d   : > { %vm396_vm2 = vmand %vm393_vm1, %vm390_vm15 }
  0x2e   : > { %v402_v42 = vsel %vm396_vm2, %v399_v39, %v385_v37 }
  0x2f   : > { %vm1360_vm3 = vcmp.lt.s32.totalorder %v402_v42, 4 }
  0x30   : > { %v445_v46 = vsel %vm1360_vm3, %v436_v40, 0.0 }
  0x31   : > { %v458_v43 = vld [vmem:[#allocation2 + $0x1] sm:$0xff]  ;;  %448 = vst.msk [vmem:[#allocation2 + $0x17] sm:$0xff] %vm406_vm0, %v445_v46 }
  0x32   : > { %v540_v13 = vld [vmem:[#allocation2 + $0x2] sm:$0xff] }
  0x33   : > { %v589_v45 = vld [vmem:[#allocation2 + $0x6] sm:$0xff]  ;;  %v590_v50 = vld [vmem:[#allocation2 + $0xe] sm:$0xff] }
  0x34   : > { %v459_v48 = vld [vmem:[#allocation2 + $0x9] sm:$0xff]  ;;  %v592_v53 = vpack.c.bf16 %v590_v50, %v589_v45  ;;  %v449_v2 = vld [vmem:[#allocation2] sm:$0xff] }
  0x35   : > { %v541_v49 = vld [vmem:[#allocation2 + $0xa] sm:$0xff]  ;;  %v461_v51 = vpack.c.bf16 %v459_v48, %v458_v43 }
  0x36   : > { %v543_v52 = vpack.c.bf16 %v541_v49, %v540_v13  ;;  %1089 = vmatmul.msk.bf16.vlgmr.msra.gmra.mxu3 %vm406_vm0, %v592_v53  ;;  %v638_v59 = vld [vmem:[#allocation2 + $0x7] sm:$0xff]  ;;  %v639_v60 = vld [vmem:[#allocation2 + $0xf] sm:$0xff] }
  0x37   : > { %1051 = vmatmul.msk.bf16.vlgmr.msra.gmra.mxu0 %vm406_vm0, %v461_v51  ;;  %v641_v63 = vpack.c.bf16 %v639_v60, %v638_v59  ;;  %v450_v3 = vld [vmem:[#allocation2 + $0x8] sm:$0xff] }
  0x38   : > { %1075 = vmatmul.msk.bf16.vlgmr.msra.gmra.mxu2 %vm406_vm0, %v543_v52  ;;  %868 = vmatpush.bf16.msra.mxu0 %v1180_v47  ;;  %v460_v54 = vld [vmem:[#allocation2 + $0x11] sm:$0xff]  ;;  %v452_v4 = vpack.c.bf16 %v450_v3, %v449_v2  ;;  %v738_v18 = vld [vmem:[#allocation2 + $0x1c] sm:$0xff] }
  0x39   : > { %v462_v56 = vpack.c.bf16 %v460_v54, %v460_v54  ;;  %v542_v61 = vld [vmem:[#allocation2 + $0x12] sm:$0xff]  ;;  %v787_v19 = vld [vmem:[#allocation2 + $0x1d] sm:$0xff]  ;;  %v740_v21 = vpack.c.bf16 %v738_v18, %v738_v18 }
  0x3a   : > { %v591_v62 = vld [vmem:[#allocation2 + $0x16] sm:$0xff]  ;;  %v544_v0 = vpack.c.bf16 %v542_v61, %v542_v61  ;;  %v736_v8 = vld [vmem:[#allocation2 + $0xc] sm:$0xff]  ;;  %v789_v22 = vpack.c.bf16 %v787_v19, %v787_v19  ;;  %v836_v24 = vld [vmem:[#allocation2 + $0x1e] sm:$0xff] }
  0x3b   : > { %1052 = vmatmul.msk.bf16.vlgmr.msra.gmra.mxu1 %vm406_vm0, %v462_v56  ;;  %v593_v1 = vpack.c.bf16 %v591_v62, %v591_v62  ;;  %v640_v6 = vld [vmem:[#allocation2 + $0x17] sm:$0xff]  ;;  %v785_v10 = vld [vmem:[#allocation2 + $0xd] sm:$0xff]  ;;  %v837_v20 = vpack.c.bf16 %v591_v62, %v590_v50  ;;  %v838_v25 = vpack.c.bf16 %v836_v24, %v836_v24 }
  0x3c   : > { %721 = vmatpush.bf16.msra.mxu1 %v1174_v55  ;;  %869 = vmatpush.bf16.msra.mxu0 %v1179_v58  ;;  %v737_v9 = vld [vmem:[#allocation2 + $0x14] sm:$0xff]  ;;  %v642_v12 = vpack.c.bf16 %v640_v6, %v640_v6 }
  0x3d   : > { %v786_v11 = vld [vmem:[#allocation2 + $0x15] sm:$0xff]  ;;  %v739_v14 = vpack.c.bf16 %v737_v9, %v736_v8 }
  0x3e   : > { %v788_v15 = vpack.c.bf16 %v786_v11, %v785_v10  ;;  %v451_v16 = vld [vmem:[#allocation2 + $0x10] sm:$0xff]  ;;  %v689_v26 = vld [vmem:[#allocation2 + $0x18] sm:$0xff] }
  0x3f   : > { %v453_v17 = vpack.c.bf16 %v451_v16, %v451_v16  ;;  %v690_v23 = vpack.c.bf16 %v451_v16, %v450_v3  ;;  %v691_v27 = vpack.c.bf16 %v689_v26, %v689_v26 }
  0x40   : > { %722 = vmatpush.bf16.msra.mxu1 %v1173_v57 }
  0x46   : > { %1090 = vmatmul.msk.bf16.gmra.mxu3 %vm406_vm0, %v593_v1 }
  0x47   : > { %1103 = vmatmul.msk.bf16.vlgmr.msrb.gmra.mxu0 %vm406_vm0, %v641_v63 }
  0x48   : > { %1076 = vmatmul.msk.bf16.gmra.mxu2 %vm406_vm0, %v544_v0 }
  0x4b   : > { %1061 = vmatmul.msk.bf16.vlgmr.msrb.gmra.mxu1 %vm406_vm0, %v452_v4  ;;  %v1200_v4 = vld [vmem:[%s1438_s2] ss:$0 sm:$0xff] }
  0x56   : > { %1145 = vmatmul.msk.bf16.vlgmr.msrb.gmra.mxu3 %vm406_vm0, %v788_v15 }
  0x57   : > { %1104 = vmatmul.msk.bf16.gmra.mxu0 %vm406_vm0, %v642_v12 }
  0x58   : > { %1131 = vmatmul.msk.bf16.vlgmr.msrb.gmra.mxu2 %vm406_vm0, %v739_v14 }
  0x5b   : > { %1062 = vmatmul.msk.bf16.gmra.mxu1 %vm406_vm0, %v453_v17 }
  0x66   : > { %1146 = vmatmul.msk.bf16.gmra.mxu3 %vm406_vm0, %v789_v22 }
  0x67   : > { %1159 = vmatmul.msk.bf16.vlgmr.msra.gmra.mxu0 %vm406_vm0, %v837_v20 }
  0x68   : > { %1132 = vmatmul.msk.bf16.gmra.mxu2 %vm406_vm0, %v740_v21 }
  0x6b   : > { %1117 = vmatmul.msk.bf16.vlgmr.msra.gmra.mxu1 %vm406_vm0, %v690_v23 }
  0x77   : > { %1160 = vmatmul.msk.bf16.gmra.mxu0 %vm406_vm0, %v838_v25 }
  0x7b   : > { %1118 = vmatmul.msk.bf16.gmra.mxu1 %vm406_vm0, %v691_v27 }
  0xb4   : > { %v495_v28 = vpop.f32.mrf.mxu0 }
  0xb8   : > { %v500_v5 = vpop.f32.mrf.mxu1 }
  0xb9   : > { %v626_v31 = vpop.f32.mrf.mxu3 }
  0xbb   : > { %v577_v29 = vpop.f32.mrf.mxu2 }
  0xbc   : > { %v497_v32 = vpop.f32.mrf.mxu0 }
  0xc0   : > { %v502_v34 = vpop.f32.mrf.mxu1 }
  0xc1   : > { %v628_v35 = vpop.f32.mrf.mxu3 }
  0xc3   : > { %v579_v33 = vpop.f32.mrf.mxu2 }
  0xc4   : > { %v675_v36 = vpop.f32.mrf.mxu0 }
  0xc8   : > { %v531_v38 = vpop.f32.mrf.mxu1 }
  0xc9   : > { %v631_v39 = vpop.f32.mrf.mxu3  ;;  %v532_v49 = vadd.f32 %v531_v38, %v495_v28 }
  0xcb   : > { %v582_v37 = vpop.f32.mrf.mxu2  ;;  %v586_v50 = vadd.f32 %v577_v29, %v532_v49 }
  0xcc   : > { %v677_v40 = vpop.f32.mrf.mxu0 }
  0xcd   : > { %v635_v55 = vadd.f32 %v626_v31, %v586_v50 }
  0xcf   : > { %v684_v57 = vadd.f32 %v675_v36, %v635_v55 }
  0xd0   : > { %v533_v42 = vpop.f32.mrf.mxu1 }
  0xd1   : > { %v633_v43 = vpop.f32.mrf.mxu3  ;;  %v534_v56 = vadd.f32 %v533_v42, %v497_v32 }
  0xd3   : > { %v584_v41 = vpop.f32.mrf.mxu2  ;;  %v587_v58 = vadd.f32 %v579_v33, %v534_v56 }
  0xd4   : > { %v680_v13 = vpop.f32.mrf.mxu0 }
  0xd5   : > { %v636_v0 = vadd.f32 %v628_v35, %v587_v58 }
  0xd7   : > { %v685_v6 = vadd.f32 %v677_v40, %v636_v0 }
  0xd8   : > { %v536_v46 = vpop.f32.mrf.mxu1 }
  0xd9   : > { %v822_v47 = vpop.f32.mrf.mxu3  ;;  %v537_v1 = vadd.f32 %v536_v46, %v500_v5 }
  0xdb   : > { %v773_v45 = vpop.f32.mrf.mxu2  ;;  %v588_v8 = vadd.f32 %v582_v37, %v537_v1 }
  0xdc   : > { %v682_v48 = vpop.f32.mrf.mxu0 }
  0xdd   : > { %v637_v17 = vadd.f32 %v631_v39, %v588_v8 }
  0xdf   : > { %v686_v22 = vadd.f32 %v680_v13, %v637_v17 }
  0xe0   : > { %v538_v52 = vpop.f32.mrf.mxu1 }
  0xe1   : > { %v824_v53 = vpop.f32.mrf.mxu3 }
  0xe3   : > { %v775_v51 = vpop.f32.mrf.mxu2 }
  0xe4   : > { %v871_v54 = vpop.f32.mrf.mxu0 }
  0xe8   : > { %v724_v60 = vpop.f32.mrf.mxu1 }
  0xe9   : > { %v827_v61 = vpop.f32.mrf.mxu3  ;;  %v733_v62 = vadd.f32 %v724_v60, %v684_v57 }
  0xeb   : > { %v778_v59 = vpop.f32.mrf.mxu2  ;;  %v782_v2 = vadd.f32 %v773_v45, %v733_v62 }
  0xec   : > { %v873_v63 = vpop.f32.mrf.mxu0 }
  0xed   : > { %v831_v3 = vadd.f32 %v822_v47, %v782_v2 }
  0xef   : > { %v880_v9 = vadd.f32 %v871_v54, %v831_v3 }
  0xf0   : > { %v726_v11 = vpop.f32.mrf.mxu1 }
  0xf1   : > { %v829_v12 = vpop.f32.mrf.mxu3  ;;  %v887_v14 = vadd.f32 %v1200_v4, %v880_v9  ;;  %v734_v15 = vadd.f32 %v726_v11, %v685_v6 }
  0xf3   : > { %v780_v10 = vpop.f32.mrf.mxu2  ;;  %v890_v18 = vsel %vm1339_vm12, %v887_v14, 0.0  ;;  %v783_v19 = vadd.f32 %v775_v51, %v734_v15 }
  0xf4   : > { %v876_v16 = vpop.f32.mrf.mxu0  ;;  %v921_v20 = vpack.c.bf16 %v890_v18, %v890_v18  ;;  %v906_v33 = vmul.f32 %v890_v18, %v890_v18  ;;  %v893_v37 = vsel %vm406_vm0, %v890_v18, 0.0 }
  0xf5   : > { %v832_v21 = vadd.f32 %v824_v53, %v783_v19 }
  0xf6   : > { %924 = vst.msk [vmem:[%s1405_s10] sm:$0xf] %vm412_vm4, %v921_v20  ;;  %v909_v40 = vsel %vm406_vm0, %v906_v33, 0.0 }
  0xf7   : > { %v881_v23 = vadd.f32 %v873_v63, %v832_v21 }
  0xf8   : > { %v729_v24 = vpop.f32.mrf.mxu1 }
  0xf9   : > { %v888_v25 = vadd.f32 %v1200_v4, %v881_v23  ;;  %v735_v26 = vadd.f32 %v729_v24, %v686_v22 }
  0xfb   : > { %v891_v28 = vsel %vm1346_vm14, %v888_v25, 0.0  ;;  %v784_v29 = vadd.f32 %v778_v59, %v735_v26 }
  0xfc   : > { %v878_v27 = vpop.f32.mrf.mxu0  ;;  %v922_v5 = vpack.c.bf16 %v891_v28, %v891_v28  ;;  %v907_v31 = vmul.f32 %v891_v28, %v891_v28  ;;  %v894_v34 = vsel %vm406_vm0, %v891_v28, 0.0 }
  0xfd   : > { %v833_v30 = vadd.f32 %v827_v61, %v784_v29  ;;  %v895_v39 = vadd.f32 %v894_v34, %v893_v37 }
  0xfe   : > { %925 = vst.msk [vmem:[%s1405_s10 + $0x4] sm:$0xf] %vm412_vm4, %v922_v5  ;;  %v910_v38 = vsel %vm406_vm0, %v907_v31, 0.0 }
  0xff   : > { %v882_v32 = vadd.f32 %v876_v16, %v833_v30  ;;  %v911_v13 = vadd.f32 %v910_v38, %v909_v40 }
 0x100   : > { %v731_v35 = vpop.f32.mrf.mxu1 }
 0x101   : > { %v889_v36 = vadd.f32 %v1200_v4, %v882_v32 }
 0x103   : > { %v892_v7 = vsel %vm1360_vm3, %v889_v36, 0.0 }
 0x104   : > { %v896_v41 = vsel %vm406_vm0, %v892_v7, 0.0  ;;  %v908_v42 = vmul.f32 %v892_v7, %v892_v7  ;;  %v923_v43 = vpack.c.bf16 %v892_v7, %v892_v7 }
 0x105   : > { %v897_v45 = vadd.f32 %v896_v41, %v895_v39 }
 0x106   : > { %v912_v46 = vsel %vm406_vm0, %v908_v42, 0.0  ;;  %926 = vst.msk [vmem:[%s1405_s10 + $0x8] sm:$0xf] %vm412_vm4, %v923_v43 }
 0x107   : > { %v898_v47 = vrot.slane %v897_v45, 4  ;;  %v913_v48 = vadd.f32 %v912_v46, %v911_v13 }
 0x109   : > { %v899_v49 = vadd.f32 %v898_v47, %v897_v45  ;;  %v914_v50 = vrot.slane %v913_v48, 4 }
 0x10b   : > { %v900_v44 = vrot.slane %v899_v49, 2  ;;  %v915_v51 = vadd.f32 %v914_v50, %v913_v48 }
 0x10d   : > { %v901_v52 = vadd.f32 %v900_v44, %v899_v49  ;;  %v916_v53 = vrot.slane %v915_v51, 2 }
 0x10f   : > { %v902_v54 = vrot.slane %v901_v52, 1  ;;  %v917_v55 = vadd.f32 %v916_v53, %v915_v51 }
 0x111   : > { %v903_v56 = vadd.f32 %v902_v54, %v901_v52  ;;  %v918_v57 = vrot.slane %v917_v55, 1 }
 0x113   : > { %905 = vst.msk [vmem:[%s292_s13] sm:$0x1] %vm904_vm5, %v903_v56  ;;  %v919_v58 = vadd.f32 %v918_v57, %v917_v55 }
 0x115   : > { %920 = vst.msk [vmem:[%s295_s16] sm:$0x1] %vm904_vm5, %v919_v58 }
 0x116 PF: > { %s18_s24 = sadd.s32 1, %s1207_s24  }
 0x117   : > { %p15_p4 = scmp.ge.s32.totalorder %s18_s24, 4  }
 0x119   :  { %17 = sbr.rel (!%p15_p4) target bundleno = 1 (0x1), region = 102 }

</bundles_post_ra>
